<compile_context>
chip_gen: v7x
topology: tpu7x:2x2x1
jax: 0.10.0
libtpu: 0.0.40
codegen_flags: <defaults>
</compile_context>

<pallas_src>
import jax
import jax.numpy as jnp
from jax.experimental import pallas as pl
from jax.experimental.pallas import tpu as pltpu

SIZE_0 = 1024   # hidden width
SIZE_1 = 64     # bottleneck width (zero-padded to 128 inside the wrapper)
LANE = 128


def _round_up(n, m):
    return (n + m - 1) // m * m


def _pad_to(a, shape):
    return jnp.pad(a, [(0, t - s) for s, t in zip(a.shape, shape)])


def _autoencoder_kernel(x_ref,
                        w0_ref, b0_ref,
                        w1_ref, b1_ref,
                        w2_ref, b2_ref,
                        w3_ref, b3_ref,
                        o_ref):
    """Fused 4-layer MLP: bf16 matmul inputs, f32 accumulation / bias / nonlinearity."""
    x = x_ref[...]                                                     # (tb, Dp) bf16

    # encoder_0 + ReLU
    h0 = jnp.dot(x, w0_ref[...], preferred_element_type=jnp.float32) + b0_ref[...]
    h0 = jnp.maximum(h0, 0.0).astype(jnp.bfloat16)                     # (tb, 1024)

    # encoder_1 (bottleneck, no activation)
    z = jnp.dot(h0, w1_ref[...], preferred_element_type=jnp.float32) + b1_ref[...]
    z = z.astype(jnp.bfloat16)                                         # (tb, 128)

    # decoder_2 + ReLU
    h2 = jnp.dot(z, w2_ref[...], preferred_element_type=jnp.float32) + b2_ref[...]
    h2 = jnp.maximum(h2, 0.0).astype(jnp.bfloat16)                     # (tb, 1024)

    # decoder_3 + Sigmoid (f32 until the final store)
    y = jnp.dot(h2, w3_ref[...], preferred_element_type=jnp.float32) + b3_ref[...]
    o_ref[...] = jax.nn.sigmoid(y).astype(o_ref.dtype)                 # (tb, Dp)


def deep_autoencoder(x, params, *, tb=128, single_buffer_weights=True):
    """x: (B, D) float32. params: dict of (in, out)-transposed f32 weights/biases."""
    B, D = x.shape
    Dp = _round_up(max(D, LANE), LANE)      # lane-dense feature dim
    Zp = _round_up(SIZE_1, LANE)            # bottleneck padded 64 -> 128
    Bp = _round_up(B, tb)                   # batch padded to the tile

    bf16, f32 = jnp.bfloat16, jnp.float32
    w0 = _pad_to(params["w0"], (Dp, SIZE_0)).astype(bf16)
    b0 = params["b0"].astype(f32)
    w1 = _pad_to(params["w1"], (SIZE_0, Zp)).astype(bf16)
    b1 = _pad_to(params["b1"], (1, Zp)).astype(f32)
    w2 = _pad_to(params["w2"], (Zp, SIZE_0)).astype(bf16)
    b2 = params["b2"].astype(f32)
    w3 = _pad_to(params["w3"], (SIZE_0, Dp)).astype(bf16)
    b3 = _pad_to(params["b3"], (1, Dp)).astype(f32)
    xp = _pad_to(x, (Bp, Dp)).astype(bf16)

    # Grid-invariant operands: single-buffer (DMA'd once; default double buffering
    # would only waste VMEM).
    if single_buffer_weights:
        wspec = lambda a: pl.BlockSpec(a.shape, lambda i: (0, 0),
                                       pipeline_mode=pl.Buffered(1))
    else:
        wspec = lambda a: pl.BlockSpec(a.shape, lambda i: (0, 0))

    # VMEM budget (v7x is the tightest: 64 MiB physical / 32 MiB scoped default).
    wbuf = 1 if single_buffer_weights else 2
    weight_bytes = 2 * (Dp * SIZE_0 + SIZE_0 * Zp + Zp * SIZE_0 + SIZE_0 * Dp)
    bias_bytes = 4 * (SIZE_0 + Zp + SIZE_0 + Dp)
    io_bytes = 2 * (tb * Dp * 2) + 2 * (tb * Dp * 4)    # double-buffered x (bf16) + out (f32)
    act_bytes = 4 * tb * (SIZE_0 + Zp + SIZE_0 + Dp)    # f32 intermediates (upper bound)
    vmem_limit = 32 * 1024 * 1024
    assert wbuf * (weight_bytes + bias_bytes) + io_bytes + act_bytes < vmem_limit, (
        "tile/feature sizes exceed the VMEM budget; reduce tb")

    out_padded = pl.pallas_call(
        _autoencoder_kernel,
        out_shape=jax.ShapeDtypeStruct((Bp, Dp), jnp.float32),
        grid_spec=pltpu.PrefetchScalarGridSpec(
            num_scalar_prefetch=0,
            grid=(Bp // tb,),
            in_specs=[
                pl.BlockSpec((tb, Dp), lambda i: (i, 0)),   # x tile (pipelined)
                wspec(w0), wspec(b0),
                wspec(w1), wspec(b1),
                wspec(w2), wspec(b2),
                wspec(w3), wspec(b3),
            ],
            out_specs=pl.BlockSpec((tb, Dp), lambda i: (i, 0)),
        ),
        compiler_params=pltpu.CompilerParams(
            dimension_semantics=("parallel",),
            vmem_limit_bytes=vmem_limit,
        ),
    )(xp, w0, b0, w1, b1, w2, b2, w3, b3)

    return out_padded[:B, :D]


def init_params(key, input_size):
    """Deterministic synthetic init (uniform, like PyTorch Linear default)."""
    def linear(k, fan_in, fan_out):
        kw, kb = jax.random.split(k)
        bound = 1.0 / jnp.sqrt(fan_in)
        # stored (in, out) — already transposed relative to torch.nn.Linear.weight
        w = jax.random.uniform(kw, (fan_in, fan_out), jnp.float32, -bound, bound)
        b = jax.random.uniform(kb, (1, fan_out), jnp.float32, -bound, bound)
        return w, b

    k0, k1, k2, k3 = jax.random.split(key, 4)
    w0, b0 = linear(k0, input_size, SIZE_0)
    w1, b1 = linear(k1, SIZE_0, SIZE_1)
    w2, b2 = linear(k2, SIZE_1, SIZE_0)
    w3, b3 = linear(k3, SIZE_0, input_size)
    return dict(w0=w0, b0=b0, w1=w1, b1=b1, w2=w2, b2=b2, w3=w3, b3=b3)


def reference_f32(x, p):
    h0 = jnp.maximum(x @ p["w0"] + p["b0"], 0.0)
    z = h0 @ p["w1"] + p["b1"]
    h2 = jnp.maximum(z @ p["w2"] + p["b2"], 0.0)
    return jax.nn.sigmoid(h2 @ p["w3"] + p["b3"])


def reference_bf16(x, p):
    """Mirrors the kernel's dtype path (bf16 matmul inputs, f32 accumulation)."""
    bf16, f32 = jnp.bfloat16, jnp.float32
    dot = lambda a, b: jnp.dot(a.astype(bf16), b.astype(bf16), preferred_element_type=f32)
    h0 = jnp.maximum(dot(x, p["w0"]) + p["b0"], 0.0)
    z = dot(h0, p["w1"]) + p["b1"]
    h2 = jnp.maximum(dot(z, p["w2"]) + p["b2"], 0.0)
    return jax.nn.sigmoid(dot(h2, p["w3"]) + p["b3"])


if __name__ == "__main__":
    key = jax.random.PRNGKey(0)
    k_param, k_x = jax.random.split(key)

    INPUT_SIZE = 200   # deliberately not a multiple of 128: exercises the D-padding path
    BATCH = 200        # pads to 256 rows -> 2 parallel grid steps (keeps both v7x TCs busy)
    TB = 128           # fills the MXU on v5e; use 256 on v6e/v7x for large real batches

    params = init_params(k_param, INPUT_SIZE)
    x = jax.random.uniform(k_x, (BATCH, INPUT_SIZE), jnp.float32)

    run = jax.jit(deep_autoencoder, static_argnames=("tb", "single_buffer_weights"))
    try:
        out = jax.block_until_ready(run(x, params, tb=TB, single_buffer_weights=True))
    except Exception:
        # Fallback for jax builds that reject pl.Buffered(1) on grid-invariant inputs;
        # default double-buffering is functionally identical (weights still DMA'd once).
        out = jax.block_until_ready(run(x, params, tb=TB, single_buffer_weights=False))

    assert out.shape == (BATCH, INPUT_SIZE)
    assert out.dtype == jnp.float32

    ref_b = reference_bf16(x, params)
    assert jnp.allclose(out, ref_b, atol=2e-3, rtol=2e-3), "mismatch vs bf16-path JAX reference"

    ref_f = reference_f32(x, params)
    assert jnp.allclose(out, ref_f, atol=3e-2, rtol=3e-2), "mismatch vs f32 JAX reference"

    print("KERNEL_OK")
</pallas_src>

<mosaic_0001>
module attributes {stable_mosaic.version = 11 : i64} {
  func.func @_autoencoder_kernel(%arg0: i32, %arg1: memref<128x256xbf16, #tpu.memory_space<vmem>>, %arg2: memref<256x1024xbf16, #tpu.memory_space<vmem>>, %arg3: memref<1x1024xf32, #tpu.memory_space<vmem>>, %arg4: memref<1024x128xbf16, #tpu.memory_space<vmem>>, %arg5: memref<1x128xf32, #tpu.memory_space<vmem>>, %arg6: memref<128x1024xbf16, #tpu.memory_space<vmem>>, %arg7: memref<1x1024xf32, #tpu.memory_space<vmem>>, %arg8: memref<1024x256xbf16, #tpu.memory_space<vmem>>, %arg9: memref<1x256xf32, #tpu.memory_space<vmem>>, %arg10: memref<128x256xf32, #tpu.memory_space<vmem>>) attributes {dimension_semantics = [#tpu.dimension_semantics<parallel>], iteration_bounds = array<i64: 2>, scalar_prefetch = 0 : i64, scratch_operands = 0 : i64, tpu.core_type = #tpu.core_type<tc>, window_params = [{transform_indices = @transform_0, window_bounds = array<i64: 128, 256>}, {pipeline_mode = #tpu.pipeline_mode<synchronous>, transform_indices = @transform_1, window_bounds = array<i64: 256, 1024>}, {pipeline_mode = #tpu.pipeline_mode<synchronous>, transform_indices = @transform_2, window_bounds = array<i64: 1, 1024>}, {pipeline_mode = #tpu.pipeline_mode<synchronous>, transform_indices = @transform_3, window_bounds = array<i64: 1024, 128>}, {pipeline_mode = #tpu.pipeline_mode<synchronous>, transform_indices = @transform_4, window_bounds = array<i64: 1, 128>}, {pipeline_mode = #tpu.pipeline_mode<synchronous>, transform_indices = @transform_5, window_bounds = array<i64: 128, 1024>}, {pipeline_mode = #tpu.pipeline_mode<synchronous>, transform_indices = @transform_6, window_bounds = array<i64: 1, 1024>}, {pipeline_mode = #tpu.pipeline_mode<synchronous>, transform_indices = @transform_7, window_bounds = array<i64: 1024, 256>}, {pipeline_mode = #tpu.pipeline_mode<synchronous>, transform_indices = @transform_8, window_bounds = array<i64: 1, 256>}, {transform_indices = @transform_9, window_bounds = array<i64: 128, 256>}]} {
    %c0 = arith.constant 0 : index
    %c0_0 = arith.constant 0 : index
    %0 = vector.load %arg1[%c0, %c0_0] : memref<128x256xbf16, #tpu.memory_space<vmem>>, vector<128x256xbf16>
    %c0_1 = arith.constant 0 : index
    %c0_2 = arith.constant 0 : index
    %1 = vector.load %arg2[%c0_1, %c0_2] : memref<256x1024xbf16, #tpu.memory_space<vmem>>, vector<256x1024xbf16>
    %cst = arith.constant dense<0.000000e+00> : vector<128x1024xf32>
    %2 = tpu.matmul %0, %1, %cst {dimension_numbers = #tpu.dot_dimension_numbers<[1], [0], [0], [1], [0, 0, 1, 1], [], []>} : vector<128x256xbf16>, vector<256x1024xbf16>, vector<128x1024xf32> -> vector<128x1024xf32>
    %c0_3 = arith.constant 0 : index
    %c0_4 = arith.constant 0 : index
    %3 = vector.load %arg3[%c0_3, %c0_4] : memref<1x1024xf32, #tpu.memory_space<vmem>>, vector<1x1024xf32>
    %4 = vector.broadcast %3 : vector<1x1024xf32> to vector<128x1024xf32>
    %5 = arith.addf %2, %4 : vector<128x1024xf32>
    %cst_5 = arith.constant 0.000000e+00 : f32
    %6 = vector.broadcast %cst_5 : f32 to vector<128x1024xf32>
    %7 = arith.maximumf %5, %6 : vector<128x1024xf32>
    %8 = arith.truncf %7 : vector<128x1024xf32> to vector<128x1024xbf16>
    %c0_6 = arith.constant 0 : index
    %c0_7 = arith.constant 0 : index
    %9 = vector.load %arg4[%c0_6, %c0_7] : memref<1024x128xbf16, #tpu.memory_space<vmem>>, vector<1024x128xbf16>
    %cst_8 = arith.constant dense<0.000000e+00> : vector<128x128xf32>
    %10 = tpu.matmul %8, %9, %cst_8 {dimension_numbers = #tpu.dot_dimension_numbers<[1], [0], [0], [1], [0, 0, 1, 1], [], []>} : vector<128x1024xbf16>, vector<1024x128xbf16>, vector<128x128xf32> -> vector<128x128xf32>
    %c0_9 = arith.constant 0 : index
    %c0_10 = arith.constant 0 : index
    %11 = vector.load %arg5[%c0_9, %c0_10] : memref<1x128xf32, #tpu.memory_space<vmem>>, vector<1x128xf32>
    %12 = vector.broadcast %11 : vector<1x128xf32> to vector<128x128xf32>
    %13 = arith.addf %10, %12 : vector<128x128xf32>
    %14 = arith.truncf %13 : vector<128x128xf32> to vector<128x128xbf16>
    %c0_11 = arith.constant 0 : index
    %c0_12 = arith.constant 0 : index
    %15 = vector.load %arg6[%c0_11, %c0_12] : memref<128x1024xbf16, #tpu.memory_space<vmem>>, vector<128x1024xbf16>
    %cst_13 = arith.constant dense<0.000000e+00> : vector<128x1024xf32>
    %16 = tpu.matmul %14, %15, %cst_13 {dimension_numbers = #tpu.dot_dimension_numbers<[1], [0], [0], [1], [0, 0, 1, 1], [], []>} : vector<128x128xbf16>, vector<128x1024xbf16>, vector<128x1024xf32> -> vector<128x1024xf32>
    %c0_14 = arith.constant 0 : index
    %c0_15 = arith.constant 0 : index
    %17 = vector.load %arg7[%c0_14, %c0_15] : memref<1x1024xf32, #tpu.memory_space<vmem>>, vector<1x1024xf32>
    %18 = vector.broadcast %17 : vector<1x1024xf32> to vector<128x1024xf32>
    %19 = arith.addf %16, %18 : vector<128x1024xf32>
    %cst_16 = arith.constant 0.000000e+00 : f32
    %20 = vector.broadcast %cst_16 : f32 to vector<128x1024xf32>
    %21 = arith.maximumf %19, %20 : vector<128x1024xf32>
    %22 = arith.truncf %21 : vector<128x1024xf32> to vector<128x1024xbf16>
    %c0_17 = arith.constant 0 : index
    %c0_18 = arith.constant 0 : index
    %23 = vector.load %arg8[%c0_17, %c0_18] : memref<1024x256xbf16, #tpu.memory_space<vmem>>, vector<1024x256xbf16>
    %cst_19 = arith.constant dense<0.000000e+00> : vector<128x256xf32>
    %24 = tpu.matmul %22, %23, %cst_19 {dimension_numbers = #tpu.dot_dimension_numbers<[1], [0], [0], [1], [0, 0, 1, 1], [], []>} : vector<128x1024xbf16>, vector<1024x256xbf16>, vector<128x256xf32> -> vector<128x256xf32>
    %c0_20 = arith.constant 0 : index
    %c0_21 = arith.constant 0 : index
    %25 = vector.load %arg9[%c0_20, %c0_21] : memref<1x256xf32, #tpu.memory_space<vmem>>, vector<1x256xf32>
    %26 = vector.broadcast %25 : vector<1x256xf32> to vector<128x256xf32>
    %27 = arith.addf %24, %26 : vector<128x256xf32>
    %28 = arith.negf %27 : vector<128x256xf32>
    %29 = math.exp %28 : vector<128x256xf32>
    %cst_22 = arith.constant 1.000000e+00 : f32
    %30 = vector.broadcast %cst_22 : f32 to vector<128x256xf32>
    %31 = arith.addf %30, %29 : vector<128x256xf32>
    %32 = arith.divf %30, %31 : vector<128x256xf32>
    %c0_23 = arith.constant 0 : index
    %c0_24 = arith.constant 0 : index
    %33 = vector.load %arg10[%c0_23, %c0_24] : memref<128x256xf32, #tpu.memory_space<vmem>>, vector<128x256xf32>
    tpu.vector_store %arg10[%c0_23, %c0_24], %32 {strides = array<i32>} : memref<128x256xf32, #tpu.memory_space<vmem>>, vector<128x256xf32>,
    return
  }
  func.func @transform_0(%arg0: i32) -> (i32, i32) {
    %c0_i32 = arith.constant 0 : i32
    %c0_i32_0 = arith.constant 0 : i32
    return %arg0, %c0_i32 : i32, i32
  }
  func.func @transform_1(%arg0: i32) -> (i32, i32) {
    %c0_i32 = arith.constant 0 : i32
    %c0_i32_0 = arith.constant 0 : i32
    %c0_i32_1 = arith.constant 0 : i32
    return %c0_i32, %c0_i32_0 : i32, i32
  }
  func.func @transform_2(%arg0: i32) -> (i32, i32) {
    %c0_i32 = arith.constant 0 : i32
    %c0_i32_0 = arith.constant 0 : i32
    %c0_i32_1 = arith.constant 0 : i32
    return %c0_i32, %c0_i32_0 : i32, i32
  }
  func.func @transform_3(%arg0: i32) -> (i32, i32) {
    %c0_i32 = arith.constant 0 : i32
    %c0_i32_0 = arith.constant 0 : i32
    %c0_i32_1 = arith.constant 0 : i32
    return %c0_i32, %c0_i32_0 : i32, i32
  }
  func.func @transform_4(%arg0: i32) -> (i32, i32) {
    %c0_i32 = arith.constant 0 : i32
    %c0_i32_0 = arith.constant 0 : i32
    %c0_i32_1 = arith.constant 0 : i32
    return %c0_i32, %c0_i32_0 : i32, i32
  }
  func.func @transform_5(%arg0: i32) -> (i32, i32) {
    %c0_i32 = arith.constant 0 : i32
    %c0_i32_0 = arith.constant 0 : i32
    %c0_i32_1 = arith.constant 0 : i32
    return %c0_i32, %c0_i32_0 : i32, i32
  }
  func.func @transform_6(%arg0: i32) -> (i32, i32) {
    %c0_i32 = arith.constant 0 : i32
    %c0_i32_0 = arith.constant 0 : i32
    %c0_i32_1 = arith.constant 0 : i32
    return %c0_i32, %c0_i32_0 : i32, i32
  }
  func.func @transform_7(%arg0: i32) -> (i32, i32) {
    %c0_i32 = arith.constant 0 : i32
    %c0_i32_0 = arith.constant 0 : i32
    %c0_i32_1 = arith.constant 0 : i32
    return %c0_i32, %c0_i32_0 : i32, i32
  }
  func.func @transform_8(%arg0: i32) -> (i32, i32) {
    %c0_i32 = arith.constant 0 : i32
    %c0_i32_0 = arith.constant 0 : i32
    %c0_i32_1 = arith.constant 0 : i32
    return %c0_i32, %c0_i32_0 : i32, i32
  }
  func.func @transform_9(%arg0: i32) -> (i32, i32) {
    %c0_i32 = arith.constant 0 : i32
    %c0_i32_0 = arith.constant 0 : i32
    return %arg0, %c0_i32 : i32, i32
  }
}

module attributes {stable_mosaic.version = 11 : i64} {
  func.func @_autoencoder_kernel(%arg0: i32, %arg1: memref<128x256xbf16, #tpu.memory_space<vmem>>, %arg2: memref<256x1024xbf16, #tpu.memory_space<vmem>>, %arg3: memref<1x1024xf32, #tpu.memory_space<vmem>>, %arg4: memref<1024x128xbf16, #tpu.memory_space<vmem>>, %arg5: memref<1x128xf32, #tpu.memory_space<vmem>>, %arg6: memref<128x1024xbf16, #tpu.memory_space<vmem>>, %arg7: memref<1x1024xf32, #tpu.memory_space<vmem>>, %arg8: memref<1024x256xbf16, #tpu.memory_space<vmem>>, %arg9: memref<1x256xf32, #tpu.memory_space<vmem>>, %arg10: memref<128x256xf32, #tpu.memory_space<vmem>>) attributes {dimension_semantics = [#tpu.dimension_semantics<parallel>], iteration_bounds = array<i64: 2>, scalar_prefetch = 0 : i64, scratch_operands = 0 : i64, tpu.core_type = #tpu.core_type<tc>, window_params = [{transform_indices = @transform_0, window_bounds = array<i64: 128, 256>}, {pipeline_mode = #tpu.pipeline_mode<synchronous>, transform_indices = @transform_1, window_bounds = array<i64: 256, 1024>}, {pipeline_mode = #tpu.pipeline_mode<synchronous>, transform_indices = @transform_2, window_bounds = array<i64: 1, 1024>}, {pipeline_mode = #tpu.pipeline_mode<synchronous>, transform_indices = @transform_3, window_bounds = array<i64: 1024, 128>}, {pipeline_mode = #tpu.pipeline_mode<synchronous>, transform_indices = @transform_4, window_bounds = array<i64: 1, 128>}, {pipeline_mode = #tpu.pipeline_mode<synchronous>, transform_indices = @transform_5, window_bounds = array<i64: 128, 1024>}, {pipeline_mode = #tpu.pipeline_mode<synchronous>, transform_indices = @transform_6, window_bounds = array<i64: 1, 1024>}, {pipeline_mode = #tpu.pipeline_mode<synchronous>, transform_indices = @transform_7, window_bounds = array<i64: 1024, 256>}, {pipeline_mode = #tpu.pipeline_mode<synchronous>, transform_indices = @transform_8, window_bounds = array<i64: 1, 256>}, {transform_indices = @transform_9, window_bounds = array<i64: 128, 256>}]} {
    %c0 = arith.constant 0 : index
    %c0_0 = arith.constant 0 : index
    %0 = vector.load %arg1[%c0, %c0_0] : memref<128x256xbf16, #tpu.memory_space<vmem>>, vector<128x256xbf16>
    %c0_1 = arith.constant 0 : index
    %c0_2 = arith.constant 0 : index
    %1 = vector.load %arg2[%c0_1, %c0_2] : memref<256x1024xbf16, #tpu.memory_space<vmem>>, vector<256x1024xbf16>
    %cst = arith.constant dense<0.000000e+00> : vector<128x1024xf32>
    %2 = tpu.matmul %0, %1, %cst {dimension_numbers = #tpu.dot_dimension_numbers<[1], [0], [0], [1], [0, 0, 1, 1], [], []>} : vector<128x256xbf16>, vector<256x1024xbf16>, vector<128x1024xf32> -> vector<128x1024xf32>
    %c0_3 = arith.constant 0 : index
    %c0_4 = arith.constant 0 : index
    %3 = vector.load %arg3[%c0_3, %c0_4] : memref<1x1024xf32, #tpu.memory_space<vmem>>, vector<1x1024xf32>
    %4 = vector.broadcast %3 : vector<1x1024xf32> to vector<128x1024xf32>
    %5 = arith.addf %2, %4 : vector<128x1024xf32>
    %cst_5 = arith.constant 0.000000e+00 : f32
    %6 = vector.broadcast %cst_5 : f32 to vector<128x1024xf32>
    %7 = arith.maximumf %5, %6 : vector<128x1024xf32>
    %8 = arith.truncf %7 : vector<128x1024xf32> to vector<128x1024xbf16>
    %c0_6 = arith.constant 0 : index
    %c0_7 = arith.constant 0 : index
    %9 = vector.load %arg4[%c0_6, %c0_7] : memref<1024x128xbf16, #tpu.memory_space<vmem>>, vector<1024x128xbf16>
    %cst_8 = arith.constant dense<0.000000e+00> : vector<128x128xf32>
    %10 = tpu.matmul %8, %9, %cst_8 {dimension_numbers = #tpu.dot_dimension_numbers<[1], [0], [0], [1], [0, 0, 1, 1], [], []>} : vector<128x1024xbf16>, vector<1024x128xbf16>, vector<128x128xf32> -> vector<128x128xf32>
    %c0_9 = arith.constant 0 : index
    %c0_10 = arith.constant 0 : index
    %11 = vector.load %arg5[%c0_9, %c0_10] : memref<1x128xf32, #tpu.memory_space<vmem>>, vector<1x128xf32>
    %12 = vector.broadcast %11 : vector<1x128xf32> to vector<128x128xf32>
    %13 = arith.addf %10, %12 : vector<128x128xf32>
    %14 = arith.truncf %13 : vector<128x128xf32> to vector<128x128xbf16>
    %c0_11 = arith.constant 0 : index
    %c0_12 = arith.constant 0 : index
    %15 = vector.load %arg6[%c0_11, %c0_12] : memref<128x1024xbf16, #tpu.memory_space<vmem>>, vector<128x1024xbf16>
    %cst_13 = arith.constant dense<0.000000e+00> : vector<128x1024xf32>
    %16 = tpu.matmul %14, %15, %cst_13 {dimension_numbers = #tpu.dot_dimension_numbers<[1], [0], [0], [1], [0, 0, 1, 1], [], []>} : vector<128x128xbf16>, vector<128x1024xbf16>, vector<128x1024xf32> -> vector<128x1024xf32>
    %c0_14 = arith.constant 0 : index
    %c0_15 = arith.constant 0 : index
    %17 = vector.load %arg7[%c0_14, %c0_15] : memref<1x1024xf32, #tpu.memory_space<vmem>>, vector<1x1024xf32>
    %18 = vector.broadcast %17 : vector<1x1024xf32> to vector<128x1024xf32>
    %19 = arith.addf %16, %18 : vector<128x1024xf32>
    %cst_16 = arith.constant 0.000000e+00 : f32
    %20 = vector.broadcast %cst_16 : f32 to vector<128x1024xf32>
    %21 = arith.maximumf %19, %20 : vector<128x1024xf32>
    %22 = arith.truncf %21 : vector<128x1024xf32> to vector<128x1024xbf16>
    %c0_17 = arith.constant 0 : index
    %c0_18 = arith.constant 0 : index
    %23 = vector.load %arg8[%c0_17, %c0_18] : memref<1024x256xbf16, #tpu.memory_space<vmem>>, vector<1024x256xbf16>
    %cst_19 = arith.constant dense<0.000000e+00> : vector<128x256xf32>
    %24 = tpu.matmul %22, %23, %cst_19 {dimension_numbers = #tpu.dot_dimension_numbers<[1], [0], [0], [1], [0, 0, 1, 1], [], []>} : vector<128x1024xbf16>, vector<1024x256xbf16>, vector<128x256xf32> -> vector<128x256xf32>
    %c0_20 = arith.constant 0 : index
    %c0_21 = arith.constant 0 : index
    %25 = vector.load %arg9[%c0_20, %c0_21] : memref<1x256xf32, #tpu.memory_space<vmem>>, vector<1x256xf32>
    %26 = vector.broadcast %25 : vector<1x256xf32> to vector<128x256xf32>
    %27 = arith.addf %24, %26 : vector<128x256xf32>
    %28 = arith.negf %27 : vector<128x256xf32>
    %29 = math.exp %28 : vector<128x256xf32>
    %cst_22 = arith.constant 1.000000e+00 : f32
    %30 = vector.broadcast %cst_22 : f32 to vector<128x256xf32>
    %31 = arith.addf %30, %29 : vector<128x256xf32>
    %32 = arith.divf %30, %31 : vector<128x256xf32>
    %c0_23 = arith.constant 0 : index
    %c0_24 = arith.constant 0 : index
    %33 = vector.load %arg10[%c0_23, %c0_24] : memref<128x256xf32, #tpu.memory_space<vmem>>, vector<128x256xf32>
    tpu.vector_store %arg10[%c0_23, %c0_24], %32 {strides = array<i32>} : memref<128x256xf32, #tpu.memory_space<vmem>>, vector<128x256xf32>,
    return
  }
  func.func @transform_0(%arg0: i32) -> (i32, i32) {
    %c0_i32 = arith.constant 0 : i32
    %c0_i32_0 = arith.constant 0 : i32
    return %arg0, %c0_i32 : i32, i32
  }
  func.func @transform_1(%arg0: i32) -> (i32, i32) {
    %c0_i32 = arith.constant 0 : i32
    %c0_i32_0 = arith.constant 0 : i32
    %c0_i32_1 = arith.constant 0 : i32
    return %c0_i32, %c0_i32_0 : i32, i32
  }
  func.func @transform_2(%arg0: i32) -> (i32, i32) {
    %c0_i32 = arith.constant 0 : i32
    %c0_i32_0 = arith.constant 0 : i32
    %c0_i32_1 = arith.constant 0 : i32
    return %c0_i32, %c0_i32_0 : i32, i32
  }
  func.func @transform_3(%arg0: i32) -> (i32, i32) {
    %c0_i32 = arith.constant 0 : i32
    %c0_i32_0 = arith.constant 0 : i32
    %c0_i32_1 = arith.constant 0 : i32
    return %c0_i32, %c0_i32_0 : i32, i32
  }
  func.func @transform_4(%arg0: i32) -> (i32, i32) {
    %c0_i32 = arith.constant 0 : i32
    %c0_i32_0 = arith.constant 0 : i32
    %c0_i32_1 = arith.constant 0 : i32
    return %c0_i32, %c0_i32_0 : i32, i32
  }
  func.func @transform_5(%arg0: i32) -> (i32, i32) {
    %c0_i32 = arith.constant 0 : i32
    %c0_i32_0 = arith.constant 0 : i32
    %c0_i32_1 = arith.constant 0 : i32
    return %c0_i32, %c0_i32_0 : i32, i32
  }
  func.func @transform_6(%arg0: i32) -> (i32, i32) {
    %c0_i32 = arith.constant 0 : i32
    %c0_i32_0 = arith.constant 0 : i32
    %c0_i32_1 = arith.constant 0 : i32
    return %c0_i32, %c0_i32_0 : i32, i32
  }
  func.func @transform_7(%arg0: i32) -> (i32, i32) {
    %c0_i32 = arith.constant 0 : i32
    %c0_i32_0 = arith.constant 0 : i32
    %c0_i32_1 = arith.constant 0 : i32
    return %c0_i32, %c0_i32_0 : i32, i32
  }
  func.func @transform_8(%arg0: i32) -> (i32, i32) {
    %c0_i32 = arith.constant 0 : i32
    %c0_i32_0 = arith.constant 0 : i32
    %c0_i32_1 = arith.constant 0 : i32
    return %c0_i32, %c0_i32_0 : i32, i32
  }
  func.func @transform_9(%arg0: i32) -> (i32, i32) {
    %c0_i32 = arith.constant 0 : i32
    %c0_i32_0 = arith.constant 0 : i32
    return %arg0, %c0_i32 : i32, i32
  }
}

</mosaic_0001>

<bundles_post_ra>
// kernel: deep_autoencoder.1
= control target key start
LH: loop header
LB: loop body
LE: loop exit
PB: predicated region body
PF: predicated region fallthrough
CT: control target
= control target key end

     0   :  { %s6710_s30 = smov 0   ;;  %s8842_s0 = inlined_call_operand.vmem [shape: bf16[256,256], index: 0, kind: input, shape index: {}]   ;;  %s8843_s1 = inlined_call_operand.vmem [shape: bf16[256,1024], index: 1, kind: input, shape index: {}]   ;;  %s8844_s2 = inlined_call_operand.vmem [shape: f32[1,1024], index: 2, kind: input, shape index: {}]   ;;  %s8845_s3 = inlined_call_operand.vmem [shape: bf16[1024,128], index: 3, kind: input, shape index: {}]   ;;  %s8846_s4 = inlined_call_operand.vmem [shape: f32[1,128], index: 4, kind: input, shape index: {}]   ;;  %s8847_s5 = inlined_call_operand.vmem [shape: bf16[128,1024], index: 5, kind: input, shape index: {}]   ;;  %s8848_s6 = inlined_call_operand.vmem [shape: f32[1,1024], index: 6, kind: input, shape index: {}]   ;;  %s8849_s7 = inlined_call_operand.vmem [shape: bf16[1024,256], index: 7, kind: input, shape index: {}]   ;;  %s8850_s8 = inlined_call_operand.vmem [shape: f32[1,256], index: 8, kind: input, shape index: {}]   ;;  %s8851_s9 = inlined_call_operand.vmem [shape: f32[256,256], index: 9, kind: output, shape index: {}]  }
   0x1 LB: > { %s5391_s10 = sadd.s32 4294967295, %s6657_s30   ;;  %p5395_p0 = scmp.ge.s32.totalorder %s6657_s30, 1  ;;  %s6657_s30 = sphi %s6710_s30, %s19_s30  }
   0x2   : > { %p289_p1 = scmp.lt.s32.totalorder %s6657_s30, 3 }
   0x4   : > { %p290_p2 = pnand %p5395_p0, %p289_p1 }
   0x5   : > { %v358_v0 = vld [vmem:[%s8843_s1] sm:$0xff] (!%p290_p2)  ;;  %s5396_s17 = sshll.u32 (!%p290_p2), %s5391_s10, 4  ;;  %v359_v63 = vld [vmem:[%s8843_s1 + $0x8] sm:$0xff] (!%p290_p2) }
   0x6   : > { %293 = sbr.rel (%p290_p2) target bundleno = 1425 (0x591), region = 56  ;;  %v362_v1 = vld [vmem:[%s8843_s1 + $0x20] sm:$0xff] (!%p290_p2)  ;;  %p328_p3 = scmp.lt.s32.totalorder (!%p290_p2), %s5396_s17, 31 }
   0x7   : > { %v366_v2 = vld [vmem:[%s8843_s1 + $0x40] sm:$0xff] (!%p290_p2)  ;;  %v5419_v3 = vcombine.high (!%p290_p2), %v358_v0, %v362_v1  ;;  %v5418_v4 = vcombine.low (!%p290_p2), %v358_v0, %v362_v1  ;;  %v363_v0 = vld [vmem:[%s8843_s1 + $0x28] sm:$0xff] (!%p290_p2) }
   0x8   : > { %v370_v5 = vld [vmem:[%s8843_s1 + $0x60] sm:$0xff] (!%p290_p2) }
   0x9   : > { %v5427_v6 = vcombine.high (!%p290_p2), %v366_v2, %v370_v5  ;;  %v374_v7 = vld [vmem:[%s8843_s1 + $0x80] sm:$0xff] (!%p290_p2)  ;;  %1248 = vmatprep.subr.bf16.mxu1 (!%p290_p2), %v5419_v3  ;;  %v5426_v9 = vcombine.low (!%p290_p2), %v366_v2, %v370_v5  ;;  %v367_v3 = vld [vmem:[%s8843_s1 + $0x48] sm:$0xff] (!%p290_p2) }
   0xa   : > { %v378_v8 = vld [vmem:[%s8843_s1 + $0xa0] sm:$0xff] (!%p290_p2)  ;;  %1249 = vmatpush1.bf16.msra.mxu1 (!%p290_p2), %v5418_v4  ;;  %v371_v4 = vld [vmem:[%s8843_s1 + $0x68] sm:$0xff] (!%p290_p2) }
   0xb   : > { %1250 = vmatprep.subr.bf16.mxu1 (!%p290_p2), %v5427_v6  ;;  %v5435_v10 = vcombine.high (!%p290_p2), %v374_v7, %v378_v8  ;;  %v382_v11 = vld [vmem:[%s8843_s1 + $0xc0] sm:$0xff] (!%p290_p2)  ;;  %v5434_v13 = vcombine.low (!%p290_p2), %v374_v7, %v378_v8  ;;  %v5421_v6 = vcombine.high (!%p290_p2), %v359_v63, %v363_v0  ;;  %v5420_v8 = vcombine.low (!%p290_p2), %v359_v63, %v363_v0  ;;  %v463_v0 = vld [vmem:[%s8843_s1 + $0x348] sm:$0xff] (!%p290_p2) }
   0xc   : > { %v386_v12 = vld [vmem:[%s8843_s1 + $0xe0] sm:$0xff] (!%p290_p2) }
   0xd   : > { %s8853_s17 = smov (!%p328_p3, %s5396_s17), 31  ;;  %v5443_v14 = vcombine.high %v382_v11, %v386_v12  ;;  %v390_v15 = vld [vmem:[%s8843_s1 + $0x100] sm:$0xff]  ;;  %v5442_v18 = vcombine.low %v382_v11, %v386_v12  ;;  %v5429_v11 = vcombine.high %v367_v3, %v371_v4  ;;  %v5428_v12 = vcombine.low %v367_v3, %v371_v4 }
   0xe   : > { %s5837_s24 = sshll.u32 %s8853_s17, 3  ;;  %1251 = vmatpush1.bf16.msra.mxu1 %v5426_v9  ;;  %v394_v16 = vld [vmem:[%s8843_s1 + $0x120] sm:$0xff]  ;;  %v375_v9 = vld [vmem:[%s8843_s1 + $0x88] sm:$0xff]  ;;  %s5838_s29 = sshll.u32 %s8853_s17, 4 }
   0xf   : > { %s6748_s11 = scalar_lea.vmem %s8842_s0, %s5837_s24  ;;  %1252 = vmatprep.subr.bf16.mxu1 %v5435_v10  ;;  %v5451_v19 = vcombine.high %v390_v15, %v394_v16  ;;  %v398_v20 = vld [vmem:[%s8843_s1 + $0x140] sm:$0xff]  ;;  %v5450_v22 = vcombine.low %v390_v15, %v394_v16  ;;  %v379_v10 = vld [vmem:[%s8843_s1 + $0xa8] sm:$0xff]  ;;  %s8786_s13 = scalar_lea.vmem %s8851_s9, %s5838_s29 }
  0x10   : > { %v6757_v17 = vld [vmem:[%s6748_s11 + $0x4] ss:$8 sps:$4 sm:$0xff]   ;;  %v6839_v5 = vld [vmem:[%s6748_s11] ss:$8 sps:$4 sm:$0xff]   ;;  %v6842_v7 = vld [vmem:[%s6748_s11 + $0x14] ss:$8 sps:$4 sm:$0xff]   ;;  %v5437_v16 = vcombine.high %v375_v9, %v379_v10 }
  0x11   : > { %1280 = vmatprep.mubr.bf16.mxu1 %v6757_v17  ;;  %v402_v21 = vld [vmem:[%s8843_s1 + $0x160] sm:$0xff]  ;;  %v6859_v15 = vld [vmem:[%s6748_s11 + $0x10] ss:$8 sps:$4 sm:$0xff]   ;;  %v6962_v4 = vld [vmem:[%s6748_s11 + $0x74] ss:$8 sps:$4 sm:$0xff]  }
  0x12   : > { %1253 = vmatpush1.bf16.msra.mxu1 %v5434_v13  ;;  %v5459_v23 = vcombine.high %v398_v20, %v402_v21  ;;  %v406_v24 = vld [vmem:[%s8843_s1 + $0x180] sm:$0xff]  ;;  %v5458_v26 = vcombine.low %v398_v20, %v402_v21  ;;  %v383_v13 = vld [vmem:[%s8843_s1 + $0xc8] sm:$0xff] }
  0x13   : > { %1254 = vmatprep.subr.bf16.mxu1 %v5443_v14  ;;  %v410_v25 = vld [vmem:[%s8843_s1 + $0x1a0] sm:$0xff]  ;;  %v387_v14 = vld [vmem:[%s8843_s1 + $0xe8] sm:$0xff] }
  0x14   : > { %v5467_v27 = vcombine.high %v406_v24, %v410_v25  ;;  %v414_v28 = vld [vmem:[%s8843_s1 + $0x1c0] sm:$0xff]  ;;  %v5466_v30 = vcombine.low %v406_v24, %v410_v25  ;;  %v391_v20 = vld [vmem:[%s8843_s1 + $0x108] sm:$0xff] }
  0x15   : > { %v418_v29 = vld [vmem:[%s8843_s1 + $0x1e0] sm:$0xff]  ;;  %v395_v21 = vld [vmem:[%s8843_s1 + $0x128] sm:$0xff] }
  0x16   : > { %1255 = vmatpush1.bf16.msra.mxu1 %v5442_v18  ;;  %v5475_v31 = vcombine.high %v414_v28, %v418_v29  ;;  %v422_v32 = vld [vmem:[%s8843_s1 + $0x200] sm:$0xff]  ;;  %v5474_v34 = vcombine.low %v414_v28, %v418_v29  ;;  %v399_v24 = vld [vmem:[%s8843_s1 + $0x148] sm:$0xff]  ;;  %v6882_v28 = vld [vmem:[%s6748_s11 + $0x34] ss:$8 sps:$4 sm:$0xff]   ;;  %v5452_v29 = vcombine.low %v391_v20, %v395_v21 }
  0x17   : > { %1256 = vmatprep.subr.bf16.mxu1 %v5451_v19  ;;  %v426_v33 = vld [vmem:[%s8843_s1 + $0x220] sm:$0xff]  ;;  %v5436_v19 = vcombine.low %v375_v9, %v379_v10  ;;  %v403_v25 = vld [vmem:[%s8843_s1 + $0x168] sm:$0xff] }
  0x18   : > { %v5483_v35 = vcombine.high %v422_v32, %v426_v33  ;;  %v430_v36 = vld [vmem:[%s8843_s1 + $0x240] sm:$0xff]  ;;  %v5482_v38 = vcombine.low %v422_v32, %v426_v33  ;;  %v5461_v32 = vcombine.high %v399_v24, %v403_v25  ;;  %v5460_v33 = vcombine.low %v399_v24, %v403_v25  ;;  %v475_v9 = vld [vmem:[%s8843_s1 + $0x3a8] sm:$0xff]  ;;  %v368_v24 = vld [vmem:[%s8843_s1 + $0x50] sm:$0xff] }
  0x19   : > { %v434_v37 = vld [vmem:[%s8843_s1 + $0x260] sm:$0xff]  ;;  %v372_v25 = vld [vmem:[%s8843_s1 + $0x70] sm:$0xff] }
  0x1a   : > { %1257 = vmatpush1.bf16.msra.mxu1 %v5450_v22  ;;  %v5491_v39 = vcombine.high %v430_v36, %v434_v37  ;;  %v438_v40 = vld [vmem:[%s8843_s1 + $0x280] sm:$0xff]  ;;  %v5490_v42 = vcombine.low %v430_v36, %v434_v37  ;;  %v5445_v22 = vcombine.high %v383_v13, %v387_v14  ;;  %v6899_v36 = vld [vmem:[%s6748_s11 + $0x30] ss:$8 sps:$4 sm:$0xff]  }
  0x1b   : > { %1258 = vmatprep.subr.bf16.mxu1 %v5459_v23  ;;  %v442_v41 = vld [vmem:[%s8843_s1 + $0x2a0] sm:$0xff]  ;;  %v5444_v23 = vcombine.low %v383_v13, %v387_v14  ;;  %v483_v13 = vld [vmem:[%s8843_s1 + $0x3e8] sm:$0xff]  ;;  %v6979_v14 = vld [vmem:[%s6748_s11 + $0x70] ss:$8 sps:$4 sm:$0xff]  }
  0x1c   : > { %v5499_v43 = vcombine.high %v438_v40, %v442_v41  ;;  %v446_v44 = vld [vmem:[%s8843_s1 + $0x2c0] sm:$0xff]  ;;  %v5498_v46 = vcombine.low %v438_v40, %v442_v41  ;;  %v423_v40 = vld [vmem:[%s8843_s1 + $0x208] sm:$0xff] }
  0x1d   : > { %v450_v45 = vld [vmem:[%s8843_s1 + $0x2e0] sm:$0xff]  ;;  %v427_v41 = vld [vmem:[%s8843_s1 + $0x228] sm:$0xff] }
  0x1e   : > { %1259 = vmatpush1.bf16.msra.mxu1 %v5458_v26  ;;  %v454_v47 = vld [vmem:[%s8843_s1 + $0x300] sm:$0xff]  ;;  %v5507_v49 = vcombine.high %v446_v44, %v450_v45  ;;  %v5506_v50 = vcombine.low %v446_v44, %v450_v45  ;;  %v431_v44 = vld [vmem:[%s8843_s1 + $0x248] sm:$0xff] }
  0x1f   : > { %1260 = vmatprep.subr.bf16.mxu1 %v5467_v27  ;;  %v458_v48 = vld [vmem:[%s8843_s1 + $0x320] sm:$0xff]  ;;  %v5453_v27 = vcombine.high %v391_v20, %v395_v21  ;;  %v435_v45 = vld [vmem:[%s8843_s1 + $0x268] sm:$0xff]  ;;  %v360_v20 = vld [vmem:[%s8843_s1 + $0x10] sm:$0xff] }
  0x20   : > { %v462_v51 = vld [vmem:[%s8843_s1 + $0x340] sm:$0xff]  ;;  %v5515_v53 = vcombine.high %v454_v47, %v458_v48  ;;  %v5514_v54 = vcombine.low %v454_v47, %v458_v48  ;;  %v5485_v47 = vcombine.high %v423_v40, %v427_v41  ;;  %v6922_v48 = vld [vmem:[%s6748_s11 + $0x54] ss:$8 sps:$4 sm:$0xff]  }
  0x21   : > { %v466_v52 = vld [vmem:[%s8843_s1 + $0x360] sm:$0xff]  ;;  %v364_v21 = vld [vmem:[%s8843_s1 + $0x30] sm:$0xff] }
  0x22   : > { %1261 = vmatpush1.bf16.msra.mxu1 %v5466_v30  ;;  %v470_v55 = vld [vmem:[%s8843_s1 + $0x380] sm:$0xff]  ;;  %v5523_v57 = vcombine.high %v462_v51, %v466_v52  ;;  %v5522_v58 = vcombine.low %v462_v51, %v466_v52  ;;  %v407_v30 = vld [vmem:[%s8843_s1 + $0x188] sm:$0xff]  ;;  %v5493_v52 = vcombine.high %v431_v44, %v435_v45 }
  0x23   : > { %1262 = vmatprep.subr.bf16.mxu1 %v5475_v31  ;;  %v474_v56 = vld [vmem:[%s8843_s1 + $0x3a0] sm:$0xff]  ;;  %v411_v31 = vld [vmem:[%s8843_s1 + $0x1a8] sm:$0xff] }
  0x24   : > { %v478_v59 = vld [vmem:[%s8843_s1 + $0x3c0] sm:$0xff]  ;;  %v5531_v61 = vcombine.high %v470_v55, %v474_v56  ;;  %v5530_v62 = vcombine.low %v470_v55, %v474_v56  ;;  %v5469_v37 = vcombine.high %v407_v30, %v411_v31  ;;  %v443_v51 = vld [vmem:[%s8843_s1 + $0x2a8] sm:$0xff]  ;;  %v6939_v56 = vld [vmem:[%s6748_s11 + $0x50] ss:$8 sps:$4 sm:$0xff]  }
  0x25   : > { %v482_v60 = vld [vmem:[%s8843_s1 + $0x3e0] sm:$0xff]  ;;  %v451_v55 = vld [vmem:[%s8843_s1 + $0x2e8] sm:$0xff] }
  0x26   : > { %1263 = vmatpush1.bf16.msra.mxu1 %v5474_v34  ;;  %v5539_v1 = vcombine.high %v478_v59, %v482_v60  ;;  %v5538_v2 = vcombine.low %v478_v59, %v482_v60  ;;  %v6862_v18 = vld [vmem:[%s6748_s11 + $0x24] ss:$8 sps:$4 sm:$0xff]   ;;  %v6879_v26 = vld [vmem:[%s6748_s11 + $0x20] ss:$8 sps:$4 sm:$0xff]  }
  0x27   : > { %1264 = vmatprep.subr.bf16.mxu1 %v5483_v35  ;;  %v415_v34 = vld [vmem:[%s8843_s1 + $0x1c8] sm:$0xff] }
  0x28   : > { %v419_v35 = vld [vmem:[%s8843_s1 + $0x1e8] sm:$0xff] }
  0x29   : > { %v455_v60 = vld [vmem:[%s8843_s1 + $0x308] sm:$0xff] }
  0x2a   : > { %1265 = vmatpush1.bf16.msra.mxu1 %v5482_v38  ;;  %v6902_v38 = vld [vmem:[%s6748_s11 + $0x44] ss:$8 sps:$4 sm:$0xff]  }
  0x2b   : > { %1266 = vmatprep.subr.bf16.mxu1 %v5491_v39  ;;  %v5468_v39 = vcombine.low %v407_v30, %v411_v31  ;;  %v5422_v30 = vcombine.low %v360_v20, %v364_v21  ;;  %v380_v31 = vld [vmem:[%s8843_s1 + $0xb0] sm:$0xff] }
  0x2e   : > { %1267 = vmatpush1.bf16.msra.mxu1 %v5490_v42  ;;  %v5477_v42 = vcombine.high %v415_v34, %v419_v35 }
  0x2f   : > { %1268 = vmatprep.subr.bf16.mxu1 %v5499_v43  ;;  %v5476_v43 = vcombine.low %v415_v34, %v419_v35  ;;  %v6258_v34 = vld [vmem:[%s8845_s3 + $0x48] sm:$0xff]  }
  0x30   : > { %v6259_v35 = vld [vmem:[%s8845_s3 + $0x8] sm:$0xff]  }
  0x32   : > { %1269 = vmatpush1.bf16.msra.mxu1 %v5498_v46  ;;  %v6919_v46 = vld [vmem:[%s6748_s11 + $0x40] ss:$8 sps:$4 sm:$0xff]  }
  0x33   : > { %1270 = vmatprep.subr.bf16.mxu1 %v5507_v49  ;;  %v5484_v49 = vcombine.low %v423_v40, %v427_v41  ;;  %v384_v40 = vld [vmem:[%s8843_s1 + $0xd0] sm:$0xff] }
  0x34   : > { %v388_v41 = vld [vmem:[%s8843_s1 + $0xf0] sm:$0xff] }
  0x36   : > { %1271 = vmatpush1.bf16.msra.mxu1 %v5506_v50  ;;  %v439_v50 = vld [vmem:[%s8843_s1 + $0x288] sm:$0xff] }
  0x37   : > { %1272 = vmatprep.subr.bf16.mxu1 %v5515_v53  ;;  %v5492_v53 = vcombine.low %v431_v44, %v435_v45  ;;  %v5500_v59 = vcombine.low %v439_v50, %v443_v51  ;;  %v392_v45 = vld [vmem:[%s8843_s1 + $0x110] sm:$0xff] }
  0x3a   : > { %1273 = vmatpush1.bf16.msra.mxu1 %v5514_v54  ;;  %v447_v54 = vld [vmem:[%s8843_s1 + $0x2c8] sm:$0xff] }
  0x3b   : > { %1274 = vmatprep.subr.bf16.mxu1 %v5523_v57  ;;  %v5501_v57 = vcombine.high %v439_v50, %v443_v51  ;;  %v5508_v63 = vcombine.low %v447_v54, %v451_v55  ;;  %v6262_v50 = vld [vmem:[%s8845_s3 + $0x58] sm:$0xff]  }
  0x3c   : > { %v6263_v51 = vld [vmem:[%s8845_s3 + $0x18] sm:$0xff]  }
  0x3e   : > { %1275 = vmatpush1.bf16.msra.mxu1 %v5522_v58  ;;  %v6942_v58 = vld [vmem:[%s6748_s11 + $0x64] ss:$8 sps:$4 sm:$0xff]  }
  0x3f   : > { %1276 = vmatprep.subr.bf16.mxu1 %v5531_v61  ;;  %v459_v61 = vld [vmem:[%s8843_s1 + $0x328] sm:$0xff] }
  0x40   : > { %v5517_v3 = vcombine.high %v455_v60, %v459_v61 }
  0x42   : > { %1277 = vmatpush1.bf16.msra.mxu1 %v5530_v62  ;;  %v5509_v62 = vcombine.high %v447_v54, %v451_v55  ;;  %v400_v55 = vld [vmem:[%s8843_s1 + $0x150] sm:$0xff] }
  0x43   : > { %1278 = vmatprep.subr.bf16.mxu1 %v5539_v1  ;;  %v467_v1 = vld [vmem:[%s8843_s1 + $0x368] sm:$0xff] }
  0x44   : > { %v5525_v10 = vcombine.high %v463_v0, %v467_v1 }
  0x46   : > { %1279 = vmatpush1.bf16.msra.mxu1 %v5538_v2  ;;  %v6959_v2 = vld [vmem:[%s6748_s11 + $0x60] ss:$8 sps:$4 sm:$0xff]  }
  0x47   : > { %1361 = vmatprep.subr.bf16.mxu1 %v5421_v6  ;;  %v5516_v6 = vcombine.low %v455_v60, %v459_v61 }
  0x49   : > { %1281 = vmatmul.mubr.bf16.vlgmr.msra.gmra.mrb[0].mxu1 %v6839_v5 }
  0x4a   : > { %1362 = vmatpush1.bf16.msra.mxu1 %v5420_v8  ;;  %1290 = vmatprep.mubr.bf16.mxu1 %v6842_v7  ;;  %v471_v8 = vld [vmem:[%s8843_s1 + $0x388] sm:$0xff] }
  0x4b   : > { %1363 = vmatprep.subr.bf16.mxu1 %v5429_v11  ;;  %v5524_v11 = vcombine.low %v463_v0, %v467_v1  ;;  %v6266_v0 = vld [vmem:[%s8845_s3 + $0x68] sm:$0xff]  }
  0x4e   : > { %1364 = vmatpush1.bf16.msra.mxu1 %v5428_v12  ;;  %v479_v12 = vld [vmem:[%s8843_s1 + $0x3c8] sm:$0xff] }
  0x4f   : > { %1365 = vmatprep.subr.bf16.mxu1 %v5437_v16  ;;  %v5533_v16 = vcombine.high %v471_v8, %v475_v9 }
  0x51   : > { %1291 = vmatmul.mubr.bf16.gmra.mrb[4].mxu1 %v6859_v15 }
  0x52   : > { %1366 = vmatpush1.bf16.msra.mxu1 %v5436_v19  ;;  %1300 = vmatprep.mubr.bf16.mxu1 %v6862_v18  ;;  %v5532_v19 = vcombine.low %v471_v8, %v475_v9  ;;  %v416_v8 = vld [vmem:[%s8843_s1 + $0x1d0] sm:$0xff] }
  0x53   : > { %1367 = vmatprep.subr.bf16.mxu1 %v5445_v22  ;;  %v5541_v22 = vcombine.high %v479_v12, %v483_v13  ;;  %v420_v9 = vld [vmem:[%s8843_s1 + $0x1f0] sm:$0xff] }
  0x56   : > { %1368 = vmatpush1.bf16.msra.mxu1 %v5444_v23  ;;  %v5540_v23 = vcombine.low %v479_v12, %v483_v13  ;;  %v6269_v12 = vld [vmem:[%s8845_s3 + $0x30] sm:$0xff]   ;;  %v5479_v13 = vcombine.high %v416_v8, %v420_v9 }
  0x57   : > { %1369 = vmatprep.subr.bf16.mxu1 %v5453_v27  ;;  %v5423_v27 = vcombine.high %v360_v20, %v364_v21  ;;  %v6270_v20 = vld [vmem:[%s8845_s3 + $0x78] sm:$0xff]   ;;  %v5478_v21 = vcombine.low %v416_v8, %v420_v9 }
  0x58   : > { %v377_v8 = vld [vmem:[%s8843_s1 + $0x98] sm:$0xff] }
  0x59   : > { %1301 = vmatmul.mubr.bf16.gmra.mrb[8].mxu1 %v6879_v26  ;;  %v381_v9 = vld [vmem:[%s8843_s1 + $0xb8] sm:$0xff] }
  0x5a   : > { %1370 = vmatpush1.bf16.msra.mxu1 %v5452_v29  ;;  %1310 = vmatprep.mubr.bf16.mxu1 %v6882_v28  ;;  %v6256_v29 = vld [vmem:[%s8845_s3 + $0x40] sm:$0xff]  }
  0x5b   : > { %1371 = vmatprep.subr.bf16.mxu1 %v5461_v32  ;;  %v6257_v32 = vld [vmem:[%s8845_s3] sm:$0xff]   ;;  %5839 = vmatprep.subr.bf16.mxu0 %v6256_v29 }
  0x5c   : > { %5840 = vmatpush3.bf16.msra.mxu0 %v6257_v32 }
  0x5d   : > { %5841 = vmatprep.subr.bf16.mxu0 %v6258_v34  ;;  %v452_v34 = vld [vmem:[%s8843_s1 + $0x2f0] sm:$0xff] }
  0x5e   : > { %1372 = vmatpush1.bf16.msra.mxu1 %v5460_v33  ;;  %v5431_v33 = vcombine.high %v368_v24, %v372_v25 }
  0x5f   : > { %1373 = vmatprep.subr.bf16.mxu1 %v5469_v37  ;;  %v6260_v37 = vld [vmem:[%s8845_s3 + $0x50] sm:$0xff]  }
  0x60   : > { %5842 = vmatpush3.bf16.msra.mxu0 %v6259_v35 }
  0x61   : > { %1311 = vmatmul.mubr.bf16.gmra.mrb[12].mxu1 %v6899_v36  ;;  %5843 = vmatprep.subr.bf16.mxu0 %v6260_v37 }
  0x62   : > { %1374 = vmatpush1.bf16.msra.mxu1 %v5468_v39  ;;  %1320 = vmatprep.mubr.bf16.mxu1 %v6902_v38  ;;  %v5430_v39 = vcombine.low %v368_v24, %v372_v25  ;;  %v432_v24 = vld [vmem:[%s8843_s1 + $0x250] sm:$0xff] }
  0x63   : > { %1375 = vmatprep.subr.bf16.mxu1 %v5477_v42  ;;  %v6261_v42 = vld [vmem:[%s8845_s3 + $0x10] sm:$0xff]  }
  0x64   : > { %5844 = vmatpush3.bf16.msra.mxu0 %v6261_v42  ;;  %v436_v25 = vld [vmem:[%s8843_s1 + $0x270] sm:$0xff] }
  0x65   : > { %5845 = vmatprep.subr.bf16.mxu0 %v6262_v50  ;;  %v5495_v29 = vcombine.high %v432_v24, %v436_v25  ;;  %v476_v50 = vld [vmem:[%s8843_s1 + $0x3b0] sm:$0xff] }
  0x66   : > { %1376 = vmatpush1.bf16.msra.mxu1 %v5476_v43 }
  0x67   : > { %1377 = vmatprep.subr.bf16.mxu1 %v5485_v47  ;;  %v396_v47 = vld [vmem:[%s8843_s1 + $0x130] sm:$0xff] }
  0x68   : > { %v5455_v54 = vcombine.high %v392_v45, %v396_v47  ;;  %5846 = vmatpush3.bf16.msra.mxu0 %v6263_v51  ;;  %v5454_v60 = vcombine.low %v392_v45, %v396_v47 }
  0x69   : > { %1321 = vmatmul.mubr.bf16.gmra.mrb[16].mxu1 %v6919_v46 }
  0x6a   : > { %1378 = vmatpush1.bf16.msra.mxu1 %v5484_v49  ;;  %1330 = vmatprep.mubr.bf16.mxu1 %v6922_v48  ;;  %v5447_v49 = vcombine.high %v384_v40, %v388_v41 }
  0x6b   : > { %1379 = vmatprep.subr.bf16.mxu1 %v5493_v52  ;;  %v6264_v52 = vld [vmem:[%s8845_s3 + $0x60] sm:$0xff]  }
  0x6c   : > { %5847 = vmatprep.subr.bf16.mxu0 %v6264_v52 }
  0x6e   : > { %1380 = vmatpush1.bf16.msra.mxu1 %v5492_v53  ;;  %v5446_v53 = vcombine.low %v384_v40, %v388_v41  ;;  %v460_v40 = vld [vmem:[%s8843_s1 + $0x330] sm:$0xff] }
  0x6f   : > { %1381 = vmatprep.subr.bf16.mxu1 %v5501_v57  ;;  %v404_v57 = vld [vmem:[%s8843_s1 + $0x170] sm:$0xff] }
  0x70   : > { %v5463_v61 = vcombine.high %v400_v55, %v404_v57  ;;  %v5462_v1 = vcombine.low %v400_v55, %v404_v57 }
  0x71   : > { %1331 = vmatmul.mubr.bf16.gmra.mrb[20].mxu1 %v6939_v56 }
  0x72   : > { %1382 = vmatpush1.bf16.msra.mxu1 %v5500_v59  ;;  %1340 = vmatprep.mubr.bf16.mxu1 %v6942_v58  ;;  %v6265_v59 = vld [vmem:[%s8845_s3 + $0x20] sm:$0xff]  }
  0x73   : > { %1383 = vmatprep.subr.bf16.mxu1 %v5509_v62  ;;  %v408_v62 = vld [vmem:[%s8843_s1 + $0x190] sm:$0xff]  ;;  %5848 = vmatpush3.bf16.msra.mxu0 %v6265_v59  ;;  %v361_v59 = vld [vmem:[%s8843_s1 + $0x18] sm:$0xff] }
  0x74   : > { %5849 = vmatprep.subr.bf16.mxu0 %v6266_v0  ;;  %v369_v0 = vld [vmem:[%s8843_s1 + $0x58] sm:$0xff] }
  0x76   : > { %1384 = vmatpush1.bf16.msra.mxu1 %v5508_v63  ;;  %v412_v63 = vld [vmem:[%s8843_s1 + $0x1b0] sm:$0xff] }
  0x77   : > { %1385 = vmatprep.subr.bf16.mxu1 %v5517_v3  ;;  %v6267_v3 = vld [vmem:[%s8845_s3 + $0x28] sm:$0xff]  }
  0x78   : > { %5850 = vmatpush3.bf16.msra.mxu0 %v6267_v3 }
  0x79   : > { %1341 = vmatmul.mubr.bf16.gmra.mrb[24].mxu1 %v6959_v2 }
  0x7a   : > { %1386 = vmatpush1.bf16.msra.mxu1 %v5516_v6  ;;  %1350 = vmatprep.mubr.bf16.mxu1 %v6962_v4  ;;  %v5471_v6 = vcombine.high %v408_v62, %v412_v63 }
  0x7b   : > { %1387 = vmatprep.subr.bf16.mxu1 %v5525_v10  ;;  %v6268_v10 = vld [vmem:[%s8845_s3 + $0x70] sm:$0xff]  }
  0x7c   : > { %5851 = vmatprep.subr.bf16.mxu0 %v6268_v10 }
  0x7d   : > { %5852 = vmatpush3.bf16.msra.mxu0 %v6269_v12  ;;  %v385_v12 = vld [vmem:[%s8843_s1 + $0xd8] sm:$0xff] }
  0x7e   : > { %1388 = vmatpush1.bf16.msra.mxu1 %v5524_v11  ;;  %v5470_v11 = vcombine.low %v408_v62, %v412_v63  ;;  %5853 = vmatprep.subr.bf16.mxu0 %v6270_v20  ;;  %v7149_v62 = vld [vmem:[%s6748_s11 + $0x4] ss:$8 sps:$4 sm:$0xff]  }
  0x7f   : > { %1389 = vmatprep.subr.bf16.mxu1 %v5533_v16  ;;  %v424_v16 = vld [vmem:[%s8843_s1 + $0x210] sm:$0xff] }
  0x81   : > { %1351 = vmatmul.mubr.bf16.gmra.mrb[28].mxu1 %v6979_v14 }
  0x82   : > { %1390 = vmatpush1.bf16.msra.mxu1 %v5532_v19  ;;  %1393 = vmatprep.mubr.bf16.mxu1 %v6757_v17  ;;  %v376_v17 = vld [vmem:[%s8843_s1 + $0x90] sm:$0xff] }
  0x83   : > { %1391 = vmatprep.subr.bf16.mxu1 %v5541_v22  ;;  %v5439_v43 = vcombine.high %v376_v17, %v380_v31  ;;  %v5438_v44 = vcombine.low %v376_v17, %v380_v31  ;;  %v428_v19 = vld [vmem:[%s8843_s1 + $0x230] sm:$0xff]  ;;  %v6271_v22 = vld [vmem:[%s8845_s3 + $0x38] sm:$0xff]   ;;  %v5494_v31 = vcombine.low %v432_v24, %v436_v25 }
  0x84   : > { %5854 = vmatpush3.bf16.msra.mxu0 %v6271_v22  ;;  %v444_v17 = vld [vmem:[%s8843_s1 + $0x2b0] sm:$0xff]  ;;  %v401_v22 = vld [vmem:[%s8843_s1 + $0x158] sm:$0xff] }
  0x86   : > { %1392 = vmatpush1.bf16.msra.mxu1 %v5540_v23  ;;  %v5487_v23 = vcombine.high %v424_v16, %v428_v19 }
  0x87   : > { %1474 = vmatprep.subr.bf16.mxu1 %v5423_v27  ;;  %v5486_v27 = vcombine.low %v424_v16, %v428_v19  ;;  %v5440_v16 = vcombine.low %v377_v8, %v381_v9 }
  0x89   : > { %1394 = vmatmul.mubr.bf16.vlgmr.msra.gmra.mrb[32].mxu1 %v6839_v5 }
  0x8a   : > { %1475 = vmatpush1.bf16.msra.mxu1 %v5422_v30  ;;  %1403 = vmatprep.mubr.bf16.mxu1 %v6842_v7  ;;  %v440_v30 = vld [vmem:[%s8843_s1 + $0x290] sm:$0xff] }
  0x8b   : > { %1476 = vmatprep.subr.bf16.mxu1 %v5431_v33  ;;  %v5503_v32 = vcombine.high %v440_v30, %v444_v17  ;;  %v448_v33 = vld [vmem:[%s8843_s1 + $0x2d0] sm:$0xff]  ;;  %v5502_v35 = vcombine.low %v440_v30, %v444_v17  ;;  %v417_v30 = vld [vmem:[%s8843_s1 + $0x1d8] sm:$0xff] }
  0x8c   : > { %v5511_v37 = vcombine.high %v448_v33, %v452_v34  ;;  %v5510_v41 = vcombine.low %v448_v33, %v452_v34  ;;  %v421_v17 = vld [vmem:[%s8843_s1 + $0x1f8] sm:$0xff] }
  0x8d   : > { %v5480_v33 = vcombine.low %v417_v30, %v421_v17 }
  0x8e   : > { %1477 = vmatpush1.bf16.msra.mxu1 %v5430_v39  ;;  %v456_v39 = vld [vmem:[%s8843_s1 + $0x310] sm:$0xff] }
  0x8f   : > { %1478 = vmatprep.subr.bf16.mxu1 %v5439_v43  ;;  %v5519_v42 = vcombine.high %v456_v39, %v460_v40  ;;  %v464_v43 = vld [vmem:[%s8843_s1 + $0x350] sm:$0xff]  ;;  %v5518_v45 = vcombine.low %v456_v39, %v460_v40 }
  0x91   : > { %1404 = vmatmul.mubr.bf16.gmra.mrb[36].mxu1 %v6859_v15 }
  0x92   : > { %1479 = vmatpush1.bf16.msra.mxu1 %v5438_v44  ;;  %1413 = vmatprep.mubr.bf16.mxu1 %v6862_v18  ;;  %v468_v44 = vld [vmem:[%s8843_s1 + $0x370] sm:$0xff] }
  0x93   : > { %1480 = vmatprep.subr.bf16.mxu1 %v5447_v49  ;;  %v5527_v47 = vcombine.high %v464_v43, %v468_v44  ;;  %v472_v49 = vld [vmem:[%s8843_s1 + $0x390] sm:$0xff]  ;;  %v5526_v51 = vcombine.low %v464_v43, %v468_v44  ;;  %v449_v43 = vld [vmem:[%s8843_s1 + $0x2d8] sm:$0xff] }
  0x94   : > { %v5535_v52 = vcombine.high %v472_v49, %v476_v50  ;;  %v5534_v55 = vcombine.low %v472_v49, %v476_v50  ;;  %v453_v44 = vld [vmem:[%s8843_s1 + $0x2f8] sm:$0xff] }
  0x95   : > { %v5512_v49 = vcombine.low %v449_v43, %v453_v44 }
  0x96   : > { %1481 = vmatpush1.bf16.msra.mxu1 %v5446_v53  ;;  %v480_v53 = vld [vmem:[%s8843_s1 + $0x3d0] sm:$0xff] }
  0x97   : > { %1482 = vmatprep.subr.bf16.mxu1 %v5455_v54  ;;  %v484_v54 = vld [vmem:[%s8843_s1 + $0x3f0] sm:$0xff] }
  0x98   : > { %v5543_v57 = vcombine.high %v480_v53, %v484_v54 }
  0x99   : > { %1414 = vmatmul.mubr.bf16.gmra.mrb[40].mxu1 %v6879_v26 }
  0x9a   : > { %1483 = vmatpush1.bf16.msra.mxu1 %v5454_v60  ;;  %1423 = vmatprep.mubr.bf16.mxu1 %v6882_v28  ;;  %v365_v60 = vld [vmem:[%s8843_s1 + $0x38] sm:$0xff] }
  0x9b   : > { %1484 = vmatprep.subr.bf16.mxu1 %v5463_v61  ;;  %v5542_v61 = vcombine.low %v480_v53, %v484_v54  ;;  %v5425_v63 = vcombine.high %v361_v59, %v365_v60  ;;  %v5424_v3 = vcombine.low %v361_v59, %v365_v60 }
  0x9e   : > { %1485 = vmatpush1.bf16.msra.mxu1 %v5462_v1  ;;  %v373_v1 = vld [vmem:[%s8843_s1 + $0x78] sm:$0xff] }
  0x9f   : > { %1486 = vmatprep.subr.bf16.mxu1 %v5471_v6  ;;  %v5433_v6 = vcombine.high %v369_v0, %v373_v1  ;;  %v5432_v10 = vcombine.low %v369_v0, %v373_v1 }
  0xa1   : > { %1424 = vmatmul.mubr.bf16.gmra.mrb[44].mxu1 %v6899_v36 }
  0xa2   : > { %1487 = vmatpush1.bf16.msra.mxu1 %v5470_v11  ;;  %1433 = vmatprep.mubr.bf16.mxu1 %v6902_v38  ;;  %v5441_v11 = vcombine.high %v377_v8, %v381_v9  ;;  %v6288_v8 = vld [vmem:[%s8845_s3 + $0x140] sm:$0xff]  }
  0xa3   : > { %1488 = vmatprep.subr.bf16.mxu1 %v5479_v13  ;;  %v389_v13 = vld [vmem:[%s8843_s1 + $0xf8] sm:$0xff]  ;;  %v6273_v9 = vld [vmem:[%s8845_s3 + $0x80] sm:$0xff]   ;;  %5967 = vmatprep.subr.bf16.mxu0 %v6288_v8  ;;  %v6292_v8 = vld [vmem:[%s8845_s3 + $0x150] sm:$0xff]  }
  0xa4   : > { %v5449_v19 = vcombine.high %v385_v12, %v389_v13  ;;  %v5448_v20 = vcombine.low %v385_v12, %v389_v13  ;;  %v6275_v12 = vld [vmem:[%s8845_s3 + $0x88] sm:$0xff]   ;;  %v6276_v13 = vld [vmem:[%s8845_s3 + $0xd0] sm:$0xff]  }
  0xa6   : > { %1489 = vmatpush1.bf16.msra.mxu1 %v5478_v21 }
  0xa7   : > { %1490 = vmatprep.subr.bf16.mxu1 %v5487_v23  ;;  %v405_v23 = vld [vmem:[%s8843_s1 + $0x178] sm:$0xff] }
  0xa8   : > { %v5465_v25 = vcombine.high %v401_v22, %v405_v23 }
  0xa9   : > { %1434 = vmatmul.mubr.bf16.gmra.mrb[48].mxu1 %v6919_v46 }
  0xaa   : > { %1491 = vmatpush1.bf16.msra.mxu1 %v5486_v27  ;;  %1443 = vmatprep.mubr.bf16.mxu1 %v6922_v48  ;;  %v5464_v27 = vcombine.low %v401_v22, %v405_v23  ;;  %v6279_v22 = vld [vmem:[%s8845_s3 + $0x98] sm:$0xff]   ;;  %v6280_v23 = vld [vmem:[%s8845_s3 + $0xe0] sm:$0xff]  }
  0xab   : > { %1492 = vmatprep.subr.bf16.mxu1 %v5495_v29 }
  0xae   : > { %1493 = vmatpush1.bf16.msra.mxu1 %v5494_v31 }
  0xaf   : > { %1494 = vmatprep.subr.bf16.mxu1 %v5503_v32  ;;  %v5481_v32 = vcombine.high %v417_v30, %v421_v17 }
  0xb1   : > { %1444 = vmatmul.mubr.bf16.gmra.mrb[52].mxu1 %v6939_v56 }
  0xb2   : > { %1495 = vmatpush1.bf16.msra.mxu1 %v5502_v35  ;;  %1453 = vmatprep.mubr.bf16.mxu1 %v6942_v58  ;;  %v433_v35 = vld [vmem:[%s8843_s1 + $0x258] sm:$0xff] }
  0xb3   : > { %1496 = vmatprep.subr.bf16.mxu1 %v5511_v37  ;;  %v437_v37 = vld [vmem:[%s8843_s1 + $0x278] sm:$0xff] }
  0xb4   : > { %v5497_v40 = vcombine.high %v433_v35, %v437_v37 }
  0xb6   : > { %1497 = vmatpush1.bf16.msra.mxu1 %v5510_v41  ;;  %v5496_v41 = vcombine.low %v433_v35, %v437_v37 }
  0xb7   : > { %1498 = vmatprep.subr.bf16.mxu1 %v5519_v42 }
  0xb9   : > { %1454 = vmatmul.mubr.bf16.gmra.mrb[56].mxu1 %v6959_v2 }
  0xba   : > { %1499 = vmatpush1.bf16.msra.mxu1 %v5518_v45  ;;  %1463 = vmatprep.mubr.bf16.mxu1 %v6962_v4 }
  0xbb   : > { %1500 = vmatprep.subr.bf16.mxu1 %v5527_v47  ;;  %v5513_v47 = vcombine.high %v449_v43, %v453_v44  ;;  %v6647_v44 = vld [vmem:[%s6748_s11 + $0x30] ss:$8 sps:$4 sm:$0xff]  }
  0xbe   : > { %1501 = vmatpush1.bf16.msra.mxu1 %v5526_v51  ;;  %v465_v51 = vld [vmem:[%s8843_s1 + $0x358] sm:$0xff] }
  0xbf   : > { %1502 = vmatprep.subr.bf16.mxu1 %v5535_v52  ;;  %v469_v52 = vld [vmem:[%s8843_s1 + $0x378] sm:$0xff] }
  0xc0   : > { %v5529_v54 = vcombine.high %v465_v51, %v469_v52  ;;  %v5528_v59 = vcombine.low %v465_v51, %v469_v52  ;;  %v6289_v52 = vld [vmem:[%s8845_s3 + $0x100] sm:$0xff]  }
  0xc1   : > { %1464 = vmatmul.mubr.bf16.gmra.mrb[60].mxu1 %v6979_v14 }
  0xc2   : > { %1503 = vmatpush1.bf16.msra.mxu1 %v5534_v55  ;;  %1506 = vmatprep.mubr.bf16.mxu1 %v7149_v62  ;;  %v473_v55 = vld [vmem:[%s8843_s1 + $0x398] sm:$0xff] }
  0xc3   : > { %1504 = vmatprep.subr.bf16.mxu1 %v5543_v57  ;;  %v477_v57 = vld [vmem:[%s8843_s1 + $0x3b8] sm:$0xff] }
  0xc4   : > { %v5537_v60 = vcombine.high %v473_v55, %v477_v57  ;;  %v5536_v0 = vcombine.low %v473_v55, %v477_v57  ;;  %v6290_v55 = vld [vmem:[%s8845_s3 + $0x148] sm:$0xff]  }
  0xc6   : > { %1505 = vmatpush1.bf16.msra.mxu1 %v5542_v61  ;;  %v481_v61 = vld [vmem:[%s8843_s1 + $0x3d8] sm:$0xff] }
  0xc7   : > { %1587 = vmatprep.subr.bf16.mxu1 %v5425_v63  ;;  %v485_v63 = vld [vmem:[%s8843_s1 + $0x3f8] sm:$0xff] }
  0xc8   : > { %v5545_v1 = vcombine.high %v481_v61, %v485_v63 }
  0xc9   : > { %1507 = vmatmul.mubr.bf16.vlgmr.msra.gmra.mrb[64].mxu1 %v6839_v5  ;;  %v393_v5 = vld [vmem:[%s8843_s1 + $0x118] sm:$0xff] }
  0xca   : > { %1588 = vmatpush1.bf16.msra.mxu1 %v5424_v3  ;;  %1516 = vmatprep.mubr.bf16.mxu1 %v6842_v7  ;;  %v397_v7 = vld [vmem:[%s8843_s1 + $0x138] sm:$0xff]  ;;  %v5544_v3 = vcombine.low %v481_v61, %v485_v63 }
  0xcb   : > { %1589 = vmatprep.subr.bf16.mxu1 %v5433_v6  ;;  %v5457_v21 = vcombine.high %v393_v5, %v397_v7  ;;  %v5456_v24 = vcombine.low %v393_v5, %v397_v7  ;;  %v6272_v6 = vld [vmem:[%s8845_s3 + $0xc0] sm:$0xff]   ;;  %v6278_v5 = vld [vmem:[%s8845_s3 + $0xd8] sm:$0xff]  }
  0xcc   : > { %v6643_v7 = vld [vmem:[%s6748_s11 + $0x10] ss:$8 sps:$4 sm:$0xff]  }
  0xce   : > { %1590 = vmatpush1.bf16.msra.mxu1 %v5432_v10  ;;  %v6641_v10 = vld [vmem:[%s6748_s11] ss:$8 sps:$4 sm:$0xff]  }
  0xcf   : > { %1591 = vmatprep.subr.bf16.mxu1 %v5441_v11  ;;  %v6642_v11 = vld [vmem:[%s6748_s11 + $0x14] ss:$8 sps:$4 sm:$0xff]  }
  0xd1   : > { %1517 = vmatmul.mubr.bf16.gmra.mrb[68].mxu1 %v6859_v15  ;;  %v409_v15 = vld [vmem:[%s8843_s1 + $0x198] sm:$0xff] }
  0xd2   : > { %1592 = vmatpush1.bf16.msra.mxu1 %v5440_v16  ;;  %1526 = vmatprep.mubr.bf16.mxu1 %v6862_v18  ;;  %v413_v18 = vld [vmem:[%s8843_s1 + $0x1b8] sm:$0xff]  ;;  %v488_v16 = vlaneseq }
  0xd3   : > { %1593 = vmatprep.subr.bf16.mxu1 %v5449_v19  ;;  %v5473_v29 = vcombine.high %v409_v15, %v413_v18  ;;  %v5472_v31 = vcombine.low %v409_v15, %v413_v18  ;;  %v6277_v19 = vld [vmem:[%s8845_s3 + $0x90] sm:$0xff]   ;;  %v6281_v18 = vld [vmem:[%s8845_s3 + $0xa0] sm:$0xff]  }
  0xd6   : > { %1594 = vmatpush1.bf16.msra.mxu1 %v5448_v20  ;;  %v7285_v20 = vshrl.u32 %v488_v16, 7  ;;  %v6293_v16 = vld [vmem:[%s8845_s3 + $0x110] sm:$0xff]  }
  0xd7   : > { %1595 = vmatprep.subr.bf16.mxu1 %v5457_v21  ;;  %v6644_v21 = vld [vmem:[%s6748_s11 + $0x24] ss:$8 sps:$4 sm:$0xff]  }
  0xd8   : > { %v7303_v15 = vsub.s32 1, %v7285_v20 }
  0xd9   : > { %1527 = vmatmul.mubr.bf16.gmra.mrb[72].mxu1 %v6879_v26  ;;  %v425_v26 = vld [vmem:[%s8843_s1 + $0x218] sm:$0xff] }
  0xda   : > { %1596 = vmatpush1.bf16.msra.mxu1 %v5456_v24  ;;  %1536 = vmatprep.mubr.bf16.mxu1 %v6882_v28  ;;  %v429_v28 = vld [vmem:[%s8843_s1 + $0x238] sm:$0xff]  ;;  %v7295_v24 = vsub.s32 0, %v7285_v20 }
  0xdb   : > { %1597 = vmatprep.subr.bf16.mxu1 %v5465_v25  ;;  %v5489_v34 = vcombine.high %v425_v26, %v429_v28  ;;  %v5488_v39 = vcombine.low %v425_v26, %v429_v28  ;;  %v7300_v25 = vld [vmem:[%s8844_s2] sm:$0xff]  ;;  %v6284_v26 = vld [vmem:[%s8845_s3 + $0xf0] sm:$0xff]  }
  0xdc   : > { %v7314_v30 = vrot.slane %v7300_v25, %v7295_v24  ;;  %v7318_v17 = vrot.slane %v7300_v25, %v7303_v15 }
  0xde   : > { %1598 = vmatpush1.bf16.msra.mxu1 %v5464_v27  ;;  %v6282_v27 = vld [vmem:[%s8845_s3 + $0xe8] sm:$0xff]  }
  0xdf   : > { %1599 = vmatprep.subr.bf16.mxu1 %v5473_v29  ;;  %v6645_v29 = vld [vmem:[%s6748_s11 + $0x20] ss:$8 sps:$4 sm:$0xff]  }
  0xe1   : > { %1537 = vmatmul.mubr.bf16.gmra.mrb[76].mxu1 %v6899_v36  ;;  %v441_v36 = vld [vmem:[%s8843_s1 + $0x298] sm:$0xff] }
  0xe2   : > { %1600 = vmatpush1.bf16.msra.mxu1 %v5472_v31  ;;  %1546 = vmatprep.mubr.bf16.mxu1 %v6902_v38  ;;  %v445_v38 = vld [vmem:[%s8843_s1 + $0x2b8] sm:$0xff] }
  0xe3   : > { %1601 = vmatprep.subr.bf16.mxu1 %v5481_v32  ;;  %v5505_v42 = vcombine.high %v441_v36, %v445_v38  ;;  %v5504_v45 = vcombine.low %v441_v36, %v445_v38  ;;  %v6646_v31 = vld [vmem:[%s6748_s11 + $0x34] ss:$8 sps:$4 sm:$0xff]   ;;  %v6283_v32 = vld [vmem:[%s8845_s3 + $0xa8] sm:$0xff]  }
  0xe4   : > { %v6286_v38 = vld [vmem:[%s8845_s3 + $0xf8] sm:$0xff]  }
  0xe6   : > { %1602 = vmatpush1.bf16.msra.mxu1 %v5480_v33 }
  0xe7   : > { %1603 = vmatprep.subr.bf16.mxu1 %v5489_v34 }
  0xe9   : > { %1547 = vmatmul.mubr.bf16.gmra.mrb[80].mxu1 %v6919_v46  ;;  %v457_v46 = vld [vmem:[%s8843_s1 + $0x318] sm:$0xff] }
  0xea   : > { %1604 = vmatpush1.bf16.msra.mxu1 %v5488_v39  ;;  %1556 = vmatprep.mubr.bf16.mxu1 %v6922_v48  ;;  %v461_v48 = vld [vmem:[%s8843_s1 + $0x338] sm:$0xff]  ;;  %v6285_v39 = vld [vmem:[%s8845_s3 + $0xb0] sm:$0xff]  }
  0xeb   : > { %1605 = vmatprep.subr.bf16.mxu1 %v5497_v40  ;;  %v5521_v50 = vcombine.high %v457_v46, %v461_v48  ;;  %v5520_v53 = vcombine.low %v457_v46, %v461_v48  ;;  %v6648_v46 = vld [vmem:[%s6748_s11 + $0x44] ss:$8 sps:$4 sm:$0xff]   ;;  %v6287_v48 = vld [vmem:[%s8845_s3 + $0xb8] sm:$0xff]  }
  0xee   : > { %1606 = vmatpush1.bf16.msra.mxu1 %v5496_v41 }
  0xef   : > { %1607 = vmatprep.subr.bf16.mxu1 %v5505_v42 }
  0xf1   : > { %1557 = vmatmul.mubr.bf16.gmra.mrb[84].mxu1 %v6939_v56 }
  0xf2   : > { %1608 = vmatpush1.bf16.msra.mxu1 %v5504_v45  ;;  %1566 = vmatprep.mubr.bf16.mxu1 %v6942_v58 }
  0xf3   : > { %1609 = vmatprep.subr.bf16.mxu1 %v5513_v47 }
  0xf6   : > { %1610 = vmatpush1.bf16.msra.mxu1 %v5512_v49 }
  0xf7   : > { %1611 = vmatprep.subr.bf16.mxu1 %v5521_v50 }
  0xf9   : > { %1567 = vmatmul.mubr.bf16.gmra.mrb[88].mxu1 %v6959_v2 }
  0xfa   : > { %1612 = vmatpush1.bf16.msra.mxu1 %v5520_v53  ;;  %1576 = vmatprep.mubr.bf16.mxu1 %v6962_v4 }
  0xfb   : > { %1613 = vmatprep.subr.bf16.mxu1 %v5529_v54 }
  0xfe   : > { %1614 = vmatpush1.bf16.msra.mxu1 %v5528_v59 }
  0xff   : > { %1615 = vmatprep.subr.bf16.mxu1 %v5537_v60 }
 0x101   : > { %1577 = vmatmul.mubr.bf16.gmra.mrb[92].mxu1 %v6979_v14 }
 0x102   : > { %1616 = vmatpush1.bf16.msra.mxu1 %v5536_v0  ;;  %1619 = vmatprep.mubr.bf16.mxu1 %v7149_v62  ;;  %v6274_v62 = vld [vmem:[%s8845_s3 + $0xc8] sm:$0xff]  }
 0x103   : > { %1617 = vmatprep.subr.bf16.mxu1 %v5545_v1  ;;  %v6291_v0 = vld [vmem:[%s8845_s3 + $0x108] sm:$0xff]  }
 0x106   : > { %1618 = vmatpush1.bf16.msra.mxu1 %v5544_v3 }
 0x107   : > { %5903 = vmatprep.subr.bf16.mxu1 %v6272_v6  ;;  %v6649_v6 = vld [vmem:[%s6748_s11 + $0x40] ss:$8 sps:$4 sm:$0xff]  }
 0x109   : > { %1620 = vmatmul.mubr.bf16.vlgmr.msra.gmra.mrb[96].mxu1 %v6641_v10  ;;  %v6650_v10 = vld [vmem:[%s6748_s11 + $0x54] ss:$8 sps:$4 sm:$0xff]  }
 0x10a   : > { %1629 = vmatprep.mubr.bf16.mxu1 %v6642_v11  ;;  %5904 = vmatpush3.bf16.msra.mxu1 %v6273_v9 }
 0x10b   : > { %5905 = vmatprep.subr.bf16.mxu1 %v6274_v62 }
 0x10e   : > { %5906 = vmatpush3.bf16.msra.mxu1 %v6275_v12 }
 0x10f   : > { %5907 = vmatprep.subr.bf16.mxu1 %v6276_v13 }
 0x111   : > { %1630 = vmatmul.mubr.bf16.gmra.mrb[100].mxu1 %v6643_v7 }
 0x112   : > { %1639 = vmatprep.mubr.bf16.mxu1 %v6644_v21  ;;  %5908 = vmatpush3.bf16.msra.mxu1 %v6277_v19  ;;  %v6304_v19 = vld [vmem:[%s8845_s3 + $0x1c0] sm:$0xff]   ;;  %v6294_v21 = vld [vmem:[%s8845_s3 + $0x158] sm:$0xff]  }
 0x113   : > { %5909 = vmatprep.subr.bf16.mxu1 %v6278_v5 }
 0x116   : > { %5910 = vmatpush3.bf16.msra.mxu1 %v6279_v22 }
 0x117   : > { %5911 = vmatprep.subr.bf16.mxu1 %v6280_v23 }
 0x119   : > { %1640 = vmatmul.mubr.bf16.gmra.mrb[104].mxu1 %v6645_v29 }
 0x11a   : > { %1649 = vmatprep.mubr.bf16.mxu1 %v6646_v31  ;;  %5912 = vmatpush3.bf16.msra.mxu1 %v6281_v18  ;;  %v6295_v31 = vld [vmem:[%s8845_s3 + $0x118] sm:$0xff]  }
 0x11b   : > { %5913 = vmatprep.subr.bf16.mxu1 %v6282_v27 }
 0x11c   : > { %v1282_v28 = vpop.f32.mrb[0].mxu1 }
 0x11d   : > { %v1283_v33 = vadd.f32 %v1282_v28, %v7314_v30  ;;  %v1284_v34 = vpop.f32.mrb[1].mxu1  ;;  %v6296_v28 = vld [vmem:[%s8845_s3 + $0x160] sm:$0xff]  }
 0x11e   : > { %v1285_v35 = vadd.f32 %v1284_v34, %v7318_v17  ;;  %v1286_v37 = vpop.f32.mrb[2].mxu1  ;;  %5914 = vmatpush3.bf16.msra.mxu1 %v6283_v32 }
 0x11f   : > { %v1287_v40 = vadd.f32 %v1286_v37, %v7314_v30  ;;  %v1288_v36 = vpop.f32.mrb[3].mxu1  ;;  %5915 = vmatprep.subr.bf16.mxu1 %v6284_v26  ;;  %v1700_v42 = vmax.f32 %v1283_v33, 0.0 }
 0x120   : > { %v1289_v41 = vadd.f32 %v1288_v36, %v7318_v17  ;;  %v1701_v45 = vmax.f32 %v1285_v35, 0.0 }
 0x121   : > { %v1708_v43 = vmax.f32 %v1287_v40, 0.0  ;;  %1650 = vmatmul.mubr.bf16.gmra.mrb[108].mxu1 %v6647_v44  ;;  %v6297_v40 = vld [vmem:[%s8845_s3 + $0x120] sm:$0xff]  }
 0x122   : > { %v1709_v47 = vmax.f32 %v1289_v41, 0.0  ;;  %1659 = vmatprep.mubr.bf16.mxu1 %v6648_v46  ;;  %5916 = vmatpush3.bf16.msra.mxu1 %v6285_v39 }
 0x123   : > { %v1828_v49 = vpack.c.bf16 %v1708_v43, %v1700_v42  ;;  %5917 = vmatprep.subr.bf16.mxu1 %v6286_v38  ;;  %v6298_v38 = vld [vmem:[%s8845_s3 + $0x168] sm:$0xff]  }
 0x124   : > { %v1292_v50 = vpop.f32.mrb[4].mxu1  ;;  %v1829_v51 = vpack.c.bf16 %v1709_v47, %v1701_v45  ;;  %v6299_v45 = vld [vmem:[%s8845_s3 + $0x128] sm:$0xff]  }
 0x125   : > { %v1293_v53 = vadd.f32 %v1292_v50, %v7314_v30  ;;  %v1294_v54 = vpop.f32.mrb[5].mxu1 }
 0x126   : > { %v1295_v57 = vadd.f32 %v1294_v54, %v7318_v17  ;;  %v1296_v59 = vpop.f32.mrb[6].mxu1  ;;  %2443 = vmatprep.mubr.bf16.mxu0 %v1829_v51  ;;  %5918 = vmatpush3.bf16.msra.mxu1 %v6287_v48  ;;  %v6300_v48 = vld [vmem:[%s8845_s3 + $0x170] sm:$0xff]  }
 0x127   : > { %v1297_v60 = vadd.f32 %v1296_v59, %v7314_v30  ;;  %v1298_v61 = vpop.f32.mrb[7].mxu1  ;;  %2444 = vmatmul.mubr.bf16.vlgmr.msra.gmra.mrb[0].mxu0 %v1828_v49  ;;  %v1716_v1 = vmax.f32 %v1293_v53, 0.0  ;;  %6031 = vmatprep.subr.bf16.mxu1 %v6304_v19  ;;  %v6301_v54 = vld [vmem:[%s8845_s3 + $0x130] sm:$0xff]  }
 0x128   : > { %v1299_v63 = vadd.f32 %v1298_v61, %v7318_v17  ;;  %5968 = vmatpush3.bf16.msra.mxu0 %v6289_v52  ;;  %v1717_v9 = vmax.f32 %v1295_v57, 0.0  ;;  %v6302_v57 = vld [vmem:[%s8845_s3 + $0x178] sm:$0xff]  }
 0x129   : > { %v1724_v3 = vmax.f32 %v1297_v60, 0.0  ;;  %1660 = vmatmul.mubr.bf16.gmra.mrb[112].mxu1 %v6649_v6  ;;  %5969 = vmatprep.subr.bf16.mxu0 %v6290_v55 }
 0x12a   : > { %v1725_v62 = vmax.f32 %v1299_v63, 0.0  ;;  %1669 = vmatprep.mubr.bf16.mxu1 %v6650_v10 }
 0x12b   : > { %v1836_v11 = vpack.c.bf16 %v1724_v3, %v1716_v1 }
 0x12c   : > { %v1837_v12 = vpack.c.bf16 %v1725_v62, %v1717_v9  ;;  %v1302_v13 = vpop.f32.mrb[8].mxu1  ;;  %5970 = vmatpush3.bf16.msra.mxu0 %v6291_v0  ;;  %v6303_v0 = vld [vmem:[%s8845_s3 + $0x138] sm:$0xff]  }
 0x12d   : > { %v1303_v5 = vadd.f32 %v1302_v13, %v7314_v30  ;;  %v1304_v7 = vpop.f32.mrb[9].mxu1  ;;  %5971 = vmatprep.subr.bf16.mxu0 %v6292_v8 }
 0x12e   : > { %v1305_v22 = vadd.f32 %v1304_v7, %v7318_v17  ;;  %v1306_v23 = vpop.f32.mrb[10].mxu1  ;;  %2451 = vmatprep.mubr.bf16.mxu0 %v1837_v12 }
 0x12f   : > { %v1307_v18 = vadd.f32 %v1306_v23, %v7314_v30  ;;  %v1308_v27 = vpop.f32.mrb[11].mxu1  ;;  %2452 = vmatmul.mubr.bf16.gmra.mrb[4].mxu0 %v1836_v11  ;;  %v1732_v32 = vmax.f32 %v1303_v5, 0.0 }
 0x130   : > { %v1309_v29 = vadd.f32 %v1308_v27, %v7318_v17  ;;  %5972 = vmatpush3.bf16.msra.mxu0 %v6293_v16  ;;  %v1733_v33 = vmax.f32 %v1305_v22, 0.0 }
 0x131   : > { %v1740_v26 = vmax.f32 %v1307_v18, 0.0  ;;  %1670 = vmatmul.mubr.bf16.gmra.mrb[116].mxu1 %v6939_v56  ;;  %5973 = vmatprep.subr.bf16.mxu0 %v6294_v21 }
 0x132   : > { %v1741_v34 = vmax.f32 %v1309_v29, 0.0  ;;  %1679 = vmatprep.mubr.bf16.mxu1 %v6942_v58 }
 0x133   : > { %v1844_v35 = vpack.c.bf16 %v1740_v26, %v1732_v32 }
 0x134   : > { %v1845_v37 = vpack.c.bf16 %v1741_v34, %v1733_v33  ;;  %v1312_v39 = vpop.f32.mrb[12].mxu1  ;;  %5974 = vmatpush3.bf16.msra.mxu0 %v6295_v31 }
 0x135   : > { %v1313_v36 = vadd.f32 %v1312_v39, %v7314_v30  ;;  %v1314_v56 = vpop.f32.mrb[13].mxu1  ;;  %5975 = vmatprep.subr.bf16.mxu0 %v6296_v28 }
 0x136   : > { %v1315_v41 = vadd.f32 %v1314_v56, %v7318_v17  ;;  %v1316_v42 = vpop.f32.mrb[14].mxu1  ;;  %2459 = vmatprep.mubr.bf16.mxu0 %v1845_v37 }
 0x137   : > { %v1317_v58 = vadd.f32 %v1316_v42, %v7314_v30  ;;  %v1318_v43 = vpop.f32.mrb[15].mxu1  ;;  %2460 = vmatmul.mubr.bf16.gmra.mrb[8].mxu0 %v1844_v35  ;;  %v1748_v47 = vmax.f32 %v1313_v36, 0.0 }
 0x138   : > { %v1319_v44 = vadd.f32 %v1318_v43, %v7318_v17  ;;  %5976 = vmatpush3.bf16.msra.mxu0 %v6297_v40  ;;  %v1749_v49 = vmax.f32 %v1315_v41, 0.0  ;;  %v498_v43 = vsub.s32 2, %v7285_v20 }
 0x139   : > { %v1756_v46 = vmax.f32 %v1317_v58, 0.0  ;;  %1680 = vmatmul.mubr.bf16.gmra.mrb[120].mxu1 %v6959_v2  ;;  %5977 = vmatprep.subr.bf16.mxu0 %v6298_v38 }
 0x13a   : > { %v1757_v50 = vmax.f32 %v1319_v44, 0.0  ;;  %1689 = vmatprep.mubr.bf16.mxu1 %v6962_v4 }
 0x13b   : > { %v1852_v51 = vpack.c.bf16 %v1756_v46, %v1748_v47  ;;  %v502_v47 = vsub.s32 3, %v7285_v20 }
 0x13c   : > { %v1853_v52 = vpack.c.bf16 %v1757_v50, %v1749_v49  ;;  %v1322_v53 = vpop.f32.mrb[16].mxu1  ;;  %5978 = vmatpush3.bf16.msra.mxu0 %v6299_v45 }
 0x13d   : > { %v1323_v55 = vadd.f32 %v1322_v53, %v7314_v30  ;;  %v1324_v2 = vpop.f32.mrb[17].mxu1  ;;  %5979 = vmatprep.subr.bf16.mxu0 %v6300_v48 }
 0x13e   : > { %v1325_v59 = vadd.f32 %v1324_v2, %v7318_v17  ;;  %v1326_v60 = vpop.f32.mrb[18].mxu1  ;;  %2467 = vmatprep.mubr.bf16.mxu0 %v1853_v52  ;;  %v7430_v52 = vrot.slane %v7300_v25, %v498_v43 }
 0x13f   : > { %v1327_v4 = vadd.f32 %v1326_v60, %v7314_v30  ;;  %v1328_v61 = vpop.f32.mrb[19].mxu1  ;;  %2468 = vmatmul.mubr.bf16.gmra.mrb[12].mxu0 %v1852_v51  ;;  %v1764_v1 = vmax.f32 %v1323_v55, 0.0  ;;  %v7435_v55 = vrot.slane %v7300_v25, %v502_v47 }
 0x140   : > { %v1329_v63 = vadd.f32 %v1328_v61, %v7318_v17  ;;  %5980 = vmatpush3.bf16.msra.mxu0 %v6301_v54  ;;  %v1765_v6 = vmax.f32 %v1325_v59, 0.0 }
 0x141   : > { %v1772_v3 = vmax.f32 %v1327_v4, 0.0  ;;  %1690 = vmatmul.mubr.bf16.gmra.mrb[124].mxu1 %v6979_v14  ;;  %5981 = vmatprep.subr.bf16.mxu0 %v6302_v57 }
 0x142   : > { %v1773_v8 = vmax.f32 %v1329_v63, 0.0 }
 0x143   : > { %v1860_v9 = vpack.c.bf16 %v1772_v3, %v1764_v1 }
 0x144   : > { %v1861_v62 = vpack.c.bf16 %v1773_v8, %v1765_v6  ;;  %v1332_v10 = vpop.f32.mrb[20].mxu1  ;;  %5982 = vmatpush3.bf16.msra.mxu0 %v6303_v0 }
 0x145   : > { %v1333_v11 = vadd.f32 %v1332_v10, %v7314_v30  ;;  %v1334_v12 = vpop.f32.mrb[21].mxu1 }
 0x146   : > { %v1335_v13 = vadd.f32 %v1334_v12, %v7318_v17  ;;  %v1336_v16 = vpop.f32.mrb[22].mxu1  ;;  %2475 = vmatprep.mubr.bf16.mxu0 %v1861_v62 }
 0x147   : > { %v1337_v19 = vadd.f32 %v1336_v16, %v7314_v30  ;;  %v1338_v5 = vpop.f32.mrb[23].mxu1  ;;  %2476 = vmatmul.mubr.bf16.gmra.mrb[16].mxu0 %v1860_v9  ;;  %v1780_v7 = vmax.f32 %v1333_v11, 0.0  ;;  %v6305_v11 = vld [vmem:[%s8845_s3 + $0x180] sm:$0xff]   ;;  %v6306_v16 = vld [vmem:[%s8845_s3 + $0x1c8] sm:$0xff]  }
 0x148   : > { %v1339_v14 = vadd.f32 %v1338_v5, %v7318_v17  ;;  %v1781_v22 = vmax.f32 %v1335_v13, 0.0 }
 0x149   : > { %v1788_v21 = vmax.f32 %v1337_v19, 0.0 }
 0x14a   : > { %v1789_v23 = vmax.f32 %v1339_v14, 0.0 }
 0x14b   : > { %v1868_v18 = vpack.c.bf16 %v1788_v21, %v1780_v7 }
 0x14c   : > { %v1869_v27 = vpack.c.bf16 %v1789_v23, %v1781_v22  ;;  %v1342_v29 = vpop.f32.mrb[24].mxu1  ;;  %v6307_v22 = vld [vmem:[%s8845_s3 + $0x188] sm:$0xff]  }
 0x14d   : > { %v1343_v31 = vadd.f32 %v1342_v29, %v7314_v30  ;;  %v1344_v32 = vpop.f32.mrb[25].mxu1 }
 0x14e   : > { %v1345_v26 = vadd.f32 %v1344_v32, %v7318_v17  ;;  %v1346_v28 = vpop.f32.mrb[26].mxu1  ;;  %2483 = vmatprep.mubr.bf16.mxu0 %v1869_v27  ;;  %v6308_v27 = vld [vmem:[%s8845_s3 + $0x1d0] sm:$0xff]  }
 0x14f   : > { %v1347_v33 = vadd.f32 %v1346_v28, %v7314_v30  ;;  %v1348_v34 = vpop.f32.mrb[27].mxu1  ;;  %2484 = vmatmul.mubr.bf16.gmra.mrb[20].mxu0 %v1868_v18  ;;  %v1796_v37 = vmax.f32 %v1343_v31, 0.0 }
 0x150   : > { %v1349_v35 = vadd.f32 %v1348_v34, %v7318_v17  ;;  %v1797_v40 = vmax.f32 %v1345_v26, 0.0 }
 0x151   : > { %v1804_v39 = vmax.f32 %v1347_v33, 0.0  ;;  %v6309_v33 = vld [vmem:[%s8845_s3 + $0x190] sm:$0xff]  }
 0x152   : > { %v1805_v36 = vmax.f32 %v1349_v35, 0.0 }
 0x153   : > { %v1876_v56 = vpack.c.bf16 %v1804_v39, %v1796_v37  ;;  %v6310_v37 = vld [vmem:[%s8845_s3 + $0x1d8] sm:$0xff]  }
 0x154   : > { %v1877_v38 = vpack.c.bf16 %v1805_v36, %v1797_v40  ;;  %v1352_v41 = vpop.f32.mrb[28].mxu1 }
 0x155   : > { %v1353_v42 = vadd.f32 %v1352_v41, %v7314_v30  ;;  %v1354_v58 = vpop.f32.mrb[29].mxu1  ;;  %v6311_v41 = vld [vmem:[%s8845_s3 + $0x198] sm:$0xff]  }
 0x156   : > { %v1355_v44 = vadd.f32 %v1354_v58, %v7318_v17  ;;  %v1356_v45 = vpop.f32.mrb[30].mxu1  ;;  %2491 = vmatprep.mubr.bf16.mxu0 %v1877_v38 }
 0x157   : > { %v1357_v46 = vadd.f32 %v1356_v45, %v7314_v30  ;;  %v1358_v48 = vpop.f32.mrb[31].mxu1  ;;  %2492 = vmatmul.mubr.bf16.gmra.mrb[24].mxu0 %v1876_v56  ;;  %v1812_v50 = vmax.f32 %v1353_v42, 0.0 }
 0x158   : > { %v1359_v49 = vadd.f32 %v1358_v48, %v7318_v17  ;;  %v1813_v53 = vmax.f32 %v1355_v44, 0.0  ;;  %v6312_v44 = vld [vmem:[%s8845_s3 + $0x1e0] sm:$0xff]  }
 0x159   : > { %v1820_v51 = vmax.f32 %v1357_v46, 0.0 }
 0x15a   : > { %v1821_v54 = vmax.f32 %v1359_v49, 0.0 }
 0x15b   : > { %v1884_v2 = vpack.c.bf16 %v1820_v51, %v1812_v50  ;;  %v6313_v51 = vld [vmem:[%s8845_s3 + $0x1a0] sm:$0xff]  }
 0x15c   : > { %v1885_v30 = vpack.c.bf16 %v1821_v54, %v1813_v53  ;;  %v1395_v57 = vpop.f32.mrb[32].mxu1 }
 0x15d   : > { %v1396_v59 = vadd.f32 %v1395_v57, %v7430_v52  ;;  %v1397_v17 = vpop.f32.mrb[33].mxu1 }
 0x15e   : > { %v1398_v60 = vadd.f32 %v1397_v17, %v7435_v55  ;;  %v1399_v4 = vpop.f32.mrb[34].mxu1  ;;  %2499 = vmatprep.mubr.bf16.mxu0 %v1885_v30 }
 0x15f   : > { %v1400_v61 = vadd.f32 %v1399_v4, %v7430_v52  ;;  %v1401_v63 = vpop.f32.mrb[35].mxu1  ;;  %2500 = vmatmul.mubr.bf16.gmra.mrb[28].mxu0 %v1884_v2  ;;  %v1702_v1 = vmax.f32 %v1396_v59, 0.0  ;;  %v6314_v2 = vld [vmem:[%s8845_s3 + $0x1e8] sm:$0xff]  }
 0x160   : > { %v1402_v0 = vadd.f32 %v1401_v63, %v7435_v55  ;;  %v1703_v6 = vmax.f32 %v1398_v60, 0.0  ;;  %v6315_v4 = vld [vmem:[%s8845_s3 + $0x1a8] sm:$0xff]  }
 0x161   : > { %v1710_v3 = vmax.f32 %v1400_v61, 0.0 }
 0x162   : > { %v1711_v8 = vmax.f32 %v1402_v0, 0.0  ;;  %v6316_v0 = vld [vmem:[%s8845_s3 + $0x1f0] sm:$0xff]  }
 0x163   : > { %v1830_v9 = vpack.c.bf16 %v1710_v3, %v1702_v1 }
 0x164   : > { %v1831_v62 = vpack.c.bf16 %v1711_v8, %v1703_v6  ;;  %v1405_v10 = vpop.f32.mrb[36].mxu1 }
 0x165   : > { %v1406_v12 = vadd.f32 %v1405_v10, %v7430_v52  ;;  %v1407_v13 = vpop.f32.mrb[37].mxu1 }
 0x166   : > { %v1408_v19 = vadd.f32 %v1407_v13, %v7435_v55  ;;  %v1409_v5 = vpop.f32.mrb[38].mxu1  ;;  %2540 = vmatprep.mubr.bf16.mxu1 %v1831_v62  ;;  %v6317_v62 = vld [vmem:[%s8845_s3 + $0x1b0] sm:$0xff]  }
 0x167   : > { %v1410_v14 = vadd.f32 %v1409_v5, %v7430_v52  ;;  %v1411_v7 = vpop.f32.mrb[39].mxu1  ;;  %2541 = vmatmul.mubr.bf16.vlgmr.msra.gmra.mrb[128].mxu1 %v1830_v9  ;;  %v1718_v23 = vmax.f32 %v1406_v12, 0.0  ;;  %v6318_v12 = vld [vmem:[%s8845_s3 + $0x1f8] sm:$0xff]  }
 0x168   : > { %v1412_v21 = vadd.f32 %v1411_v7, %v7435_v55  ;;  %6032 = vmatpush3.bf16.msra.mxu1 %v6305_v11  ;;  %v1719_v29 = vmax.f32 %v1408_v19, 0.0  ;;  %v6319_v7 = vld [vmem:[%s8845_s3 + $0x1b8] sm:$0xff]  }
 0x169   : > { %v1726_v18 = vmax.f32 %v1410_v14, 0.0  ;;  %6033 = vmatprep.subr.bf16.mxu1 %v6306_v16 }
 0x16a   : > { %v1727_v31 = vmax.f32 %v1412_v21, 0.0 }
 0x16b   : > { %v1838_v32 = vpack.c.bf16 %v1726_v18, %v1718_v23 }
 0x16c   : > { %v1839_v26 = vpack.c.bf16 %v1727_v31, %v1719_v29  ;;  %v1415_v28 = vpop.f32.mrb[40].mxu1  ;;  %6034 = vmatpush3.bf16.msra.mxu1 %v6307_v22 }
 0x16d   : > { %v1416_v34 = vadd.f32 %v1415_v28, %v7430_v52  ;;  %v1417_v35 = vpop.f32.mrb[41].mxu1  ;;  %6035 = vmatprep.subr.bf16.mxu1 %v6308_v27 }
 0x16e   : > { %v1418_v39 = vadd.f32 %v1417_v35, %v7435_v55  ;;  %v1419_v40 = vpop.f32.mrb[42].mxu1  ;;  %2548 = vmatprep.mubr.bf16.mxu1 %v1839_v26 }
 0x16f   : > { %v1420_v36 = vadd.f32 %v1419_v40, %v7430_v52  ;;  %v1421_v56 = vpop.f32.mrb[43].mxu1  ;;  %2549 = vmatmul.mubr.bf16.gmra.mrb[132].mxu1 %v1838_v32  ;;  %v1734_v42 = vmax.f32 %v1416_v34, 0.0 }
 0x170   : > { %v1422_v38 = vadd.f32 %v1421_v56, %v7435_v55  ;;  %6036 = vmatpush3.bf16.msra.mxu1 %v6309_v33  ;;  %v1735_v45 = vmax.f32 %v1418_v39, 0.0 }
 0x171   : > { %v1742_v58 = vmax.f32 %v1420_v36, 0.0  ;;  %6037 = vmatprep.subr.bf16.mxu1 %v6310_v37 }
 0x172   : > { %v1743_v46 = vmax.f32 %v1422_v38, 0.0 }
 0x173   : > { %v1846_v48 = vpack.c.bf16 %v1742_v58, %v1734_v42 }
 0x174   : > { %v1847_v49 = vpack.c.bf16 %v1743_v46, %v1735_v45  ;;  %v1425_v50 = vpop.f32.mrb[44].mxu1  ;;  %6038 = vmatpush3.bf16.msra.mxu1 %v6311_v41 }
 0x175   : > { %v1426_v53 = vadd.f32 %v1425_v50, %v7430_v52  ;;  %v1427_v54 = vpop.f32.mrb[45].mxu1  ;;  %6039 = vmatprep.subr.bf16.mxu1 %v6312_v44 }
 0x176   : > { %v1428_v30 = vadd.f32 %v1427_v54, %v7435_v55  ;;  %v1429_v57 = vpop.f32.mrb[46].mxu1  ;;  %2556 = vmatprep.mubr.bf16.mxu1 %v1847_v49 }
 0x177   : > { %v1430_v59 = vadd.f32 %v1429_v57, %v7430_v52  ;;  %v1431_v17 = vpop.f32.mrb[47].mxu1  ;;  %2557 = vmatmul.mubr.bf16.gmra.mrb[136].mxu1 %v1846_v48  ;;  %v1750_v61 = vmax.f32 %v1426_v53, 0.0 }
 0x178   : > { %v1432_v60 = vadd.f32 %v1431_v17, %v7435_v55  ;;  %6040 = vmatpush3.bf16.msra.mxu1 %v6313_v51  ;;  %v1751_v1 = vmax.f32 %v1428_v30, 0.0 }
 0x179   : > { %v1758_v63 = vmax.f32 %v1430_v59, 0.0  ;;  %6041 = vmatprep.subr.bf16.mxu1 %v6314_v2 }
 0x17a   : > { %v1759_v3 = vmax.f32 %v1432_v60, 0.0 }
 0x17b   : > { %v1854_v6 = vpack.c.bf16 %v1758_v63, %v1750_v61 }
 0x17c   : > { %v1855_v8 = vpack.c.bf16 %v1759_v3, %v1751_v1  ;;  %v1435_v9 = vpop.f32.mrb[48].mxu1  ;;  %6042 = vmatpush3.bf16.msra.mxu1 %v6315_v4  ;;  %v506_v4 = vsub.s32 4, %v7285_v20 }
 0x17d   : > { %v1436_v10 = vadd.f32 %v1435_v9, %v7430_v52  ;;  %v1437_v11 = vpop.f32.mrb[49].mxu1  ;;  %6043 = vmatprep.subr.bf16.mxu1 %v6316_v0  ;;  %v510_v0 = vsub.s32 5, %v7285_v20 }
 0x17e   : > { %v1438_v13 = vadd.f32 %v1437_v11, %v7435_v55  ;;  %v1439_v16 = vpop.f32.mrb[50].mxu1  ;;  %2564 = vmatprep.mubr.bf16.mxu1 %v1855_v8 }
 0x17f   : > { %v1440_v19 = vadd.f32 %v1439_v16, %v7430_v52  ;;  %v1441_v5 = vpop.f32.mrb[51].mxu1  ;;  %2565 = vmatmul.mubr.bf16.gmra.mrb[140].mxu1 %v1854_v6  ;;  %v1766_v21 = vmax.f32 %v1436_v10, 0.0 }
 0x180   : > { %v1442_v14 = vadd.f32 %v1441_v5, %v7435_v55  ;;  %6044 = vmatpush3.bf16.msra.mxu1 %v6317_v62  ;;  %v1767_v23 = vmax.f32 %v1438_v13, 0.0  ;;  %v7519_v62 = vrot.slane %v7300_v25, %v506_v4 }
 0x181   : > { %v1774_v22 = vmax.f32 %v1440_v19, 0.0  ;;  %6045 = vmatprep.subr.bf16.mxu1 %v6318_v12  ;;  %v7524_v12 = vrot.slane %v7300_v25, %v510_v0 }
 0x182   : > { %v1775_v18 = vmax.f32 %v1442_v14, 0.0 }
 0x183   : > { %v1862_v27 = vpack.c.bf16 %v1774_v22, %v1766_v21 }
 0x184   : > { %v1863_v29 = vpack.c.bf16 %v1775_v18, %v1767_v23  ;;  %v1445_v31 = vpop.f32.mrb[52].mxu1  ;;  %6046 = vmatpush3.bf16.msra.mxu1 %v6319_v7 }
 0x185   : > { %v1446_v32 = vadd.f32 %v1445_v31, %v7430_v52  ;;  %v1447_v26 = vpop.f32.mrb[53].mxu1 }
 0x186   : > { %v1448_v28 = vadd.f32 %v1447_v26, %v7435_v55  ;;  %v1449_v33 = vpop.f32.mrb[54].mxu1  ;;  %2572 = vmatprep.mubr.bf16.mxu1 %v1863_v29 }
 0x187   : > { %v1450_v34 = vadd.f32 %v1449_v33, %v7430_v52  ;;  %v1451_v35 = vpop.f32.mrb[55].mxu1  ;;  %2573 = vmatmul.mubr.bf16.gmra.mrb[144].mxu1 %v1862_v27  ;;  %v1782_v39 = vmax.f32 %v1446_v32, 0.0 }
 0x188   : > { %v1452_v37 = vadd.f32 %v1451_v35, %v7435_v55  ;;  %v1783_v36 = vmax.f32 %v1448_v28, 0.0 }
 0x189   : > { %v1790_v40 = vmax.f32 %v1450_v34, 0.0 }
 0x18a   : > { %v1791_v56 = vmax.f32 %v1452_v37, 0.0 }
 0x18b   : > { %v1870_v38 = vpack.c.bf16 %v1790_v40, %v1782_v39 }
 0x18c   : > { %v1871_v41 = vpack.c.bf16 %v1791_v56, %v1783_v36  ;;  %v1455_v42 = vpop.f32.mrb[56].mxu1 }
 0x18d   : > { %v1456_v58 = vadd.f32 %v1455_v42, %v7430_v52  ;;  %v1457_v44 = vpop.f32.mrb[57].mxu1 }
 0x18e   : > { %v1458_v45 = vadd.f32 %v1457_v44, %v7435_v55  ;;  %v1459_v46 = vpop.f32.mrb[58].mxu1  ;;  %2580 = vmatprep.mubr.bf16.mxu1 %v1871_v41 }
 0x18f   : > { %v1460_v48 = vadd.f32 %v1459_v46, %v7430_v52  ;;  %v1461_v49 = vpop.f32.mrb[59].mxu1  ;;  %2581 = vmatmul.mubr.bf16.gmra.mrb[148].mxu1 %v1870_v38  ;;  %v1798_v51 = vmax.f32 %v1456_v58, 0.0 }
 0x190   : > { %v1462_v50 = vadd.f32 %v1461_v49, %v7435_v55  ;;  %v1799_v54 = vmax.f32 %v1458_v45, 0.0 }
 0x191   : > { %v1806_v53 = vmax.f32 %v1460_v48, 0.0 }
 0x192   : > { %v1807_v2 = vmax.f32 %v1462_v50, 0.0 }
 0x193   : > { %v1878_v30 = vpack.c.bf16 %v1806_v53, %v1798_v51 }
 0x194   : > { %v1879_v57 = vpack.c.bf16 %v1807_v2, %v1799_v54  ;;  %v1465_v59 = vpop.f32.mrb[60].mxu1 }
 0x195   : > { %v1466_v17 = vadd.f32 %v1465_v59, %v7430_v52  ;;  %v1467_v60 = vpop.f32.mrb[61].mxu1 }
 0x196   : > { %v1468_v61 = vadd.f32 %v1467_v60, %v7435_v55  ;;  %v1469_v63 = vpop.f32.mrb[62].mxu1  ;;  %2588 = vmatprep.mubr.bf16.mxu1 %v1879_v57 }
 0x197   : > { %v1470_v1 = vadd.f32 %v1469_v63, %v7430_v52  ;;  %v1471_v3 = vpop.f32.mrb[63].mxu1  ;;  %2589 = vmatmul.mubr.bf16.gmra.mrb[152].mxu1 %v1878_v30  ;;  %v1814_v8 = vmax.f32 %v1466_v17, 0.0 }
 0x198   : > { %v1472_v6 = vadd.f32 %v1471_v3, %v7435_v55  ;;  %v1815_v10 = vmax.f32 %v1468_v61, 0.0 }
 0x199   : > { %v1822_v9 = vmax.f32 %v1470_v1, 0.0 }
 0x19a   : > { %v1823_v11 = vmax.f32 %v1472_v6, 0.0 }
 0x19b   : > { %v1886_v13 = vpack.c.bf16 %v1822_v9, %v1814_v8 }
 0x19c   : > { %v1887_v52 = vpack.c.bf16 %v1823_v11, %v1815_v10  ;;  %v1508_v16 = vpop.f32.mrb[64].mxu1 }
 0x19d   : > { %v1509_v19 = vadd.f32 %v1508_v16, %v7519_v62  ;;  %v1510_v55 = vpop.f32.mrb[65].mxu1 }
 0x19e   : > { %v1511_v5 = vadd.f32 %v1510_v55, %v7524_v12  ;;  %v1512_v14 = vpop.f32.mrb[66].mxu1  ;;  %2596 = vmatprep.mubr.bf16.mxu1 %v1887_v52 }
 0x19f   : > { %v1513_v7 = vadd.f32 %v1512_v14, %v7519_v62  ;;  %v1514_v21 = vpop.f32.mrb[67].mxu1  ;;  %2597 = vmatmul.mubr.bf16.gmra.mrb[156].mxu1 %v1886_v13  ;;  %v1704_v23 = vmax.f32 %v1509_v19, 0.0 }
 0x1a0   : > { %v1515_v22 = vadd.f32 %v1514_v21, %v7524_v12  ;;  %v1705_v27 = vmax.f32 %v1511_v5, 0.0 }
 0x1a1   : > { %v1712_v18 = vmax.f32 %v1513_v7, 0.0 }
 0x1a2   : > { %v1713_v29 = vmax.f32 %v1515_v22, 0.0 }
 0x1a3   : > { %v1832_v31 = vpack.c.bf16 %v1712_v18, %v1704_v23 }
 0x1a4   : > { %v1833_v32 = vpack.c.bf16 %v1713_v29, %v1705_v27  ;;  %v1518_v26 = vpop.f32.mrb[68].mxu1 }
 0x1a5   : > { %v1519_v28 = vadd.f32 %v1518_v26, %v7519_v62  ;;  %v1520_v33 = vpop.f32.mrb[69].mxu1 }
 0x1a6   : > { %v1521_v34 = vadd.f32 %v1520_v33, %v7524_v12  ;;  %v1522_v35 = vpop.f32.mrb[70].mxu1  ;;  %2637 = vmatprep.mubr.bf16.mxu0 %v1833_v32 }
 0x1a7   : > { %v1523_v37 = vadd.f32 %v1522_v35, %v7519_v62  ;;  %v1524_v39 = vpop.f32.mrb[71].mxu1  ;;  %2638 = vmatmul.mubr.bf16.vlgmr.msra.gmra.mrb[32].mxu0 %v1832_v31  ;;  %v1720_v36 = vmax.f32 %v1519_v28, 0.0 }
 0x1a8   : > { %v1525_v40 = vadd.f32 %v1524_v39, %v7524_v12  ;;  %v1721_v38 = vmax.f32 %v1521_v34, 0.0 }
 0x1a9   : > { %v1728_v56 = vmax.f32 %v1523_v37, 0.0 }
 0x1aa   : > { %v1729_v41 = vmax.f32 %v1525_v40, 0.0 }
 0x1ab   : > { %v1840_v42 = vpack.c.bf16 %v1728_v56, %v1720_v36 }
 0x1ac   : > { %v1841_v58 = vpack.c.bf16 %v1729_v41, %v1721_v38  ;;  %v1528_v44 = vpop.f32.mrb[72].mxu1 }
 0x1ad   : > { %v1529_v45 = vadd.f32 %v1528_v44, %v7519_v62  ;;  %v1530_v46 = vpop.f32.mrb[73].mxu1 }
 0x1ae   : > { %v1531_v48 = vadd.f32 %v1530_v46, %v7524_v12  ;;  %v1532_v49 = vpop.f32.mrb[74].mxu1  ;;  %2645 = vmatprep.mubr.bf16.mxu0 %v1841_v58 }
 0x1af   : > { %v1533_v50 = vadd.f32 %v1532_v49, %v7519_v62  ;;  %v1534_v51 = vpop.f32.mrb[75].mxu1  ;;  %2646 = vmatmul.mubr.bf16.gmra.mrb[36].mxu0 %v1840_v42  ;;  %v1736_v54 = vmax.f32 %v1529_v45, 0.0 }
 0x1b0   : > { %v1535_v53 = vadd.f32 %v1534_v51, %v7524_v12  ;;  %v1737_v30 = vmax.f32 %v1531_v48, 0.0 }
 0x1b1   : > { %v1744_v2 = vmax.f32 %v1533_v50, 0.0 }
 0x1b2   : > { %v1745_v57 = vmax.f32 %v1535_v53, 0.0 }
 0x1b3   : > { %v1848_v59 = vpack.c.bf16 %v1744_v2, %v1736_v54 }
 0x1b4   : > { %v1849_v17 = vpack.c.bf16 %v1745_v57, %v1737_v30  ;;  %v1538_v60 = vpop.f32.mrb[76].mxu1 }
 0x1b5   : > { %v1539_v61 = vadd.f32 %v1538_v60, %v7519_v62  ;;  %v1540_v63 = vpop.f32.mrb[77].mxu1 }
 0x1b6   : > { %v1541_v1 = vadd.f32 %v1540_v63, %v7524_v12  ;;  %v1542_v3 = vpop.f32.mrb[78].mxu1  ;;  %2653 = vmatprep.mubr.bf16.mxu0 %v1849_v17 }
 0x1b7   : > { %v1543_v6 = vadd.f32 %v1542_v3, %v7519_v62  ;;  %v1544_v8 = vpop.f32.mrb[79].mxu1  ;;  %2654 = vmatmul.mubr.bf16.gmra.mrb[40].mxu0 %v1848_v59  ;;  %v1752_v10 = vmax.f32 %v1539_v61, 0.0 }
 0x1b8   : > { %v1545_v9 = vadd.f32 %v1544_v8, %v7524_v12  ;;  %v1753_v13 = vmax.f32 %v1541_v1, 0.0 }
 0x1b9   : > { %v1760_v11 = vmax.f32 %v1543_v6, 0.0  ;;  %v514_v6 = vsub.s32 6, %v7285_v20 }
 0x1ba   : > { %v1761_v52 = vmax.f32 %v1545_v9, 0.0 }
 0x1bb   : > { %v1856_v16 = vpack.c.bf16 %v1760_v11, %v1752_v10  ;;  %v518_v10 = vsub.s32 7, %v7285_v20 }
 0x1bc   : > { %v1857_v19 = vpack.c.bf16 %v1761_v52, %v1753_v13  ;;  %v1548_v55 = vpop.f32.mrb[80].mxu1 }
 0x1bd   : > { %v1549_v5 = vadd.f32 %v1548_v55, %v7519_v62  ;;  %v1550_v14 = vpop.f32.mrb[81].mxu1  ;;  %v7563_v55 = vrot.slane %v7300_v25, %v514_v6 }
 0x1be   : > { %v1551_v7 = vadd.f32 %v1550_v14, %v7524_v12  ;;  %v1552_v21 = vpop.f32.mrb[82].mxu1  ;;  %2661 = vmatprep.mubr.bf16.mxu0 %v1857_v19 }
 0x1bf   : > { %v1553_v22 = vadd.f32 %v1552_v21, %v7519_v62  ;;  %v1554_v23 = vpop.f32.mrb[83].mxu1  ;;  %2662 = vmatmul.mubr.bf16.gmra.mrb[44].mxu0 %v1856_v16  ;;  %v1768_v27 = vmax.f32 %v1549_v5, 0.0 }
 0x1c0   : > { %v1555_v18 = vadd.f32 %v1554_v23, %v7524_v12  ;;  %v1769_v31 = vmax.f32 %v1551_v7, 0.0  ;;  %v7568_v7 = vrot.slane %v7300_v25, %v518_v10 }
 0x1c1   : > { %v1776_v29 = vmax.f32 %v1553_v22, 0.0 }
 0x1c2   : > { %v1777_v32 = vmax.f32 %v1555_v18, 0.0 }
 0x1c3   : > { %v1864_v26 = vpack.c.bf16 %v1776_v29, %v1768_v27 }
 0x1c4   : > { %v1865_v28 = vpack.c.bf16 %v1777_v32, %v1769_v31  ;;  %v1558_v33 = vpop.f32.mrb[84].mxu1 }
 0x1c5   : > { %v1559_v34 = vadd.f32 %v1558_v33, %v7519_v62  ;;  %v1560_v35 = vpop.f32.mrb[85].mxu1 }
 0x1c6   : > { %v1561_v37 = vadd.f32 %v1560_v35, %v7524_v12  ;;  %v1562_v39 = vpop.f32.mrb[86].mxu1  ;;  %2669 = vmatprep.mubr.bf16.mxu0 %v1865_v28 }
 0x1c7   : > { %v1563_v40 = vadd.f32 %v1562_v39, %v7519_v62  ;;  %v1564_v36 = vpop.f32.mrb[87].mxu1  ;;  %2670 = vmatmul.mubr.bf16.gmra.mrb[48].mxu0 %v1864_v26  ;;  %v1784_v38 = vmax.f32 %v1559_v34, 0.0 }
 0x1c8   : > { %v1565_v56 = vadd.f32 %v1564_v36, %v7524_v12  ;;  %v1785_v42 = vmax.f32 %v1561_v37, 0.0 }
 0x1c9   : > { %v1792_v41 = vmax.f32 %v1563_v40, 0.0 }
 0x1ca   : > { %v1793_v58 = vmax.f32 %v1565_v56, 0.0 }
 0x1cb   : > { %v1872_v44 = vpack.c.bf16 %v1792_v41, %v1784_v38 }
 0x1cc   : > { %v1873_v45 = vpack.c.bf16 %v1793_v58, %v1785_v42  ;;  %v1568_v46 = vpop.f32.mrb[88].mxu1 }
 0x1cd   : > { %v1569_v48 = vadd.f32 %v1568_v46, %v7519_v62  ;;  %v1570_v49 = vpop.f32.mrb[89].mxu1 }
 0x1ce   : > { %v1571_v50 = vadd.f32 %v1570_v49, %v7524_v12  ;;  %v1572_v51 = vpop.f32.mrb[90].mxu1  ;;  %2677 = vmatprep.mubr.bf16.mxu0 %v1873_v45 }
 0x1cf   : > { %v1573_v53 = vadd.f32 %v1572_v51, %v7519_v62  ;;  %v1574_v54 = vpop.f32.mrb[91].mxu1  ;;  %2678 = vmatmul.mubr.bf16.gmra.mrb[52].mxu0 %v1872_v44  ;;  %v1800_v30 = vmax.f32 %v1569_v48, 0.0 }
 0x1d0   : > { %v1575_v2 = vadd.f32 %v1574_v54, %v7524_v12  ;;  %v1801_v59 = vmax.f32 %v1571_v50, 0.0 }
 0x1d1   : > { %v1808_v57 = vmax.f32 %v1573_v53, 0.0 }
 0x1d2   : > { %v1809_v17 = vmax.f32 %v1575_v2, 0.0 }
 0x1d3   : > { %v1880_v60 = vpack.c.bf16 %v1808_v57, %v1800_v30 }
 0x1d4   : > { %v1881_v61 = vpack.c.bf16 %v1809_v17, %v1801_v59  ;;  %v1578_v63 = vpop.f32.mrb[92].mxu1 }
 0x1d5   : > { %v1579_v1 = vadd.f32 %v1578_v63, %v7519_v62  ;;  %v1580_v3 = vpop.f32.mrb[93].mxu1 }
 0x1d6   : > { %v1581_v8 = vadd.f32 %v1580_v3, %v7524_v12  ;;  %v1582_v9 = vpop.f32.mrb[94].mxu1  ;;  %2685 = vmatprep.mubr.bf16.mxu0 %v1881_v61 }
 0x1d7   : > { %v1583_v11 = vadd.f32 %v1582_v9, %v7519_v62  ;;  %v1584_v13 = vpop.f32.mrb[95].mxu1  ;;  %2686 = vmatmul.mubr.bf16.gmra.mrb[56].mxu0 %v1880_v60  ;;  %v1816_v16 = vmax.f32 %v1579_v1, 0.0 }
 0x1d8   : > { %v1585_v52 = vadd.f32 %v1584_v13, %v7524_v12  ;;  %v1817_v5 = vmax.f32 %v1581_v8, 0.0 }
 0x1d9   : > { %v1824_v19 = vmax.f32 %v1583_v11, 0.0 }
 0x1da   : > { %v1825_v14 = vmax.f32 %v1585_v52, 0.0 }
 0x1db   : > { %v1888_v21 = vpack.c.bf16 %v1824_v19, %v1816_v16 }
 0x1dc   : > { %v1889_v62 = vpack.c.bf16 %v1825_v14, %v1817_v5  ;;  %v1621_v22 = vpop.f32.mrb[96].mxu1 }
 0x1dd   : > { %v1622_v23 = vadd.f32 %v1621_v22, %v7563_v55  ;;  %v1623_v12 = vpop.f32.mrb[97].mxu1 }
 0x1de   : > { %v1624_v18 = vadd.f32 %v1623_v12, %v7568_v7  ;;  %v1625_v27 = vpop.f32.mrb[98].mxu1  ;;  %2693 = vmatprep.mubr.bf16.mxu0 %v1889_v62 }
 0x1df   : > { %v1626_v29 = vadd.f32 %v1625_v27, %v7563_v55  ;;  %v1627_v31 = vpop.f32.mrb[99].mxu1  ;;  %2694 = vmatmul.mubr.bf16.gmra.mrb[60].mxu0 %v1888_v21  ;;  %v1706_v26 = vmax.f32 %v1622_v23, 0.0 }
 0x1e0   : > { %v1628_v32 = vadd.f32 %v1627_v31, %v7568_v7  ;;  %v1707_v25 = vmax.f32 %v1624_v18, 0.0 }
 0x1e1   : > { %v1714_v28 = vmax.f32 %v1626_v29, 0.0 }
 0x1e2   : > { %v1715_v33 = vmax.f32 %v1628_v32, 0.0 }
 0x1e3   : > { %v1834_v34 = vpack.c.bf16 %v1714_v28, %v1706_v26 }
 0x1e4   : > { %v1835_v35 = vpack.c.bf16 %v1715_v33, %v1707_v25  ;;  %v1631_v37 = vpop.f32.mrb[100].mxu1 }
 0x1e5   : > { %v1632_v39 = vadd.f32 %v1631_v37, %v7563_v55  ;;  %v1633_v40 = vpop.f32.mrb[101].mxu1 }
 0x1e6   : > { %v1634_v36 = vadd.f32 %v1633_v40, %v7568_v7  ;;  %v1635_v56 = vpop.f32.mrb[102].mxu1  ;;  %2734 = vmatprep.mubr.bf16.mxu1 %v1835_v35 }
 0x1e7   : > { %v1636_v38 = vadd.f32 %v1635_v56, %v7563_v55  ;;  %v1637_v41 = vpop.f32.mrb[103].mxu1  ;;  %2735 = vmatmul.mubr.bf16.vlgmr.msra.gmra.mrb[160].mxu1 %v1834_v34  ;;  %v1722_v58 = vmax.f32 %v1632_v39, 0.0 }
 0x1e8   : > { %v1638_v42 = vadd.f32 %v1637_v41, %v7568_v7  ;;  %v1723_v45 = vmax.f32 %v1634_v36, 0.0 }
 0x1e9   : > { %v1730_v44 = vmax.f32 %v1636_v38, 0.0 }
 0x1ea   : > { %v1731_v46 = vmax.f32 %v1638_v42, 0.0 }
 0x1eb   : > { %v1842_v48 = vpack.c.bf16 %v1730_v44, %v1722_v58 }
 0x1ec   : > { %v1843_v49 = vpack.c.bf16 %v1731_v46, %v1723_v45  ;;  %v1641_v50 = vpop.f32.mrb[104].mxu1 }
 0x1ed   : > { %v1642_v51 = vadd.f32 %v1641_v50, %v7563_v55  ;;  %v1643_v53 = vpop.f32.mrb[105].mxu1 }
 0x1ee   : > { %v1644_v54 = vadd.f32 %v1643_v53, %v7568_v7  ;;  %v1645_v2 = vpop.f32.mrb[106].mxu1  ;;  %2742 = vmatprep.mubr.bf16.mxu1 %v1843_v49 }
 0x1ef   : > { %v1646_v30 = vadd.f32 %v1645_v2, %v7563_v55  ;;  %v1647_v57 = vpop.f32.mrb[107].mxu1  ;;  %2743 = vmatmul.mubr.bf16.gmra.mrb[164].mxu1 %v1842_v48  ;;  %v1738_v17 = vmax.f32 %v1642_v51, 0.0 }
 0x1f0   : > { %v1648_v59 = vadd.f32 %v1647_v57, %v7568_v7  ;;  %v1739_v61 = vmax.f32 %v1644_v54, 0.0  ;;  %v2807_v57 = vld [vmem:[%s8847_s5] sm:$0xff] }
 0x1f1   : > { %v1746_v60 = vmax.f32 %v1646_v30, 0.0 }
 0x1f2   : > { %v1747_v63 = vmax.f32 %v1648_v59, 0.0  ;;  %v2811_v59 = vld [vmem:[%s8847_s5 + $0x20] sm:$0xff] }
 0x1f3   : > { %v1850_v1 = vpack.c.bf16 %v1746_v60, %v1738_v17 }
 0x1f4   : > { %v1851_v3 = vpack.c.bf16 %v1747_v63, %v1739_v61  ;;  %v1651_v8 = vpop.f32.mrb[108].mxu1  ;;  %v5611_v61 = vcombine.low %v2807_v57, %v2811_v59  ;;  %v5612_v63 = vcombine.high %v2807_v57, %v2811_v59  ;;  %v2827_v57 = vld [vmem:[%s8847_s5 + $0xa0] sm:$0xff] }
 0x1f5   : > { %v1652_v9 = vadd.f32 %v1651_v8, %v7563_v55  ;;  %v1653_v11 = vpop.f32.mrb[109].mxu1 }
 0x1f6   : > { %v1654_v13 = vadd.f32 %v1653_v11, %v7568_v7  ;;  %v1655_v52 = vpop.f32.mrb[110].mxu1  ;;  %2750 = vmatprep.mubr.bf16.mxu1 %v1851_v3  ;;  %3233 = vmatprep.subr.bf16.mxu0 %v5612_v63 }
 0x1f7   : > { %v1656_v16 = vadd.f32 %v1655_v52, %v7563_v55  ;;  %v1657_v19 = vpop.f32.mrb[111].mxu1  ;;  %2751 = vmatmul.mubr.bf16.gmra.mrb[168].mxu1 %v1850_v1  ;;  %v1754_v14 = vmax.f32 %v1652_v9, 0.0  ;;  %3234 = vmatpush1.bf16.msra.mxu0 %v5611_v61 }
 0x1f8   : > { %v1658_v5 = vadd.f32 %v1657_v19, %v7568_v7  ;;  %v1755_v62 = vmax.f32 %v1654_v13, 0.0 }
 0x1f9   : > { %v1762_v21 = vmax.f32 %v1656_v16, 0.0 }
 0x1fa   : > { %v1763_v22 = vmax.f32 %v1658_v5, 0.0  ;;  %v5855_v23 = vpop.f32.mrb[0].mxu0 }
 0x1fb   : > { %v1858_v12 = vpack.c.bf16 %v1762_v21, %v1754_v14  ;;  %v5856_v18 = vpop.f32.mrb[1].mxu0 }
 0x1fc   : > { %v1859_v27 = vpack.c.bf16 %v1763_v22, %v1755_v62  ;;  %v7586_v29 = vadd.f32 %v5856_v18, %v5855_v23  ;;  %v1661_v31 = vpop.f32.mrb[112].mxu1  ;;  %v5858_v32 = vpop.f32.mrb[2].mxu0 }
 0x1fd   : > { %v1662_v26 = vadd.f32 %v1661_v31, %v7563_v55  ;;  %v1663_v28 = vpop.f32.mrb[113].mxu1  ;;  %v5859_v25 = vpop.f32.mrb[3].mxu0  ;;  %v2815_v31 = vld [vmem:[%s8847_s5 + $0x40] sm:$0xff] }
 0x1fe   : > { %v1664_v33 = vadd.f32 %v1663_v28, %v7568_v7  ;;  %v7590_v34 = vadd.f32 %v5859_v25, %v5858_v32  ;;  %v1665_v35 = vpop.f32.mrb[114].mxu1  ;;  %2758 = vmatprep.mubr.bf16.mxu1 %v1859_v27  ;;  %v2819_v32 = vld [vmem:[%s8847_s5 + $0x60] sm:$0xff] }
 0x1ff   : > { %v1666_v37 = vadd.f32 %v1665_v35, %v7563_v55  ;;  %v1667_v39 = vpop.f32.mrb[115].mxu1  ;;  %2759 = vmatmul.mubr.bf16.gmra.mrb[172].mxu1 %v1858_v12  ;;  %v1770_v36 = vmax.f32 %v1662_v26, 0.0  ;;  %v5619_v25 = vcombine.low %v2815_v31, %v2819_v32 }
 0x200   : > { %v1668_v40 = vadd.f32 %v1667_v39, %v7568_v7  ;;  %v1771_v38 = vmax.f32 %v1664_v33, 0.0  ;;  %v5620_v33 = vcombine.high %v2815_v31, %v2819_v32 }
 0x201   : > { %v1778_v56 = vmax.f32 %v1666_v37, 0.0 }
 0x202   : > { %v1779_v41 = vmax.f32 %v1668_v40, 0.0  ;;  %v5861_v42 = vpop.f32.mrb[4].mxu0  ;;  %3235 = vmatprep.subr.bf16.mxu0 %v5620_v33 }
 0x203   : > { %v1866_v58 = vpack.c.bf16 %v1778_v56, %v1770_v36  ;;  %v5862_v44 = vpop.f32.mrb[5].mxu0  ;;  %3236 = vmatpush1.bf16.msra.mxu0 %v5619_v25 }
 0x204   : > { %v1867_v45 = vpack.c.bf16 %v1779_v41, %v1771_v38  ;;  %v7594_v46 = vadd.f32 %v5862_v44, %v5861_v42  ;;  %v1671_v48 = vpop.f32.mrb[116].mxu1  ;;  %v5864_v49 = vpop.f32.mrb[6].mxu0 }
 0x205   : > { %v1672_v50 = vadd.f32 %v1671_v48, %v7563_v55  ;;  %v1673_v51 = vpop.f32.mrb[117].mxu1  ;;  %v5865_v53 = vpop.f32.mrb[7].mxu0 }
 0x206   : > { %v1674_v54 = vadd.f32 %v1673_v51, %v7568_v7  ;;  %v7598_v2 = vadd.f32 %v5865_v53, %v5864_v49  ;;  %v1675_v30 = vpop.f32.mrb[118].mxu1  ;;  %2766 = vmatprep.mubr.bf16.mxu1 %v1867_v45 }
 0x207   : > { %v1676_v17 = vadd.f32 %v1675_v30, %v7563_v55  ;;  %v1677_v60 = vpop.f32.mrb[119].mxu1  ;;  %2767 = vmatmul.mubr.bf16.gmra.mrb[176].mxu1 %v1866_v58  ;;  %v1786_v3 = vmax.f32 %v1672_v50, 0.0  ;;  %v2823_v30 = vld [vmem:[%s8847_s5 + $0x80] sm:$0xff] }
 0x208   : > { %v1678_v1 = vadd.f32 %v1677_v60, %v7568_v7  ;;  %v1787_v9 = vmax.f32 %v1674_v54, 0.0  ;;  %v5627_v60 = vcombine.low %v2823_v30, %v2827_v57  ;;  %v5628_v61 = vcombine.high %v2823_v30, %v2827_v57 }
 0x209   : > { %v1794_v8 = vmax.f32 %v1676_v17, 0.0 }
 0x20a   : > { %v1795_v11 = vmax.f32 %v1678_v1, 0.0  ;;  %v5867_v13 = vpop.f32.mrb[8].mxu0  ;;  %3237 = vmatprep.subr.bf16.mxu0 %v5628_v61 }
 0x20b   : > { %v1874_v52 = vpack.c.bf16 %v1794_v8, %v1786_v3  ;;  %v5868_v16 = vpop.f32.mrb[9].mxu0  ;;  %3238 = vmatpush1.bf16.msra.mxu0 %v5627_v60  ;;  %v2836_v60 = vld [vmem:[%s8847_s5 + $0xe8] sm:$0xff] }
 0x20c   : > { %v1875_v19 = vpack.c.bf16 %v1795_v11, %v1787_v9  ;;  %v7608_v5 = vadd.f32 %v5868_v16, %v5867_v13  ;;  %v1681_v14 = vpop.f32.mrb[120].mxu1  ;;  %v5870_v21 = vpop.f32.mrb[10].mxu0 }
 0x20d   : > { %v1682_v62 = vadd.f32 %v1681_v14, %v7563_v55  ;;  %v1683_v22 = vpop.f32.mrb[121].mxu1  ;;  %v5871_v23 = vpop.f32.mrb[11].mxu0 }
 0x20e   : > { %v1684_v12 = vadd.f32 %v1683_v22, %v7568_v7  ;;  %v7612_v18 = vadd.f32 %v5871_v23, %v5870_v21  ;;  %v1685_v27 = vpop.f32.mrb[122].mxu1  ;;  %2774 = vmatprep.mubr.bf16.mxu1 %v1875_v19 }
 0x20f   : > { %v1686_v26 = vadd.f32 %v1685_v27, %v7563_v55  ;;  %v1687_v28 = vpop.f32.mrb[123].mxu1  ;;  %2775 = vmatmul.mubr.bf16.gmra.mrb[180].mxu1 %v1874_v52  ;;  %v1802_v37 = vmax.f32 %v1682_v62, 0.0  ;;  %v2835_v62 = vld [vmem:[%s8847_s5 + $0xe0] sm:$0xff]  ;;  %v2812_v27 = vld [vmem:[%s8847_s5 + $0x28] sm:$0xff] }
 0x210   : > { %v1688_v35 = vadd.f32 %v1687_v28, %v7568_v7  ;;  %v1803_v40 = vmax.f32 %v1684_v12, 0.0  ;;  %v2808_v12 = vld [vmem:[%s8847_s5 + $0x8] sm:$0xff] }
 0x211   : > { %v1810_v39 = vmax.f32 %v1686_v26, 0.0  ;;  %v5614_v32 = vcombine.high %v2808_v12, %v2812_v27  ;;  %v5613_v28 = vcombine.low %v2808_v12, %v2812_v27  ;;  %v2848_v12 = vld [vmem:[%s8847_s5 + $0x148] sm:$0xff] }
 0x212   : > { %v1811_v36 = vmax.f32 %v1688_v35, 0.0  ;;  %v5873_v56 = vpop.f32.mrb[12].mxu0  ;;  %v2852_v27 = vld [vmem:[%s8847_s5 + $0x168] sm:$0xff] }
 0x213   : > { %v1882_v38 = vpack.c.bf16 %v1810_v39, %v1802_v37  ;;  %v5874_v41 = vpop.f32.mrb[13].mxu0  ;;  %3346 = vmatprep.subr.bf16.mxu1 %v5614_v32  ;;  %v2816_v37 = vld [vmem:[%s8847_s5 + $0x48] sm:$0xff]  ;;  %v2855_v32 = vld [vmem:[%s8847_s5 + $0x180] sm:$0xff] }
 0x214   : > { %v1883_v42 = vpack.c.bf16 %v1811_v36, %v1803_v40  ;;  %v7622_v58 = vadd.f32 %v5874_v41, %v5873_v56  ;;  %v1691_v44 = vpop.f32.mrb[124].mxu1  ;;  %v5876_v45 = vpop.f32.mrb[14].mxu0  ;;  %3347 = vmatpush1.bf16.msra.mxu1 %v5613_v28  ;;  %v2820_v39 = vld [vmem:[%s8847_s5 + $0x68] sm:$0xff]  ;;  %v2839_v36 = vld [vmem:[%s8847_s5 + $0x100] sm:$0xff]  ;;  %v5654_v28 = vcombine.high %v2848_v12, %v2852_v27 }
 0x215   : > { %v1692_v48 = vadd.f32 %v1691_v44, %v7563_v55  ;;  %v1693_v49 = vpop.f32.mrb[125].mxu1  ;;  %v5877_v50 = vpop.f32.mrb[15].mxu0  ;;  %v2843_v56 = vld [vmem:[%s8847_s5 + $0x120] sm:$0xff]  ;;  %v5621_v44 = vcombine.low %v2816_v37, %v2820_v39 }
 0x216   : > { %v1694_v51 = vadd.f32 %v1693_v49, %v7568_v7  ;;  %v7626_v53 = vadd.f32 %v5877_v50, %v5876_v45  ;;  %v1695_v54 = vpop.f32.mrb[126].mxu1  ;;  %2782 = vmatprep.mubr.bf16.mxu1 %v1883_v42  ;;  %v5643_v41 = vcombine.low %v2839_v36, %v2843_v56  ;;  %v5644_v42 = vcombine.high %v2839_v36, %v2843_v56  ;;  %v2824_v45 = vld [vmem:[%s8847_s5 + $0x88] sm:$0xff] }
 0x217   : > { %v1696_v59 = vadd.f32 %v1695_v54, %v7563_v55  ;;  %v1697_v17 = vpop.f32.mrb[127].mxu1  ;;  %2783 = vmatmul.mubr.bf16.gmra.mrb[184].mxu1 %v1882_v38  ;;  %v1818_v1 = vmax.f32 %v1692_v48, 0.0  ;;  %v5622_v38 = vcombine.high %v2816_v37, %v2820_v39  ;;  %v2828_v48 = vld [vmem:[%s8847_s5 + $0xa8] sm:$0xff]  ;;  %v5653_v37 = vcombine.low %v2848_v12, %v2852_v27  ;;  %v7715_v39 = vld [vmem:[%s8846_s4] ss:$0 sm:$0xff] }
 0x218   : > { %v1698_v63 = vadd.f32 %v1697_v17, %v7568_v7  ;;  %v1819_v8 = vmax.f32 %v1694_v51, 0.0  ;;  %v2831_v7 = vld [vmem:[%s8847_s5 + $0xc0] sm:$0xff]  ;;  %v5630_v50 = vcombine.high %v2824_v45, %v2828_v48  ;;  %v5629_v54 = vcombine.low %v2824_v45, %v2828_v48  ;;  %v2832_v17 = vld [vmem:[%s8847_s5 + $0xc8] sm:$0xff] }
 0x219   : > { %v1826_v3 = vmax.f32 %v1696_v59, 0.0  ;;  %v5635_v22 = vcombine.low %v2831_v7, %v2835_v62  ;;  %v5636_v23 = vcombine.high %v2831_v7, %v2835_v62  ;;  %3348 = vmatprep.subr.bf16.mxu1 %v5622_v38  ;;  %v2856_v36 = vld [vmem:[%s8847_s5 + $0x188] sm:$0xff]  ;;  %v2446_v45 = vadd.f32 %v7586_v29, %v7715_v39 }
 0x21a   : > { %v1827_v9 = vmax.f32 %v1698_v63, 0.0  ;;  %v5879_v11 = vpop.f32.mrb[16].mxu0  ;;  %3349 = vmatpush1.bf16.msra.mxu1 %v5621_v44  ;;  %v2847_v63 = vld [vmem:[%s8847_s5 + $0x140] sm:$0xff]  ;;  %v2860_v56 = vld [vmem:[%s8847_s5 + $0x1a8] sm:$0xff] }
 0x21b   : > { %v1890_v13 = vpack.c.bf16 %v1826_v3, %v1818_v1  ;;  %v5880_v52 = vpop.f32.mrb[17].mxu0  ;;  %3239 = vmatprep.subr.bf16.mxu0 %v5636_v23  ;;  %3350 = vmatprep.subr.bf16.mxu1 %v5630_v50  ;;  %v2851_v1 = vld [vmem:[%s8847_s5 + $0x160] sm:$0xff]  ;;  %v5638_v3 = vcombine.high %v2832_v17, %v2836_v60  ;;  %v5661_v44 = vcombine.low %v2856_v36, %v2860_v56  ;;  %v2864_v29 = vld [vmem:[%s8847_s5 + $0x1c8] sm:$0xff] }
 0x21c   : > { %v1891_v16 = vpack.c.bf16 %v1827_v9, %v1819_v8  ;;  %v7636_v19 = vadd.f32 %v5880_v52, %v5879_v11  ;;  %v5882_v14 = vpop.f32.mrb[18].mxu0  ;;  %3240 = vmatpush1.bf16.msra.mxu0 %v5635_v22  ;;  %v5651_v8 = vcombine.low %v2847_v63, %v2851_v1  ;;  %v5652_v9 = vcombine.high %v2847_v63, %v2851_v1  ;;  %v2844_v52 = vld [vmem:[%s8847_s5 + $0x128] sm:$0xff] }
 0x21d   : > { %v5883_v55 = vpop.f32.mrb[19].mxu0  ;;  %3241 = vmatprep.subr.bf16.mxu0 %v5644_v42  ;;  %v5637_v11 = vcombine.low %v2832_v17, %v2836_v60  ;;  %v2449_v50 = vadd.f32 %v7590_v34, %v7715_v39  ;;  %v2868_v34 = vld [vmem:[%s8847_s5 + $0x1e8] sm:$0xff] }
 0x21e   : > { %v7638_v21 = vadd.f32 %v5883_v55, %v5882_v14  ;;  %2790 = vmatprep.mubr.bf16.mxu1 %v1891_v16  ;;  %3351 = vmatpush1.bf16.msra.mxu1 %v5629_v54  ;;  %v2863_v54 = vld [vmem:[%s8847_s5 + $0x1c0] sm:$0xff]  ;;  %v5669_v1 = vcombine.low %v2864_v29, %v2868_v34 }
 0x21f   : > { %2791 = vmatmul.mubr.bf16.gmra.mrb[188].mxu1 %v1890_v13  ;;  %3352 = vmatprep.subr.bf16.mxu1 %v5638_v3  ;;  %v2840_v13 = vld [vmem:[%s8847_s5 + $0x108] sm:$0xff]  ;;  %v5670_v3 = vcombine.high %v2864_v29, %v2868_v34  ;;  %v7780_v34 = vld [vmem:[%s8847_s5 + $0x10] sm:$0xff] }
 0x220   : > { %3242 = vmatpush1.bf16.msra.mxu0 %v5643_v41  ;;  %v5646_v14 = vcombine.high %v2840_v13, %v2844_v52  ;;  %v5645_v7 = vcombine.low %v2840_v13, %v2844_v52  ;;  %v5662_v41 = vcombine.high %v2856_v36, %v2860_v56  ;;  %v6659_v13 = vmov 0  }
 0x221   : > { %3243 = vmatprep.subr.bf16.mxu0 %v5652_v9  ;;  %3265 = vmatprep.mubr.bf16.mxu0 %v6659_v13  ;;  %v2454_v52 = vadd.f32 %v7594_v46, %v7715_v39  ;;  %v2465_v46 = vadd.f32 %v7612_v18, %v7715_v39 }
 0x222   : > { %v5885_v31 = vpop.f32.mrb[20].mxu0  ;;  %3353 = vmatpush1.bf16.msra.mxu1 %v5637_v11  ;;  %3378 = vmatprep.mubr.bf16.mxu1 %v6659_v13 }
 0x223   : > { %v5886_v26 = vpop.f32.mrb[21].mxu0  ;;  %3354 = vmatprep.subr.bf16.mxu1 %v5646_v14 }
 0x224   : > { %v7652_v25 = vadd.f32 %v5886_v26, %v5885_v31  ;;  %v5888_v33 = vpop.f32.mrb[22].mxu0  ;;  %3244 = vmatpush1.bf16.msra.mxu0 %v5651_v8  ;;  %v2859_v26 = vld [vmem:[%s8847_s5 + $0x1a0] sm:$0xff] }
 0x225   : > { %v5889_v35 = vpop.f32.mrb[23].mxu0 }
 0x226   : > { %v7660_v40 = vadd.f32 %v5889_v35, %v5888_v33  ;;  %3355 = vmatpush1.bf16.msra.mxu1 %v5645_v7  ;;  %v5659_v33 = vcombine.low %v2855_v32, %v2859_v26  ;;  %v5660_v35 = vcombine.high %v2855_v32, %v2859_v26  ;;  %v2457_v7 = vadd.f32 %v7598_v2, %v7715_v39 }
 0x227   : > { %3356 = vmatprep.subr.bf16.mxu1 %v5654_v28  ;;  %v2462_v26 = vadd.f32 %v7608_v5, %v7715_v39  ;;  %v2473_v5 = vadd.f32 %v7626_v53, %v7715_v39 }
 0x228   : > { %3245 = vmatprep.subr.bf16.mxu0 %v5660_v35 }
 0x229   : > { %3246 = vmatpush1.bf16.msra.mxu0 %v5659_v33 }
 0x22a   : > { %v5891_v49 = vpop.f32.mrb[24].mxu0  ;;  %3357 = vmatpush1.bf16.msra.mxu1 %v5653_v37 }
 0x22b   : > { %v5892_v51 = vpop.f32.mrb[25].mxu0  ;;  %3358 = vmatprep.subr.bf16.mxu1 %v5662_v41  ;;  %v2470_v41 = vadd.f32 %v7622_v58, %v7715_v39  ;;  %v2481_v58 = vadd.f32 %v7638_v21, %v7715_v39 }
 0x22c   : > { %v7674_v30 = vadd.f32 %v5892_v51, %v5891_v49  ;;  %v5894_v57 = vpop.f32.mrb[26].mxu0 }
 0x22d   : > { %v5895_v59 = vpop.f32.mrb[27].mxu0 }
 0x22e   : > { %v7682_v61 = vadd.f32 %v5895_v59, %v5894_v57  ;;  %v2867_v57 = vld [vmem:[%s8847_s5 + $0x1e0] sm:$0xff]  ;;  %3359 = vmatpush1.bf16.msra.mxu1 %v5661_v44 }
 0x22f   : > { %v5667_v60 = vcombine.low %v2863_v54, %v2867_v57  ;;  %v5668_v63 = vcombine.high %v2863_v54, %v2867_v57  ;;  %3360 = vmatprep.subr.bf16.mxu1 %v5670_v3  ;;  %v2478_v54 = vadd.f32 %v7636_v19, %v7715_v39  ;;  %v7785_v19 = vld [vmem:[%s8847_s5 + $0x30] sm:$0xff] }
 0x230   : > { %v5616_v3 = vcombine.high %v7780_v34, %v7785_v19 }
 0x231   : > { %3247 = vmatprep.subr.bf16.mxu0 %v5668_v63 }
 0x232   : > { %v5897_v16 = vpop.f32.mrb[28].mxu0  ;;  %3248 = vmatpush1.bf16.msra.mxu0 %v5667_v60  ;;  %3361 = vmatpush1.bf16.msra.mxu1 %v5669_v1  ;;  %v7790_v1 = vld [vmem:[%s8847_s5 + $0x18] sm:$0xff] }
 0x233   : > { %v5898_v55 = vpop.f32.mrb[29].mxu0  ;;  %3459 = vmatprep.subr.bf16.mxu0 %v5616_v3 }
 0x234   : > { %v7696_v62 = vadd.f32 %v5898_v55, %v5897_v16  ;;  %v5900_v22 = vpop.f32.mrb[30].mxu0 }
 0x235   : > { %v5901_v23 = vpop.f32.mrb[31].mxu0 }
 0x236   : > { %v7704_v31 = vadd.f32 %v5901_v23, %v5900_v22 }
 0x23a   : > { %v5919_v38 = vpop.f32.mrb[128].mxu1 }
 0x23b   : > { %v5920_v42 = vpop.f32.mrb[129].mxu1 }
 0x23c   : > { %v5921_v48 = vadd.f32 %v5920_v42, %v5919_v38  ;;  %v5922_v49 = vpop.f32.mrb[130].mxu1 }
 0x23d   : > { %v5923_v51 = vpop.f32.mrb[131].mxu1 }
 0x23e   : > { %v7736_v59 = vadd.f32 %v5921_v48, %v2446_v45  ;;  %v5924_v17 = vadd.f32 %v5923_v51, %v5922_v49 }
 0x240   : > { %v7741_v8 = vadd.f32 %v5924_v17, %v2449_v50 }
 0x242   : > { %v5925_v9 = vpop.f32.mrb[132].mxu1 }
 0x243   : > { %v5926_v11 = vpop.f32.mrb[133].mxu1 }
 0x244   : > { %v5927_v16 = vadd.f32 %v5926_v11, %v5925_v9  ;;  %v5928_v14 = vpop.f32.mrb[134].mxu1  ;;  %v7797_v9 = vld [vmem:[%s8847_s5 + $0x38] sm:$0xff] }
 0x245   : > { %v5929_v55 = vpop.f32.mrb[135].mxu1 }
 0x246   : > { %v7749_v22 = vadd.f32 %v5927_v16, %v2454_v52  ;;  %v5930_v23 = vadd.f32 %v5929_v55, %v5928_v14  ;;  %v5615_v52 = vcombine.low %v7780_v34, %v7785_v19  ;;  %v5617_v16 = vcombine.low %v7790_v1, %v7797_v9  ;;  %v2837_v34 = vld [vmem:[%s8847_s5 + $0xf0] sm:$0xff]  ;;  %v2834_v19 = vld [vmem:[%s8847_s5 + $0xd8] sm:$0xff] }
 0x247   : > { %v5618_v14 = vcombine.high %v7790_v1, %v7797_v9  ;;  %v2486_v55 = vadd.f32 %v7652_v25, %v7715_v39  ;;  %v2838_v1 = vld [vmem:[%s8847_s5 + $0xf8] sm:$0xff] }
 0x248   : > { %v7751_v12 = vadd.f32 %v5930_v23, %v2457_v7 }
 0x249   : > { %3572 = vmatprep.subr.bf16.mxu1 %v5618_v14 }
 0x24a   : > { %v5931_v27 = vpop.f32.mrb[136].mxu1 }
 0x24b   : > { %v5932_v32 = vpop.f32.mrb[137].mxu1 }
 0x24c   : > { %v5933_v28 = vadd.f32 %v5932_v32, %v5931_v27  ;;  %v5934_v33 = vpop.f32.mrb[138].mxu1  ;;  %v2489_v32 = vadd.f32 %v7660_v40, %v7715_v39 }
 0x24d   : > { %v5935_v35 = vpop.f32.mrb[139].mxu1 }
 0x24e   : > { %v7757_v37 = vadd.f32 %v5933_v28, %v2462_v26  ;;  %v5936_v36 = vadd.f32 %v5935_v35, %v5934_v33 }
 0x250   : > { %v7759_v2 = vadd.f32 %v5936_v36, %v2465_v46  ;;  %v2494_v36 = vadd.f32 %v7674_v30, %v7715_v39  ;;  %v2505_v30 = vadd.f32 %v7704_v31, %v7715_v39 }
 0x252   : > { %v5937_v56 = vpop.f32.mrb[140].mxu1 }
 0x253   : > { %v5938_v38 = vpop.f32.mrb[141].mxu1 }
 0x254   : > { %v5939_v42 = vadd.f32 %v5938_v38, %v5937_v56  ;;  %v5940_v44 = vpop.f32.mrb[142].mxu1 }
 0x255   : > { %v5941_v45 = vpop.f32.mrb[143].mxu1 }
 0x256   : > { %v7765_v48 = vadd.f32 %v5939_v42, %v2470_v41  ;;  %v5942_v49 = vadd.f32 %v5941_v45, %v5940_v44  ;;  %v2497_v41 = vadd.f32 %v7682_v61, %v7715_v39 }
 0x258   : > { %v7767_v18 = vadd.f32 %v5942_v49, %v2473_v5  ;;  %v2502_v49 = vadd.f32 %v7696_v62, %v7715_v39 }
 0x25a   : > { %v5943_v50 = vpop.f32.mrb[144].mxu1 }
 0x25b   : > { %v5944_v51 = vpop.f32.mrb[145].mxu1 }
 0x25c   : > { %v5945_v57 = vadd.f32 %v5944_v51, %v5943_v50  ;;  %v5946_v29 = vpop.f32.mrb[146].mxu1 }
 0x25d   : > { %v5947_v17 = vpop.f32.mrb[147].mxu1 }
 0x25e   : > { %v7773_v60 = vadd.f32 %v5945_v57, %v2478_v54  ;;  %v5948_v63 = vadd.f32 %v5947_v17, %v5946_v29 }
 0x260   : > { %v7775_v53 = vadd.f32 %v5948_v63, %v2481_v58 }
 0x262   : > { %v5949_v21 = vpop.f32.mrb[148].mxu1 }
 0x263   : > { %v5950_v11 = vpop.f32.mrb[149].mxu1 }
 0x264   : > { %v5951_v7 = vadd.f32 %v5950_v11, %v5949_v21  ;;  %v5952_v23 = vpop.f32.mrb[150].mxu1 }
 0x265   : > { %v5953_v27 = vpop.f32.mrb[151].mxu1 }
 0x266   : > { %v7809_v26 = vadd.f32 %v5951_v7, %v2486_v55  ;;  %v5954_v28 = vadd.f32 %v5953_v27, %v5952_v23 }
 0x268   : > { %v7811_v33 = vadd.f32 %v5954_v28, %v2489_v32 }
 0x26a   : > { %v5955_v35 = vpop.f32.mrb[152].mxu1 }
 0x26b   : > { %v5956_v46 = vpop.f32.mrb[153].mxu1 }
 0x26c   : > { %v5957_v56 = vadd.f32 %v5956_v46, %v5955_v35  ;;  %v5958_v25 = vpop.f32.mrb[154].mxu1 }
 0x26d   : > { %v5959_v38 = vpop.f32.mrb[155].mxu1 }
 0x26e   : > { %v7817_v42 = vadd.f32 %v5957_v56, %v2494_v36  ;;  %v5960_v44 = vadd.f32 %v5959_v38, %v5958_v25 }
 0x270   : > { %v7819_v40 = vadd.f32 %v5960_v44, %v2497_v41 }
 0x272   : > { %v5961_v45 = vpop.f32.mrb[156].mxu1 }
 0x273   : > { %v5962_v5 = vpop.f32.mrb[157].mxu1 }
 0x274   : > { %v5963_v50 = vadd.f32 %v5962_v5, %v5961_v45  ;;  %v5964_v51 = vpop.f32.mrb[158].mxu1 }
 0x275   : > { %v5965_v54 = vpop.f32.mrb[159].mxu1 }
 0x276   : > { %v7825_v57 = vadd.f32 %v5963_v50, %v2502_v49  ;;  %v5966_v29 = vadd.f32 %v5965_v54, %v5964_v51 }
 0x278   : > { %v7827_v61 = vadd.f32 %v5966_v29, %v2505_v30 }
 0x27a   : > { %v5983_v17 = vpop.f32.mrb[32].mxu0 }
 0x27b   : > { %v5984_v58 = vpop.f32.mrb[33].mxu0 }
 0x27c   : > { %v5985_v63 = vadd.f32 %v5984_v58, %v5983_v17  ;;  %v5986_v21 = vpop.f32.mrb[34].mxu0 }
 0x27d   : > { %v5987_v3 = vpop.f32.mrb[35].mxu0 }
 0x27e   : > { %v7830_v11 = vadd.f32 %v5985_v63, %v7736_v59  ;;  %v5988_v62 = vadd.f32 %v5987_v3, %v5986_v21 }
 0x280   : > { %v7833_v14 = vadd.f32 %v5988_v62, %v7741_v8 }
 0x282   : > { %v5989_v55 = vpop.f32.mrb[36].mxu0 }
 0x283   : > { %v5990_v7 = vpop.f32.mrb[37].mxu0 }
 0x284   : > { %v5991_v31 = vadd.f32 %v5990_v7, %v5989_v55  ;;  %v5992_v39 = vpop.f32.mrb[38].mxu0 }
 0x285   : > { %v5993_v23 = vpop.f32.mrb[39].mxu0 }
 0x286   : > { %v7836_v27 = vadd.f32 %v5991_v31, %v7749_v22  ;;  %v5994_v32 = vadd.f32 %v5993_v23, %v5992_v39 }
 0x288   : > { %v7839_v28 = vadd.f32 %v5994_v32, %v7751_v12 }
 0x28a   : > { %v5995_v35 = vpop.f32.mrb[40].mxu0 }
 0x28b   : > { %v5996_v46 = vpop.f32.mrb[41].mxu0 }
 0x28c   : > { %v5997_v59 = vadd.f32 %v5996_v46, %v5995_v35  ;;  %v5998_v36 = vpop.f32.mrb[42].mxu0 }
 0x28d   : > { %v5999_v56 = vpop.f32.mrb[43].mxu0 }
 0x28e   : > { %v7842_v8 = vadd.f32 %v5997_v59, %v7757_v37  ;;  %v6000_v25 = vadd.f32 %v5999_v56, %v5998_v36 }
 0x290   : > { %v7845_v38 = vadd.f32 %v6000_v25, %v7759_v2 }
 0x292   : > { %v6001_v41 = vpop.f32.mrb[44].mxu0 }
 0x293   : > { %v6002_v44 = vpop.f32.mrb[45].mxu0 }
 0x294   : > { %v6003_v22 = vadd.f32 %v6002_v44, %v6001_v41  ;;  %v6004_v45 = vpop.f32.mrb[46].mxu0 }
 0x295   : > { %v6005_v5 = vpop.f32.mrb[47].mxu0 }
 0x296   : > { %v7848_v12 = vadd.f32 %v6003_v22, %v7765_v48  ;;  %v6006_v49 = vadd.f32 %v6005_v5, %v6004_v45 }
 0x298   : > { %v7851_v50 = vadd.f32 %v6006_v49, %v7767_v18 }
 0x29a   : > { %v6007_v51 = vpop.f32.mrb[48].mxu0 }
 0x29b   : > { %v6008_v54 = vpop.f32.mrb[49].mxu0 }
 0x29c   : > { %v6009_v37 = vadd.f32 %v6008_v54, %v6007_v51  ;;  %v6010_v30 = vpop.f32.mrb[50].mxu0  ;;  %v2817_v54 = vld [vmem:[%s8847_s5 + $0x50] sm:$0xff] }
 0x29d   : > { %v6011_v29 = vpop.f32.mrb[51].mxu0 }
 0x29e   : > { %v7854_v2 = vadd.f32 %v6009_v37, %v7773_v60  ;;  %v6012_v17 = vadd.f32 %v6011_v29, %v6010_v30  ;;  %v2822_v30 = vld [vmem:[%s8847_s5 + $0x78] sm:$0xff] }
 0x2a0   : > { %v7857_v58 = vadd.f32 %v6012_v17, %v7775_v53 }
 0x2a2   : > { %v6013_v63 = vpop.f32.mrb[52].mxu0 }
 0x2a3   : > { %v6014_v21 = vpop.f32.mrb[53].mxu0 }
 0x2a4   : > { %v6015_v48 = vadd.f32 %v6014_v21, %v6013_v63  ;;  %v6016_v3 = vpop.f32.mrb[54].mxu0 }
 0x2a5   : > { %v6017_v62 = vpop.f32.mrb[55].mxu0 }
 0x2a6   : > { %v7860_v18 = vadd.f32 %v6015_v48, %v7809_v26  ;;  %v6018_v55 = vadd.f32 %v6017_v62, %v6016_v3  ;;  %v2829_v62 = vld [vmem:[%s8847_s5 + $0xb0] sm:$0xff] }
 0x2a8   : > { %v7863_v7 = vadd.f32 %v6018_v55, %v7811_v33  ;;  %v2826_v55 = vld [vmem:[%s8847_s5 + $0x98] sm:$0xff] }
 0x2aa   : > { %v6019_v31 = vpop.f32.mrb[56].mxu0 }
 0x2ab   : > { %v6020_v39 = vpop.f32.mrb[57].mxu0 }
 0x2ac   : > { %v6021_v60 = vadd.f32 %v6020_v39, %v6019_v31  ;;  %v6022_v23 = vpop.f32.mrb[58].mxu0  ;;  %v2830_v31 = vld [vmem:[%s8847_s5 + $0xb8] sm:$0xff] }
 0x2ad   : > { %v6023_v32 = vpop.f32.mrb[59].mxu0 }
 0x2ae   : > { %v7866_v53 = vadd.f32 %v6021_v60, %v7817_v42  ;;  %v6024_v35 = vadd.f32 %v6023_v32, %v6022_v23 }
 0x2b0   : > { %v7869_v46 = vadd.f32 %v6024_v35, %v7819_v40 }
 0x2b2   : > { %v6025_v59 = vpop.f32.mrb[60].mxu0 }
 0x2b3   : > { %v6026_v36 = vpop.f32.mrb[61].mxu0 }
 0x2b4   : > { %v6027_v26 = vadd.f32 %v6026_v36, %v6025_v59  ;;  %v6028_v56 = vpop.f32.mrb[62].mxu0  ;;  %v5634_v36 = vcombine.high %v2826_v55, %v2830_v31 }
 0x2b5   : > { %v6029_v25 = vpop.f32.mrb[63].mxu0 }
 0x2b6   : > { %v7872_v33 = vadd.f32 %v6027_v26, %v7825_v57  ;;  %v6030_v41 = vadd.f32 %v6029_v25, %v6028_v56  ;;  %v2821_v57 = vld [vmem:[%s8847_s5 + $0x70] sm:$0xff]  ;;  %v5633_v56 = vcombine.low %v2826_v55, %v2830_v31 }
 0x2b7   : > { %v5624_v63 = vcombine.high %v2817_v54, %v2821_v57  ;;  %v5623_v60 = vcombine.low %v2817_v54, %v2821_v57  ;;  %v2833_v26 = vld [vmem:[%s8847_s5 + $0xd0] sm:$0xff] }
 0x2b8   : > { %v7875_v44 = vadd.f32 %v6030_v41, %v7827_v61  ;;  %v2818_v61 = vld [vmem:[%s8847_s5 + $0x58] sm:$0xff]  ;;  %v5640_v25 = vcombine.high %v2833_v26, %v2837_v34  ;;  %v5642_v41 = vcombine.high %v2834_v19, %v2838_v1  ;;  %v5639_v54 = vcombine.low %v2833_v26, %v2837_v34 }
 0x2b9   : > { %v5626_v21 = vcombine.high %v2818_v61, %v2822_v30  ;;  %v5625_v35 = vcombine.low %v2818_v61, %v2822_v30  ;;  %v5641_v61 = vcombine.low %v2834_v19, %v2838_v1 }
 0x2ba   : > { %v6047_v22 = vpop.f32.mrb[160].mxu1 }
 0x2bb   : > { %v6048_v45 = vpop.f32.mrb[161].mxu1 }
 0x2bc   : > { %v6049_v42 = vadd.f32 %v6048_v45, %v6047_v22  ;;  %v6050_v5 = vpop.f32.mrb[162].mxu1  ;;  %v2841_v22 = vld [vmem:[%s8847_s5 + $0x110] sm:$0xff] }
 0x2bd   : > { %v6051_v49 = vpop.f32.mrb[163].mxu1 }
 0x2be   : > { %v2737_v40 = vadd.f32 %v6049_v42, %v7830_v11  ;;  %v6052_v51 = vadd.f32 %v6051_v49, %v6050_v5  ;;  %v2845_v5 = vld [vmem:[%s8847_s5 + $0x130] sm:$0xff]  ;;  %v2842_v49 = vld [vmem:[%s8847_s5 + $0x118] sm:$0xff] }
 0x2bf   : > { %v5648_v30 = vcombine.high %v2841_v22, %v2845_v5 }
 0x2c0   : > { %v2740_v37 = vadd.f32 %v6052_v51, %v7833_v14  ;;  %v2825_v14 = vld [vmem:[%s8847_s5 + $0x90] sm:$0xff] }
 0x2c1   : > { %v5632_v59 = vcombine.high %v2825_v14, %v2829_v62 }
 0x2c2   : > { %v7891_v11 = vpack.c.bf16 %v2740_v37, %v2737_v40  ;;  %v6053_v29 = vpop.f32.mrb[164].mxu1  ;;  %v2846_v40 = vld [vmem:[%s8847_s5 + $0x138] sm:$0xff] }
 0x2c3   : > { %v6054_v17 = vpop.f32.mrb[165].mxu1  ;;  %v5649_v55 = vcombine.low %v2842_v49, %v2846_v40 }
 0x2c4   : > { %v6055_v48 = vadd.f32 %v6054_v17, %v6053_v29  ;;  %v6056_v3 = vpop.f32.mrb[166].mxu1  ;;  %3266 = vmatmul.mubr.bf16.vlgmr.msra.gmra.mrb[64].mxu0 %v7891_v11  ;;  %3379 = vmatmul.mubr.bf16.vlgmr.msra.gmra.mrb[192].mxu1 %v7891_v11  ;;  %v5650_v29 = vcombine.high %v2842_v49, %v2846_v40  ;;  %v2849_v17 = vld [vmem:[%s8847_s5 + $0x150] sm:$0xff] }
 0x2c5   : > { %v6057_v39 = vpop.f32.mrb[167].mxu1  ;;  %3275 = vmatprep.mubr.bf16.mxu0 %v6659_v13  ;;  %3388 = vmatprep.mubr.bf16.mxu1 %v6659_v13 }
 0x2c6   : > { %v2745_v23 = vadd.f32 %v6055_v48, %v7836_v27  ;;  %v6058_v32 = vadd.f32 %v6057_v39, %v6056_v3  ;;  %3460 = vmatpush1.bf16.msra.mxu0 %v5615_v52  ;;  %3573 = vmatpush1.bf16.msra.mxu1 %v5617_v16  ;;  %v5631_v16 = vcombine.low %v2825_v14, %v2829_v62  ;;  %v2854_v14 = vld [vmem:[%s8847_s5 + $0x178] sm:$0xff] }
 0x2c7   : > { %3461 = vmatprep.subr.bf16.mxu0 %v5624_v63  ;;  %3574 = vmatprep.subr.bf16.mxu1 %v5626_v21  ;;  %v2853_v21 = vld [vmem:[%s8847_s5 + $0x170] sm:$0xff]  ;;  %v5647_v62 = vcombine.low %v2841_v22, %v2845_v5 }
 0x2c8   : > { %v2748_v27 = vadd.f32 %v6058_v32, %v7839_v28  ;;  %v5656_v31 = vcombine.high %v2849_v17, %v2853_v21 }
 0x2ca   : > { %v7929_v9 = vpack.c.bf16 %v2748_v27, %v2745_v23  ;;  %v6059_v52 = vpop.f32.mrb[168].mxu1  ;;  %3462 = vmatpush1.bf16.msra.mxu0 %v5623_v60  ;;  %3575 = vmatpush1.bf16.msra.mxu1 %v5625_v35  ;;  %v2857_v60 = vld [vmem:[%s8847_s5 + $0x190] sm:$0xff]  ;;  %v5655_v27 = vcombine.low %v2849_v17, %v2853_v21  ;;  %v6322_v17 = vld [vmem:[%s8849_s7 + $0x4] ss:$8 sps:$4 sm:$0xff]  }
 0x2cb   : > { %v6060_v28 = vpop.f32.mrb[169].mxu1  ;;  %3463 = vmatprep.subr.bf16.mxu0 %v5632_v59  ;;  %3576 = vmatprep.subr.bf16.mxu1 %v5634_v36  ;;  %v2861_v35 = vld [vmem:[%s8847_s5 + $0x1b0] sm:$0xff]  ;;  %v2858_v59 = vld [vmem:[%s8847_s5 + $0x198] sm:$0xff] }
 0x2cc   : > { %v6061_v45 = vadd.f32 %v6060_v28, %v6059_v52  ;;  %v6062_v42 = vpop.f32.mrb[170].mxu1  ;;  %3276 = vmatmul.mubr.bf16.gmra.mrb[68].mxu0 %v7929_v9  ;;  %3389 = vmatmul.mubr.bf16.gmra.mrb[196].mxu1 %v7929_v9  ;;  %v2862_v36 = vld [vmem:[%s8847_s5 + $0x1b8] sm:$0xff]  ;;  %v5664_v52 = vcombine.high %v2857_v60, %v2861_v35 }
 0x2cd   : > { %v6063_v51 = vpop.f32.mrb[171].mxu1  ;;  %3285 = vmatprep.mubr.bf16.mxu0 %v6659_v13  ;;  %3398 = vmatprep.mubr.bf16.mxu1 %v6659_v13  ;;  %v5665_v5 = vcombine.low %v2858_v59, %v2862_v36 }
 0x2ce   : > { %v2753_v37 = vadd.f32 %v6061_v45, %v7842_v8  ;;  %v6064_v57 = vadd.f32 %v6063_v51, %v6062_v42  ;;  %3464 = vmatpush1.bf16.msra.mxu0 %v5631_v16  ;;  %3577 = vmatpush1.bf16.msra.mxu1 %v5633_v56  ;;  %v2850_v8 = vld [vmem:[%s8847_s5 + $0x158] sm:$0xff]  ;;  %v5666_v16 = vcombine.high %v2858_v59, %v2862_v36  ;;  %v2865_v56 = vld [vmem:[%s8847_s5 + $0x1d0] sm:$0xff] }
 0x2cf   : > { %3465 = vmatprep.subr.bf16.mxu0 %v5640_v25  ;;  %3578 = vmatprep.subr.bf16.mxu1 %v5642_v41  ;;  %v5658_v39 = vcombine.high %v2850_v8, %v2854_v14  ;;  %v5657_v1 = vcombine.low %v2850_v8, %v2854_v14  ;;  %v2869_v25 = vld [vmem:[%s8847_s5 + $0x1f0] sm:$0xff]  ;;  %v2870_v41 = vld [vmem:[%s8847_s5 + $0x1f8] sm:$0xff]  ;;  %v5663_v42 = vcombine.low %v2857_v60, %v2861_v35 }
 0x2d0   : > { %v2756_v63 = vadd.f32 %v6064_v57, %v7845_v38  ;;  %v5672_v49 = vcombine.high %v2865_v56, %v2869_v25  ;;  %v5671_v57 = vcombine.low %v2865_v56, %v2869_v25  ;;  %v6320_v56 = vld [vmem:[%s8849_s7] ss:$8 sps:$4 sm:$0xff]  }
 0x2d1   : > { %v6326_v25 = vld [vmem:[%s8849_s7 + $0x20] ss:$8 sps:$4 sm:$0xff]  }
 0x2d2   : > { %v7961_v48 = vpack.c.bf16 %v2756_v63, %v2753_v37  ;;  %v6065_v3 = vpop.f32.mrb[172].mxu1  ;;  %3466 = vmatpush1.bf16.msra.mxu0 %v5639_v54  ;;  %3579 = vmatpush1.bf16.msra.mxu1 %v5641_v61 }
 0x2d3   : > { %v6066_v38 = vpop.f32.mrb[173].mxu1  ;;  %3467 = vmatprep.subr.bf16.mxu0 %v5648_v30  ;;  %3580 = vmatprep.subr.bf16.mxu1 %v5650_v29 }
 0x2d4   : > { %v6067_v23 = vadd.f32 %v6066_v38, %v6065_v3  ;;  %v6068_v32 = vpop.f32.mrb[174].mxu1  ;;  %3286 = vmatmul.mubr.bf16.gmra.mrb[72].mxu0 %v7961_v48  ;;  %3399 = vmatmul.mubr.bf16.gmra.mrb[200].mxu1 %v7961_v48 }
 0x2d5   : > { %v6069_v26 = vpop.f32.mrb[175].mxu1  ;;  %3295 = vmatprep.mubr.bf16.mxu0 %v6659_v13  ;;  %3408 = vmatprep.mubr.bf16.mxu1 %v6659_v13 }
 0x2d6   : > { %v2761_v34 = vadd.f32 %v6067_v23, %v7848_v12  ;;  %v6070_v19 = vadd.f32 %v6069_v26, %v6068_v32  ;;  %3468 = vmatpush1.bf16.msra.mxu0 %v5647_v62  ;;  %3581 = vmatpush1.bf16.msra.mxu1 %v5649_v55  ;;  %v2866_v12 = vld [vmem:[%s8847_s5 + $0x1d8] sm:$0xff] }
 0x2d7   : > { %3469 = vmatprep.subr.bf16.mxu0 %v5656_v31  ;;  %3582 = vmatprep.subr.bf16.mxu1 %v5658_v39  ;;  %v5674_v40 = vcombine.high %v2866_v12, %v2870_v41  ;;  %v5673_v29 = vcombine.low %v2866_v12, %v2870_v41  ;;  %v6329_v12 = vld [vmem:[%s8849_s7 + $0x30] ss:$8 sps:$4 sm:$0xff]   ;;  %v6334_v41 = vld [vmem:[%s8849_s7 + $0x44] ss:$8 sps:$4 sm:$0xff]  }
 0x2d8   : > { %v2764_v28 = vadd.f32 %v6070_v19, %v7851_v50 }
 0x2da   : > { %v7993_v22 = vpack.c.bf16 %v2764_v28, %v2761_v34  ;;  %v6071_v45 = vpop.f32.mrb[176].mxu1  ;;  %3470 = vmatpush1.bf16.msra.mxu0 %v5655_v27  ;;  %3583 = vmatpush1.bf16.msra.mxu1 %v5657_v1  ;;  %v6328_v28 = vld [vmem:[%s8849_s7 + $0x24] ss:$8 sps:$4 sm:$0xff]  }
 0x2db   : > { %v6072_v50 = vpop.f32.mrb[177].mxu1  ;;  %3471 = vmatprep.subr.bf16.mxu0 %v5664_v52  ;;  %3584 = vmatprep.subr.bf16.mxu1 %v5666_v16 }
 0x2dc   : > { %v6073_v51 = vadd.f32 %v6072_v50, %v6071_v45  ;;  %v6074_v54 = vpop.f32.mrb[178].mxu1  ;;  %3296 = vmatmul.mubr.bf16.gmra.mrb[76].mxu0 %v7993_v22  ;;  %3409 = vmatmul.mubr.bf16.gmra.mrb[204].mxu1 %v7993_v22  ;;  %v6332_v45 = vld [vmem:[%s8849_s7 + $0x40] ss:$8 sps:$4 sm:$0xff]  }
 0x2dd   : > { %v6075_v37 = vpop.f32.mrb[179].mxu1  ;;  %3305 = vmatprep.mubr.bf16.mxu0 %v6659_v13  ;;  %3418 = vmatprep.mubr.bf16.mxu1 %v6659_v13  ;;  %v6338_v50 = vld [vmem:[%s8849_s7 + $0x60] ss:$8 sps:$4 sm:$0xff]  }
 0x2de   : > { %v2769_v61 = vadd.f32 %v6073_v51, %v7854_v2  ;;  %v6076_v30 = vadd.f32 %v6075_v37, %v6074_v54  ;;  %3472 = vmatpush1.bf16.msra.mxu0 %v5663_v42  ;;  %3585 = vmatpush1.bf16.msra.mxu1 %v5665_v5  ;;  %v6335_v42 = vld [vmem:[%s8849_s7 + $0x50] ss:$8 sps:$4 sm:$0xff]   ;;  %v6340_v5 = vld [vmem:[%s8849_s7 + $0x64] ss:$8 sps:$4 sm:$0xff]   ;;  %v6344_v51 = vld [vmem:[%s8849_s7 + $0x80] ss:$8 sps:$4 sm:$0xff]  }
 0x2df   : > { %3473 = vmatprep.subr.bf16.mxu0 %v5672_v49  ;;  %3586 = vmatprep.subr.bf16.mxu1 %v5674_v40  ;;  %v6341_v49 = vld [vmem:[%s8849_s7 + $0x70] ss:$8 sps:$4 sm:$0xff]   ;;  %v6346_v40 = vld [vmem:[%s8849_s7 + $0x84] ss:$8 sps:$4 sm:$0xff]  }
 0x2e0   : > { %v2772_v63 = vadd.f32 %v6076_v30, %v7857_v58  ;;  %v6347_v54 = vld [vmem:[%s8849_s7 + $0x90] ss:$8 sps:$4 sm:$0xff]   ;;  %v6352_v37 = vld [vmem:[%s8849_s7 + $0xa4] ss:$8 sps:$4 sm:$0xff]  }
 0x2e1   : > { %v6353_v30 = vld [vmem:[%s8849_s7 + $0xb0] ss:$8 sps:$4 sm:$0xff]  }
 0x2e2   : > { %v8004_v21 = vpack.c.bf16 %v2772_v63, %v2769_v61  ;;  %v6077_v8 = vpop.f32.mrb[180].mxu1  ;;  %3474 = vmatpush1.bf16.msra.mxu0 %v5671_v57  ;;  %3587 = vmatpush1.bf16.msra.mxu1 %v5673_v29  ;;  %v6350_v57 = vld [vmem:[%s8849_s7 + $0xa0] ss:$8 sps:$4 sm:$0xff]   ;;  %v6355_v61 = vld [vmem:[%s8849_s7 + $0xb4] ss:$8 sps:$4 sm:$0xff]  }
 0x2e3   : > { %v6078_v14 = vpop.f32.mrb[181].mxu1  ;;  %4657 = vmatprep.subr.bf16.mxu0 %v6322_v17  ;;  %v6358_v29 = vld [vmem:[%s8849_s7 + $0xc4] ss:$8 sps:$4 sm:$0xff]   ;;  %v6356_v17 = vld [vmem:[%s8849_s7 + $0xc0] ss:$8 sps:$4 sm:$0xff]  }
 0x2e4   : > { %v6079_v2 = vadd.f32 %v6078_v14, %v6077_v8  ;;  %v6080_v3 = vpop.f32.mrb[182].mxu1  ;;  %3306 = vmatmul.mubr.bf16.gmra.mrb[80].mxu0 %v8004_v21  ;;  %3419 = vmatmul.mubr.bf16.gmra.mrb[208].mxu1 %v8004_v21  ;;  %v6361_v63 = vld [vmem:[%s8849_s7 + $0xd4] ss:$8 sps:$4 sm:$0xff]   ;;  %v6364_v8 = vld [vmem:[%s8849_s7 + $0xe4] ss:$8 sps:$4 sm:$0xff]  }
 0x2e5   : > { %v6081_v62 = vpop.f32.mrb[183].mxu1  ;;  %3315 = vmatprep.mubr.bf16.mxu0 %v6659_v13  ;;  %3428 = vmatprep.mubr.bf16.mxu1 %v6659_v13  ;;  %v6362_v14 = vld [vmem:[%s8849_s7 + $0xe0] ss:$8 sps:$4 sm:$0xff]  }
 0x2e6   : > { %v2777_v58 = vadd.f32 %v6079_v2, %v7860_v18  ;;  %v6082_v55 = vadd.f32 %v6081_v62, %v6080_v3  ;;  %v6365_v2 = vld [vmem:[%s8849_s7 + $0xf0] ss:$8 sps:$4 sm:$0xff]   ;;  %v6370_v3 = vld [vmem:[%s8849_s7 + $0x104] ss:$8 sps:$4 sm:$0xff]  }
 0x2e7   : > { %v8163_v62 = vld [vmem:[%s8848_s6] sm:$0xff] }
 0x2e8   : > { %v2780_v38 = vadd.f32 %v6082_v55, %v7863_v7  ;;  %v8172_v55 = vrot.slane %v8163_v62, %v498_v43 }
 0x2ea   : > { %v8012_v31 = vpack.c.bf16 %v2780_v38, %v2777_v58  ;;  %v6083_v39 = vpop.f32.mrb[184].mxu1  ;;  %v8167_v58 = vrot.slane %v8163_v62, %v7295_v24  ;;  %v8176_v38 = vrot.slane %v8163_v62, %v7303_v15 }
 0x2eb   : > { %v6084_v60 = vpop.f32.mrb[185].mxu1 }
 0x2ec   : > { %v6085_v23 = vadd.f32 %v6084_v60, %v6083_v39  ;;  %v6086_v32 = vpop.f32.mrb[186].mxu1  ;;  %3316 = vmatmul.mubr.bf16.gmra.mrb[84].mxu0 %v8012_v31  ;;  %3429 = vmatmul.mubr.bf16.gmra.mrb[212].mxu1 %v8012_v31 }
 0x2ed   : > { %v6087_v35 = vpop.f32.mrb[187].mxu1  ;;  %3325 = vmatprep.mubr.bf16.mxu0 %v6659_v13  ;;  %3438 = vmatprep.mubr.bf16.mxu1 %v6659_v13 }
 0x2ee   : > { %v2785_v18 = vadd.f32 %v6085_v23, %v7866_v53  ;;  %v6088_v59 = vadd.f32 %v6087_v35, %v6086_v32 }
 0x2f0   : > { %v2788_v7 = vadd.f32 %v6088_v59, %v7869_v46 }
 0x2f2   : > { %v8020_v36 = vpack.c.bf16 %v2788_v7, %v2785_v18  ;;  %v6089_v26 = vpop.f32.mrb[188].mxu1 }
 0x2f3   : > { %v6090_v27 = vpop.f32.mrb[189].mxu1 }
 0x2f4   : > { %v6091_v34 = vadd.f32 %v6090_v27, %v6089_v26  ;;  %v6092_v19 = vpop.f32.mrb[190].mxu1  ;;  %3326 = vmatmul.mubr.bf16.gmra.mrb[88].mxu0 %v8020_v36  ;;  %3439 = vmatmul.mubr.bf16.gmra.mrb[216].mxu1 %v8020_v36 }
 0x2f5   : > { %v6093_v1 = vpop.f32.mrb[191].mxu1  ;;  %3335 = vmatprep.mubr.bf16.mxu0 %v6659_v13  ;;  %3448 = vmatprep.mubr.bf16.mxu1 %v6659_v13 }
 0x2f6   : > { %v2793_v53 = vadd.f32 %v6091_v34, %v7872_v33  ;;  %v6094_v52 = vadd.f32 %v6093_v1, %v6092_v19  ;;  %v6325_v33 = vld [vmem:[%s8849_s7 + $0x14] ss:$8 sps:$4 sm:$0xff]  }
 0x2f8   : > { %v2796_v46 = vadd.f32 %v6094_v52, %v7875_v44  ;;  %v6323_v44 = vld [vmem:[%s8849_s7 + $0x10] ss:$8 sps:$4 sm:$0xff]  }
 0x2fa   : > { %v8028_v16 = vpack.c.bf16 %v2796_v46, %v2793_v53 }
 0x2fc   : > { %3336 = vmatmul.mubr.bf16.gmra.mrb[92].mxu0 %v8028_v16  ;;  %3449 = vmatmul.mubr.bf16.gmra.mrb[220].mxu1 %v8028_v16 }
 0x2fd   : > { %3491 = vmatprep.mubr.bf16.mxu0 %v6659_v13  ;;  %3604 = vmatprep.mubr.bf16.mxu1 %v6659_v13 }
 0x304   : > { %3492 = vmatmul.mubr.bf16.vlgmr.msra.gmra.mrb[96].mxu0 %v7891_v11  ;;  %3605 = vmatmul.mubr.bf16.vlgmr.msra.gmra.mrb[224].mxu1 %v7891_v11  ;;  %v6331_v11 = vld [vmem:[%s8849_s7 + $0x34] ss:$8 sps:$4 sm:$0xff]  }
 0x305   : > { %3501 = vmatprep.mubr.bf16.mxu0 %v6659_v13  ;;  %3614 = vmatprep.mubr.bf16.mxu1 %v6659_v13 }
 0x306   : > { %4658 = vmatpush1.bf16.msra.mxu0 %v6320_v56 }
 0x307   : > { %4659 = vmatprep.subr.bf16.mxu0 %v6325_v33 }
 0x30a   : > { %4660 = vmatpush1.bf16.msra.mxu0 %v6323_v44 }
 0x30b   : > { %4661 = vmatprep.subr.bf16.mxu0 %v6328_v28 }
 0x30c   : > { %3502 = vmatmul.mubr.bf16.gmra.mrb[100].mxu0 %v7929_v9  ;;  %3615 = vmatmul.mubr.bf16.gmra.mrb[228].mxu1 %v7929_v9  ;;  %v6337_v9 = vld [vmem:[%s8849_s7 + $0x54] ss:$8 sps:$4 sm:$0xff]  }
 0x30d   : > { %3511 = vmatprep.mubr.bf16.mxu0 %v6659_v13  ;;  %3624 = vmatprep.mubr.bf16.mxu1 %v6659_v13 }
 0x30e   : > { %4662 = vmatpush1.bf16.msra.mxu0 %v6326_v25 }
 0x30f   : > { %4663 = vmatprep.subr.bf16.mxu0 %v6331_v11 }
 0x312   : > { %4664 = vmatpush1.bf16.msra.mxu0 %v6329_v12 }
 0x313   : > { %4665 = vmatprep.subr.bf16.mxu0 %v6334_v41 }
 0x314   : > { %3512 = vmatmul.mubr.bf16.gmra.mrb[104].mxu0 %v7961_v48  ;;  %3625 = vmatmul.mubr.bf16.gmra.mrb[232].mxu1 %v7961_v48  ;;  %v6343_v48 = vld [vmem:[%s8849_s7 + $0x74] ss:$8 sps:$4 sm:$0xff]  }
 0x315   : > { %3521 = vmatprep.mubr.bf16.mxu0 %v6659_v13  ;;  %3634 = vmatprep.mubr.bf16.mxu1 %v6659_v13 }
 0x316   : > { %4666 = vmatpush1.bf16.msra.mxu0 %v6332_v45 }
 0x317   : > { %4667 = vmatprep.subr.bf16.mxu0 %v6337_v9 }
 0x31a   : > { %4668 = vmatpush1.bf16.msra.mxu0 %v6335_v42  ;;  %v6368_v42 = vld [vmem:[%s8849_s7 + $0x100] ss:$8 sps:$4 sm:$0xff]  }
 0x31b   : > { %4669 = vmatprep.subr.bf16.mxu0 %v6340_v5 }
 0x31c   : > { %3522 = vmatmul.mubr.bf16.gmra.mrb[108].mxu0 %v7993_v22  ;;  %3635 = vmatmul.mubr.bf16.gmra.mrb[236].mxu1 %v7993_v22  ;;  %v6349_v22 = vld [vmem:[%s8849_s7 + $0x94] ss:$8 sps:$4 sm:$0xff]  }
 0x31d   : > { %3531 = vmatprep.mubr.bf16.mxu0 %v6659_v13  ;;  %3644 = vmatprep.mubr.bf16.mxu1 %v6659_v13 }
 0x31e   : > { %4670 = vmatpush1.bf16.msra.mxu0 %v6338_v50 }
 0x31f   : > { %4671 = vmatprep.subr.bf16.mxu0 %v6343_v48 }
 0x322   : > { %4672 = vmatpush1.bf16.msra.mxu0 %v6341_v49 }
 0x323   : > { %4673 = vmatprep.subr.bf16.mxu0 %v6346_v40  ;;  %v6373_v40 = vld [vmem:[%s8849_s7 + $0x114] ss:$8 sps:$4 sm:$0xff]  }
 0x324   : > { %3532 = vmatmul.mubr.bf16.gmra.mrb[112].mxu0 %v8004_v21  ;;  %3645 = vmatmul.mubr.bf16.gmra.mrb[240].mxu1 %v8004_v21  ;;  %v6359_v21 = vld [vmem:[%s8849_s7 + $0xd0] ss:$8 sps:$4 sm:$0xff]  }
 0x325   : > { %3541 = vmatprep.mubr.bf16.mxu0 %v6659_v13  ;;  %3654 = vmatprep.mubr.bf16.mxu1 %v6659_v13 }
 0x326   : > { %4674 = vmatpush1.bf16.msra.mxu0 %v6344_v51 }
 0x327   : > { %4675 = vmatprep.subr.bf16.mxu0 %v6349_v22 }
 0x32a   : > { %4676 = vmatpush1.bf16.msra.mxu0 %v6347_v54 }
 0x32b   : > { %4677 = vmatprep.subr.bf16.mxu0 %v6352_v37 }
 0x32c   : > { %3542 = vmatmul.mubr.bf16.gmra.mrb[116].mxu0 %v8012_v31  ;;  %3655 = vmatmul.mubr.bf16.gmra.mrb[244].mxu1 %v8012_v31  ;;  %v8181_v31 = vrot.slane %v8163_v62, %v502_v47 }
 0x32d   : > { %3551 = vmatprep.mubr.bf16.mxu0 %v6659_v13  ;;  %3664 = vmatprep.mubr.bf16.mxu1 %v6659_v13 }
 0x32e   : > { %4678 = vmatpush1.bf16.msra.mxu0 %v6350_v57 }
 0x32f   : > { %4679 = vmatprep.subr.bf16.mxu0 %v6355_v61 }
 0x332   : > { %4680 = vmatpush1.bf16.msra.mxu0 %v6353_v30 }
 0x333   : > { %4681 = vmatprep.subr.bf16.mxu0 %v6358_v29 }
 0x334   : > { %3552 = vmatmul.mubr.bf16.gmra.mrb[120].mxu0 %v8020_v36  ;;  %3665 = vmatmul.mubr.bf16.gmra.mrb[248].mxu1 %v8020_v36 }
 0x335   : > { %3561 = vmatprep.mubr.bf16.mxu0 %v6659_v13  ;;  %3674 = vmatprep.mubr.bf16.mxu1 %v6659_v13  ;;  %v6367_v13 = vld [vmem:[%s8849_s7 + $0xf4] ss:$8 sps:$4 sm:$0xff]  }
 0x336   : > { %4682 = vmatpush1.bf16.msra.mxu0 %v6356_v17 }
 0x337   : > { %4683 = vmatprep.subr.bf16.mxu0 %v6361_v63 }
 0x33a   : > { %4684 = vmatpush1.bf16.msra.mxu0 %v6359_v21  ;;  %v6371_v21 = vld [vmem:[%s8849_s7 + $0x110] ss:$8 sps:$4 sm:$0xff]  }
 0x33b   : > { %4685 = vmatprep.subr.bf16.mxu0 %v6364_v8 }
 0x33c   : > { %3562 = vmatmul.mubr.bf16.gmra.mrb[124].mxu0 %v8028_v16  ;;  %3675 = vmatmul.mubr.bf16.gmra.mrb[252].mxu1 %v8028_v16 }
 0x33e   : > { %4686 = vmatpush1.bf16.msra.mxu0 %v6362_v14 }
 0x33f   : > { %4687 = vmatprep.subr.bf16.mxu0 %v6367_v13 }
 0x342   : > { %4688 = vmatpush1.bf16.msra.mxu0 %v6365_v2 }
 0x343   : > { %4770 = vmatprep.subr.bf16.mxu0 %v6370_v3  ;;  %v6376_v3 = vld [vmem:[%s8849_s7 + $0x124] ss:$8 sps:$4 sm:$0xff]  }
 0x397   : > { %v3267_v39 = vpop.f32.mrb[64].mxu0  ;;  %v3380_v60 = vpop.f32.mrb[192].mxu1 }
 0x398   : > { %v3268_v23 = vadd.f32 %v3267_v39, %v8167_v58  ;;  %v3381_v32 = vadd.f32 %v3380_v60, %v8172_v55  ;;  %v3269_v35 = vpop.f32.mrb[65].mxu0  ;;  %v3382_v18 = vpop.f32.mrb[193].mxu1 }
 0x399   : > { %v3270_v43 = vadd.f32 %v3269_v35, %v8176_v38  ;;  %v3383_v59 = vadd.f32 %v3382_v18, %v8181_v31  ;;  %v3271_v7 = vpop.f32.mrb[66].mxu0  ;;  %v3384_v36 = vpop.f32.mrb[194].mxu1 }
 0x39a   : > { %v3272_v26 = vadd.f32 %v3271_v7, %v8167_v58  ;;  %v3385_v27 = vadd.f32 %v3384_v36, %v8172_v55  ;;  %v3273_v47 = vpop.f32.mrb[67].mxu0  ;;  %v3386_v34 = vpop.f32.mrb[195].mxu1  ;;  %v3685_v53 = vmax.f32 %v3268_v23, 0.0  ;;  %v3687_v52 = vmax.f32 %v3381_v32, 0.0 }
 0x39b   : > { %v3274_v19 = vadd.f32 %v3273_v47, %v8176_v38  ;;  %v3387_v1 = vadd.f32 %v3386_v34, %v8181_v31  ;;  %v3686_v56 = vmax.f32 %v3270_v43, 0.0  ;;  %v3688_v33 = vmax.f32 %v3383_v59, 0.0 }
 0x39c   : > { %v3693_v46 = vmax.f32 %v3272_v26, 0.0  ;;  %v3695_v16 = vmax.f32 %v3385_v27, 0.0  ;;  %v6374_v26 = vld [vmem:[%s8849_s7 + $0x120] ss:$8 sps:$4 sm:$0xff]  }
 0x39d   : > { %v3694_v44 = vmax.f32 %v3274_v19, 0.0  ;;  %v3696_v28 = vmax.f32 %v3387_v1, 0.0  ;;  %v6379_v1 = vld [vmem:[%s8849_s7 + $0x134] ss:$8 sps:$4 sm:$0xff]  }
 0x39e   : > { %v3813_v25 = vpack.c.bf16 %v3693_v46, %v3685_v53  ;;  %v8191_v11 = vpack.c.bf16 %v3695_v16, %v3687_v52 }
 0x39f   : > { %v3814_v12 = vpack.c.bf16 %v3694_v44, %v3686_v56  ;;  %v8193_v41 = vpack.c.bf16 %v3696_v28, %v3688_v33  ;;  %v3277_v45 = vpop.f32.mrb[68].mxu0  ;;  %v3390_v9 = vpop.f32.mrb[196].mxu1 }
 0x3a0   : > { %v3278_v5 = vadd.f32 %v3277_v45, %v8167_v58  ;;  %v3391_v50 = vadd.f32 %v3390_v9, %v8172_v55  ;;  %v3279_v48 = vpop.f32.mrb[69].mxu0  ;;  %v3392_v49 = vpop.f32.mrb[197].mxu1  ;;  %v6377_v45 = vld [vmem:[%s8849_s7 + $0x130] ss:$8 sps:$4 sm:$0xff]  }
 0x3a1   : > { %v3280_v51 = vadd.f32 %v3279_v48, %v8176_v38  ;;  %v3393_v22 = vadd.f32 %v3392_v49, %v8181_v31  ;;  %v3281_v54 = vpop.f32.mrb[70].mxu0  ;;  %v3394_v37 = vpop.f32.mrb[198].mxu1  ;;  %4689 = vmatprep.mubr.bf16.mxu0 %v3814_v12  ;;  %v6382_v48 = vld [vmem:[%s8849_s7 + $0x144] ss:$8 sps:$4 sm:$0xff]  }
 0x3a2   : > { %v3282_v57 = vadd.f32 %v3281_v54, %v8167_v58  ;;  %v3395_v61 = vadd.f32 %v3394_v37, %v8172_v55  ;;  %v3283_v30 = vpop.f32.mrb[71].mxu0  ;;  %v3396_v29 = vpop.f32.mrb[199].mxu1  ;;  %4690 = vmatmul.mubr.bf16.vlgmr.msra.gmra.mrb[128].mxu0 %v3813_v25  ;;  %v3701_v8 = vmax.f32 %v3278_v5, 0.0  ;;  %v3703_v14 = vmax.f32 %v3391_v50, 0.0 }
 0x3a3   : > { %v3284_v17 = vadd.f32 %v3283_v30, %v8176_v38  ;;  %v3397_v63 = vadd.f32 %v3396_v29, %v8181_v31  ;;  %4771 = vmatpush1.bf16.msra.mxu0 %v6368_v42  ;;  %v3702_v39 = vmax.f32 %v3280_v51, 0.0  ;;  %v3704_v60 = vmax.f32 %v3393_v22, 0.0 }
 0x3a4   : > { %v3709_v13 = vmax.f32 %v3282_v57, 0.0  ;;  %v3711_v2 = vmax.f32 %v3395_v61, 0.0  ;;  %4772 = vmatprep.subr.bf16.mxu0 %v6373_v40 }
 0x3a5   : > { %v3710_v23 = vmax.f32 %v3284_v17, 0.0  ;;  %v3712_v32 = vmax.f32 %v3397_v63, 0.0  ;;  %v6380_v17 = vld [vmem:[%s8849_s7 + $0x140] ss:$8 sps:$4 sm:$0xff]  }
 0x3a6   : > { %v3821_v35 = vpack.c.bf16 %v3709_v13, %v3701_v8  ;;  %v8215_v18 = vpack.c.bf16 %v3711_v2, %v3703_v14  ;;  %v6385_v13 = vld [vmem:[%s8849_s7 + $0x154] ss:$8 sps:$4 sm:$0xff]  }
 0x3a7   : > { %v3822_v43 = vpack.c.bf16 %v3710_v23, %v3702_v39  ;;  %v8217_v59 = vpack.c.bf16 %v3712_v32, %v3704_v60  ;;  %v3287_v7 = vpop.f32.mrb[72].mxu0  ;;  %v3400_v36 = vpop.f32.mrb[200].mxu1  ;;  %4773 = vmatpush1.bf16.msra.mxu0 %v6371_v21 }
 0x3a8   : > { %v3288_v27 = vadd.f32 %v3287_v7, %v8167_v58  ;;  %v3401_v47 = vadd.f32 %v3400_v36, %v8172_v55  ;;  %v3289_v34 = vpop.f32.mrb[73].mxu0  ;;  %v3402_v19 = vpop.f32.mrb[201].mxu1  ;;  %4774 = vmatprep.subr.bf16.mxu0 %v6376_v3 }
 0x3a9   : > { %v3290_v53 = vadd.f32 %v3289_v34, %v8176_v38  ;;  %v3403_v52 = vadd.f32 %v3402_v19, %v8181_v31  ;;  %v3291_v46 = vpop.f32.mrb[74].mxu0  ;;  %v3404_v16 = vpop.f32.mrb[202].mxu1  ;;  %4699 = vmatprep.mubr.bf16.mxu0 %v3822_v43 }
 0x3aa   : > { %v3292_v56 = vadd.f32 %v3291_v46, %v8167_v58  ;;  %v3405_v33 = vadd.f32 %v3404_v16, %v8172_v55  ;;  %v3293_v44 = vpop.f32.mrb[75].mxu0  ;;  %v3406_v28 = vpop.f32.mrb[203].mxu1  ;;  %4700 = vmatmul.mubr.bf16.gmra.mrb[132].mxu0 %v3821_v35  ;;  %v3717_v9 = vmax.f32 %v3288_v27, 0.0  ;;  %v3719_v42 = vmax.f32 %v3401_v47, 0.0 }
 0x3ab   : > { %v3294_v25 = vadd.f32 %v3293_v44, %v8176_v38  ;;  %v3407_v12 = vadd.f32 %v3406_v28, %v8181_v31  ;;  %4775 = vmatpush1.bf16.msra.mxu0 %v6374_v26  ;;  %v3718_v49 = vmax.f32 %v3290_v53, 0.0  ;;  %v3720_v40 = vmax.f32 %v3403_v52, 0.0  ;;  %v6383_v26 = vld [vmem:[%s8849_s7 + $0x150] ss:$8 sps:$4 sm:$0xff]  }
 0x3ac   : > { %v3725_v5 = vmax.f32 %v3292_v56, 0.0  ;;  %v3727_v50 = vmax.f32 %v3405_v33, 0.0  ;;  %4776 = vmatprep.subr.bf16.mxu0 %v6379_v1  ;;  %v6388_v1 = vld [vmem:[%s8849_s7 + $0x164] ss:$8 sps:$4 sm:$0xff]  }
 0x3ad   : > { %v3726_v51 = vmax.f32 %v3294_v25, 0.0  ;;  %v3728_v22 = vmax.f32 %v3407_v12, 0.0 }
 0x3ae   : > { %v3829_v54 = vpack.c.bf16 %v3725_v5, %v3717_v9  ;;  %v8239_v37 = vpack.c.bf16 %v3727_v50, %v3719_v42 }
 0x3af   : > { %v3830_v57 = vpack.c.bf16 %v3726_v51, %v3718_v49  ;;  %v8241_v61 = vpack.c.bf16 %v3728_v22, %v3720_v40  ;;  %v3297_v30 = vpop.f32.mrb[76].mxu0  ;;  %v3410_v29 = vpop.f32.mrb[204].mxu1  ;;  %4777 = vmatpush1.bf16.msra.mxu0 %v6377_v45  ;;  %v6386_v45 = vld [vmem:[%s8849_s7 + $0x160] ss:$8 sps:$4 sm:$0xff]  }
 0x3b0   : > { %v3298_v63 = vadd.f32 %v3297_v30, %v8167_v58  ;;  %v3411_v21 = vadd.f32 %v3410_v29, %v8172_v55  ;;  %v3299_v8 = vpop.f32.mrb[77].mxu0  ;;  %v3412_v14 = vpop.f32.mrb[205].mxu1  ;;  %4778 = vmatprep.subr.bf16.mxu0 %v6382_v48  ;;  %v6391_v48 = vld [vmem:[%s8849_s7 + $0x174] ss:$8 sps:$4 sm:$0xff]  }
 0x3b1   : > { %v3300_v2 = vadd.f32 %v3299_v8, %v8176_v38  ;;  %v3413_v3 = vadd.f32 %v3412_v14, %v8181_v31  ;;  %v3301_v39 = vpop.f32.mrb[78].mxu0  ;;  %v3414_v60 = vpop.f32.mrb[206].mxu1  ;;  %4709 = vmatprep.mubr.bf16.mxu0 %v3830_v57 }
 0x3b2   : > { %v3302_v23 = vadd.f32 %v3301_v39, %v8167_v58  ;;  %v3415_v32 = vadd.f32 %v3414_v60, %v8172_v55  ;;  %v3303_v35 = vpop.f32.mrb[79].mxu0  ;;  %v3416_v43 = vpop.f32.mrb[207].mxu1  ;;  %4710 = vmatmul.mubr.bf16.gmra.mrb[136].mxu0 %v3829_v54  ;;  %v3733_v27 = vmax.f32 %v3298_v63, 0.0  ;;  %v3735_v47 = vmax.f32 %v3411_v21, 0.0  ;;  %v6389_v21 = vld [vmem:[%s8849_s7 + $0x170] ss:$8 sps:$4 sm:$0xff]  }
 0x3b3   : > { %v3304_v7 = vadd.f32 %v3303_v35, %v8176_v38  ;;  %v3417_v36 = vadd.f32 %v3416_v43, %v8181_v31  ;;  %4779 = vmatpush1.bf16.msra.mxu0 %v6380_v17  ;;  %v3734_v53 = vmax.f32 %v3300_v2, 0.0  ;;  %v3736_v52 = vmax.f32 %v3413_v3, 0.0  ;;  %v6394_v3 = vld [vmem:[%s8849_s7 + $0x184] ss:$8 sps:$4 sm:$0xff]  }
 0x3b4   : > { %v3741_v34 = vmax.f32 %v3302_v23, 0.0  ;;  %v3743_v19 = vmax.f32 %v3415_v32, 0.0  ;;  %4780 = vmatprep.subr.bf16.mxu0 %v6385_v13 }
 0x3b5   : > { %v3742_v46 = vmax.f32 %v3304_v7, 0.0  ;;  %v3744_v16 = vmax.f32 %v3417_v36, 0.0 }
 0x3b6   : > { %v3837_v56 = vpack.c.bf16 %v3741_v34, %v3733_v27  ;;  %v8263_v33 = vpack.c.bf16 %v3743_v19, %v3735_v47  ;;  %v6392_v47 = vld [vmem:[%s8849_s7 + $0x180] ss:$8 sps:$4 sm:$0xff]  }
 0x3b7   : > { %v3838_v44 = vpack.c.bf16 %v3742_v46, %v3734_v53  ;;  %v8265_v28 = vpack.c.bf16 %v3744_v16, %v3736_v52  ;;  %v3307_v25 = vpop.f32.mrb[80].mxu0  ;;  %v3420_v12 = vpop.f32.mrb[208].mxu1  ;;  %4781 = vmatpush1.bf16.msra.mxu0 %v6383_v26  ;;  %v6397_v52 = vld [vmem:[%s8849_s7 + $0x194] ss:$8 sps:$4 sm:$0xff]  }
 0x3b8   : > { %v3308_v9 = vadd.f32 %v3307_v25, %v8167_v58  ;;  %v3421_v42 = vadd.f32 %v3420_v12, %v8172_v55  ;;  %v3309_v5 = vpop.f32.mrb[81].mxu0  ;;  %v3422_v50 = vpop.f32.mrb[209].mxu1  ;;  %4782 = vmatprep.subr.bf16.mxu0 %v6388_v1 }
 0x3b9   : > { %v3310_v49 = vadd.f32 %v3309_v5, %v8176_v38  ;;  %v3423_v40 = vadd.f32 %v3422_v50, %v8181_v31  ;;  %v3311_v51 = vpop.f32.mrb[82].mxu0  ;;  %v3424_v22 = vpop.f32.mrb[210].mxu1  ;;  %4719 = vmatprep.mubr.bf16.mxu0 %v3838_v44  ;;  %v6395_v50 = vld [vmem:[%s8849_s7 + $0x190] ss:$8 sps:$4 sm:$0xff]  }
 0x3ba   : > { %v3312_v54 = vadd.f32 %v3311_v51, %v8167_v58  ;;  %v3425_v57 = vadd.f32 %v3424_v22, %v8172_v55  ;;  %v3313_v30 = vpop.f32.mrb[83].mxu0  ;;  %v3426_v29 = vpop.f32.mrb[211].mxu1  ;;  %4720 = vmatmul.mubr.bf16.gmra.mrb[140].mxu0 %v3837_v56  ;;  %v3749_v8 = vmax.f32 %v3308_v9, 0.0  ;;  %v3751_v14 = vmax.f32 %v3421_v42, 0.0  ;;  %v6400_v22 = vld [vmem:[%s8849_s7 + $0x1a4] ss:$8 sps:$4 sm:$0xff]  }
 0x3bb   : > { %v3314_v17 = vadd.f32 %v3313_v30, %v8176_v38  ;;  %v3427_v63 = vadd.f32 %v3426_v29, %v8181_v31  ;;  %4783 = vmatpush1.bf16.msra.mxu0 %v6386_v45  ;;  %v3750_v39 = vmax.f32 %v3310_v49, 0.0  ;;  %v3752_v60 = vmax.f32 %v3423_v40, 0.0 }
 0x3bc   : > { %v3757_v13 = vmax.f32 %v3312_v54, 0.0  ;;  %v3759_v2 = vmax.f32 %v3425_v57, 0.0  ;;  %4784 = vmatprep.subr.bf16.mxu0 %v6391_v48 }
 0x3bd   : > { %v3758_v23 = vmax.f32 %v3314_v17, 0.0  ;;  %v3760_v32 = vmax.f32 %v3427_v63, 0.0 }
 0x3be   : > { %v3845_v35 = vpack.c.bf16 %v3757_v13, %v3749_v8  ;;  %v8287_v43 = vpack.c.bf16 %v3759_v2, %v3751_v14  ;;  %v6398_v2 = vld [vmem:[%s8849_s7 + $0x1a0] ss:$8 sps:$4 sm:$0xff]  }
 0x3bf   : > { %v3846_v7 = vpack.c.bf16 %v3758_v23, %v3750_v39  ;;  %v8289_v36 = vpack.c.bf16 %v3760_v32, %v3752_v60  ;;  %v3317_v26 = vpop.f32.mrb[84].mxu0  ;;  %v3430_v27 = vpop.f32.mrb[212].mxu1  ;;  %4785 = vmatpush1.bf16.msra.mxu0 %v6389_v21  ;;  %v6403_v32 = vld [vmem:[%s8849_s7 + $0x1b4] ss:$8 sps:$4 sm:$0xff]  }
 0x3c0   : > { %v3318_v34 = vadd.f32 %v3317_v26, %v8167_v58  ;;  %v3431_v19 = vadd.f32 %v3430_v27, %v8172_v55  ;;  %v3319_v1 = vpop.f32.mrb[85].mxu0  ;;  %v3432_v53 = vpop.f32.mrb[213].mxu1  ;;  %4786 = vmatprep.subr.bf16.mxu0 %v6394_v3 }
 0x3c1   : > { %v3320_v46 = vadd.f32 %v3319_v1, %v8176_v38  ;;  %v3433_v16 = vadd.f32 %v3432_v53, %v8181_v31  ;;  %v3321_v56 = vpop.f32.mrb[86].mxu0  ;;  %v3434_v44 = vpop.f32.mrb[214].mxu1  ;;  %4729 = vmatprep.mubr.bf16.mxu0 %v3846_v7 }
 0x3c2   : > { %v3322_v25 = vadd.f32 %v3321_v56, %v8167_v58  ;;  %v3435_v12 = vadd.f32 %v3434_v44, %v8172_v55  ;;  %v3323_v45 = vpop.f32.mrb[87].mxu0  ;;  %v3436_v9 = vpop.f32.mrb[215].mxu1  ;;  %4730 = vmatmul.mubr.bf16.gmra.mrb[144].mxu0 %v3845_v35  ;;  %v3765_v48 = vmax.f32 %v3318_v34, 0.0  ;;  %v3767_v49 = vmax.f32 %v3431_v19, 0.0 }
 0x3c3   : > { %v3324_v42 = vadd.f32 %v3323_v45, %v8176_v38  ;;  %v3437_v5 = vadd.f32 %v3436_v9, %v8181_v31  ;;  %4787 = vmatpush1.bf16.msra.mxu0 %v6392_v47  ;;  %v3766_v54 = vmax.f32 %v3320_v46, 0.0  ;;  %v3768_v57 = vmax.f32 %v3433_v16, 0.0  ;;  %v6401_v46 = vld [vmem:[%s8849_s7 + $0x1b0] ss:$8 sps:$4 sm:$0xff]  }
 0x3c4   : > { %v3773_v40 = vmax.f32 %v3322_v25, 0.0  ;;  %v3775_v51 = vmax.f32 %v3435_v12, 0.0  ;;  %4788 = vmatprep.subr.bf16.mxu0 %v6397_v52  ;;  %v6406_v12 = vld [vmem:[%s8849_s7 + $0x1c4] ss:$8 sps:$4 sm:$0xff]  }
 0x3c5   : > { %v3774_v30 = vmax.f32 %v3324_v42, 0.0  ;;  %v3776_v29 = vmax.f32 %v3437_v5, 0.0 }
 0x3c6   : > { %v3853_v17 = vpack.c.bf16 %v3773_v40, %v3765_v48  ;;  %v8311_v63 = vpack.c.bf16 %v3775_v51, %v3767_v49 }
 0x3c7   : > { %v3854_v21 = vpack.c.bf16 %v3774_v30, %v3766_v54  ;;  %v8313_v8 = vpack.c.bf16 %v3776_v29, %v3768_v57  ;;  %v3327_v14 = vpop.f32.mrb[88].mxu0  ;;  %v3440_v13 = vpop.f32.mrb[216].mxu1  ;;  %4789 = vmatpush1.bf16.msra.mxu0 %v6395_v50  ;;  %v6404_v54 = vld [vmem:[%s8849_s7 + $0x1c0] ss:$8 sps:$4 sm:$0xff]  }
 0x3c8   : > { %v3328_v3 = vadd.f32 %v3327_v14, %v8167_v58  ;;  %v3441_v39 = vadd.f32 %v3440_v13, %v8172_v55  ;;  %v3329_v60 = vpop.f32.mrb[89].mxu0  ;;  %v3442_v23 = vpop.f32.mrb[217].mxu1  ;;  %4790 = vmatprep.subr.bf16.mxu0 %v6400_v22 }
 0x3c9   : > { %v3330_v35 = vadd.f32 %v3329_v60, %v8176_v38  ;;  %v3443_v7 = vadd.f32 %v3442_v23, %v8181_v31  ;;  %v3331_v26 = vpop.f32.mrb[90].mxu0  ;;  %v3444_v27 = vpop.f32.mrb[218].mxu1  ;;  %4739 = vmatprep.mubr.bf16.mxu0 %v3854_v21  ;;  %v6409_v21 = vld [vmem:[%s8849_s7 + $0x1d4] ss:$8 sps:$4 sm:$0xff]  }
 0x3ca   : > { %v3332_v47 = vadd.f32 %v3331_v26, %v8167_v58  ;;  %v3445_v34 = vadd.f32 %v3444_v27, %v8172_v55  ;;  %v3333_v19 = vpop.f32.mrb[91].mxu0  ;;  %v3446_v1 = vpop.f32.mrb[219].mxu1  ;;  %4740 = vmatmul.mubr.bf16.gmra.mrb[148].mxu0 %v3853_v17  ;;  %v3781_v16 = vmax.f32 %v3328_v3, 0.0  ;;  %v3783_v56 = vmax.f32 %v3441_v39, 0.0 }
 0x3cb   : > { %v3334_v53 = vadd.f32 %v3333_v19, %v8176_v38  ;;  %v3447_v52 = vadd.f32 %v3446_v1, %v8181_v31  ;;  %4791 = vmatpush1.bf16.msra.mxu0 %v6398_v2  ;;  %v3782_v45 = vmax.f32 %v3330_v35, 0.0  ;;  %v3784_v9 = vmax.f32 %v3443_v7, 0.0 }
 0x3cc   : > { %v3789_v44 = vmax.f32 %v3332_v47, 0.0  ;;  %v3791_v25 = vmax.f32 %v3445_v34, 0.0  ;;  %4792 = vmatprep.subr.bf16.mxu0 %v6403_v32  ;;  %v8354_v35 = vrot.slane %v8163_v62, %v506_v4  ;;  %v8359_v7 = vrot.slane %v8163_v62, %v514_v6 }
 0x3cd   : > { %v3790_v42 = vmax.f32 %v3334_v53, 0.0  ;;  %v3792_v5 = vmax.f32 %v3447_v52, 0.0  ;;  %v8374_v4 = vrot.slane %v8163_v62, %v518_v10 }
 0x3ce   : > { %v3861_v50 = vpack.c.bf16 %v3789_v44, %v3781_v16  ;;  %v8335_v48 = vpack.c.bf16 %v3791_v25, %v3783_v56  ;;  %v6410_v56 = vld [vmem:[%s8849_s7 + $0x1e0] ss:$8 sps:$4 sm:$0xff]  }
 0x3cf   : > { %v3862_v49 = vpack.c.bf16 %v3790_v42, %v3782_v45  ;;  %v8337_v40 = vpack.c.bf16 %v3792_v5, %v3784_v9  ;;  %v3337_v51 = vpop.f32.mrb[92].mxu0  ;;  %v3450_v22 = vpop.f32.mrb[220].mxu1  ;;  %4793 = vmatpush1.bf16.msra.mxu0 %v6401_v46  ;;  %v6415_v9 = vld [vmem:[%s8849_s7 + $0x1f4] ss:$8 sps:$4 sm:$0xff]  }
 0x3d0   : > { %v3338_v57 = vadd.f32 %v3337_v51, %v8167_v58  ;;  %v3451_v30 = vadd.f32 %v3450_v22, %v8172_v55  ;;  %v3339_v29 = vpop.f32.mrb[93].mxu0  ;;  %v3452_v17 = vpop.f32.mrb[221].mxu1  ;;  %4794 = vmatprep.subr.bf16.mxu0 %v6406_v12 }
 0x3d1   : > { %v3340_v14 = vadd.f32 %v3339_v29, %v8176_v38  ;;  %v3453_v13 = vadd.f32 %v3452_v17, %v8181_v31  ;;  %v3341_v2 = vpop.f32.mrb[94].mxu0  ;;  %v3454_v3 = vpop.f32.mrb[222].mxu1  ;;  %4749 = vmatprep.mubr.bf16.mxu0 %v3862_v49  ;;  %v6413_v17 = vld [vmem:[%s8849_s7 + $0x1f0] ss:$8 sps:$4 sm:$0xff]  }
 0x3d2   : > { %v3342_v39 = vadd.f32 %v3341_v2, %v8167_v58  ;;  %v3455_v60 = vadd.f32 %v3454_v3, %v8172_v55  ;;  %v3343_v23 = vpop.f32.mrb[95].mxu0  ;;  %v3456_v32 = vpop.f32.mrb[223].mxu1  ;;  %4750 = vmatmul.mubr.bf16.gmra.mrb[152].mxu0 %v3861_v50  ;;  %v6407_v58 = vld [vmem:[%s8849_s7 + $0x1d0] ss:$8 sps:$4 sm:$0xff]   ;;  %v8369_v55 = vrot.slane %v8163_v62, %v510_v0  ;;  %v3797_v6 = vmax.f32 %v3338_v57, 0.0 }
 0x3d3   : > { %v3344_v26 = vadd.f32 %v3343_v23, %v8176_v38  ;;  %v3457_v27 = vadd.f32 %v3456_v32, %v8181_v31  ;;  %4795 = vmatpush1.bf16.msra.mxu0 %v6404_v54  ;;  %v3799_v47 = vmax.f32 %v3451_v30, 0.0  ;;  %v6412_v31 = vld [vmem:[%s8849_s7 + $0x1e4] ss:$8 sps:$4 sm:$0xff]   ;;  %v3798_v19 = vmax.f32 %v3340_v14, 0.0 }
 0x3d4   : > { %v3805_v38 = vmax.f32 %v3342_v39, 0.0  ;;  %v3807_v34 = vmax.f32 %v3455_v60, 0.0  ;;  %4796 = vmatprep.subr.bf16.mxu0 %v6409_v21  ;;  %v3800_v1 = vmax.f32 %v3453_v13, 0.0  ;;  %v6418_v3 = vld [vmem:[%s8849_s7 + $0x204] ss:$8 sps:$4 sm:$0xff]  }
 0x3d5   : > { %v3806_v53 = vmax.f32 %v3344_v26, 0.0  ;;  %v3808_v52 = vmax.f32 %v3457_v27, 0.0 }
 0x3d6   : > { %v3869_v0 = vpack.c.bf16 %v3805_v38, %v3797_v6  ;;  %v8379_v46 = vpack.c.bf16 %v3807_v34, %v3799_v47  ;;  %v6416_v38 = vld [vmem:[%s8849_s7 + $0x200] ss:$8 sps:$4 sm:$0xff]  }
 0x3d7   : > { %v3870_v20 = vpack.c.bf16 %v3806_v53, %v3798_v19  ;;  %v8381_v16 = vpack.c.bf16 %v3808_v52, %v3800_v1  ;;  %v3493_v10 = vpop.f32.mrb[96].mxu0  ;;  %v3606_v62 = vpop.f32.mrb[224].mxu1  ;;  %4797 = vmatpush1.bf16.msra.mxu0 %v6407_v58  ;;  %v6421_v53 = vld [vmem:[%s8849_s7 + $0x214] ss:$8 sps:$4 sm:$0xff]  }
 0x3d8   : > { %v3494_v44 = vadd.f32 %v3493_v10, %v8354_v35  ;;  %v3607_v25 = vadd.f32 %v3606_v62, %v8359_v7  ;;  %v3495_v12 = vpop.f32.mrb[97].mxu0  ;;  %v3608_v45 = vpop.f32.mrb[225].mxu1  ;;  %4798 = vmatprep.subr.bf16.mxu0 %v6412_v31 }
 0x3d9   : > { %v3496_v42 = vadd.f32 %v3495_v12, %v8369_v55  ;;  %v3609_v5 = vadd.f32 %v3608_v45, %v8374_v4  ;;  %v3497_v50 = vpop.f32.mrb[98].mxu0  ;;  %v3610_v49 = vpop.f32.mrb[226].mxu1  ;;  %4759 = vmatprep.mubr.bf16.mxu0 %v3870_v20 }
 0x3da   : > { %v3498_v51 = vadd.f32 %v3497_v50, %v8354_v35  ;;  %v3611_v22 = vadd.f32 %v3610_v49, %v8359_v7  ;;  %v3499_v54 = vpop.f32.mrb[99].mxu0  ;;  %v3612_v57 = vpop.f32.mrb[227].mxu1  ;;  %4760 = vmatmul.mubr.bf16.gmra.mrb[156].mxu0 %v3869_v0  ;;  %v3689_v21 = vmax.f32 %v3494_v44, 0.0  ;;  %v3691_v14 = vmax.f32 %v3607_v25, 0.0 }
 0x3db   : > { %v3500_v30 = vadd.f32 %v3499_v54, %v8369_v55  ;;  %v3613_v29 = vadd.f32 %v3612_v57, %v8374_v4  ;;  %4799 = vmatpush1.bf16.msra.mxu0 %v6410_v56  ;;  %4802 = vmatprep.mubr.bf16.mxu0 %v8193_v41  ;;  %v3690_v39 = vmax.f32 %v3496_v42, 0.0  ;;  %v3692_v60 = vmax.f32 %v3609_v5, 0.0 }
 0x3dc   : > { %v3697_v13 = vmax.f32 %v3498_v51, 0.0  ;;  %v3699_v2 = vmax.f32 %v3611_v22, 0.0  ;;  %4800 = vmatprep.subr.bf16.mxu0 %v6415_v9  ;;  %v6419_v9 = vld [vmem:[%s8849_s7 + $0x210] ss:$8 sps:$4 sm:$0xff]  }
 0x3dd   : > { %v3698_v23 = vmax.f32 %v3500_v30, 0.0  ;;  %v3700_v32 = vmax.f32 %v3613_v29, 0.0 }
 0x3de   : > { %v8404_v26 = vpack.c.bf16 %v3697_v13, %v3689_v21  ;;  %v8406_v41 = vpack.c.bf16 %v3699_v2, %v3691_v14  ;;  %v6422_v13 = vld [vmem:[%s8849_s7 + $0x220] ss:$8 sps:$4 sm:$0xff]  }
 0x3df   : > { %v8408_v27 = vpack.c.bf16 %v3698_v23, %v3690_v39  ;;  %v8410_v58 = vpack.c.bf16 %v3700_v32, %v3692_v60  ;;  %v3503_v6 = vpop.f32.mrb[100].mxu0  ;;  %v3616_v47 = vpop.f32.mrb[228].mxu1  ;;  %4801 = vmatpush1.bf16.msra.mxu0 %v6413_v17  ;;  %v6427_v23 = vld [vmem:[%s8849_s7 + $0x234] ss:$8 sps:$4 sm:$0xff]  }
 0x3e0   : > { %v3504_v34 = vadd.f32 %v3503_v6, %v8354_v35  ;;  %v3617_v31 = vadd.f32 %v3616_v47, %v8359_v7  ;;  %v3505_v19 = vpop.f32.mrb[101].mxu0  ;;  %v3618_v1 = vpop.f32.mrb[229].mxu1  ;;  %4883 = vmatprep.subr.bf16.mxu0 %v6418_v3 }
 0x3e1   : > { %v3506_v52 = vadd.f32 %v3505_v19, %v8369_v55  ;;  %v3619_v0 = vadd.f32 %v3618_v1, %v8374_v4  ;;  %v3507_v20 = vpop.f32.mrb[102].mxu0  ;;  %v3620_v10 = vpop.f32.mrb[230].mxu1 }
 0x3e2   : > { %v3508_v62 = vadd.f32 %v3507_v20, %v8354_v35  ;;  %v3621_v56 = vadd.f32 %v3620_v10, %v8359_v7  ;;  %v3509_v44 = vpop.f32.mrb[103].mxu0  ;;  %v3622_v25 = vpop.f32.mrb[231].mxu1  ;;  %4803 = vmatmul.mubr.bf16.vlgmr.msra.gmra.mrb[128].mxu0 %v8191_v11  ;;  %v3705_v42 = vmax.f32 %v3504_v34, 0.0  ;;  %v3707_v5 = vmax.f32 %v3617_v31, 0.0  ;;  %v6424_v11 = vld [vmem:[%s8849_s7 + $0x224] ss:$8 sps:$4 sm:$0xff]  }
 0x3e3   : > { %v3510_v12 = vadd.f32 %v3509_v44, %v8369_v55  ;;  %v3623_v45 = vadd.f32 %v3622_v25, %v8374_v4  ;;  %4812 = vmatprep.mubr.bf16.mxu0 %v8217_v59  ;;  %4884 = vmatpush1.bf16.msra.mxu0 %v6416_v38  ;;  %v3706_v51 = vmax.f32 %v3506_v52, 0.0  ;;  %v3708_v22 = vmax.f32 %v3619_v0, 0.0  ;;  %v6425_v0 = vld [vmem:[%s8849_s7 + $0x230] ss:$8 sps:$4 sm:$0xff]  }
 0x3e4   : > { %v3713_v50 = vmax.f32 %v3508_v62, 0.0  ;;  %v3715_v49 = vmax.f32 %v3621_v56, 0.0  ;;  %4885 = vmatprep.subr.bf16.mxu0 %v6421_v53 }
 0x3e5   : > { %v3714_v54 = vmax.f32 %v3510_v12, 0.0  ;;  %v3716_v57 = vmax.f32 %v3623_v45, 0.0 }
 0x3e6   : > { %v8434_v30 = vpack.c.bf16 %v3713_v50, %v3705_v42  ;;  %v8436_v59 = vpack.c.bf16 %v3715_v49, %v3707_v5 }
 0x3e7   : > { %v8438_v29 = vpack.c.bf16 %v3714_v54, %v3706_v51  ;;  %v8440_v17 = vpack.c.bf16 %v3716_v57, %v3708_v22  ;;  %v3513_v21 = vpop.f32.mrb[104].mxu0  ;;  %v3626_v14 = vpop.f32.mrb[232].mxu1  ;;  %4886 = vmatpush1.bf16.msra.mxu0 %v6419_v9 }
 0x3e8   : > { %v3514_v2 = vadd.f32 %v3513_v21, %v8354_v35  ;;  %v3627_v3 = vadd.f32 %v3626_v14, %v8359_v7  ;;  %v3515_v39 = vpop.f32.mrb[105].mxu0  ;;  %v3628_v60 = vpop.f32.mrb[233].mxu1  ;;  %4887 = vmatprep.subr.bf16.mxu0 %v6424_v11  ;;  %v6428_v11 = vld [vmem:[%s8849_s7 + $0x240] ss:$8 sps:$4 sm:$0xff]   ;;  %v6433_v21 = vld [vmem:[%s8849_s7 + $0x254] ss:$8 sps:$4 sm:$0xff]  }
 0x3e9   : > { %v3516_v32 = vadd.f32 %v3515_v39, %v8369_v55  ;;  %v3629_v6 = vadd.f32 %v3628_v60, %v8374_v4  ;;  %v3517_v47 = vpop.f32.mrb[106].mxu0  ;;  %v3630_v38 = vpop.f32.mrb[234].mxu1 }
 0x3ea   : > { %v3518_v34 = vadd.f32 %v3517_v47, %v8354_v35  ;;  %v3631_v31 = vadd.f32 %v3630_v38, %v8359_v7  ;;  %v3519_v19 = vpop.f32.mrb[107].mxu0  ;;  %v3632_v1 = vpop.f32.mrb[235].mxu1  ;;  %4813 = vmatmul.mubr.bf16.gmra.mrb[132].mxu0 %v8215_v18  ;;  %v3721_v20 = vmax.f32 %v3514_v2, 0.0  ;;  %v3723_v10 = vmax.f32 %v3627_v3, 0.0  ;;  %v6430_v18 = vld [vmem:[%s8849_s7 + $0x244] ss:$8 sps:$4 sm:$0xff]  }
 0x3eb   : > { %v3520_v53 = vadd.f32 %v3519_v19, %v8369_v55  ;;  %v3633_v52 = vadd.f32 %v3632_v1, %v8374_v4  ;;  %4822 = vmatprep.mubr.bf16.mxu0 %v8241_v61  ;;  %4888 = vmatpush1.bf16.msra.mxu0 %v6422_v13  ;;  %v3722_v44 = vmax.f32 %v3516_v32, 0.0  ;;  %v3724_v25 = vmax.f32 %v3629_v6, 0.0  ;;  %v6431_v38 = vld [vmem:[%s8849_s7 + $0x250] ss:$8 sps:$4 sm:$0xff]  }
 0x3ec   : > { %v3729_v62 = vmax.f32 %v3518_v34, 0.0  ;;  %v3731_v56 = vmax.f32 %v3631_v31, 0.0  ;;  %4889 = vmatprep.subr.bf16.mxu0 %v6427_v23 }
 0x3ed   : > { %v3730_v12 = vmax.f32 %v3520_v53, 0.0  ;;  %v3732_v45 = vmax.f32 %v3633_v52, 0.0 }
 0x3ee   : > { %v8464_v9 = vpack.c.bf16 %v3729_v62, %v3721_v20  ;;  %v8466_v61 = vpack.c.bf16 %v3731_v56, %v3723_v10 }
 0x3ef   : > { %v8468_v42 = vpack.c.bf16 %v3730_v12, %v3722_v44  ;;  %v8470_v5 = vpack.c.bf16 %v3732_v45, %v3724_v25  ;;  %v3523_v50 = vpop.f32.mrb[108].mxu0  ;;  %v3636_v49 = vpop.f32.mrb[236].mxu1  ;;  %4890 = vmatpush1.bf16.msra.mxu0 %v6425_v0  ;;  %v6434_v25 = vld [vmem:[%s8849_s7 + $0x260] ss:$8 sps:$4 sm:$0xff]  }
 0x3f0   : > { %v3524_v51 = vadd.f32 %v3523_v50, %v8354_v35  ;;  %v3637_v22 = vadd.f32 %v3636_v49, %v8359_v7  ;;  %v3525_v54 = vpop.f32.mrb[109].mxu0  ;;  %v3638_v57 = vpop.f32.mrb[237].mxu1  ;;  %4891 = vmatprep.subr.bf16.mxu0 %v6430_v18 }
 0x3f1   : > { %v3526_v14 = vadd.f32 %v3525_v54, %v8369_v55  ;;  %v3639_v13 = vadd.f32 %v3638_v57, %v8374_v4  ;;  %v3527_v2 = vpop.f32.mrb[110].mxu0  ;;  %v3640_v3 = vpop.f32.mrb[238].mxu1 }
 0x3f2   : > { %v3528_v39 = vadd.f32 %v3527_v2, %v8354_v35  ;;  %v3641_v60 = vadd.f32 %v3640_v3, %v8359_v7  ;;  %v3529_v23 = vpop.f32.mrb[111].mxu0  ;;  %v3642_v32 = vpop.f32.mrb[239].mxu1  ;;  %4823 = vmatmul.mubr.bf16.gmra.mrb[136].mxu0 %v8239_v37  ;;  %v3737_v34 = vmax.f32 %v3524_v51, 0.0  ;;  %v3739_v31 = vmax.f32 %v3637_v22, 0.0  ;;  %v6436_v37 = vld [vmem:[%s8849_s7 + $0x264] ss:$8 sps:$4 sm:$0xff]  }
 0x3f3   : > { %v3530_v6 = vadd.f32 %v3529_v23, %v8369_v55  ;;  %v3643_v47 = vadd.f32 %v3642_v32, %v8374_v4  ;;  %4832 = vmatprep.mubr.bf16.mxu0 %v8265_v28  ;;  %4892 = vmatpush1.bf16.msra.mxu0 %v6428_v11  ;;  %v3738_v53 = vmax.f32 %v3526_v14, 0.0  ;;  %v3740_v52 = vmax.f32 %v3639_v13, 0.0  ;;  %v6439_v11 = vld [vmem:[%s8849_s7 + $0x274] ss:$8 sps:$4 sm:$0xff]  }
 0x3f4   : > { %v3745_v19 = vmax.f32 %v3528_v39, 0.0  ;;  %v3747_v1 = vmax.f32 %v3641_v60, 0.0  ;;  %4893 = vmatprep.subr.bf16.mxu0 %v6433_v21  ;;  %v6437_v60 = vld [vmem:[%s8849_s7 + $0x270] ss:$8 sps:$4 sm:$0xff]  }
 0x3f5   : > { %v3746_v0 = vmax.f32 %v3530_v6, 0.0  ;;  %v3748_v20 = vmax.f32 %v3643_v47, 0.0 }
 0x3f6   : > { %v8494_v10 = vpack.c.bf16 %v3745_v19, %v3737_v34  ;;  %v8496_v28 = vpack.c.bf16 %v3747_v1, %v3739_v31 }
 0x3f7   : > { %v8498_v62 = vpack.c.bf16 %v3746_v0, %v3738_v53  ;;  %v8500_v56 = vpack.c.bf16 %v3748_v20, %v3740_v52  ;;  %v3533_v18 = vpop.f32.mrb[112].mxu0  ;;  %v3646_v44 = vpop.f32.mrb[240].mxu1  ;;  %4894 = vmatpush1.bf16.msra.mxu0 %v6431_v38  ;;  %v6440_v20 = vld [vmem:[%s8849_s7 + $0x280] ss:$8 sps:$4 sm:$0xff]  }
 0x3f8   : > { %v3534_v12 = vadd.f32 %v3533_v18, %v8354_v35  ;;  %v3647_v45 = vadd.f32 %v3646_v44, %v8359_v7  ;;  %v3535_v50 = vpop.f32.mrb[113].mxu0  ;;  %v3648_v49 = vpop.f32.mrb[241].mxu1  ;;  %4895 = vmatprep.subr.bf16.mxu0 %v6436_v37 }
 0x3f9   : > { %v3536_v51 = vadd.f32 %v3535_v50, %v8369_v55  ;;  %v3649_v22 = vadd.f32 %v3648_v49, %v8374_v4  ;;  %v3537_v54 = vpop.f32.mrb[114].mxu0  ;;  %v3650_v57 = vpop.f32.mrb[242].mxu1 }
 0x3fa   : > { %v3538_v21 = vadd.f32 %v3537_v54, %v8354_v35  ;;  %v3651_v14 = vadd.f32 %v3650_v57, %v8359_v7  ;;  %v3539_v13 = vpop.f32.mrb[115].mxu0  ;;  %v3652_v2 = vpop.f32.mrb[243].mxu1  ;;  %4833 = vmatmul.mubr.bf16.gmra.mrb[140].mxu0 %v8263_v33  ;;  %v3753_v23 = vmax.f32 %v3534_v12, 0.0  ;;  %v3755_v32 = vmax.f32 %v3647_v45, 0.0  ;;  %v6442_v33 = vld [vmem:[%s8849_s7 + $0x284] ss:$8 sps:$4 sm:$0xff]  }
 0x3fb   : > { %v3540_v3 = vadd.f32 %v3539_v13, %v8369_v55  ;;  %v3653_v39 = vadd.f32 %v3652_v2, %v8374_v4  ;;  %4842 = vmatprep.mubr.bf16.mxu0 %v8289_v36  ;;  %4896 = vmatpush1.bf16.msra.mxu0 %v6434_v25  ;;  %v3754_v38 = vmax.f32 %v3536_v51, 0.0  ;;  %v3756_v34 = vmax.f32 %v3649_v22, 0.0  ;;  %v6445_v45 = vld [vmem:[%s8849_s7 + $0x294] ss:$8 sps:$4 sm:$0xff]   ;;  %v6443_v2 = vld [vmem:[%s8849_s7 + $0x290] ss:$8 sps:$4 sm:$0xff]  }
 0x3fc   : > { %v3761_v6 = vmax.f32 %v3538_v21, 0.0  ;;  %v3763_v47 = vmax.f32 %v3651_v14, 0.0  ;;  %4897 = vmatprep.subr.bf16.mxu0 %v6439_v11 }
 0x3fd   : > { %v3762_v31 = vmax.f32 %v3540_v3, 0.0  ;;  %v3764_v19 = vmax.f32 %v3653_v39, 0.0 }
 0x3fe   : > { %v8524_v1 = vpack.c.bf16 %v3761_v6, %v3753_v23  ;;  %v8526_v36 = vpack.c.bf16 %v3763_v47, %v3755_v32 }
 0x3ff   : > { %v8528_v37 = vpack.c.bf16 %v3762_v31, %v3754_v38  ;;  %v8530_v53 = vpack.c.bf16 %v3764_v19, %v3756_v34  ;;  %v3543_v52 = vpop.f32.mrb[116].mxu0  ;;  %v3656_v0 = vpop.f32.mrb[244].mxu1  ;;  %4898 = vmatpush1.bf16.msra.mxu0 %v6437_v60 }
 0x400   : > { %v3544_v18 = vadd.f32 %v3543_v52, %v8354_v35  ;;  %v3657_v44 = vadd.f32 %v3656_v0, %v8359_v7  ;;  %v3545_v25 = vpop.f32.mrb[117].mxu0  ;;  %v3658_v12 = vpop.f32.mrb[245].mxu1  ;;  %4899 = vmatprep.subr.bf16.mxu0 %v6442_v33  ;;  %v6446_v0 = vld [vmem:[%s8849_s7 + $0x2a0] ss:$8 sps:$4 sm:$0xff]  }
 0x401   : > { %v3546_v50 = vadd.f32 %v3545_v25, %v8369_v55  ;;  %v3659_v49 = vadd.f32 %v3658_v12, %v8374_v4  ;;  %v3547_v11 = vpop.f32.mrb[118].mxu0  ;;  %v3660_v51 = vpop.f32.mrb[246].mxu1  ;;  %v6451_v12 = vld [vmem:[%s8849_s7 + $0x2b4] ss:$8 sps:$4 sm:$0xff]  }
 0x402   : > { %v3548_v22 = vadd.f32 %v3547_v11, %v8354_v35  ;;  %v3661_v54 = vadd.f32 %v3660_v51, %v8359_v7  ;;  %v3549_v57 = vpop.f32.mrb[119].mxu0  ;;  %v3662_v21 = vpop.f32.mrb[247].mxu1  ;;  %4843 = vmatmul.mubr.bf16.gmra.mrb[144].mxu0 %v8287_v43  ;;  %v3769_v3 = vmax.f32 %v3544_v18, 0.0  ;;  %v3771_v39 = vmax.f32 %v3657_v44, 0.0  ;;  %v6448_v43 = vld [vmem:[%s8849_s7 + $0x2a4] ss:$8 sps:$4 sm:$0xff]  }
 0x403   : > { %v3550_v14 = vadd.f32 %v3549_v57, %v8369_v55  ;;  %v3663_v13 = vadd.f32 %v3662_v21, %v8374_v4  ;;  %4852 = vmatprep.mubr.bf16.mxu0 %v8313_v8  ;;  %4900 = vmatpush1.bf16.msra.mxu0 %v6440_v20  ;;  %v3770_v32 = vmax.f32 %v3546_v50, 0.0  ;;  %v3772_v6 = vmax.f32 %v3659_v49, 0.0 }
 0x404   : > { %v3777_v60 = vmax.f32 %v3548_v22, 0.0  ;;  %v3779_v23 = vmax.f32 %v3661_v54, 0.0  ;;  %4901 = vmatprep.subr.bf16.mxu0 %v6445_v45 }
 0x405   : > { %v3778_v47 = vmax.f32 %v3550_v14, 0.0  ;;  %v3780_v33 = vmax.f32 %v3663_v13, 0.0  ;;  %v6449_v13 = vld [vmem:[%s8849_s7 + $0x2b0] ss:$8 sps:$4 sm:$0xff]  }
 0x406   : > { %v8554_v38 = vpack.c.bf16 %v3777_v60, %v3769_v3  ;;  %v8556_v8 = vpack.c.bf16 %v3779_v23, %v3771_v39 }
 0x407   : > { %v8558_v34 = vpack.c.bf16 %v3778_v47, %v3770_v32  ;;  %v8560_v31 = vpack.c.bf16 %v3780_v33, %v3772_v6  ;;  %v3553_v19 = vpop.f32.mrb[120].mxu0  ;;  %v3666_v52 = vpop.f32.mrb[248].mxu1  ;;  %4902 = vmatpush1.bf16.msra.mxu0 %v6443_v2 }
 0x408   : > { %v3554_v20 = vadd.f32 %v3553_v19, %v8354_v35  ;;  %v3667_v18 = vadd.f32 %v3666_v52, %v8359_v7  ;;  %v3555_v44 = vpop.f32.mrb[121].mxu0  ;;  %v3668_v25 = vpop.f32.mrb[249].mxu1  ;;  %4903 = vmatprep.subr.bf16.mxu0 %v6448_v43 }
 0x409   : > { %v3556_v45 = vadd.f32 %v3555_v44, %v8369_v55  ;;  %v3669_v50 = vadd.f32 %v3668_v25, %v8374_v4  ;;  %v3557_v49 = vpop.f32.mrb[122].mxu0  ;;  %v3670_v11 = vpop.f32.mrb[250].mxu1 }
 0x40a   : > { %v3558_v51 = vadd.f32 %v3557_v49, %v8354_v35  ;;  %v3671_v22 = vadd.f32 %v3670_v11, %v8359_v7  ;;  %v3559_v54 = vpop.f32.mrb[123].mxu0  ;;  %v3672_v57 = vpop.f32.mrb[251].mxu1  ;;  %4853 = vmatmul.mubr.bf16.gmra.mrb[148].mxu0 %v8311_v63  ;;  %v3785_v2 = vmax.f32 %v3554_v20, 0.0  ;;  %v3787_v3 = vmax.f32 %v3667_v18, 0.0  ;;  %v6454_v63 = vld [vmem:[%s8849_s7 + $0x2c4] ss:$8 sps:$4 sm:$0xff]  }
 0x40b   : > { %v3560_v21 = vadd.f32 %v3559_v54, %v8369_v55  ;;  %v3673_v14 = vadd.f32 %v3672_v57, %v8374_v4  ;;  %4862 = vmatprep.mubr.bf16.mxu0 %v8337_v40  ;;  %4904 = vmatpush1.bf16.msra.mxu0 %v6446_v0  ;;  %v3786_v23 = vmax.f32 %v3556_v45, 0.0  ;;  %v3788_v43 = vmax.f32 %v3669_v50, 0.0  ;;  %v6452_v20 = vld [vmem:[%s8849_s7 + $0x2c0] ss:$8 sps:$4 sm:$0xff]   ;;  %v6457_v45 = vld [vmem:[%s8849_s7 + $0x2d4] ss:$8 sps:$4 sm:$0xff]  }
 0x40c   : > { %v3793_v39 = vmax.f32 %v3558_v51, 0.0  ;;  %v3795_v60 = vmax.f32 %v3671_v22, 0.0  ;;  %4905 = vmatprep.subr.bf16.mxu0 %v6451_v12 }
 0x40d   : > { %v3794_v32 = vmax.f32 %v3560_v21, 0.0  ;;  %v3796_v6 = vmax.f32 %v3673_v14, 0.0 }
 0x40e   : > { %v8584_v47 = vpack.c.bf16 %v3793_v39, %v3785_v2  ;;  %v8586_v40 = vpack.c.bf16 %v3795_v60, %v3787_v3  ;;  %v6455_v2 = vld [vmem:[%s8849_s7 + $0x2d0] ss:$8 sps:$4 sm:$0xff]  }
 0x40f   : > { %v8588_v33 = vpack.c.bf16 %v3794_v32, %v3786_v23  ;;  %v8590_v19 = vpack.c.bf16 %v3796_v6, %v3788_v43  ;;  %v3563_v52 = vpop.f32.mrb[124].mxu0  ;;  %v3676_v0 = vpop.f32.mrb[252].mxu1  ;;  %4906 = vmatpush1.bf16.msra.mxu0 %v6449_v13  ;;  %v6458_v6 = vld [vmem:[%s8849_s7 + $0x2e0] ss:$8 sps:$4 sm:$0xff]  }
 0x410   : > { %v3564_v18 = vadd.f32 %v3563_v52, %v8354_v35  ;;  %v3677_v44 = vadd.f32 %v3676_v0, %v8359_v7  ;;  %v3565_v25 = vpop.f32.mrb[125].mxu0  ;;  %v3678_v12 = vpop.f32.mrb[253].mxu1  ;;  %4907 = vmatprep.subr.bf16.mxu0 %v6454_v63  ;;  %v6463_v52 = vld [vmem:[%s8849_s7 + $0x2f4] ss:$8 sps:$4 sm:$0xff]   ;;  %v6461_v0 = vld [vmem:[%s8849_s7 + $0x2f0] ss:$8 sps:$4 sm:$0xff]  }
 0x411   : > { %v3566_v50 = vadd.f32 %v3565_v25, %v8369_v55  ;;  %v3679_v49 = vadd.f32 %v3678_v12, %v8374_v4  ;;  %v3567_v11 = vpop.f32.mrb[126].mxu0  ;;  %v3680_v51 = vpop.f32.mrb[254].mxu1  ;;  %v6470_v25 = vld [vmem:[%s8849_s7 + $0x320] ss:$8 sps:$4 sm:$0xff]   ;;  %v6478_v12 = vld [vmem:[%s8849_s7 + $0x344] ss:$8 sps:$4 sm:$0xff]  }
 0x412   : > { %v3568_v22 = vadd.f32 %v3567_v11, %v8354_v35  ;;  %v3681_v54 = vadd.f32 %v3680_v51, %v8359_v7  ;;  %v3569_v57 = vpop.f32.mrb[127].mxu0  ;;  %v3682_v21 = vpop.f32.mrb[255].mxu1  ;;  %4863 = vmatmul.mubr.bf16.gmra.mrb[152].mxu0 %v8335_v48  ;;  %v3801_v3 = vmax.f32 %v3564_v18, 0.0  ;;  %v3803_v39 = vmax.f32 %v3677_v44, 0.0  ;;  %v6460_v48 = vld [vmem:[%s8849_s7 + $0x2e4] ss:$8 sps:$4 sm:$0xff]  }
 0x413   : > { %v3570_v14 = vadd.f32 %v3569_v57, %v8369_v55  ;;  %v3683_v13 = vadd.f32 %v3682_v21, %v8374_v4  ;;  %4872 = vmatprep.mubr.bf16.mxu0 %v8381_v16  ;;  %4908 = vmatpush1.bf16.msra.mxu0 %v6452_v20  ;;  %v3802_v7 = vmax.f32 %v3566_v50, 0.0  ;;  %v3804_v55 = vmax.f32 %v3679_v49, 0.0  ;;  %v6466_v20 = vld [vmem:[%s8849_s7 + $0x304] ss:$8 sps:$4 sm:$0xff]   ;;  %v6464_v18 = vld [vmem:[%s8849_s7 + $0x300] ss:$8 sps:$4 sm:$0xff]  }
 0x414   : > { %v3809_v35 = vmax.f32 %v3568_v22, 0.0  ;;  %v3811_v60 = vmax.f32 %v3681_v54, 0.0  ;;  %4909 = vmatprep.subr.bf16.mxu0 %v6457_v45  ;;  %v6472_v44 = vld [vmem:[%s8849_s7 + $0x324] ss:$8 sps:$4 sm:$0xff]   ;;  %v6476_v45 = vld [vmem:[%s8849_s7 + $0x340] ss:$8 sps:$4 sm:$0xff]  }
 0x415   : > { %v3810_v63 = vmax.f32 %v3570_v14, 0.0  ;;  %v3812_v4 = vmax.f32 %v3683_v13, 0.0  ;;  %v6484_v50 = vld [vmem:[%s8849_s7 + $0x364] ss:$8 sps:$4 sm:$0xff]   ;;  %v6482_v49 = vld [vmem:[%s8849_s7 + $0x360] ss:$8 sps:$4 sm:$0xff]  }
 0x416   : > { %v8614_v23 = vpack.c.bf16 %v3809_v35, %v3801_v3  ;;  %v8616_v16 = vpack.c.bf16 %v3811_v60, %v3803_v39  ;;  %v6490_v11 = vld [vmem:[%s8849_s7 + $0x384] ss:$8 sps:$4 sm:$0xff]   ;;  %v6488_v51 = vld [vmem:[%s8849_s7 + $0x380] ss:$8 sps:$4 sm:$0xff]  }
 0x417   : > { %v8618_v43 = vpack.c.bf16 %v3810_v63, %v3802_v7  ;;  %v8620_v32 = vpack.c.bf16 %v3812_v4, %v3804_v55  ;;  %4910 = vmatpush1.bf16.msra.mxu0 %v6455_v2  ;;  %v6496_v22 = vld [vmem:[%s8849_s7 + $0x3a4] ss:$8 sps:$4 sm:$0xff]   ;;  %v6494_v54 = vld [vmem:[%s8849_s7 + $0x3a0] ss:$8 sps:$4 sm:$0xff]   ;;  %v6509_v2 = vld [vmem:[%s8849_s7 + $0x3f0] ss:$8 sps:$4 sm:$0xff]  }
 0x418   : > { %4911 = vmatprep.subr.bf16.mxu0 %v6460_v48  ;;  %v6502_v57 = vld [vmem:[%s8849_s7 + $0x3c4] ss:$8 sps:$4 sm:$0xff]   ;;  %v6500_v21 = vld [vmem:[%s8849_s7 + $0x3c0] ss:$8 sps:$4 sm:$0xff]  }
 0x419   : > { %v6508_v14 = vld [vmem:[%s8849_s7 + $0x3e4] ss:$8 sps:$4 sm:$0xff]   ;;  %v6506_v13 = vld [vmem:[%s8849_s7 + $0x3e0] ss:$8 sps:$4 sm:$0xff]  }
 0x41a   : > { %4873 = vmatmul.mubr.bf16.gmra.mrb[156].mxu0 %v8379_v46  ;;  %v6469_v46 = vld [vmem:[%s8849_s7 + $0x314] ss:$8 sps:$4 sm:$0xff]  }
 0x41b   : > { %4912 = vmatpush1.bf16.msra.mxu0 %v6458_v6  ;;  %4915 = vmatprep.mubr.bf16.mxu0 %v8408_v27  ;;  %v6467_v27 = vld [vmem:[%s8849_s7 + $0x310] ss:$8 sps:$4 sm:$0xff]  }
 0x41c   : > { %4913 = vmatprep.subr.bf16.mxu0 %v6463_v52 }
 0x41f   : > { %4914 = vmatpush1.bf16.msra.mxu0 %v6461_v0 }
 0x420   : > { %4996 = vmatprep.subr.bf16.mxu0 %v6466_v20 }
 0x422   : > { %4916 = vmatmul.mubr.bf16.vlgmr.msra.gmra.mrb[128].mxu0 %v8404_v26  ;;  %v6475_v26 = vld [vmem:[%s8849_s7 + $0x334] ss:$8 sps:$4 sm:$0xff]  }
 0x423   : > { %4925 = vmatprep.mubr.bf16.mxu0 %v8438_v29  ;;  %4997 = vmatpush1.bf16.msra.mxu0 %v6464_v18  ;;  %v6473_v29 = vld [vmem:[%s8849_s7 + $0x330] ss:$8 sps:$4 sm:$0xff]  }
 0x424   : > { %4998 = vmatprep.subr.bf16.mxu0 %v6469_v46 }
 0x427   : > { %4999 = vmatpush1.bf16.msra.mxu0 %v6467_v27 }
 0x428   : > { %5000 = vmatprep.subr.bf16.mxu0 %v6472_v44 }
 0x42a   : > { %4926 = vmatmul.mubr.bf16.gmra.mrb[132].mxu0 %v8434_v30  ;;  %v6481_v30 = vld [vmem:[%s8849_s7 + $0x354] ss:$8 sps:$4 sm:$0xff]  }
 0x42b   : > { %4935 = vmatprep.mubr.bf16.mxu0 %v8468_v42  ;;  %5001 = vmatpush1.bf16.msra.mxu0 %v6470_v25  ;;  %v6479_v42 = vld [vmem:[%s8849_s7 + $0x350] ss:$8 sps:$4 sm:$0xff]  }
 0x42c   : > { %5002 = vmatprep.subr.bf16.mxu0 %v6475_v26 }
 0x42f   : > { %5003 = vmatpush1.bf16.msra.mxu0 %v6473_v29 }
 0x430   : > { %5004 = vmatprep.subr.bf16.mxu0 %v6478_v12 }
 0x432   : > { %4936 = vmatmul.mubr.bf16.gmra.mrb[136].mxu0 %v8464_v9  ;;  %v6487_v9 = vld [vmem:[%s8849_s7 + $0x374] ss:$8 sps:$4 sm:$0xff]  }
 0x433   : > { %4945 = vmatprep.mubr.bf16.mxu0 %v8498_v62  ;;  %5005 = vmatpush1.bf16.msra.mxu0 %v6476_v45  ;;  %v6485_v62 = vld [vmem:[%s8849_s7 + $0x370] ss:$8 sps:$4 sm:$0xff]  }
 0x434   : > { %5006 = vmatprep.subr.bf16.mxu0 %v6481_v30 }
 0x437   : > { %5007 = vmatpush1.bf16.msra.mxu0 %v6479_v42 }
 0x438   : > { %5008 = vmatprep.subr.bf16.mxu0 %v6484_v50 }
 0x43a   : > { %4946 = vmatmul.mubr.bf16.gmra.mrb[140].mxu0 %v8494_v10  ;;  %v6493_v10 = vld [vmem:[%s8849_s7 + $0x394] ss:$8 sps:$4 sm:$0xff]  }
 0x43b   : > { %4955 = vmatprep.mubr.bf16.mxu0 %v8528_v37  ;;  %5009 = vmatpush1.bf16.msra.mxu0 %v6482_v49  ;;  %v6491_v37 = vld [vmem:[%s8849_s7 + $0x390] ss:$8 sps:$4 sm:$0xff]  }
 0x43c   : > { %5010 = vmatprep.subr.bf16.mxu0 %v6487_v9 }
 0x43f   : > { %5011 = vmatpush1.bf16.msra.mxu0 %v6485_v62 }
 0x440   : > { %5012 = vmatprep.subr.bf16.mxu0 %v6490_v11 }
 0x442   : > { %4956 = vmatmul.mubr.bf16.gmra.mrb[144].mxu0 %v8524_v1  ;;  %v6499_v1 = vld [vmem:[%s8849_s7 + $0x3b4] ss:$8 sps:$4 sm:$0xff]  }
 0x443   : > { %4965 = vmatprep.mubr.bf16.mxu0 %v8558_v34  ;;  %5013 = vmatpush1.bf16.msra.mxu0 %v6488_v51  ;;  %v6497_v34 = vld [vmem:[%s8849_s7 + $0x3b0] ss:$8 sps:$4 sm:$0xff]  }
 0x444   : > { %5014 = vmatprep.subr.bf16.mxu0 %v6493_v10 }
 0x447   : > { %5015 = vmatpush1.bf16.msra.mxu0 %v6491_v37 }
 0x448   : > { %5016 = vmatprep.subr.bf16.mxu0 %v6496_v22 }
 0x44a   : > { %4966 = vmatmul.mubr.bf16.gmra.mrb[148].mxu0 %v8554_v38  ;;  %v6505_v38 = vld [vmem:[%s8849_s7 + $0x3d4] ss:$8 sps:$4 sm:$0xff]  }
 0x44b   : > { %4975 = vmatprep.mubr.bf16.mxu0 %v8588_v33  ;;  %5017 = vmatpush1.bf16.msra.mxu0 %v6494_v54  ;;  %v6503_v33 = vld [vmem:[%s8849_s7 + $0x3d0] ss:$8 sps:$4 sm:$0xff]  }
 0x44c   : > { %5018 = vmatprep.subr.bf16.mxu0 %v6499_v1 }
 0x44f   : > { %5019 = vmatpush1.bf16.msra.mxu0 %v6497_v34 }
 0x450   : > { %5020 = vmatprep.subr.bf16.mxu0 %v6502_v57 }
 0x452   : > { %4976 = vmatmul.mubr.bf16.gmra.mrb[152].mxu0 %v8584_v47  ;;  %v6511_v47 = vld [vmem:[%s8849_s7 + $0x3f4] ss:$8 sps:$4 sm:$0xff]  }
 0x453   : > { %4985 = vmatprep.mubr.bf16.mxu0 %v8618_v43  ;;  %5021 = vmatpush1.bf16.msra.mxu0 %v6500_v21 }
 0x454   : > { %5022 = vmatprep.subr.bf16.mxu0 %v6505_v38 }
 0x457   : > { %5023 = vmatpush1.bf16.msra.mxu0 %v6503_v33 }
 0x458   : > { %5024 = vmatprep.subr.bf16.mxu0 %v6508_v14 }
 0x45a   : > { %4986 = vmatmul.mubr.bf16.gmra.mrb[156].mxu0 %v8614_v23 }
 0x45b   : > { %5025 = vmatpush1.bf16.msra.mxu0 %v6506_v13  ;;  %5028 = vmatprep.mubr.bf16.mxu0 %v8410_v58 }
 0x45c   : > { %5026 = vmatprep.subr.bf16.mxu0 %v6511_v47 }
 0x45f   : > { %5027 = vmatpush1.bf16.msra.mxu0 %v6509_v2 }
 0x462   : > { %5029 = vmatmul.mubr.bf16.vlgmr.msra.gmra.mrb[128].mxu0 %v8406_v41  ;;  %v4005_v41 = vld [vmem:[%s8850_s8] sm:$0x3] }
 0x463   : > { %5038 = vmatprep.mubr.bf16.mxu0 %v8440_v17  ;;  %v8764_v58 = vrot.slane %v4005_v41, %v7295_v24 }
 0x46a   : > { %5039 = vmatmul.mubr.bf16.gmra.mrb[132].mxu0 %v8436_v59  ;;  %v8767_v59 = vrot.slane %v4005_v41, %v7303_v15 }
 0x46b   : > { %5048 = vmatprep.mubr.bf16.mxu0 %v8470_v5 }
 0x472   : > { %5049 = vmatmul.mubr.bf16.gmra.mrb[136].mxu0 %v8466_v61 }
 0x473   : > { %5058 = vmatprep.mubr.bf16.mxu0 %v8500_v56 }
 0x47a   : > { %5059 = vmatmul.mubr.bf16.gmra.mrb[140].mxu0 %v8496_v28 }
 0x47b   : > { %5068 = vmatprep.mubr.bf16.mxu0 %v8530_v53 }
 0x482   : > { %5069 = vmatmul.mubr.bf16.gmra.mrb[144].mxu0 %v8526_v36 }
 0x483   : > { %5078 = vmatprep.mubr.bf16.mxu0 %v8560_v31 }
 0x48a   : > { %5079 = vmatmul.mubr.bf16.gmra.mrb[148].mxu0 %v8556_v8 }
 0x48b   : > { %5088 = vmatprep.mubr.bf16.mxu0 %v8590_v19 }
 0x492   : > { %5089 = vmatmul.mubr.bf16.gmra.mrb[152].mxu0 %v8586_v40 }
 0x493   : > { %5098 = vmatprep.mubr.bf16.mxu0 %v8620_v32 }
 0x49a   : > { %5099 = vmatmul.mubr.bf16.gmra.mrb[156].mxu0 %v8616_v16 }
 0x535   : > { %v5030_v17 = vpop.f32.mrb[128].mxu0 }
 0x536   : > { %v6095_v61 = vadd.f32 %v5030_v17, %v8764_v58  ;;  %v5032_v5 = vpop.f32.mrb[129].mxu0 }
 0x537   : > { %v6096_v28 = vadd.f32 %v5032_v5, %v8767_v59  ;;  %v5034_v56 = vpop.f32.mrb[130].mxu0 }
 0x538   : > { %v5803_v36 = vmul.f32 -1.442695, %v6095_v61  ;;  %v6097_v53 = vadd.f32 %v5034_v56, %v8764_v58  ;;  %v5036_v8 = vpop.f32.mrb[131].mxu0 }
 0x539   : > { %v5804_v31 = vmul.f32 -1.442695, %v6096_v28  ;;  %v6098_v40 = vadd.f32 %v5036_v8, %v8767_v59 }
 0x53a   : > { %6512 = vpow2.f32 %v5803_v36  ;;  %v5805_v24 = vmul.f32 -1.442695, %v6097_v53 }
 0x53b   : > { %6514 = vpow2.f32 %v5804_v31  ;;  %v5806_v19 = vmul.f32 -1.442695, %v6098_v40 }
 0x53c   : > { %6516 = vpow2.f32 %v5805_v24 }
 0x53d   : > { %6518 = vpow2.f32 %v5806_v19  ;;  %v5040_v15 = vpop.f32.mrb[132].mxu0 }
 0x53e   : > { %v6099_v3 = vadd.f32 %v5040_v15, %v8764_v58  ;;  %v5042_v39 = vpop.f32.mrb[133].mxu0 }
 0x53f   : > { %v6100_v35 = vadd.f32 %v5042_v39, %v8767_v59  ;;  %v5044_v60 = vpop.f32.mrb[134].mxu0 }
 0x540   : > { %v5807_v48 = vmul.f32 -1.442695, %v6099_v3  ;;  %v6101_v7 = vadd.f32 %v5044_v60, %v8764_v58  ;;  %v5046_v55 = vpop.f32.mrb[135].mxu0 }
 0x541   : > { %v5808_v63 = vmul.f32 -1.442695, %v6100_v35  ;;  %v6102_v4 = vadd.f32 %v5046_v55, %v8767_v59 }
 0x542   : > { %6520 = vpow2.f32 %v5807_v48  ;;  %v5809_v23 = vmul.f32 -1.442695, %v6101_v7 }
 0x543   : > { %6522 = vpow2.f32 %v5808_v63  ;;  %v5810_v16 = vmul.f32 -1.442695, %v6102_v4 }
 0x544   : > { %v6513_v43 = vpop.eup %6512  ;;  %6524 = vpow2.f32 %v5809_v23 }
 0x545   : > { %v6515_v32 = vpop.eup %6514  ;;  %v5205_v6 = vadd.f32 1.0, %v6513_v43  ;;  %6526 = vpow2.f32 %v5810_v16  ;;  %v5050_v52 = vpop.f32.mrb[136].mxu0 }
 0x546   : > { %v6517_v0 = vpop.eup %6516  ;;  %v5206_v20 = vadd.f32 1.0, %v6515_v32  ;;  %v6103_v18 = vadd.f32 %v5050_v52, %v8764_v58  ;;  %v5052_v46 = vpop.f32.mrb[137].mxu0 }
 0x547   : > { %v6519_v27 = vpop.eup %6518  ;;  %6528 = vrcp.f32 %v5205_v6  ;;  %v5207_v44 = vadd.f32 1.0, %v6517_v0  ;;  %v6104_v25 = vadd.f32 %v5052_v46, %v8767_v59  ;;  %v5054_v26 = vpop.f32.mrb[138].mxu0 }
 0x548   : > { %6530 = vrcp.f32 %v5206_v20  ;;  %v5208_v29 = vadd.f32 1.0, %v6519_v27  ;;  %v5811_v12 = vmul.f32 -1.442695, %v6103_v18  ;;  %v6105_v45 = vadd.f32 %v5054_v26, %v8764_v58  ;;  %v5056_v30 = vpop.f32.mrb[139].mxu0 }
 0x549   : > { %6532 = vrcp.f32 %v5207_v44  ;;  %v5812_v42 = vmul.f32 -1.442695, %v6104_v25  ;;  %v6106_v50 = vadd.f32 %v5056_v30, %v8767_v59 }
 0x54a   : > { %6534 = vrcp.f32 %v5208_v29  ;;  %v5813_v49 = vmul.f32 -1.442695, %v6105_v45 }
 0x54b   : > { %6536 = vpow2.f32 %v5811_v12  ;;  %v5814_v9 = vmul.f32 -1.442695, %v6106_v50 }
 0x54c   : > { %v6521_v62 = vpop.eup %6520  ;;  %6538 = vpow2.f32 %v5812_v42 }
 0x54d   : > { %v6523_v11 = vpop.eup %6522  ;;  %v5209_v51 = vadd.f32 1.0, %v6521_v62  ;;  %6540 = vpow2.f32 %v5813_v49  ;;  %v5060_v10 = vpop.f32.mrb[140].mxu0 }
 0x54e   : > { %v6525_v37 = vpop.eup %6524  ;;  %v5210_v22 = vadd.f32 1.0, %v6523_v11  ;;  %6542 = vpow2.f32 %v5814_v9  ;;  %v6107_v54 = vadd.f32 %v5060_v10, %v8764_v58  ;;  %v5062_v1 = vpop.f32.mrb[141].mxu0 }
 0x54f   : > { %v6527_v34 = vpop.eup %6526  ;;  %6544 = vrcp.f32 %v5209_v51  ;;  %v5211_v57 = vadd.f32 1.0, %v6525_v37  ;;  %v6108_v21 = vadd.f32 %v5062_v1, %v8767_v59  ;;  %v5064_v38 = vpop.f32.mrb[142].mxu0 }
 0x550   : > { %6546 = vrcp.f32 %v5210_v22  ;;  %v5212_v33 = vadd.f32 1.0, %v6527_v34  ;;  %v5815_v14 = vmul.f32 -1.442695, %v6107_v54  ;;  %v6109_v13 = vadd.f32 %v5064_v38, %v8764_v58  ;;  %v5066_v47 = vpop.f32.mrb[143].mxu0 }
 0x551   : > { %v6529_v2 = vpop.eup %6528  ;;  %6548 = vrcp.f32 %v5211_v57  ;;  %v5816_v41 = vmul.f32 -1.442695, %v6108_v21  ;;  %v6110_v17 = vadd.f32 %v5066_v47, %v8767_v59 }
 0x552   : > { %v6531_v61 = vpop.eup %6530  ;;  %5301 = vst [vmem:[%s8786_s13] sm:$0xff] %v6529_v2  ;;  %6550 = vrcp.f32 %v5212_v33  ;;  %v5817_v5 = vmul.f32 -1.442695, %v6109_v13 }
 0x553   : > { %v6533_v28 = vpop.eup %6532  ;;  %5302 = vst [vmem:[%s8786_s13 + $0x8] sm:$0xff] %v6531_v61  ;;  %6552 = vpow2.f32 %v5815_v14  ;;  %v5818_v56 = vmul.f32 -1.442695, %v6110_v17 }
 0x554   : > { %v6535_v36 = vpop.eup %6534  ;;  %5303 = vst [vmem:[%s8786_s13 + $0x10] sm:$0xff] %v6533_v28  ;;  %6554 = vpow2.f32 %v5816_v41 }
 0x555   : > { %v6537_v53 = vpop.eup %6536  ;;  %5304 = vst [vmem:[%s8786_s13 + $0x18] sm:$0xff] %v6535_v36  ;;  %6556 = vpow2.f32 %v5817_v5  ;;  %v5070_v8 = vpop.f32.mrb[144].mxu0 }
 0x556   : > { %v6539_v31 = vpop.eup %6538  ;;  %v5213_v40 = vadd.f32 1.0, %v6537_v53  ;;  %6558 = vpow2.f32 %v5818_v56  ;;  %v6111_v24 = vadd.f32 %v5070_v8, %v8764_v58  ;;  %v5072_v19 = vpop.f32.mrb[145].mxu0 }
 0x557   : > { %v6541_v15 = vpop.eup %6540  ;;  %v5214_v3 = vadd.f32 1.0, %v6539_v31  ;;  %v6112_v39 = vadd.f32 %v5072_v19, %v8767_v59  ;;  %v5074_v35 = vpop.f32.mrb[146].mxu0 }
 0x558   : > { %v6543_v60 = vpop.eup %6542  ;;  %6560 = vrcp.f32 %v5213_v40  ;;  %v5215_v48 = vadd.f32 1.0, %v6541_v15  ;;  %v5819_v7 = vmul.f32 -1.442695, %v6111_v24  ;;  %v6113_v55 = vadd.f32 %v5074_v35, %v8764_v58  ;;  %v5076_v63 = vpop.f32.mrb[147].mxu0 }
 0x559   : > { %v6545_v4 = vpop.eup %6544  ;;  %6562 = vrcp.f32 %v5214_v3  ;;  %v5216_v23 = vadd.f32 1.0, %v6543_v60  ;;  %v5820_v16 = vmul.f32 -1.442695, %v6112_v39  ;;  %v6114_v43 = vadd.f32 %v5076_v63, %v8767_v59 }
 0x55a   : > { %v6547_v32 = vpop.eup %6546  ;;  %5305 = vst [vmem:[%s8786_s13 + $0x20] sm:$0xff] %v6545_v4  ;;  %6564 = vrcp.f32 %v5215_v48  ;;  %v5821_v6 = vmul.f32 -1.442695, %v6113_v55 }
 0x55b   : > { %v6549_v52 = vpop.eup %6548  ;;  %5306 = vst [vmem:[%s8786_s13 + $0x28] sm:$0xff] %v6547_v32  ;;  %6566 = vrcp.f32 %v5216_v23  ;;  %v5822_v0 = vmul.f32 -1.442695, %v6114_v43 }
 0x55c   : > { %v6551_v20 = vpop.eup %6550  ;;  %5307 = vst [vmem:[%s8786_s13 + $0x30] sm:$0xff] %v6549_v52  ;;  %6568 = vpow2.f32 %v5819_v7 }
 0x55d   : > { %v6553_v18 = vpop.eup %6552  ;;  %5308 = vst [vmem:[%s8786_s13 + $0x38] sm:$0xff] %v6551_v20  ;;  %6570 = vpow2.f32 %v5820_v16  ;;  %v5080_v46 = vpop.f32.mrb[148].mxu0 }
 0x55e   : > { %v6555_v27 = vpop.eup %6554  ;;  %v5217_v44 = vadd.f32 1.0, %v6553_v18  ;;  %6572 = vpow2.f32 %v5821_v6  ;;  %v6115_v25 = vadd.f32 %v5080_v46, %v8764_v58  ;;  %v5082_v26 = vpop.f32.mrb[149].mxu0 }
 0x55f   : > { %v6557_v29 = vpop.eup %6556  ;;  %v5218_v12 = vadd.f32 1.0, %v6555_v27  ;;  %6574 = vpow2.f32 %v5822_v0  ;;  %v6116_v45 = vadd.f32 %v5082_v26, %v8767_v59  ;;  %v5084_v30 = vpop.f32.mrb[150].mxu0 }
 0x560   : > { %v6559_v42 = vpop.eup %6558  ;;  %6576 = vrcp.f32 %v5217_v44  ;;  %v5219_v50 = vadd.f32 1.0, %v6557_v29  ;;  %v5823_v49 = vmul.f32 -1.442695, %v6115_v25  ;;  %v6117_v9 = vadd.f32 %v5084_v30, %v8764_v58  ;;  %v5086_v62 = vpop.f32.mrb[151].mxu0 }
 0x561   : > { %6578 = vrcp.f32 %v5218_v12  ;;  %v5220_v11 = vadd.f32 1.0, %v6559_v42  ;;  %v5824_v51 = vmul.f32 -1.442695, %v6116_v45  ;;  %v6118_v10 = vadd.f32 %v5086_v62, %v8767_v59 }
 0x562   : > { %v6561_v37 = vpop.eup %6560  ;;  %6580 = vrcp.f32 %v5219_v50  ;;  %v5825_v22 = vmul.f32 -1.442695, %v6117_v9 }
 0x563   : > { %v6563_v54 = vpop.eup %6562  ;;  %5309 = vst [vmem:[%s8786_s13 + $0x40] sm:$0xff] %v6561_v37  ;;  %6582 = vrcp.f32 %v5220_v11  ;;  %v5826_v1 = vmul.f32 -1.442695, %v6118_v10 }
 0x564   : > { %v6565_v34 = vpop.eup %6564  ;;  %5310 = vst [vmem:[%s8786_s13 + $0x48] sm:$0xff] %v6563_v54  ;;  %6584 = vpow2.f32 %v5823_v49 }
 0x565   : > { %v6567_v57 = vpop.eup %6566  ;;  %5311 = vst [vmem:[%s8786_s13 + $0x50] sm:$0xff] %v6565_v34  ;;  %6586 = vpow2.f32 %v5824_v51  ;;  %v5090_v21 = vpop.f32.mrb[152].mxu0 }
 0x566   : > { %v6569_v38 = vpop.eup %6568  ;;  %5312 = vst [vmem:[%s8786_s13 + $0x58] sm:$0xff] %v6567_v57  ;;  %6588 = vpow2.f32 %v5825_v22  ;;  %v6119_v33 = vadd.f32 %v5090_v21, %v8764_v58  ;;  %v5092_v14 = vpop.f32.mrb[153].mxu0 }
 0x567   : > { %v6571_v13 = vpop.eup %6570  ;;  %v5221_v47 = vadd.f32 1.0, %v6569_v38  ;;  %6590 = vpow2.f32 %v5826_v1  ;;  %v6120_v2 = vadd.f32 %v5092_v14, %v8767_v59  ;;  %v5094_v41 = vpop.f32.mrb[154].mxu0 }
 0x568   : > { %v6573_v17 = vpop.eup %6572  ;;  %v5222_v61 = vadd.f32 1.0, %v6571_v13  ;;  %v6121_v5 = vadd.f32 %v5094_v41, %v8764_v58  ;;  %v5096_v28 = vpop.f32.mrb[155].mxu0  ;;  %v5827_v53 = vmul.f32 -1.442695, %v6119_v33 }
 0x569   : > { %v6575_v56 = vpop.eup %6574  ;;  %6592 = vrcp.f32 %v5221_v47  ;;  %v5223_v36 = vadd.f32 1.0, %v6573_v17  ;;  %v6122_v8 = vadd.f32 %v5096_v28, %v8767_v59  ;;  %v5828_v24 = vmul.f32 -1.442695, %v6120_v2 }
 0x56a   : > { %v6577_v31 = vpop.eup %6576  ;;  %6594 = vrcp.f32 %v5222_v61  ;;  %v5224_v40 = vadd.f32 1.0, %v6575_v56  ;;  %v5829_v15 = vmul.f32 -1.442695, %v6121_v5 }
 0x56b   : > { %v6579_v19 = vpop.eup %6578  ;;  %5313 = vst [vmem:[%s8786_s13 + $0x60] sm:$0xff] %v6577_v31  ;;  %6596 = vrcp.f32 %v5223_v36  ;;  %v5830_v39 = vmul.f32 -1.442695, %v6122_v8 }
 0x56c   : > { %v6581_v3 = vpop.eup %6580  ;;  %5314 = vst [vmem:[%s8786_s13 + $0x68] sm:$0xff] %v6579_v19  ;;  %6598 = vrcp.f32 %v5224_v40 }
 0x56d   : > { %v6583_v35 = vpop.eup %6582  ;;  %5315 = vst [vmem:[%s8786_s13 + $0x70] sm:$0xff] %v6581_v3  ;;  %6600 = vpow2.f32 %v5827_v53  ;;  %v5100_v60 = vpop.f32.mrb[156].mxu0 }
 0x56e   : > { %v6585_v48 = vpop.eup %6584  ;;  %5316 = vst [vmem:[%s8786_s13 + $0x78] sm:$0xff] %v6583_v35  ;;  %6602 = vpow2.f32 %v5828_v24  ;;  %v6123_v7 = vadd.f32 %v5100_v60, %v8764_v58  ;;  %v5102_v55 = vpop.f32.mrb[157].mxu0 }
 0x56f   : > { %v6587_v63 = vpop.eup %6586  ;;  %v5225_v4 = vadd.f32 1.0, %v6585_v48  ;;  %6604 = vpow2.f32 %v5829_v15  ;;  %v6124_v23 = vadd.f32 %v5102_v55, %v8767_v59  ;;  %v5104_v16 = vpop.f32.mrb[158].mxu0 }
 0x570   : > { %v6589_v43 = vpop.eup %6588  ;;  %v5226_v32 = vadd.f32 1.0, %v6587_v63  ;;  %6606 = vpow2.f32 %v5830_v39  ;;  %v6125_v6 = vadd.f32 %v5104_v16, %v8764_v58  ;;  %v5106_v52 = vpop.f32.mrb[159].mxu0  ;;  %v5831_v18 = vmul.f32 -1.442695, %v6123_v7 }
 0x571   : > { %v6591_v0 = vpop.eup %6590  ;;  %6608 = vrcp.f32 %v5225_v4  ;;  %v5227_v20 = vadd.f32 1.0, %v6589_v43  ;;  %v6126_v46 = vadd.f32 %v5106_v52, %v8767_v59  ;;  %v5832_v44 = vmul.f32 -1.442695, %v6124_v23 }
 0x572   : > { %6610 = vrcp.f32 %v5226_v32  ;;  %v5228_v27 = vadd.f32 1.0, %v6591_v0  ;;  %v5833_v26 = vmul.f32 -1.442695, %v6125_v6 }
 0x573   : > { %v6593_v25 = vpop.eup %6592  ;;  %6612 = vrcp.f32 %v5227_v20  ;;  %v5834_v58 = vmul.f32 -1.442695, %v6126_v46 }
 0x574   : > { %v6595_v29 = vpop.eup %6594  ;;  %5317 = vst [vmem:[%s8786_s13 + $0x80] sm:$0xff] %v6593_v25  ;;  %6614 = vrcp.f32 %v5228_v27 }
 0x575   : > { %v6597_v12 = vpop.eup %6596  ;;  %5318 = vst [vmem:[%s8786_s13 + $0x88] sm:$0xff] %v6595_v29  ;;  %6616 = vpow2.f32 %v5831_v18 }
 0x576   : > { %v6599_v45 = vpop.eup %6598  ;;  %5319 = vst [vmem:[%s8786_s13 + $0x90] sm:$0xff] %v6597_v12  ;;  %6618 = vpow2.f32 %v5832_v44 }
 0x577   : > { %v6601_v30 = vpop.eup %6600  ;;  %5320 = vst [vmem:[%s8786_s13 + $0x98] sm:$0xff] %v6599_v45  ;;  %6620 = vpow2.f32 %v5833_v26 }
 0x578   : > { %v6603_v59 = vpop.eup %6602  ;;  %v5229_v42 = vadd.f32 1.0, %v6601_v30  ;;  %6622 = vpow2.f32 %v5834_v58 }
 0x579   : > { %v6605_v50 = vpop.eup %6604  ;;  %v5230_v49 = vadd.f32 1.0, %v6603_v59 }
 0x57a   : > { %v6607_v9 = vpop.eup %6606  ;;  %6624 = vrcp.f32 %v5229_v42  ;;  %v5231_v62 = vadd.f32 1.0, %v6605_v50 }
 0x57b   : > { %v6609_v11 = vpop.eup %6608  ;;  %6626 = vrcp.f32 %v5230_v49  ;;  %v5232_v51 = vadd.f32 1.0, %v6607_v9 }
 0x57c   : > { %v6611_v10 = vpop.eup %6610  ;;  %5321 = vst [vmem:[%s8786_s13 + $0xa0] sm:$0xff] %v6609_v11  ;;  %6628 = vrcp.f32 %v5231_v62 }
 0x57d   : > { %v6613_v37 = vpop.eup %6612  ;;  %5322 = vst [vmem:[%s8786_s13 + $0xa8] sm:$0xff] %v6611_v10  ;;  %6630 = vrcp.f32 %v5232_v51 }
 0x57e   : > { %v6615_v22 = vpop.eup %6614  ;;  %5323 = vst [vmem:[%s8786_s13 + $0xb0] sm:$0xff] %v6613_v37 }
 0x57f   : > { %v6617_v54 = vpop.eup %6616  ;;  %5324 = vst [vmem:[%s8786_s13 + $0xb8] sm:$0xff] %v6615_v22 }
 0x580   : > { %v6619_v1 = vpop.eup %6618  ;;  %v5233_v34 = vadd.f32 1.0, %v6617_v54 }
 0x581   : > { %v6621_v57 = vpop.eup %6620  ;;  %v5234_v21 = vadd.f32 1.0, %v6619_v1 }
 0x582   : > { %v6623_v38 = vpop.eup %6622  ;;  %6632 = vrcp.f32 %v5233_v34  ;;  %v5235_v33 = vadd.f32 1.0, %v6621_v57 }
 0x583   : > { %6634 = vrcp.f32 %v5234_v21  ;;  %v5236_v14 = vadd.f32 1.0, %v6623_v38 }
 0x584   : > { %v6625_v13 = vpop.eup %6624  ;;  %6636 = vrcp.f32 %v5235_v33 }
 0x585   : > { %v6627_v47 = vpop.eup %6626  ;;  %5325 = vst [vmem:[%s8786_s13 + $0xc0] sm:$0xff] %v6625_v13  ;;  %6638 = vrcp.f32 %v5236_v14 }
 0x586   : > { %v6629_v2 = vpop.eup %6628  ;;  %5326 = vst [vmem:[%s8786_s13 + $0xc8] sm:$0xff] %v6627_v47 }
 0x587   : > { %v6631_v41 = vpop.eup %6630  ;;  %5327 = vst [vmem:[%s8786_s13 + $0xd0] sm:$0xff] %v6629_v2 }
 0x588   : > { %5328 = vst [vmem:[%s8786_s13 + $0xd8] sm:$0xff] %v6631_v41 }
 0x58c   : > { %v6633_v17 = vpop.eup %6632 }
 0x58d   : > { %v6635_v61 = vpop.eup %6634  ;;  %5329 = vst [vmem:[%s8786_s13 + $0xe0] sm:$0xff] %v6633_v17 }
 0x58e   : > { %v6637_v5 = vpop.eup %6636  ;;  %5330 = vst [vmem:[%s8786_s13 + $0xe8] sm:$0xff] %v6635_v61 }
 0x58f   : > { %v6639_v28 = vpop.eup %6638  ;;  %5331 = vst [vmem:[%s8786_s13 + $0xf0] sm:$0xff] %v6637_v5 }
 0x590   : > { %5332 = vst [vmem:[%s8786_s13 + $0xf8] sm:$0xff] %v6639_v28 }
 0x591 PF: > { %s19_s30 = sadd.s32 1, %s6657_s30  }
 0x592   : > { %p16_p4 = scmp.ge.s32.totalorder %s19_s30, 4  }
 0x594   :  { %18 = sbr.rel (!%p16_p4) target bundleno = 1 (0x1), region = 86 }

// kernel: deep_autoencoder.1
= control target key start
LH: loop header
LB: loop body
LE: loop exit
PB: predicated region body
PF: predicated region fallthrough
CT: control target
= control target key end

     0   :  { %s6710_s30 = smov 0   ;;  %s8842_s0 = inlined_call_operand.vmem [shape: bf16[256,256], index: 0, kind: input, shape index: {}]   ;;  %s8843_s1 = inlined_call_operand.vmem [shape: bf16[256,1024], index: 1, kind: input, shape index: {}]   ;;  %s8844_s2 = inlined_call_operand.vmem [shape: f32[1,1024], index: 2, kind: input, shape index: {}]   ;;  %s8845_s3 = inlined_call_operand.vmem [shape: bf16[1024,128], index: 3, kind: input, shape index: {}]   ;;  %s8846_s4 = inlined_call_operand.vmem [shape: f32[1,128], index: 4, kind: input, shape index: {}]   ;;  %s8847_s5 = inlined_call_operand.vmem [shape: bf16[128,1024], index: 5, kind: input, shape index: {}]   ;;  %s8848_s6 = inlined_call_operand.vmem [shape: f32[1,1024], index: 6, kind: input, shape index: {}]   ;;  %s8849_s7 = inlined_call_operand.vmem [shape: bf16[1024,256], index: 7, kind: input, shape index: {}]   ;;  %s8850_s8 = inlined_call_operand.vmem [shape: f32[1,256], index: 8, kind: input, shape index: {}]   ;;  %s8851_s9 = inlined_call_operand.vmem [shape: f32[256,256], index: 9, kind: output, shape index: {}]  }
   0x1 LB: > { %s5391_s10 = sadd.s32 4294967295, %s6657_s30   ;;  %p5395_p0 = scmp.ge.s32.totalorder %s6657_s30, 1  ;;  %s6657_s30 = sphi %s6710_s30, %s19_s30  }
   0x2   : > { %p289_p1 = scmp.lt.s32.totalorder %s6657_s30, 3 }
   0x4   : > { %p290_p2 = pnand %p5395_p0, %p289_p1 }
   0x5   : > { %v358_v0 = vld [vmem:[%s8843_s1] sm:$0xff] (!%p290_p2)  ;;  %s5396_s17 = sshll.u32 (!%p290_p2), %s5391_s10, 4  ;;  %v359_v63 = vld [vmem:[%s8843_s1 + $0x8] sm:$0xff] (!%p290_p2) }
   0x6   : > { %293 = sbr.rel (%p290_p2) target bundleno = 1425 (0x591), region = 56  ;;  %v362_v1 = vld [vmem:[%s8843_s1 + $0x20] sm:$0xff] (!%p290_p2)  ;;  %p328_p3 = scmp.lt.s32.totalorder (!%p290_p2), %s5396_s17, 31 }
   0x7   : > { %v366_v2 = vld [vmem:[%s8843_s1 + $0x40] sm:$0xff] (!%p290_p2)  ;;  %v5419_v3 = vcombine.high (!%p290_p2), %v358_v0, %v362_v1  ;;  %v5418_v4 = vcombine.low (!%p290_p2), %v358_v0, %v362_v1  ;;  %v363_v0 = vld [vmem:[%s8843_s1 + $0x28] sm:$0xff] (!%p290_p2) }
   0x8   : > { %v370_v5 = vld [vmem:[%s8843_s1 + $0x60] sm:$0xff] (!%p290_p2) }
   0x9   : > { %v5427_v6 = vcombine.high (!%p290_p2), %v366_v2, %v370_v5  ;;  %v374_v7 = vld [vmem:[%s8843_s1 + $0x80] sm:$0xff] (!%p290_p2)  ;;  %1248 = vmatprep.subr.bf16.mxu1 (!%p290_p2), %v5419_v3  ;;  %v5426_v9 = vcombine.low (!%p290_p2), %v366_v2, %v370_v5  ;;  %v367_v3 = vld [vmem:[%s8843_s1 + $0x48] sm:$0xff] (!%p290_p2) }
   0xa   : > { %v378_v8 = vld [vmem:[%s8843_s1 + $0xa0] sm:$0xff] (!%p290_p2)  ;;  %1249 = vmatpush1.bf16.msra.mxu1 (!%p290_p2), %v5418_v4  ;;  %v371_v4 = vld [vmem:[%s8843_s1 + $0x68] sm:$0xff] (!%p290_p2) }
   0xb   : > { %1250 = vmatprep.subr.bf16.mxu1 (!%p290_p2), %v5427_v6  ;;  %v5435_v10 = vcombine.high (!%p290_p2), %v374_v7, %v378_v8  ;;  %v382_v11 = vld [vmem:[%s8843_s1 + $0xc0] sm:$0xff] (!%p290_p2)  ;;  %v5434_v13 = vcombine.low (!%p290_p2), %v374_v7, %v378_v8  ;;  %v5421_v6 = vcombine.high (!%p290_p2), %v359_v63, %v363_v0  ;;  %v5420_v8 = vcombine.low (!%p290_p2), %v359_v63, %v363_v0  ;;  %v463_v0 = vld [vmem:[%s8843_s1 + $0x348] sm:$0xff] (!%p290_p2) }
   0xc   : > { %v386_v12 = vld [vmem:[%s8843_s1 + $0xe0] sm:$0xff] (!%p290_p2) }
   0xd   : > { %s8853_s17 = smov (!%p328_p3, %s5396_s17), 31  ;;  %v5443_v14 = vcombine.high %v382_v11, %v386_v12  ;;  %v390_v15 = vld [vmem:[%s8843_s1 + $0x100] sm:$0xff]  ;;  %v5442_v18 = vcombine.low %v382_v11, %v386_v12  ;;  %v5429_v11 = vcombine.high %v367_v3, %v371_v4  ;;  %v5428_v12 = vcombine.low %v367_v3, %v371_v4 }
   0xe   : > { %s5837_s24 = sshll.u32 %s8853_s17, 3  ;;  %1251 = vmatpush1.bf16.msra.mxu1 %v5426_v9  ;;  %v394_v16 = vld [vmem:[%s8843_s1 + $0x120] sm:$0xff]  ;;  %v375_v9 = vld [vmem:[%s8843_s1 + $0x88] sm:$0xff]  ;;  %s5838_s29 = sshll.u32 %s8853_s17, 4 }
   0xf   : > { %s6748_s11 = scalar_lea.vmem %s8842_s0, %s5837_s24  ;;  %1252 = vmatprep.subr.bf16.mxu1 %v5435_v10  ;;  %v5451_v19 = vcombine.high %v390_v15, %v394_v16  ;;  %v398_v20 = vld [vmem:[%s8843_s1 + $0x140] sm:$0xff]  ;;  %v5450_v22 = vcombine.low %v390_v15, %v394_v16  ;;  %v379_v10 = vld [vmem:[%s8843_s1 + $0xa8] sm:$0xff]  ;;  %s8786_s13 = scalar_lea.vmem %s8851_s9, %s5838_s29 }
  0x10   : > { %v6757_v17 = vld [vmem:[%s6748_s11 + $0x4] ss:$8 sps:$4 sm:$0xff]   ;;  %v6839_v5 = vld [vmem:[%s6748_s11] ss:$8 sps:$4 sm:$0xff]   ;;  %v6842_v7 = vld [vmem:[%s6748_s11 + $0x14] ss:$8 sps:$4 sm:$0xff]   ;;  %v5437_v16 = vcombine.high %v375_v9, %v379_v10 }
  0x11   : > { %1280 = vmatprep.mubr.bf16.mxu1 %v6757_v17  ;;  %v402_v21 = vld [vmem:[%s8843_s1 + $0x160] sm:$0xff]  ;;  %v6859_v15 = vld [vmem:[%s6748_s11 + $0x10] ss:$8 sps:$4 sm:$0xff]   ;;  %v6962_v4 = vld [vmem:[%s6748_s11 + $0x74] ss:$8 sps:$4 sm:$0xff]  }
  0x12   : > { %1253 = vmatpush1.bf16.msra.mxu1 %v5434_v13  ;;  %v5459_v23 = vcombine.high %v398_v20, %v402_v21  ;;  %v406_v24 = vld [vmem:[%s8843_s1 + $0x180] sm:$0xff]  ;;  %v5458_v26 = vcombine.low %v398_v20, %v402_v21  ;;  %v383_v13 = vld [vmem:[%s8843_s1 + $0xc8] sm:$0xff] }
  0x13   : > { %1254 = vmatprep.subr.bf16.mxu1 %v5443_v14  ;;  %v410_v25 = vld [vmem:[%s8843_s1 + $0x1a0] sm:$0xff]  ;;  %v387_v14 = vld [vmem:[%s8843_s1 + $0xe8] sm:$0xff] }
  0x14   : > { %v5467_v27 = vcombine.high %v406_v24, %v410_v25  ;;  %v414_v28 = vld [vmem:[%s8843_s1 + $0x1c0] sm:$0xff]  ;;  %v5466_v30 = vcombine.low %v406_v24, %v410_v25  ;;  %v391_v20 = vld [vmem:[%s8843_s1 + $0x108] sm:$0xff] }
  0x15   : > { %v418_v29 = vld [vmem:[%s8843_s1 + $0x1e0] sm:$0xff]  ;;  %v395_v21 = vld [vmem:[%s8843_s1 + $0x128] sm:$0xff] }
  0x16   : > { %1255 = vmatpush1.bf16.msra.mxu1 %v5442_v18  ;;  %v5475_v31 = vcombine.high %v414_v28, %v418_v29  ;;  %v422_v32 = vld [vmem:[%s8843_s1 + $0x200] sm:$0xff]  ;;  %v5474_v34 = vcombine.low %v414_v28, %v418_v29  ;;  %v399_v24 = vld [vmem:[%s8843_s1 + $0x148] sm:$0xff]  ;;  %v6882_v28 = vld [vmem:[%s6748_s11 + $0x34] ss:$8 sps:$4 sm:$0xff]   ;;  %v5452_v29 = vcombine.low %v391_v20, %v395_v21 }
  0x17   : > { %1256 = vmatprep.subr.bf16.mxu1 %v5451_v19  ;;  %v426_v33 = vld [vmem:[%s8843_s1 + $0x220] sm:$0xff]  ;;  %v5436_v19 = vcombine.low %v375_v9, %v379_v10  ;;  %v403_v25 = vld [vmem:[%s8843_s1 + $0x168] sm:$0xff] }
  0x18   : > { %v5483_v35 = vcombine.high %v422_v32, %v426_v33  ;;  %v430_v36 = vld [vmem:[%s8843_s1 + $0x240] sm:$0xff]  ;;  %v5482_v38 = vcombine.low %v422_v32, %v426_v33  ;;  %v5461_v32 = vcombine.high %v399_v24, %v403_v25  ;;  %v5460_v33 = vcombine.low %v399_v24, %v403_v25  ;;  %v475_v9 = vld [vmem:[%s8843_s1 + $0x3a8] sm:$0xff]  ;;  %v368_v24 = vld [vmem:[%s8843_s1 + $0x50] sm:$0xff] }
  0x19   : > { %v434_v37 = vld [vmem:[%s8843_s1 + $0x260] sm:$0xff]  ;;  %v372_v25 = vld [vmem:[%s8843_s1 + $0x70] sm:$0xff] }
  0x1a   : > { %1257 = vmatpush1.bf16.msra.mxu1 %v5450_v22  ;;  %v5491_v39 = vcombine.high %v430_v36, %v434_v37  ;;  %v438_v40 = vld [vmem:[%s8843_s1 + $0x280] sm:$0xff]  ;;  %v5490_v42 = vcombine.low %v430_v36, %v434_v37  ;;  %v5445_v22 = vcombine.high %v383_v13, %v387_v14  ;;  %v6899_v36 = vld [vmem:[%s6748_s11 + $0x30] ss:$8 sps:$4 sm:$0xff]  }
  0x1b   : > { %1258 = vmatprep.subr.bf16.mxu1 %v5459_v23  ;;  %v442_v41 = vld [vmem:[%s8843_s1 + $0x2a0] sm:$0xff]  ;;  %v5444_v23 = vcombine.low %v383_v13, %v387_v14  ;;  %v483_v13 = vld [vmem:[%s8843_s1 + $0x3e8] sm:$0xff]  ;;  %v6979_v14 = vld [vmem:[%s6748_s11 + $0x70] ss:$8 sps:$4 sm:$0xff]  }
  0x1c   : > { %v5499_v43 = vcombine.high %v438_v40, %v442_v41  ;;  %v446_v44 = vld [vmem:[%s8843_s1 + $0x2c0] sm:$0xff]  ;;  %v5498_v46 = vcombine.low %v438_v40, %v442_v41  ;;  %v423_v40 = vld [vmem:[%s8843_s1 + $0x208] sm:$0xff] }
  0x1d   : > { %v450_v45 = vld [vmem:[%s8843_s1 + $0x2e0] sm:$0xff]  ;;  %v427_v41 = vld [vmem:[%s8843_s1 + $0x228] sm:$0xff] }
  0x1e   : > { %1259 = vmatpush1.bf16.msra.mxu1 %v5458_v26  ;;  %v454_v47 = vld [vmem:[%s8843_s1 + $0x300] sm:$0xff]  ;;  %v5507_v49 = vcombine.high %v446_v44, %v450_v45  ;;  %v5506_v50 = vcombine.low %v446_v44, %v450_v45  ;;  %v431_v44 = vld [vmem:[%s8843_s1 + $0x248] sm:$0xff] }
  0x1f   : > { %1260 = vmatprep.subr.bf16.mxu1 %v5467_v27  ;;  %v458_v48 = vld [vmem:[%s8843_s1 + $0x320] sm:$0xff]  ;;  %v5453_v27 = vcombine.high %v391_v20, %v395_v21  ;;  %v435_v45 = vld [vmem:[%s8843_s1 + $0x268] sm:$0xff]  ;;  %v360_v20 = vld [vmem:[%s8843_s1 + $0x10] sm:$0xff] }
  0x20   : > { %v462_v51 = vld [vmem:[%s8843_s1 + $0x340] sm:$0xff]  ;;  %v5515_v53 = vcombine.high %v454_v47, %v458_v48  ;;  %v5514_v54 = vcombine.low %v454_v47, %v458_v48  ;;  %v5485_v47 = vcombine.high %v423_v40, %v427_v41  ;;  %v6922_v48 = vld [vmem:[%s6748_s11 + $0x54] ss:$8 sps:$4 sm:$0xff]  }
  0x21   : > { %v466_v52 = vld [vmem:[%s8843_s1 + $0x360] sm:$0xff]  ;;  %v364_v21 = vld [vmem:[%s8843_s1 + $0x30] sm:$0xff] }
  0x22   : > { %1261 = vmatpush1.bf16.msra.mxu1 %v5466_v30  ;;  %v470_v55 = vld [vmem:[%s8843_s1 + $0x380] sm:$0xff]  ;;  %v5523_v57 = vcombine.high %v462_v51, %v466_v52  ;;  %v5522_v58 = vcombine.low %v462_v51, %v466_v52  ;;  %v407_v30 = vld [vmem:[%s8843_s1 + $0x188] sm:$0xff]  ;;  %v5493_v52 = vcombine.high %v431_v44, %v435_v45 }
  0x23   : > { %1262 = vmatprep.subr.bf16.mxu1 %v5475_v31  ;;  %v474_v56 = vld [vmem:[%s8843_s1 + $0x3a0] sm:$0xff]  ;;  %v411_v31 = vld [vmem:[%s8843_s1 + $0x1a8] sm:$0xff] }
  0x24   : > { %v478_v59 = vld [vmem:[%s8843_s1 + $0x3c0] sm:$0xff]  ;;  %v5531_v61 = vcombine.high %v470_v55, %v474_v56  ;;  %v5530_v62 = vcombine.low %v470_v55, %v474_v56  ;;  %v5469_v37 = vcombine.high %v407_v30, %v411_v31  ;;  %v443_v51 = vld [vmem:[%s8843_s1 + $0x2a8] sm:$0xff]  ;;  %v6939_v56 = vld [vmem:[%s6748_s11 + $0x50] ss:$8 sps:$4 sm:$0xff]  }
  0x25   : > { %v482_v60 = vld [vmem:[%s8843_s1 + $0x3e0] sm:$0xff]  ;;  %v451_v55 = vld [vmem:[%s8843_s1 + $0x2e8] sm:$0xff] }
  0x26   : > { %1263 = vmatpush1.bf16.msra.mxu1 %v5474_v34  ;;  %v5539_v1 = vcombine.high %v478_v59, %v482_v60  ;;  %v5538_v2 = vcombine.low %v478_v59, %v482_v60  ;;  %v6862_v18 = vld [vmem:[%s6748_s11 + $0x24] ss:$8 sps:$4 sm:$0xff]   ;;  %v6879_v26 = vld [vmem:[%s6748_s11 + $0x20] ss:$8 sps:$4 sm:$0xff]  }
  0x27   : > { %1264 = vmatprep.subr.bf16.mxu1 %v5483_v35  ;;  %v415_v34 = vld [vmem:[%s8843_s1 + $0x1c8] sm:$0xff] }
  0x28   : > { %v419_v35 = vld [vmem:[%s8843_s1 + $0x1e8] sm:$0xff] }
  0x29   : > { %v455_v60 = vld [vmem:[%s8843_s1 + $0x308] sm:$0xff] }
  0x2a   : > { %1265 = vmatpush1.bf16.msra.mxu1 %v5482_v38  ;;  %v6902_v38 = vld [vmem:[%s6748_s11 + $0x44] ss:$8 sps:$4 sm:$0xff]  }
  0x2b   : > { %1266 = vmatprep.subr.bf16.mxu1 %v5491_v39  ;;  %v5468_v39 = vcombine.low %v407_v30, %v411_v31  ;;  %v5422_v30 = vcombine.low %v360_v20, %v364_v21  ;;  %v380_v31 = vld [vmem:[%s8843_s1 + $0xb0] sm:$0xff] }
  0x2e   : > { %1267 = vmatpush1.bf16.msra.mxu1 %v5490_v42  ;;  %v5477_v42 = vcombine.high %v415_v34, %v419_v35 }
  0x2f   : > { %1268 = vmatprep.subr.bf16.mxu1 %v5499_v43  ;;  %v5476_v43 = vcombine.low %v415_v34, %v419_v35  ;;  %v6258_v34 = vld [vmem:[%s8845_s3 + $0x48] sm:$0xff]  }
  0x30   : > { %v6259_v35 = vld [vmem:[%s8845_s3 + $0x8] sm:$0xff]  }
  0x32   : > { %1269 = vmatpush1.bf16.msra.mxu1 %v5498_v46  ;;  %v6919_v46 = vld [vmem:[%s6748_s11 + $0x40] ss:$8 sps:$4 sm:$0xff]  }
  0x33   : > { %1270 = vmatprep.subr.bf16.mxu1 %v5507_v49  ;;  %v5484_v49 = vcombine.low %v423_v40, %v427_v41  ;;  %v384_v40 = vld [vmem:[%s8843_s1 + $0xd0] sm:$0xff] }
  0x34   : > { %v388_v41 = vld [vmem:[%s8843_s1 + $0xf0] sm:$0xff] }
  0x36   : > { %1271 = vmatpush1.bf16.msra.mxu1 %v5506_v50  ;;  %v439_v50 = vld [vmem:[%s8843_s1 + $0x288] sm:$0xff] }
  0x37   : > { %1272 = vmatprep.subr.bf16.mxu1 %v5515_v53  ;;  %v5492_v53 = vcombine.low %v431_v44, %v435_v45  ;;  %v5500_v59 = vcombine.low %v439_v50, %v443_v51  ;;  %v392_v45 = vld [vmem:[%s8843_s1 + $0x110] sm:$0xff] }
  0x3a   : > { %1273 = vmatpush1.bf16.msra.mxu1 %v5514_v54  ;;  %v447_v54 = vld [vmem:[%s8843_s1 + $0x2c8] sm:$0xff] }
  0x3b   : > { %1274 = vmatprep.subr.bf16.mxu1 %v5523_v57  ;;  %v5501_v57 = vcombine.high %v439_v50, %v443_v51  ;;  %v5508_v63 = vcombine.low %v447_v54, %v451_v55  ;;  %v6262_v50 = vld [vmem:[%s8845_s3 + $0x58] sm:$0xff]  }
  0x3c   : > { %v6263_v51 = vld [vmem:[%s8845_s3 + $0x18] sm:$0xff]  }
  0x3e   : > { %1275 = vmatpush1.bf16.msra.mxu1 %v5522_v58  ;;  %v6942_v58 = vld [vmem:[%s6748_s11 + $0x64] ss:$8 sps:$4 sm:$0xff]  }
  0x3f   : > { %1276 = vmatprep.subr.bf16.mxu1 %v5531_v61  ;;  %v459_v61 = vld [vmem:[%s8843_s1 + $0x328] sm:$0xff] }
  0x40   : > { %v5517_v3 = vcombine.high %v455_v60, %v459_v61 }
  0x42   : > { %1277 = vmatpush1.bf16.msra.mxu1 %v5530_v62  ;;  %v5509_v62 = vcombine.high %v447_v54, %v451_v55  ;;  %v400_v55 = vld [vmem:[%s8843_s1 + $0x150] sm:$0xff] }
  0x43   : > { %1278 = vmatprep.subr.bf16.mxu1 %v5539_v1  ;;  %v467_v1 = vld [vmem:[%s8843_s1 + $0x368] sm:$0xff] }
  0x44   : > { %v5525_v10 = vcombine.high %v463_v0, %v467_v1 }
  0x46   : > { %1279 = vmatpush1.bf16.msra.mxu1 %v5538_v2  ;;  %v6959_v2 = vld [vmem:[%s6748_s11 + $0x60] ss:$8 sps:$4 sm:$0xff]  }
  0x47   : > { %1361 = vmatprep.subr.bf16.mxu1 %v5421_v6  ;;  %v5516_v6 = vcombine.low %v455_v60, %v459_v61 }
  0x49   : > { %1281 = vmatmul.mubr.bf16.vlgmr.msra.gmra.mrb[0].mxu1 %v6839_v5 }
  0x4a   : > { %1362 = vmatpush1.bf16.msra.mxu1 %v5420_v8  ;;  %1290 = vmatprep.mubr.bf16.mxu1 %v6842_v7  ;;  %v471_v8 = vld [vmem:[%s8843_s1 + $0x388] sm:$0xff] }
  0x4b   : > { %1363 = vmatprep.subr.bf16.mxu1 %v5429_v11  ;;  %v5524_v11 = vcombine.low %v463_v0, %v467_v1  ;;  %v6266_v0 = vld [vmem:[%s8845_s3 + $0x68] sm:$0xff]  }
  0x4e   : > { %1364 = vmatpush1.bf16.msra.mxu1 %v5428_v12  ;;  %v479_v12 = vld [vmem:[%s8843_s1 + $0x3c8] sm:$0xff] }
  0x4f   : > { %1365 = vmatprep.subr.bf16.mxu1 %v5437_v16  ;;  %v5533_v16 = vcombine.high %v471_v8, %v475_v9 }
  0x51   : > { %1291 = vmatmul.mubr.bf16.gmra.mrb[4].mxu1 %v6859_v15 }
  0x52   : > { %1366 = vmatpush1.bf16.msra.mxu1 %v5436_v19  ;;  %1300 = vmatprep.mubr.bf16.mxu1 %v6862_v18  ;;  %v5532_v19 = vcombine.low %v471_v8, %v475_v9  ;;  %v416_v8 = vld [vmem:[%s8843_s1 + $0x1d0] sm:$0xff] }
  0x53   : > { %1367 = vmatprep.subr.bf16.mxu1 %v5445_v22  ;;  %v5541_v22 = vcombine.high %v479_v12, %v483_v13  ;;  %v420_v9 = vld [vmem:[%s8843_s1 + $0x1f0] sm:$0xff] }
  0x56   : > { %1368 = vmatpush1.bf16.msra.mxu1 %v5444_v23  ;;  %v5540_v23 = vcombine.low %v479_v12, %v483_v13  ;;  %v6269_v12 = vld [vmem:[%s8845_s3 + $0x30] sm:$0xff]   ;;  %v5479_v13 = vcombine.high %v416_v8, %v420_v9 }
  0x57   : > { %1369 = vmatprep.subr.bf16.mxu1 %v5453_v27  ;;  %v5423_v27 = vcombine.high %v360_v20, %v364_v21  ;;  %v6270_v20 = vld [vmem:[%s8845_s3 + $0x78] sm:$0xff]   ;;  %v5478_v21 = vcombine.low %v416_v8, %v420_v9 }
  0x58   : > { %v377_v8 = vld [vmem:[%s8843_s1 + $0x98] sm:$0xff] }
  0x59   : > { %1301 = vmatmul.mubr.bf16.gmra.mrb[8].mxu1 %v6879_v26  ;;  %v381_v9 = vld [vmem:[%s8843_s1 + $0xb8] sm:$0xff] }
  0x5a   : > { %1370 = vmatpush1.bf16.msra.mxu1 %v5452_v29  ;;  %1310 = vmatprep.mubr.bf16.mxu1 %v6882_v28  ;;  %v6256_v29 = vld [vmem:[%s8845_s3 + $0x40] sm:$0xff]  }
  0x5b   : > { %1371 = vmatprep.subr.bf16.mxu1 %v5461_v32  ;;  %v6257_v32 = vld [vmem:[%s8845_s3] sm:$0xff]   ;;  %5839 = vmatprep.subr.bf16.mxu0 %v6256_v29 }
  0x5c   : > { %5840 = vmatpush3.bf16.msra.mxu0 %v6257_v32 }
  0x5d   : > { %5841 = vmatprep.subr.bf16.mxu0 %v6258_v34  ;;  %v452_v34 = vld [vmem:[%s8843_s1 + $0x2f0] sm:$0xff] }
  0x5e   : > { %1372 = vmatpush1.bf16.msra.mxu1 %v5460_v33  ;;  %v5431_v33 = vcombine.high %v368_v24, %v372_v25 }
  0x5f   : > { %1373 = vmatprep.subr.bf16.mxu1 %v5469_v37  ;;  %v6260_v37 = vld [vmem:[%s8845_s3 + $0x50] sm:$0xff]  }
  0x60   : > { %5842 = vmatpush3.bf16.msra.mxu0 %v6259_v35 }
  0x61   : > { %1311 = vmatmul.mubr.bf16.gmra.mrb[12].mxu1 %v6899_v36  ;;  %5843 = vmatprep.subr.bf16.mxu0 %v6260_v37 }
  0x62   : > { %1374 = vmatpush1.bf16.msra.mxu1 %v5468_v39  ;;  %1320 = vmatprep.mubr.bf16.mxu1 %v6902_v38  ;;  %v5430_v39 = vcombine.low %v368_v24, %v372_v25  ;;  %v432_v24 = vld [vmem:[%s8843_s1 + $0x250] sm:$0xff] }
  0x63   : > { %1375 = vmatprep.subr.bf16.mxu1 %v5477_v42  ;;  %v6261_v42 = vld [vmem:[%s8845_s3 + $0x10] sm:$0xff]  }
  0x64   : > { %5844 = vmatpush3.bf16.msra.mxu0 %v6261_v42  ;;  %v436_v25 = vld [vmem:[%s8843_s1 + $0x270] sm:$0xff] }
  0x65   : > { %5845 = vmatprep.subr.bf16.mxu0 %v6262_v50  ;;  %v5495_v29 = vcombine.high %v432_v24, %v436_v25  ;;  %v476_v50 = vld [vmem:[%s8843_s1 + $0x3b0] sm:$0xff] }
  0x66   : > { %1376 = vmatpush1.bf16.msra.mxu1 %v5476_v43 }
  0x67   : > { %1377 = vmatprep.subr.bf16.mxu1 %v5485_v47  ;;  %v396_v47 = vld [vmem:[%s8843_s1 + $0x130] sm:$0xff] }
  0x68   : > { %v5455_v54 = vcombine.high %v392_v45, %v396_v47  ;;  %5846 = vmatpush3.bf16.msra.mxu0 %v6263_v51  ;;  %v5454_v60 = vcombine.low %v392_v45, %v396_v47 }
  0x69   : > { %1321 = vmatmul.mubr.bf16.gmra.mrb[16].mxu1 %v6919_v46 }
  0x6a   : > { %1378 = vmatpush1.bf16.msra.mxu1 %v5484_v49  ;;  %1330 = vmatprep.mubr.bf16.mxu1 %v6922_v48  ;;  %v5447_v49 = vcombine.high %v384_v40, %v388_v41 }
  0x6b   : > { %1379 = vmatprep.subr.bf16.mxu1 %v5493_v52  ;;  %v6264_v52 = vld [vmem:[%s8845_s3 + $0x60] sm:$0xff]  }
  0x6c   : > { %5847 = vmatprep.subr.bf16.mxu0 %v6264_v52 }
  0x6e   : > { %1380 = vmatpush1.bf16.msra.mxu1 %v5492_v53  ;;  %v5446_v53 = vcombine.low %v384_v40, %v388_v41  ;;  %v460_v40 = vld [vmem:[%s8843_s1 + $0x330] sm:$0xff] }
  0x6f   : > { %1381 = vmatprep.subr.bf16.mxu1 %v5501_v57  ;;  %v404_v57 = vld [vmem:[%s8843_s1 + $0x170] sm:$0xff] }
  0x70   : > { %v5463_v61 = vcombine.high %v400_v55, %v404_v57  ;;  %v5462_v1 = vcombine.low %v400_v55, %v404_v57 }
  0x71   : > { %1331 = vmatmul.mubr.bf16.gmra.mrb[20].mxu1 %v6939_v56 }
  0x72   : > { %1382 = vmatpush1.bf16.msra.mxu1 %v5500_v59  ;;  %1340 = vmatprep.mubr.bf16.mxu1 %v6942_v58  ;;  %v6265_v59 = vld [vmem:[%s8845_s3 + $0x20] sm:$0xff]  }
  0x73   : > { %1383 = vmatprep.subr.bf16.mxu1 %v5509_v62  ;;  %v408_v62 = vld [vmem:[%s8843_s1 + $0x190] sm:$0xff]  ;;  %5848 = vmatpush3.bf16.msra.mxu0 %v6265_v59  ;;  %v361_v59 = vld [vmem:[%s8843_s1 + $0x18] sm:$0xff] }
  0x74   : > { %5849 = vmatprep.subr.bf16.mxu0 %v6266_v0  ;;  %v369_v0 = vld [vmem:[%s8843_s1 + $0x58] sm:$0xff] }
  0x76   : > { %1384 = vmatpush1.bf16.msra.mxu1 %v5508_v63  ;;  %v412_v63 = vld [vmem:[%s8843_s1 + $0x1b0] sm:$0xff] }
  0x77   : > { %1385 = vmatprep.subr.bf16.mxu1 %v5517_v3  ;;  %v6267_v3 = vld [vmem:[%s8845_s3 + $0x28] sm:$0xff]  }
  0x78   : > { %5850 = vmatpush3.bf16.msra.mxu0 %v6267_v3 }
  0x79   : > { %1341 = vmatmul.mubr.bf16.gmra.mrb[24].mxu1 %v6959_v2 }
  0x7a   : > { %1386 = vmatpush1.bf16.msra.mxu1 %v5516_v6  ;;  %1350 = vmatprep.mubr.bf16.mxu1 %v6962_v4  ;;  %v5471_v6 = vcombine.high %v408_v62, %v412_v63 }
  0x7b   : > { %1387 = vmatprep.subr.bf16.mxu1 %v5525_v10  ;;  %v6268_v10 = vld [vmem:[%s8845_s3 + $0x70] sm:$0xff]  }
  0x7c   : > { %5851 = vmatprep.subr.bf16.mxu0 %v6268_v10 }
  0x7d   : > { %5852 = vmatpush3.bf16.msra.mxu0 %v6269_v12  ;;  %v385_v12 = vld [vmem:[%s8843_s1 + $0xd8] sm:$0xff] }
  0x7e   : > { %1388 = vmatpush1.bf16.msra.mxu1 %v5524_v11  ;;  %v5470_v11 = vcombine.low %v408_v62, %v412_v63  ;;  %5853 = vmatprep.subr.bf16.mxu0 %v6270_v20  ;;  %v7149_v62 = vld [vmem:[%s6748_s11 + $0x4] ss:$8 sps:$4 sm:$0xff]  }
  0x7f   : > { %1389 = vmatprep.subr.bf16.mxu1 %v5533_v16  ;;  %v424_v16 = vld [vmem:[%s8843_s1 + $0x210] sm:$0xff] }
  0x81   : > { %1351 = vmatmul.mubr.bf16.gmra.mrb[28].mxu1 %v6979_v14 }
  0x82   : > { %1390 = vmatpush1.bf16.msra.mxu1 %v5532_v19  ;;  %1393 = vmatprep.mubr.bf16.mxu1 %v6757_v17  ;;  %v376_v17 = vld [vmem:[%s8843_s1 + $0x90] sm:$0xff] }
  0x83   : > { %1391 = vmatprep.subr.bf16.mxu1 %v5541_v22  ;;  %v5439_v43 = vcombine.high %v376_v17, %v380_v31  ;;  %v5438_v44 = vcombine.low %v376_v17, %v380_v31  ;;  %v428_v19 = vld [vmem:[%s8843_s1 + $0x230] sm:$0xff]  ;;  %v6271_v22 = vld [vmem:[%s8845_s3 + $0x38] sm:$0xff]   ;;  %v5494_v31 = vcombine.low %v432_v24, %v436_v25 }
  0x84   : > { %5854 = vmatpush3.bf16.msra.mxu0 %v6271_v22  ;;  %v444_v17 = vld [vmem:[%s8843_s1 + $0x2b0] sm:$0xff]  ;;  %v401_v22 = vld [vmem:[%s8843_s1 + $0x158] sm:$0xff] }
  0x86   : > { %1392 = vmatpush1.bf16.msra.mxu1 %v5540_v23  ;;  %v5487_v23 = vcombine.high %v424_v16, %v428_v19 }
  0x87   : > { %1474 = vmatprep.subr.bf16.mxu1 %v5423_v27  ;;  %v5486_v27 = vcombine.low %v424_v16, %v428_v19  ;;  %v5440_v16 = vcombine.low %v377_v8, %v381_v9 }
  0x89   : > { %1394 = vmatmul.mubr.bf16.vlgmr.msra.gmra.mrb[32].mxu1 %v6839_v5 }
  0x8a   : > { %1475 = vmatpush1.bf16.msra.mxu1 %v5422_v30  ;;  %1403 = vmatprep.mubr.bf16.mxu1 %v6842_v7  ;;  %v440_v30 = vld [vmem:[%s8843_s1 + $0x290] sm:$0xff] }
  0x8b   : > { %1476 = vmatprep.subr.bf16.mxu1 %v5431_v33  ;;  %v5503_v32 = vcombine.high %v440_v30, %v444_v17  ;;  %v448_v33 = vld [vmem:[%s8843_s1 + $0x2d0] sm:$0xff]  ;;  %v5502_v35 = vcombine.low %v440_v30, %v444_v17  ;;  %v417_v30 = vld [vmem:[%s8843_s1 + $0x1d8] sm:$0xff] }
  0x8c   : > { %v5511_v37 = vcombine.high %v448_v33, %v452_v34  ;;  %v5510_v41 = vcombine.low %v448_v33, %v452_v34  ;;  %v421_v17 = vld [vmem:[%s8843_s1 + $0x1f8] sm:$0xff] }
  0x8d   : > { %v5480_v33 = vcombine.low %v417_v30, %v421_v17 }
  0x8e   : > { %1477 = vmatpush1.bf16.msra.mxu1 %v5430_v39  ;;  %v456_v39 = vld [vmem:[%s8843_s1 + $0x310] sm:$0xff] }
  0x8f   : > { %1478 = vmatprep.subr.bf16.mxu1 %v5439_v43  ;;  %v5519_v42 = vcombine.high %v456_v39, %v460_v40  ;;  %v464_v43 = vld [vmem:[%s8843_s1 + $0x350] sm:$0xff]  ;;  %v5518_v45 = vcombine.low %v456_v39, %v460_v40 }
  0x91   : > { %1404 = vmatmul.mubr.bf16.gmra.mrb[36].mxu1 %v6859_v15 }
  0x92   : > { %1479 = vmatpush1.bf16.msra.mxu1 %v5438_v44  ;;  %1413 = vmatprep.mubr.bf16.mxu1 %v6862_v18  ;;  %v468_v44 = vld [vmem:[%s8843_s1 + $0x370] sm:$0xff] }
  0x93   : > { %1480 = vmatprep.subr.bf16.mxu1 %v5447_v49  ;;  %v5527_v47 = vcombine.high %v464_v43, %v468_v44  ;;  %v472_v49 = vld [vmem:[%s8843_s1 + $0x390] sm:$0xff]  ;;  %v5526_v51 = vcombine.low %v464_v43, %v468_v44  ;;  %v449_v43 = vld [vmem:[%s8843_s1 + $0x2d8] sm:$0xff] }
  0x94   : > { %v5535_v52 = vcombine.high %v472_v49, %v476_v50  ;;  %v5534_v55 = vcombine.low %v472_v49, %v476_v50  ;;  %v453_v44 = vld [vmem:[%s8843_s1 + $0x2f8] sm:$0xff] }
  0x95   : > { %v5512_v49 = vcombine.low %v449_v43, %v453_v44 }
  0x96   : > { %1481 = vmatpush1.bf16.msra.mxu1 %v5446_v53  ;;  %v480_v53 = vld [vmem:[%s8843_s1 + $0x3d0] sm:$0xff] }
  0x97   : > { %1482 = vmatprep.subr.bf16.mxu1 %v5455_v54  ;;  %v484_v54 = vld [vmem:[%s8843_s1 + $0x3f0] sm:$0xff] }
  0x98   : > { %v5543_v57 = vcombine.high %v480_v53, %v484_v54 }
  0x99   : > { %1414 = vmatmul.mubr.bf16.gmra.mrb[40].mxu1 %v6879_v26 }
  0x9a   : > { %1483 = vmatpush1.bf16.msra.mxu1 %v5454_v60  ;;  %1423 = vmatprep.mubr.bf16.mxu1 %v6882_v28  ;;  %v365_v60 = vld [vmem:[%s8843_s1 + $0x38] sm:$0xff] }
  0x9b   : > { %1484 = vmatprep.subr.bf16.mxu1 %v5463_v61  ;;  %v5542_v61 = vcombine.low %v480_v53, %v484_v54  ;;  %v5425_v63 = vcombine.high %v361_v59, %v365_v60  ;;  %v5424_v3 = vcombine.low %v361_v59, %v365_v60 }
  0x9e   : > { %1485 = vmatpush1.bf16.msra.mxu1 %v5462_v1  ;;  %v373_v1 = vld [vmem:[%s8843_s1 + $0x78] sm:$0xff] }
  0x9f   : > { %1486 = vmatprep.subr.bf16.mxu1 %v5471_v6  ;;  %v5433_v6 = vcombine.high %v369_v0, %v373_v1  ;;  %v5432_v10 = vcombine.low %v369_v0, %v373_v1 }
  0xa1   : > { %1424 = vmatmul.mubr.bf16.gmra.mrb[44].mxu1 %v6899_v36 }
  0xa2   : > { %1487 = vmatpush1.bf16.msra.mxu1 %v5470_v11  ;;  %1433 = vmatprep.mubr.bf16.mxu1 %v6902_v38  ;;  %v5441_v11 = vcombine.high %v377_v8, %v381_v9  ;;  %v6288_v8 = vld [vmem:[%s8845_s3 + $0x140] sm:$0xff]  }
  0xa3   : > { %1488 = vmatprep.subr.bf16.mxu1 %v5479_v13  ;;  %v389_v13 = vld [vmem:[%s8843_s1 + $0xf8] sm:$0xff]  ;;  %v6273_v9 = vld [vmem:[%s8845_s3 + $0x80] sm:$0xff]   ;;  %5967 = vmatprep.subr.bf16.mxu0 %v6288_v8  ;;  %v6292_v8 = vld [vmem:[%s8845_s3 + $0x150] sm:$0xff]  }
  0xa4   : > { %v5449_v19 = vcombine.high %v385_v12, %v389_v13  ;;  %v5448_v20 = vcombine.low %v385_v12, %v389_v13  ;;  %v6275_v12 = vld [vmem:[%s8845_s3 + $0x88] sm:$0xff]   ;;  %v6276_v13 = vld [vmem:[%s8845_s3 + $0xd0] sm:$0xff]  }
  0xa6   : > { %1489 = vmatpush1.bf16.msra.mxu1 %v5478_v21 }
  0xa7   : > { %1490 = vmatprep.subr.bf16.mxu1 %v5487_v23  ;;  %v405_v23 = vld [vmem:[%s8843_s1 + $0x178] sm:$0xff] }
  0xa8   : > { %v5465_v25 = vcombine.high %v401_v22, %v405_v23 }
  0xa9   : > { %1434 = vmatmul.mubr.bf16.gmra.mrb[48].mxu1 %v6919_v46 }
  0xaa   : > { %1491 = vmatpush1.bf16.msra.mxu1 %v5486_v27  ;;  %1443 = vmatprep.mubr.bf16.mxu1 %v6922_v48  ;;  %v5464_v27 = vcombine.low %v401_v22, %v405_v23  ;;  %v6279_v22 = vld [vmem:[%s8845_s3 + $0x98] sm:$0xff]   ;;  %v6280_v23 = vld [vmem:[%s8845_s3 + $0xe0] sm:$0xff]  }
  0xab   : > { %1492 = vmatprep.subr.bf16.mxu1 %v5495_v29 }
  0xae   : > { %1493 = vmatpush1.bf16.msra.mxu1 %v5494_v31 }
  0xaf   : > { %1494 = vmatprep.subr.bf16.mxu1 %v5503_v32  ;;  %v5481_v32 = vcombine.high %v417_v30, %v421_v17 }
  0xb1   : > { %1444 = vmatmul.mubr.bf16.gmra.mrb[52].mxu1 %v6939_v56 }
  0xb2   : > { %1495 = vmatpush1.bf16.msra.mxu1 %v5502_v35  ;;  %1453 = vmatprep.mubr.bf16.mxu1 %v6942_v58  ;;  %v433_v35 = vld [vmem:[%s8843_s1 + $0x258] sm:$0xff] }
  0xb3   : > { %1496 = vmatprep.subr.bf16.mxu1 %v5511_v37  ;;  %v437_v37 = vld [vmem:[%s8843_s1 + $0x278] sm:$0xff] }
  0xb4   : > { %v5497_v40 = vcombine.high %v433_v35, %v437_v37 }
  0xb6   : > { %1497 = vmatpush1.bf16.msra.mxu1 %v5510_v41  ;;  %v5496_v41 = vcombine.low %v433_v35, %v437_v37 }
  0xb7   : > { %1498 = vmatprep.subr.bf16.mxu1 %v5519_v42 }
  0xb9   : > { %1454 = vmatmul.mubr.bf16.gmra.mrb[56].mxu1 %v6959_v2 }
  0xba   : > { %1499 = vmatpush1.bf16.msra.mxu1 %v5518_v45  ;;  %1463 = vmatprep.mubr.bf16.mxu1 %v6962_v4 }
  0xbb   : > { %1500 = vmatprep.subr.bf16.mxu1 %v5527_v47  ;;  %v5513_v47 = vcombine.high %v449_v43, %v453_v44  ;;  %v6647_v44 = vld [vmem:[%s6748_s11 + $0x30] ss:$8 sps:$4 sm:$0xff]  }
  0xbe   : > { %1501 = vmatpush1.bf16.msra.mxu1 %v5526_v51  ;;  %v465_v51 = vld [vmem:[%s8843_s1 + $0x358] sm:$0xff] }
  0xbf   : > { %1502 = vmatprep.subr.bf16.mxu1 %v5535_v52  ;;  %v469_v52 = vld [vmem:[%s8843_s1 + $0x378] sm:$0xff] }
  0xc0   : > { %v5529_v54 = vcombine.high %v465_v51, %v469_v52  ;;  %v5528_v59 = vcombine.low %v465_v51, %v469_v52  ;;  %v6289_v52 = vld [vmem:[%s8845_s3 + $0x100] sm:$0xff]  }
  0xc1   : > { %1464 = vmatmul.mubr.bf16.gmra.mrb[60].mxu1 %v6979_v14 }
  0xc2   : > { %1503 = vmatpush1.bf16.msra.mxu1 %v5534_v55  ;;  %1506 = vmatprep.mubr.bf16.mxu1 %v7149_v62  ;;  %v473_v55 = vld [vmem:[%s8843_s1 + $0x398] sm:$0xff] }
  0xc3   : > { %1504 = vmatprep.subr.bf16.mxu1 %v5543_v57  ;;  %v477_v57 = vld [vmem:[%s8843_s1 + $0x3b8] sm:$0xff] }
  0xc4   : > { %v5537_v60 = vcombine.high %v473_v55, %v477_v57  ;;  %v5536_v0 = vcombine.low %v473_v55, %v477_v57  ;;  %v6290_v55 = vld [vmem:[%s8845_s3 + $0x148] sm:$0xff]  }
  0xc6   : > { %1505 = vmatpush1.bf16.msra.mxu1 %v5542_v61  ;;  %v481_v61 = vld [vmem:[%s8843_s1 + $0x3d8] sm:$0xff] }
  0xc7   : > { %1587 = vmatprep.subr.bf16.mxu1 %v5425_v63  ;;  %v485_v63 = vld [vmem:[%s8843_s1 + $0x3f8] sm:$0xff] }
  0xc8   : > { %v5545_v1 = vcombine.high %v481_v61, %v485_v63 }
  0xc9   : > { %1507 = vmatmul.mubr.bf16.vlgmr.msra.gmra.mrb[64].mxu1 %v6839_v5  ;;  %v393_v5 = vld [vmem:[%s8843_s1 + $0x118] sm:$0xff] }
  0xca   : > { %1588 = vmatpush1.bf16.msra.mxu1 %v5424_v3  ;;  %1516 = vmatprep.mubr.bf16.mxu1 %v6842_v7  ;;  %v397_v7 = vld [vmem:[%s8843_s1 + $0x138] sm:$0xff]  ;;  %v5544_v3 = vcombine.low %v481_v61, %v485_v63 }
  0xcb   : > { %1589 = vmatprep.subr.bf16.mxu1 %v5433_v6  ;;  %v5457_v21 = vcombine.high %v393_v5, %v397_v7  ;;  %v5456_v24 = vcombine.low %v393_v5, %v397_v7  ;;  %v6272_v6 = vld [vmem:[%s8845_s3 + $0xc0] sm:$0xff]   ;;  %v6278_v5 = vld [vmem:[%s8845_s3 + $0xd8] sm:$0xff]  }
  0xcc   : > { %v6643_v7 = vld [vmem:[%s6748_s11 + $0x10] ss:$8 sps:$4 sm:$0xff]  }
  0xce   : > { %1590 = vmatpush1.bf16.msra.mxu1 %v5432_v10  ;;  %v6641_v10 = vld [vmem:[%s6748_s11] ss:$8 sps:$4 sm:$0xff]  }
  0xcf   : > { %1591 = vmatprep.subr.bf16.mxu1 %v5441_v11  ;;  %v6642_v11 = vld [vmem:[%s6748_s11 + $0x14] ss:$8 sps:$4 sm:$0xff]  }
  0xd1   : > { %1517 = vmatmul.mubr.bf16.gmra.mrb[68].mxu1 %v6859_v15  ;;  %v409_v15 = vld [vmem:[%s8843_s1 + $0x198] sm:$0xff] }
  0xd2   : > { %1592 = vmatpush1.bf16.msra.mxu1 %v5440_v16  ;;  %1526 = vmatprep.mubr.bf16.mxu1 %v6862_v18  ;;  %v413_v18 = vld [vmem:[%s8843_s1 + $0x1b8] sm:$0xff]  ;;  %v488_v16 = vlaneseq }
  0xd3   : > { %1593 = vmatprep.subr.bf16.mxu1 %v5449_v19  ;;  %v5473_v29 = vcombine.high %v409_v15, %v413_v18  ;;  %v5472_v31 = vcombine.low %v409_v15, %v413_v18  ;;  %v6277_v19 = vld [vmem:[%s8845_s3 + $0x90] sm:$0xff]   ;;  %v6281_v18 = vld [vmem:[%s8845_s3 + $0xa0] sm:$0xff]  }
  0xd6   : > { %1594 = vmatpush1.bf16.msra.mxu1 %v5448_v20  ;;  %v7285_v20 = vshrl.u32 %v488_v16, 7  ;;  %v6293_v16 = vld [vmem:[%s8845_s3 + $0x110] sm:$0xff]  }
  0xd7   : > { %1595 = vmatprep.subr.bf16.mxu1 %v5457_v21  ;;  %v6644_v21 = vld [vmem:[%s6748_s11 + $0x24] ss:$8 sps:$4 sm:$0xff]  }
  0xd8   : > { %v7303_v15 = vsub.s32 1, %v7285_v20 }
  0xd9   : > { %1527 = vmatmul.mubr.bf16.gmra.mrb[72].mxu1 %v6879_v26  ;;  %v425_v26 = vld [vmem:[%s8843_s1 + $0x218] sm:$0xff] }
  0xda   : > { %1596 = vmatpush1.bf16.msra.mxu1 %v5456_v24  ;;  %1536 = vmatprep.mubr.bf16.mxu1 %v6882_v28  ;;  %v429_v28 = vld [vmem:[%s8843_s1 + $0x238] sm:$0xff]  ;;  %v7295_v24 = vsub.s32 0, %v7285_v20 }
  0xdb   : > { %1597 = vmatprep.subr.bf16.mxu1 %v5465_v25  ;;  %v5489_v34 = vcombine.high %v425_v26, %v429_v28  ;;  %v5488_v39 = vcombine.low %v425_v26, %v429_v28  ;;  %v7300_v25 = vld [vmem:[%s8844_s2] sm:$0xff]  ;;  %v6284_v26 = vld [vmem:[%s8845_s3 + $0xf0] sm:$0xff]  }
  0xdc   : > { %v7314_v30 = vrot.slane %v7300_v25, %v7295_v24  ;;  %v7318_v17 = vrot.slane %v7300_v25, %v7303_v15 }
  0xde   : > { %1598 = vmatpush1.bf16.msra.mxu1 %v5464_v27  ;;  %v6282_v27 = vld [vmem:[%s8845_s3 + $0xe8] sm:$0xff]  }
  0xdf   : > { %1599 = vmatprep.subr.bf16.mxu1 %v5473_v29  ;;  %v6645_v29 = vld [vmem:[%s6748_s11 + $0x20] ss:$8 sps:$4 sm:$0xff]  }
  0xe1   : > { %1537 = vmatmul.mubr.bf16.gmra.mrb[76].mxu1 %v6899_v36  ;;  %v441_v36 = vld [vmem:[%s8843_s1 + $0x298] sm:$0xff] }
  0xe2   : > { %1600 = vmatpush1.bf16.msra.mxu1 %v5472_v31  ;;  %1546 = vmatprep.mubr.bf16.mxu1 %v6902_v38  ;;  %v445_v38 = vld [vmem:[%s8843_s1 + $0x2b8] sm:$0xff] }
  0xe3   : > { %1601 = vmatprep.subr.bf16.mxu1 %v5481_v32  ;;  %v5505_v42 = vcombine.high %v441_v36, %v445_v38  ;;  %v5504_v45 = vcombine.low %v441_v36, %v445_v38  ;;  %v6646_v31 = vld [vmem:[%s6748_s11 + $0x34] ss:$8 sps:$4 sm:$0xff]   ;;  %v6283_v32 = vld [vmem:[%s8845_s3 + $0xa8] sm:$0xff]  }
  0xe4   : > { %v6286_v38 = vld [vmem:[%s8845_s3 + $0xf8] sm:$0xff]  }
  0xe6   : > { %1602 = vmatpush1.bf16.msra.mxu1 %v5480_v33 }
  0xe7   : > { %1603 = vmatprep.subr.bf16.mxu1 %v5489_v34 }
  0xe9   : > { %1547 = vmatmul.mubr.bf16.gmra.mrb[80].mxu1 %v6919_v46  ;;  %v457_v46 = vld [vmem:[%s8843_s1 + $0x318] sm:$0xff] }
  0xea   : > { %1604 = vmatpush1.bf16.msra.mxu1 %v5488_v39  ;;  %1556 = vmatprep.mubr.bf16.mxu1 %v6922_v48  ;;  %v461_v48 = vld [vmem:[%s8843_s1 + $0x338] sm:$0xff]  ;;  %v6285_v39 = vld [vmem:[%s8845_s3 + $0xb0] sm:$0xff]  }
  0xeb   : > { %1605 = vmatprep.subr.bf16.mxu1 %v5497_v40  ;;  %v5521_v50 = vcombine.high %v457_v46, %v461_v48  ;;  %v5520_v53 = vcombine.low %v457_v46, %v461_v48  ;;  %v6648_v46 = vld [vmem:[%s6748_s11 + $0x44] ss:$8 sps:$4 sm:$0xff]   ;;  %v6287_v48 = vld [vmem:[%s8845_s3 + $0xb8] sm:$0xff]  }
  0xee   : > { %1606 = vmatpush1.bf16.msra.mxu1 %v5496_v41 }
  0xef   : > { %1607 = vmatprep.subr.bf16.mxu1 %v5505_v42 }
  0xf1   : > { %1557 = vmatmul.mubr.bf16.gmra.mrb[84].mxu1 %v6939_v56 }
  0xf2   : > { %1608 = vmatpush1.bf16.msra.mxu1 %v5504_v45  ;;  %1566 = vmatprep.mubr.bf16.mxu1 %v6942_v58 }
  0xf3   : > { %1609 = vmatprep.subr.bf16.mxu1 %v5513_v47 }
  0xf6   : > { %1610 = vmatpush1.bf16.msra.mxu1 %v5512_v49 }
  0xf7   : > { %1611 = vmatprep.subr.bf16.mxu1 %v5521_v50 }
  0xf9   : > { %1567 = vmatmul.mubr.bf16.gmra.mrb[88].mxu1 %v6959_v2 }
  0xfa   : > { %1612 = vmatpush1.bf16.msra.mxu1 %v5520_v53  ;;  %1576 = vmatprep.mubr.bf16.mxu1 %v6962_v4 }
  0xfb   : > { %1613 = vmatprep.subr.bf16.mxu1 %v5529_v54 }
  0xfe   : > { %1614 = vmatpush1.bf16.msra.mxu1 %v5528_v59 }
  0xff   : > { %1615 = vmatprep.subr.bf16.mxu1 %v5537_v60 }
 0x101   : > { %1577 = vmatmul.mubr.bf16.gmra.mrb[92].mxu1 %v6979_v14 }
 0x102   : > { %1616 = vmatpush1.bf16.msra.mxu1 %v5536_v0  ;;  %1619 = vmatprep.mubr.bf16.mxu1 %v7149_v62  ;;  %v6274_v62 = vld [vmem:[%s8845_s3 + $0xc8] sm:$0xff]  }
 0x103   : > { %1617 = vmatprep.subr.bf16.mxu1 %v5545_v1  ;;  %v6291_v0 = vld [vmem:[%s8845_s3 + $0x108] sm:$0xff]  }
 0x106   : > { %1618 = vmatpush1.bf16.msra.mxu1 %v5544_v3 }
 0x107   : > { %5903 = vmatprep.subr.bf16.mxu1 %v6272_v6  ;;  %v6649_v6 = vld [vmem:[%s6748_s11 + $0x40] ss:$8 sps:$4 sm:$0xff]  }
 0x109   : > { %1620 = vmatmul.mubr.bf16.vlgmr.msra.gmra.mrb[96].mxu1 %v6641_v10  ;;  %v6650_v10 = vld [vmem:[%s6748_s11 + $0x54] ss:$8 sps:$4 sm:$0xff]  }
 0x10a   : > { %1629 = vmatprep.mubr.bf16.mxu1 %v6642_v11  ;;  %5904 = vmatpush3.bf16.msra.mxu1 %v6273_v9 }
 0x10b   : > { %5905 = vmatprep.subr.bf16.mxu1 %v6274_v62 }
 0x10e   : > { %5906 = vmatpush3.bf16.msra.mxu1 %v6275_v12 }
 0x10f   : > { %5907 = vmatprep.subr.bf16.mxu1 %v6276_v13 }
 0x111   : > { %1630 = vmatmul.mubr.bf16.gmra.mrb[100].mxu1 %v6643_v7 }
 0x112   : > { %1639 = vmatprep.mubr.bf16.mxu1 %v6644_v21  ;;  %5908 = vmatpush3.bf16.msra.mxu1 %v6277_v19  ;;  %v6304_v19 = vld [vmem:[%s8845_s3 + $0x1c0] sm:$0xff]   ;;  %v6294_v21 = vld [vmem:[%s8845_s3 + $0x158] sm:$0xff]  }
 0x113   : > { %5909 = vmatprep.subr.bf16.mxu1 %v6278_v5 }
 0x116   : > { %5910 = vmatpush3.bf16.msra.mxu1 %v6279_v22 }
 0x117   : > { %5911 = vmatprep.subr.bf16.mxu1 %v6280_v23 }
 0x119   : > { %1640 = vmatmul.mubr.bf16.gmra.mrb[104].mxu1 %v6645_v29 }
 0x11a   : > { %1649 = vmatprep.mubr.bf16.mxu1 %v6646_v31  ;;  %5912 = vmatpush3.bf16.msra.mxu1 %v6281_v18  ;;  %v6295_v31 = vld [vmem:[%s8845_s3 + $0x118] sm:$0xff]  }
 0x11b   : > { %5913 = vmatprep.subr.bf16.mxu1 %v6282_v27 }
 0x11c   : > { %v1282_v28 = vpop.f32.mrb[0].mxu1 }
 0x11d   : > { %v1283_v33 = vadd.f32 %v1282_v28, %v7314_v30  ;;  %v1284_v34 = vpop.f32.mrb[1].mxu1  ;;  %v6296_v28 = vld [vmem:[%s8845_s3 + $0x160] sm:$0xff]  }
 0x11e   : > { %v1285_v35 = vadd.f32 %v1284_v34, %v7318_v17  ;;  %v1286_v37 = vpop.f32.mrb[2].mxu1  ;;  %5914 = vmatpush3.bf16.msra.mxu1 %v6283_v32 }
 0x11f   : > { %v1287_v40 = vadd.f32 %v1286_v37, %v7314_v30  ;;  %v1288_v36 = vpop.f32.mrb[3].mxu1  ;;  %5915 = vmatprep.subr.bf16.mxu1 %v6284_v26  ;;  %v1700_v42 = vmax.f32 %v1283_v33, 0.0 }
 0x120   : > { %v1289_v41 = vadd.f32 %v1288_v36, %v7318_v17  ;;  %v1701_v45 = vmax.f32 %v1285_v35, 0.0 }
 0x121   : > { %v1708_v43 = vmax.f32 %v1287_v40, 0.0  ;;  %1650 = vmatmul.mubr.bf16.gmra.mrb[108].mxu1 %v6647_v44  ;;  %v6297_v40 = vld [vmem:[%s8845_s3 + $0x120] sm:$0xff]  }
 0x122   : > { %v1709_v47 = vmax.f32 %v1289_v41, 0.0  ;;  %1659 = vmatprep.mubr.bf16.mxu1 %v6648_v46  ;;  %5916 = vmatpush3.bf16.msra.mxu1 %v6285_v39 }
 0x123   : > { %v1828_v49 = vpack.c.bf16 %v1708_v43, %v1700_v42  ;;  %5917 = vmatprep.subr.bf16.mxu1 %v6286_v38  ;;  %v6298_v38 = vld [vmem:[%s8845_s3 + $0x168] sm:$0xff]  }
 0x124   : > { %v1292_v50 = vpop.f32.mrb[4].mxu1  ;;  %v1829_v51 = vpack.c.bf16 %v1709_v47, %v1701_v45  ;;  %v6299_v45 = vld [vmem:[%s8845_s3 + $0x128] sm:$0xff]  }
 0x125   : > { %v1293_v53 = vadd.f32 %v1292_v50, %v7314_v30  ;;  %v1294_v54 = vpop.f32.mrb[5].mxu1 }
 0x126   : > { %v1295_v57 = vadd.f32 %v1294_v54, %v7318_v17  ;;  %v1296_v59 = vpop.f32.mrb[6].mxu1  ;;  %2443 = vmatprep.mubr.bf16.mxu0 %v1829_v51  ;;  %5918 = vmatpush3.bf16.msra.mxu1 %v6287_v48  ;;  %v6300_v48 = vld [vmem:[%s8845_s3 + $0x170] sm:$0xff]  }
 0x127   : > { %v1297_v60 = vadd.f32 %v1296_v59, %v7314_v30  ;;  %v1298_v61 = vpop.f32.mrb[7].mxu1  ;;  %2444 = vmatmul.mubr.bf16.vlgmr.msra.gmra.mrb[0].mxu0 %v1828_v49  ;;  %v1716_v1 = vmax.f32 %v1293_v53, 0.0  ;;  %6031 = vmatprep.subr.bf16.mxu1 %v6304_v19  ;;  %v6301_v54 = vld [vmem:[%s8845_s3 + $0x130] sm:$0xff]  }
 0x128   : > { %v1299_v63 = vadd.f32 %v1298_v61, %v7318_v17  ;;  %5968 = vmatpush3.bf16.msra.mxu0 %v6289_v52  ;;  %v1717_v9 = vmax.f32 %v1295_v57, 0.0  ;;  %v6302_v57 = vld [vmem:[%s8845_s3 + $0x178] sm:$0xff]  }
 0x129   : > { %v1724_v3 = vmax.f32 %v1297_v60, 0.0  ;;  %1660 = vmatmul.mubr.bf16.gmra.mrb[112].mxu1 %v6649_v6  ;;  %5969 = vmatprep.subr.bf16.mxu0 %v6290_v55 }
 0x12a   : > { %v1725_v62 = vmax.f32 %v1299_v63, 0.0  ;;  %1669 = vmatprep.mubr.bf16.mxu1 %v6650_v10 }
 0x12b   : > { %v1836_v11 = vpack.c.bf16 %v1724_v3, %v1716_v1 }
 0x12c   : > { %v1837_v12 = vpack.c.bf16 %v1725_v62, %v1717_v9  ;;  %v1302_v13 = vpop.f32.mrb[8].mxu1  ;;  %5970 = vmatpush3.bf16.msra.mxu0 %v6291_v0  ;;  %v6303_v0 = vld [vmem:[%s8845_s3 + $0x138] sm:$0xff]  }
 0x12d   : > { %v1303_v5 = vadd.f32 %v1302_v13, %v7314_v30  ;;  %v1304_v7 = vpop.f32.mrb[9].mxu1  ;;  %5971 = vmatprep.subr.bf16.mxu0 %v6292_v8 }
 0x12e   : > { %v1305_v22 = vadd.f32 %v1304_v7, %v7318_v17  ;;  %v1306_v23 = vpop.f32.mrb[10].mxu1  ;;  %2451 = vmatprep.mubr.bf16.mxu0 %v1837_v12 }
 0x12f   : > { %v1307_v18 = vadd.f32 %v1306_v23, %v7314_v30  ;;  %v1308_v27 = vpop.f32.mrb[11].mxu1  ;;  %2452 = vmatmul.mubr.bf16.gmra.mrb[4].mxu0 %v1836_v11  ;;  %v1732_v32 = vmax.f32 %v1303_v5, 0.0 }
 0x130   : > { %v1309_v29 = vadd.f32 %v1308_v27, %v7318_v17  ;;  %5972 = vmatpush3.bf16.msra.mxu0 %v6293_v16  ;;  %v1733_v33 = vmax.f32 %v1305_v22, 0.0 }
 0x131   : > { %v1740_v26 = vmax.f32 %v1307_v18, 0.0  ;;  %1670 = vmatmul.mubr.bf16.gmra.mrb[116].mxu1 %v6939_v56  ;;  %5973 = vmatprep.subr.bf16.mxu0 %v6294_v21 }
 0x132   : > { %v1741_v34 = vmax.f32 %v1309_v29, 0.0  ;;  %1679 = vmatprep.mubr.bf16.mxu1 %v6942_v58 }
 0x133   : > { %v1844_v35 = vpack.c.bf16 %v1740_v26, %v1732_v32 }
 0x134   : > { %v1845_v37 = vpack.c.bf16 %v1741_v34, %v1733_v33  ;;  %v1312_v39 = vpop.f32.mrb[12].mxu1  ;;  %5974 = vmatpush3.bf16.msra.mxu0 %v6295_v31 }
 0x135   : > { %v1313_v36 = vadd.f32 %v1312_v39, %v7314_v30  ;;  %v1314_v56 = vpop.f32.mrb[13].mxu1  ;;  %5975 = vmatprep.subr.bf16.mxu0 %v6296_v28 }
 0x136   : > { %v1315_v41 = vadd.f32 %v1314_v56, %v7318_v17  ;;  %v1316_v42 = vpop.f32.mrb[14].mxu1  ;;  %2459 = vmatprep.mubr.bf16.mxu0 %v1845_v37 }
 0x137   : > { %v1317_v58 = vadd.f32 %v1316_v42, %v7314_v30  ;;  %v1318_v43 = vpop.f32.mrb[15].mxu1  ;;  %2460 = vmatmul.mubr.bf16.gmra.mrb[8].mxu0 %v1844_v35  ;;  %v1748_v47 = vmax.f32 %v1313_v36, 0.0 }
 0x138   : > { %v1319_v44 = vadd.f32 %v1318_v43, %v7318_v17  ;;  %5976 = vmatpush3.bf16.msra.mxu0 %v6297_v40  ;;  %v1749_v49 = vmax.f32 %v1315_v41, 0.0  ;;  %v498_v43 = vsub.s32 2, %v7285_v20 }
 0x139   : > { %v1756_v46 = vmax.f32 %v1317_v58, 0.0  ;;  %1680 = vmatmul.mubr.bf16.gmra.mrb[120].mxu1 %v6959_v2  ;;  %5977 = vmatprep.subr.bf16.mxu0 %v6298_v38 }
 0x13a   : > { %v1757_v50 = vmax.f32 %v1319_v44, 0.0  ;;  %1689 = vmatprep.mubr.bf16.mxu1 %v6962_v4 }
 0x13b   : > { %v1852_v51 = vpack.c.bf16 %v1756_v46, %v1748_v47  ;;  %v502_v47 = vsub.s32 3, %v7285_v20 }
 0x13c   : > { %v1853_v52 = vpack.c.bf16 %v1757_v50, %v1749_v49  ;;  %v1322_v53 = vpop.f32.mrb[16].mxu1  ;;  %5978 = vmatpush3.bf16.msra.mxu0 %v6299_v45 }
 0x13d   : > { %v1323_v55 = vadd.f32 %v1322_v53, %v7314_v30  ;;  %v1324_v2 = vpop.f32.mrb[17].mxu1  ;;  %5979 = vmatprep.subr.bf16.mxu0 %v6300_v48 }
 0x13e   : > { %v1325_v59 = vadd.f32 %v1324_v2, %v7318_v17  ;;  %v1326_v60 = vpop.f32.mrb[18].mxu1  ;;  %2467 = vmatprep.mubr.bf16.mxu0 %v1853_v52  ;;  %v7430_v52 = vrot.slane %v7300_v25, %v498_v43 }
 0x13f   : > { %v1327_v4 = vadd.f32 %v1326_v60, %v7314_v30  ;;  %v1328_v61 = vpop.f32.mrb[19].mxu1  ;;  %2468 = vmatmul.mubr.bf16.gmra.mrb[12].mxu0 %v1852_v51  ;;  %v1764_v1 = vmax.f32 %v1323_v55, 0.0  ;;  %v7435_v55 = vrot.slane %v7300_v25, %v502_v47 }
 0x140   : > { %v1329_v63 = vadd.f32 %v1328_v61, %v7318_v17  ;;  %5980 = vmatpush3.bf16.msra.mxu0 %v6301_v54  ;;  %v1765_v6 = vmax.f32 %v1325_v59, 0.0 }
 0x141   : > { %v1772_v3 = vmax.f32 %v1327_v4, 0.0  ;;  %1690 = vmatmul.mubr.bf16.gmra.mrb[124].mxu1 %v6979_v14  ;;  %5981 = vmatprep.subr.bf16.mxu0 %v6302_v57 }
 0x142   : > { %v1773_v8 = vmax.f32 %v1329_v63, 0.0 }
 0x143   : > { %v1860_v9 = vpack.c.bf16 %v1772_v3, %v1764_v1 }
 0x144   : > { %v1861_v62 = vpack.c.bf16 %v1773_v8, %v1765_v6  ;;  %v1332_v10 = vpop.f32.mrb[20].mxu1  ;;  %5982 = vmatpush3.bf16.msra.mxu0 %v6303_v0 }
 0x145   : > { %v1333_v11 = vadd.f32 %v1332_v10, %v7314_v30  ;;  %v1334_v12 = vpop.f32.mrb[21].mxu1 }
 0x146   : > { %v1335_v13 = vadd.f32 %v1334_v12, %v7318_v17  ;;  %v1336_v16 = vpop.f32.mrb[22].mxu1  ;;  %2475 = vmatprep.mubr.bf16.mxu0 %v1861_v62 }
 0x147   : > { %v1337_v19 = vadd.f32 %v1336_v16, %v7314_v30  ;;  %v1338_v5 = vpop.f32.mrb[23].mxu1  ;;  %2476 = vmatmul.mubr.bf16.gmra.mrb[16].mxu0 %v1860_v9  ;;  %v1780_v7 = vmax.f32 %v1333_v11, 0.0  ;;  %v6305_v11 = vld [vmem:[%s8845_s3 + $0x180] sm:$0xff]   ;;  %v6306_v16 = vld [vmem:[%s8845_s3 + $0x1c8] sm:$0xff]  }
 0x148   : > { %v1339_v14 = vadd.f32 %v1338_v5, %v7318_v17  ;;  %v1781_v22 = vmax.f32 %v1335_v13, 0.0 }
 0x149   : > { %v1788_v21 = vmax.f32 %v1337_v19, 0.0 }
 0x14a   : > { %v1789_v23 = vmax.f32 %v1339_v14, 0.0 }
 0x14b   : > { %v1868_v18 = vpack.c.bf16 %v1788_v21, %v1780_v7 }
 0x14c   : > { %v1869_v27 = vpack.c.bf16 %v1789_v23, %v1781_v22  ;;  %v1342_v29 = vpop.f32.mrb[24].mxu1  ;;  %v6307_v22 = vld [vmem:[%s8845_s3 + $0x188] sm:$0xff]  }
 0x14d   : > { %v1343_v31 = vadd.f32 %v1342_v29, %v7314_v30  ;;  %v1344_v32 = vpop.f32.mrb[25].mxu1 }
 0x14e   : > { %v1345_v26 = vadd.f32 %v1344_v32, %v7318_v17  ;;  %v1346_v28 = vpop.f32.mrb[26].mxu1  ;;  %2483 = vmatprep.mubr.bf16.mxu0 %v1869_v27  ;;  %v6308_v27 = vld [vmem:[%s8845_s3 + $0x1d0] sm:$0xff]  }
 0x14f   : > { %v1347_v33 = vadd.f32 %v1346_v28, %v7314_v30  ;;  %v1348_v34 = vpop.f32.mrb[27].mxu1  ;;  %2484 = vmatmul.mubr.bf16.gmra.mrb[20].mxu0 %v1868_v18  ;;  %v1796_v37 = vmax.f32 %v1343_v31, 0.0 }
 0x150   : > { %v1349_v35 = vadd.f32 %v1348_v34, %v7318_v17  ;;  %v1797_v40 = vmax.f32 %v1345_v26, 0.0 }
 0x151   : > { %v1804_v39 = vmax.f32 %v1347_v33, 0.0  ;;  %v6309_v33 = vld [vmem:[%s8845_s3 + $0x190] sm:$0xff]  }
 0x152   : > { %v1805_v36 = vmax.f32 %v1349_v35, 0.0 }
 0x153   : > { %v1876_v56 = vpack.c.bf16 %v1804_v39, %v1796_v37  ;;  %v6310_v37 = vld [vmem:[%s8845_s3 + $0x1d8] sm:$0xff]  }
 0x154   : > { %v1877_v38 = vpack.c.bf16 %v1805_v36, %v1797_v40  ;;  %v1352_v41 = vpop.f32.mrb[28].mxu1 }
 0x155   : > { %v1353_v42 = vadd.f32 %v1352_v41, %v7314_v30  ;;  %v1354_v58 = vpop.f32.mrb[29].mxu1  ;;  %v6311_v41 = vld [vmem:[%s8845_s3 + $0x198] sm:$0xff]  }
 0x156   : > { %v1355_v44 = vadd.f32 %v1354_v58, %v7318_v17  ;;  %v1356_v45 = vpop.f32.mrb[30].mxu1  ;;  %2491 = vmatprep.mubr.bf16.mxu0 %v1877_v38 }
 0x157   : > { %v1357_v46 = vadd.f32 %v1356_v45, %v7314_v30  ;;  %v1358_v48 = vpop.f32.mrb[31].mxu1  ;;  %2492 = vmatmul.mubr.bf16.gmra.mrb[24].mxu0 %v1876_v56  ;;  %v1812_v50 = vmax.f32 %v1353_v42, 0.0 }
 0x158   : > { %v1359_v49 = vadd.f32 %v1358_v48, %v7318_v17  ;;  %v1813_v53 = vmax.f32 %v1355_v44, 0.0  ;;  %v6312_v44 = vld [vmem:[%s8845_s3 + $0x1e0] sm:$0xff]  }
 0x159   : > { %v1820_v51 = vmax.f32 %v1357_v46, 0.0 }
 0x15a   : > { %v1821_v54 = vmax.f32 %v1359_v49, 0.0 }
 0x15b   : > { %v1884_v2 = vpack.c.bf16 %v1820_v51, %v1812_v50  ;;  %v6313_v51 = vld [vmem:[%s8845_s3 + $0x1a0] sm:$0xff]  }
 0x15c   : > { %v1885_v30 = vpack.c.bf16 %v1821_v54, %v1813_v53  ;;  %v1395_v57 = vpop.f32.mrb[32].mxu1 }
 0x15d   : > { %v1396_v59 = vadd.f32 %v1395_v57, %v7430_v52  ;;  %v1397_v17 = vpop.f32.mrb[33].mxu1 }
 0x15e   : > { %v1398_v60 = vadd.f32 %v1397_v17, %v7435_v55  ;;  %v1399_v4 = vpop.f32.mrb[34].mxu1  ;;  %2499 = vmatprep.mubr.bf16.mxu0 %v1885_v30 }
 0x15f   : > { %v1400_v61 = vadd.f32 %v1399_v4, %v7430_v52  ;;  %v1401_v63 = vpop.f32.mrb[35].mxu1  ;;  %2500 = vmatmul.mubr.bf16.gmra.mrb[28].mxu0 %v1884_v2  ;;  %v1702_v1 = vmax.f32 %v1396_v59, 0.0  ;;  %v6314_v2 = vld [vmem:[%s8845_s3 + $0x1e8] sm:$0xff]  }
 0x160   : > { %v1402_v0 = vadd.f32 %v1401_v63, %v7435_v55  ;;  %v1703_v6 = vmax.f32 %v1398_v60, 0.0  ;;  %v6315_v4 = vld [vmem:[%s8845_s3 + $0x1a8] sm:$0xff]  }
 0x161   : > { %v1710_v3 = vmax.f32 %v1400_v61, 0.0 }
 0x162   : > { %v1711_v8 = vmax.f32 %v1402_v0, 0.0  ;;  %v6316_v0 = vld [vmem:[%s8845_s3 + $0x1f0] sm:$0xff]  }
 0x163   : > { %v1830_v9 = vpack.c.bf16 %v1710_v3, %v1702_v1 }
 0x164   : > { %v1831_v62 = vpack.c.bf16 %v1711_v8, %v1703_v6  ;;  %v1405_v10 = vpop.f32.mrb[36].mxu1 }
 0x165   : > { %v1406_v12 = vadd.f32 %v1405_v10, %v7430_v52  ;;  %v1407_v13 = vpop.f32.mrb[37].mxu1 }
 0x166   : > { %v1408_v19 = vadd.f32 %v1407_v13, %v7435_v55  ;;  %v1409_v5 = vpop.f32.mrb[38].mxu1  ;;  %2540 = vmatprep.mubr.bf16.mxu1 %v1831_v62  ;;  %v6317_v62 = vld [vmem:[%s8845_s3 + $0x1b0] sm:$0xff]  }
 0x167   : > { %v1410_v14 = vadd.f32 %v1409_v5, %v7430_v52  ;;  %v1411_v7 = vpop.f32.mrb[39].mxu1  ;;  %2541 = vmatmul.mubr.bf16.vlgmr.msra.gmra.mrb[128].mxu1 %v1830_v9  ;;  %v1718_v23 = vmax.f32 %v1406_v12, 0.0  ;;  %v6318_v12 = vld [vmem:[%s8845_s3 + $0x1f8] sm:$0xff]  }
 0x168   : > { %v1412_v21 = vadd.f32 %v1411_v7, %v7435_v55  ;;  %6032 = vmatpush3.bf16.msra.mxu1 %v6305_v11  ;;  %v1719_v29 = vmax.f32 %v1408_v19, 0.0  ;;  %v6319_v7 = vld [vmem:[%s8845_s3 + $0x1b8] sm:$0xff]  }
 0x169   : > { %v1726_v18 = vmax.f32 %v1410_v14, 0.0  ;;  %6033 = vmatprep.subr.bf16.mxu1 %v6306_v16 }
 0x16a   : > { %v1727_v31 = vmax.f32 %v1412_v21, 0.0 }
 0x16b   : > { %v1838_v32 = vpack.c.bf16 %v1726_v18, %v1718_v23 }
 0x16c   : > { %v1839_v26 = vpack.c.bf16 %v1727_v31, %v1719_v29  ;;  %v1415_v28 = vpop.f32.mrb[40].mxu1  ;;  %6034 = vmatpush3.bf16.msra.mxu1 %v6307_v22 }
 0x16d   : > { %v1416_v34 = vadd.f32 %v1415_v28, %v7430_v52  ;;  %v1417_v35 = vpop.f32.mrb[41].mxu1  ;;  %6035 = vmatprep.subr.bf16.mxu1 %v6308_v27 }
 0x16e   : > { %v1418_v39 = vadd.f32 %v1417_v35, %v7435_v55  ;;  %v1419_v40 = vpop.f32.mrb[42].mxu1  ;;  %2548 = vmatprep.mubr.bf16.mxu1 %v1839_v26 }
 0x16f   : > { %v1420_v36 = vadd.f32 %v1419_v40, %v7430_v52  ;;  %v1421_v56 = vpop.f32.mrb[43].mxu1  ;;  %2549 = vmatmul.mubr.bf16.gmra.mrb[132].mxu1 %v1838_v32  ;;  %v1734_v42 = vmax.f32 %v1416_v34, 0.0 }
 0x170   : > { %v1422_v38 = vadd.f32 %v1421_v56, %v7435_v55  ;;  %6036 = vmatpush3.bf16.msra.mxu1 %v6309_v33  ;;  %v1735_v45 = vmax.f32 %v1418_v39, 0.0 }
 0x171   : > { %v1742_v58 = vmax.f32 %v1420_v36, 0.0  ;;  %6037 = vmatprep.subr.bf16.mxu1 %v6310_v37 }
 0x172   : > { %v1743_v46 = vmax.f32 %v1422_v38, 0.0 }
 0x173   : > { %v1846_v48 = vpack.c.bf16 %v1742_v58, %v1734_v42 }
 0x174   : > { %v1847_v49 = vpack.c.bf16 %v1743_v46, %v1735_v45  ;;  %v1425_v50 = vpop.f32.mrb[44].mxu1  ;;  %6038 = vmatpush3.bf16.msra.mxu1 %v6311_v41 }
 0x175   : > { %v1426_v53 = vadd.f32 %v1425_v50, %v7430_v52  ;;  %v1427_v54 = vpop.f32.mrb[45].mxu1  ;;  %6039 = vmatprep.subr.bf16.mxu1 %v6312_v44 }
 0x176   : > { %v1428_v30 = vadd.f32 %v1427_v54, %v7435_v55  ;;  %v1429_v57 = vpop.f32.mrb[46].mxu1  ;;  %2556 = vmatprep.mubr.bf16.mxu1 %v1847_v49 }
 0x177   : > { %v1430_v59 = vadd.f32 %v1429_v57, %v7430_v52  ;;  %v1431_v17 = vpop.f32.mrb[47].mxu1  ;;  %2557 = vmatmul.mubr.bf16.gmra.mrb[136].mxu1 %v1846_v48  ;;  %v1750_v61 = vmax.f32 %v1426_v53, 0.0 }
 0x178   : > { %v1432_v60 = vadd.f32 %v1431_v17, %v7435_v55  ;;  %6040 = vmatpush3.bf16.msra.mxu1 %v6313_v51  ;;  %v1751_v1 = vmax.f32 %v1428_v30, 0.0 }
 0x179   : > { %v1758_v63 = vmax.f32 %v1430_v59, 0.0  ;;  %6041 = vmatprep.subr.bf16.mxu1 %v6314_v2 }
 0x17a   : > { %v1759_v3 = vmax.f32 %v1432_v60, 0.0 }
 0x17b   : > { %v1854_v6 = vpack.c.bf16 %v1758_v63, %v1750_v61 }
 0x17c   : > { %v1855_v8 = vpack.c.bf16 %v1759_v3, %v1751_v1  ;;  %v1435_v9 = vpop.f32.mrb[48].mxu1  ;;  %6042 = vmatpush3.bf16.msra.mxu1 %v6315_v4  ;;  %v506_v4 = vsub.s32 4, %v7285_v20 }
 0x17d   : > { %v1436_v10 = vadd.f32 %v1435_v9, %v7430_v52  ;;  %v1437_v11 = vpop.f32.mrb[49].mxu1  ;;  %6043 = vmatprep.subr.bf16.mxu1 %v6316_v0  ;;  %v510_v0 = vsub.s32 5, %v7285_v20 }
 0x17e   : > { %v1438_v13 = vadd.f32 %v1437_v11, %v7435_v55  ;;  %v1439_v16 = vpop.f32.mrb[50].mxu1  ;;  %2564 = vmatprep.mubr.bf16.mxu1 %v1855_v8 }
 0x17f   : > { %v1440_v19 = vadd.f32 %v1439_v16, %v7430_v52  ;;  %v1441_v5 = vpop.f32.mrb[51].mxu1  ;;  %2565 = vmatmul.mubr.bf16.gmra.mrb[140].mxu1 %v1854_v6  ;;  %v1766_v21 = vmax.f32 %v1436_v10, 0.0 }
 0x180   : > { %v1442_v14 = vadd.f32 %v1441_v5, %v7435_v55  ;;  %6044 = vmatpush3.bf16.msra.mxu1 %v6317_v62  ;;  %v1767_v23 = vmax.f32 %v1438_v13, 0.0  ;;  %v7519_v62 = vrot.slane %v7300_v25, %v506_v4 }
 0x181   : > { %v1774_v22 = vmax.f32 %v1440_v19, 0.0  ;;  %6045 = vmatprep.subr.bf16.mxu1 %v6318_v12  ;;  %v7524_v12 = vrot.slane %v7300_v25, %v510_v0 }
 0x182   : > { %v1775_v18 = vmax.f32 %v1442_v14, 0.0 }
 0x183   : > { %v1862_v27 = vpack.c.bf16 %v1774_v22, %v1766_v21 }
 0x184   : > { %v1863_v29 = vpack.c.bf16 %v1775_v18, %v1767_v23  ;;  %v1445_v31 = vpop.f32.mrb[52].mxu1  ;;  %6046 = vmatpush3.bf16.msra.mxu1 %v6319_v7 }
 0x185   : > { %v1446_v32 = vadd.f32 %v1445_v31, %v7430_v52  ;;  %v1447_v26 = vpop.f32.mrb[53].mxu1 }
 0x186   : > { %v1448_v28 = vadd.f32 %v1447_v26, %v7435_v55  ;;  %v1449_v33 = vpop.f32.mrb[54].mxu1  ;;  %2572 = vmatprep.mubr.bf16.mxu1 %v1863_v29 }
 0x187   : > { %v1450_v34 = vadd.f32 %v1449_v33, %v7430_v52  ;;  %v1451_v35 = vpop.f32.mrb[55].mxu1  ;;  %2573 = vmatmul.mubr.bf16.gmra.mrb[144].mxu1 %v1862_v27  ;;  %v1782_v39 = vmax.f32 %v1446_v32, 0.0 }
 0x188   : > { %v1452_v37 = vadd.f32 %v1451_v35, %v7435_v55  ;;  %v1783_v36 = vmax.f32 %v1448_v28, 0.0 }
 0x189   : > { %v1790_v40 = vmax.f32 %v1450_v34, 0.0 }
 0x18a   : > { %v1791_v56 = vmax.f32 %v1452_v37, 0.0 }
 0x18b   : > { %v1870_v38 = vpack.c.bf16 %v1790_v40, %v1782_v39 }
 0x18c   : > { %v1871_v41 = vpack.c.bf16 %v1791_v56, %v1783_v36  ;;  %v1455_v42 = vpop.f32.mrb[56].mxu1 }
 0x18d   : > { %v1456_v58 = vadd.f32 %v1455_v42, %v7430_v52  ;;  %v1457_v44 = vpop.f32.mrb[57].mxu1 }
 0x18e   : > { %v1458_v45 = vadd.f32 %v1457_v44, %v7435_v55  ;;  %v1459_v46 = vpop.f32.mrb[58].mxu1  ;;  %2580 = vmatprep.mubr.bf16.mxu1 %v1871_v41 }
 0x18f   : > { %v1460_v48 = vadd.f32 %v1459_v46, %v7430_v52  ;;  %v1461_v49 = vpop.f32.mrb[59].mxu1  ;;  %2581 = vmatmul.mubr.bf16.gmra.mrb[148].mxu1 %v1870_v38  ;;  %v1798_v51 = vmax.f32 %v1456_v58, 0.0 }
 0x190   : > { %v1462_v50 = vadd.f32 %v1461_v49, %v7435_v55  ;;  %v1799_v54 = vmax.f32 %v1458_v45, 0.0 }
 0x191   : > { %v1806_v53 = vmax.f32 %v1460_v48, 0.0 }
 0x192   : > { %v1807_v2 = vmax.f32 %v1462_v50, 0.0 }
 0x193   : > { %v1878_v30 = vpack.c.bf16 %v1806_v53, %v1798_v51 }
 0x194   : > { %v1879_v57 = vpack.c.bf16 %v1807_v2, %v1799_v54  ;;  %v1465_v59 = vpop.f32.mrb[60].mxu1 }
 0x195   : > { %v1466_v17 = vadd.f32 %v1465_v59, %v7430_v52  ;;  %v1467_v60 = vpop.f32.mrb[61].mxu1 }
 0x196   : > { %v1468_v61 = vadd.f32 %v1467_v60, %v7435_v55  ;;  %v1469_v63 = vpop.f32.mrb[62].mxu1  ;;  %2588 = vmatprep.mubr.bf16.mxu1 %v1879_v57 }
 0x197   : > { %v1470_v1 = vadd.f32 %v1469_v63, %v7430_v52  ;;  %v1471_v3 = vpop.f32.mrb[63].mxu1  ;;  %2589 = vmatmul.mubr.bf16.gmra.mrb[152].mxu1 %v1878_v30  ;;  %v1814_v8 = vmax.f32 %v1466_v17, 0.0 }
 0x198   : > { %v1472_v6 = vadd.f32 %v1471_v3, %v7435_v55  ;;  %v1815_v10 = vmax.f32 %v1468_v61, 0.0 }
 0x199   : > { %v1822_v9 = vmax.f32 %v1470_v1, 0.0 }
 0x19a   : > { %v1823_v11 = vmax.f32 %v1472_v6, 0.0 }
 0x19b   : > { %v1886_v13 = vpack.c.bf16 %v1822_v9, %v1814_v8 }
 0x19c   : > { %v1887_v52 = vpack.c.bf16 %v1823_v11, %v1815_v10  ;;  %v1508_v16 = vpop.f32.mrb[64].mxu1 }
 0x19d   : > { %v1509_v19 = vadd.f32 %v1508_v16, %v7519_v62  ;;  %v1510_v55 = vpop.f32.mrb[65].mxu1 }
 0x19e   : > { %v1511_v5 = vadd.f32 %v1510_v55, %v7524_v12  ;;  %v1512_v14 = vpop.f32.mrb[66].mxu1  ;;  %2596 = vmatprep.mubr.bf16.mxu1 %v1887_v52 }
 0x19f   : > { %v1513_v7 = vadd.f32 %v1512_v14, %v7519_v62  ;;  %v1514_v21 = vpop.f32.mrb[67].mxu1  ;;  %2597 = vmatmul.mubr.bf16.gmra.mrb[156].mxu1 %v1886_v13  ;;  %v1704_v23 = vmax.f32 %v1509_v19, 0.0 }
 0x1a0   : > { %v1515_v22 = vadd.f32 %v1514_v21, %v7524_v12  ;;  %v1705_v27 = vmax.f32 %v1511_v5, 0.0 }
 0x1a1   : > { %v1712_v18 = vmax.f32 %v1513_v7, 0.0 }
 0x1a2   : > { %v1713_v29 = vmax.f32 %v1515_v22, 0.0 }
 0x1a3   : > { %v1832_v31 = vpack.c.bf16 %v1712_v18, %v1704_v23 }
 0x1a4   : > { %v1833_v32 = vpack.c.bf16 %v1713_v29, %v1705_v27  ;;  %v1518_v26 = vpop.f32.mrb[68].mxu1 }
 0x1a5   : > { %v1519_v28 = vadd.f32 %v1518_v26, %v7519_v62  ;;  %v1520_v33 = vpop.f32.mrb[69].mxu1 }
 0x1a6   : > { %v1521_v34 = vadd.f32 %v1520_v33, %v7524_v12  ;;  %v1522_v35 = vpop.f32.mrb[70].mxu1  ;;  %2637 = vmatprep.mubr.bf16.mxu0 %v1833_v32 }
 0x1a7   : > { %v1523_v37 = vadd.f32 %v1522_v35, %v7519_v62  ;;  %v1524_v39 = vpop.f32.mrb[71].mxu1  ;;  %2638 = vmatmul.mubr.bf16.vlgmr.msra.gmra.mrb[32].mxu0 %v1832_v31  ;;  %v1720_v36 = vmax.f32 %v1519_v28, 0.0 }
 0x1a8   : > { %v1525_v40 = vadd.f32 %v1524_v39, %v7524_v12  ;;  %v1721_v38 = vmax.f32 %v1521_v34, 0.0 }
 0x1a9   : > { %v1728_v56 = vmax.f32 %v1523_v37, 0.0 }
 0x1aa   : > { %v1729_v41 = vmax.f32 %v1525_v40, 0.0 }
 0x1ab   : > { %v1840_v42 = vpack.c.bf16 %v1728_v56, %v1720_v36 }
 0x1ac   : > { %v1841_v58 = vpack.c.bf16 %v1729_v41, %v1721_v38  ;;  %v1528_v44 = vpop.f32.mrb[72].mxu1 }
 0x1ad   : > { %v1529_v45 = vadd.f32 %v1528_v44, %v7519_v62  ;;  %v1530_v46 = vpop.f32.mrb[73].mxu1 }
 0x1ae   : > { %v1531_v48 = vadd.f32 %v1530_v46, %v7524_v12  ;;  %v1532_v49 = vpop.f32.mrb[74].mxu1  ;;  %2645 = vmatprep.mubr.bf16.mxu0 %v1841_v58 }
 0x1af   : > { %v1533_v50 = vadd.f32 %v1532_v49, %v7519_v62  ;;  %v1534_v51 = vpop.f32.mrb[75].mxu1  ;;  %2646 = vmatmul.mubr.bf16.gmra.mrb[36].mxu0 %v1840_v42  ;;  %v1736_v54 = vmax.f32 %v1529_v45, 0.0 }
 0x1b0   : > { %v1535_v53 = vadd.f32 %v1534_v51, %v7524_v12  ;;  %v1737_v30 = vmax.f32 %v1531_v48, 0.0 }
 0x1b1   : > { %v1744_v2 = vmax.f32 %v1533_v50, 0.0 }
 0x1b2   : > { %v1745_v57 = vmax.f32 %v1535_v53, 0.0 }
 0x1b3   : > { %v1848_v59 = vpack.c.bf16 %v1744_v2, %v1736_v54 }
 0x1b4   : > { %v1849_v17 = vpack.c.bf16 %v1745_v57, %v1737_v30  ;;  %v1538_v60 = vpop.f32.mrb[76].mxu1 }
 0x1b5   : > { %v1539_v61 = vadd.f32 %v1538_v60, %v7519_v62  ;;  %v1540_v63 = vpop.f32.mrb[77].mxu1 }
 0x1b6   : > { %v1541_v1 = vadd.f32 %v1540_v63, %v7524_v12  ;;  %v1542_v3 = vpop.f32.mrb[78].mxu1  ;;  %2653 = vmatprep.mubr.bf16.mxu0 %v1849_v17 }
 0x1b7   : > { %v1543_v6 = vadd.f32 %v1542_v3, %v7519_v62  ;;  %v1544_v8 = vpop.f32.mrb[79].mxu1  ;;  %2654 = vmatmul.mubr.bf16.gmra.mrb[40].mxu0 %v1848_v59  ;;  %v1752_v10 = vmax.f32 %v1539_v61, 0.0 }
 0x1b8   : > { %v1545_v9 = vadd.f32 %v1544_v8, %v7524_v12  ;;  %v1753_v13 = vmax.f32 %v1541_v1, 0.0 }
 0x1b9   : > { %v1760_v11 = vmax.f32 %v1543_v6, 0.0  ;;  %v514_v6 = vsub.s32 6, %v7285_v20 }
 0x1ba   : > { %v1761_v52 = vmax.f32 %v1545_v9, 0.0 }
 0x1bb   : > { %v1856_v16 = vpack.c.bf16 %v1760_v11, %v1752_v10  ;;  %v518_v10 = vsub.s32 7, %v7285_v20 }
 0x1bc   : > { %v1857_v19 = vpack.c.bf16 %v1761_v52, %v1753_v13  ;;  %v1548_v55 = vpop.f32.mrb[80].mxu1 }
 0x1bd   : > { %v1549_v5 = vadd.f32 %v1548_v55, %v7519_v62  ;;  %v1550_v14 = vpop.f32.mrb[81].mxu1  ;;  %v7563_v55 = vrot.slane %v7300_v25, %v514_v6 }
 0x1be   : > { %v1551_v7 = vadd.f32 %v1550_v14, %v7524_v12  ;;  %v1552_v21 = vpop.f32.mrb[82].mxu1  ;;  %2661 = vmatprep.mubr.bf16.mxu0 %v1857_v19 }
 0x1bf   : > { %v1553_v22 = vadd.f32 %v1552_v21, %v7519_v62  ;;  %v1554_v23 = vpop.f32.mrb[83].mxu1  ;;  %2662 = vmatmul.mubr.bf16.gmra.mrb[44].mxu0 %v1856_v16  ;;  %v1768_v27 = vmax.f32 %v1549_v5, 0.0 }
 0x1c0   : > { %v1555_v18 = vadd.f32 %v1554_v23, %v7524_v12  ;;  %v1769_v31 = vmax.f32 %v1551_v7, 0.0  ;;  %v7568_v7 = vrot.slane %v7300_v25, %v518_v10 }
 0x1c1   : > { %v1776_v29 = vmax.f32 %v1553_v22, 0.0 }
 0x1c2   : > { %v1777_v32 = vmax.f32 %v1555_v18, 0.0 }
 0x1c3   : > { %v1864_v26 = vpack.c.bf16 %v1776_v29, %v1768_v27 }
 0x1c4   : > { %v1865_v28 = vpack.c.bf16 %v1777_v32, %v1769_v31  ;;  %v1558_v33 = vpop.f32.mrb[84].mxu1 }
 0x1c5   : > { %v1559_v34 = vadd.f32 %v1558_v33, %v7519_v62  ;;  %v1560_v35 = vpop.f32.mrb[85].mxu1 }
 0x1c6   : > { %v1561_v37 = vadd.f32 %v1560_v35, %v7524_v12  ;;  %v1562_v39 = vpop.f32.mrb[86].mxu1  ;;  %2669 = vmatprep.mubr.bf16.mxu0 %v1865_v28 }
 0x1c7   : > { %v1563_v40 = vadd.f32 %v1562_v39, %v7519_v62  ;;  %v1564_v36 = vpop.f32.mrb[87].mxu1  ;;  %2670 = vmatmul.mubr.bf16.gmra.mrb[48].mxu0 %v1864_v26  ;;  %v1784_v38 = vmax.f32 %v1559_v34, 0.0 }
 0x1c8   : > { %v1565_v56 = vadd.f32 %v1564_v36, %v7524_v12  ;;  %v1785_v42 = vmax.f32 %v1561_v37, 0.0 }
 0x1c9   : > { %v1792_v41 = vmax.f32 %v1563_v40, 0.0 }
 0x1ca   : > { %v1793_v58 = vmax.f32 %v1565_v56, 0.0 }
 0x1cb   : > { %v1872_v44 = vpack.c.bf16 %v1792_v41, %v1784_v38 }
 0x1cc   : > { %v1873_v45 = vpack.c.bf16 %v1793_v58, %v1785_v42  ;;  %v1568_v46 = vpop.f32.mrb[88].mxu1 }
 0x1cd   : > { %v1569_v48 = vadd.f32 %v1568_v46, %v7519_v62  ;;  %v1570_v49 = vpop.f32.mrb[89].mxu1 }
 0x1ce   : > { %v1571_v50 = vadd.f32 %v1570_v49, %v7524_v12  ;;  %v1572_v51 = vpop.f32.mrb[90].mxu1  ;;  %2677 = vmatprep.mubr.bf16.mxu0 %v1873_v45 }
 0x1cf   : > { %v1573_v53 = vadd.f32 %v1572_v51, %v7519_v62  ;;  %v1574_v54 = vpop.f32.mrb[91].mxu1  ;;  %2678 = vmatmul.mubr.bf16.gmra.mrb[52].mxu0 %v1872_v44  ;;  %v1800_v30 = vmax.f32 %v1569_v48, 0.0 }
 0x1d0   : > { %v1575_v2 = vadd.f32 %v1574_v54, %v7524_v12  ;;  %v1801_v59 = vmax.f32 %v1571_v50, 0.0 }
 0x1d1   : > { %v1808_v57 = vmax.f32 %v1573_v53, 0.0 }
 0x1d2   : > { %v1809_v17 = vmax.f32 %v1575_v2, 0.0 }
 0x1d3   : > { %v1880_v60 = vpack.c.bf16 %v1808_v57, %v1800_v30 }
 0x1d4   : > { %v1881_v61 = vpack.c.bf16 %v1809_v17, %v1801_v59  ;;  %v1578_v63 = vpop.f32.mrb[92].mxu1 }
 0x1d5   : > { %v1579_v1 = vadd.f32 %v1578_v63, %v7519_v62  ;;  %v1580_v3 = vpop.f32.mrb[93].mxu1 }
 0x1d6   : > { %v1581_v8 = vadd.f32 %v1580_v3, %v7524_v12  ;;  %v1582_v9 = vpop.f32.mrb[94].mxu1  ;;  %2685 = vmatprep.mubr.bf16.mxu0 %v1881_v61 }
 0x1d7   : > { %v1583_v11 = vadd.f32 %v1582_v9, %v7519_v62  ;;  %v1584_v13 = vpop.f32.mrb[95].mxu1  ;;  %2686 = vmatmul.mubr.bf16.gmra.mrb[56].mxu0 %v1880_v60  ;;  %v1816_v16 = vmax.f32 %v1579_v1, 0.0 }
 0x1d8   : > { %v1585_v52 = vadd.f32 %v1584_v13, %v7524_v12  ;;  %v1817_v5 = vmax.f32 %v1581_v8, 0.0 }
 0x1d9   : > { %v1824_v19 = vmax.f32 %v1583_v11, 0.0 }
 0x1da   : > { %v1825_v14 = vmax.f32 %v1585_v52, 0.0 }
 0x1db   : > { %v1888_v21 = vpack.c.bf16 %v1824_v19, %v1816_v16 }
 0x1dc   : > { %v1889_v62 = vpack.c.bf16 %v1825_v14, %v1817_v5  ;;  %v1621_v22 = vpop.f32.mrb[96].mxu1 }
 0x1dd   : > { %v1622_v23 = vadd.f32 %v1621_v22, %v7563_v55  ;;  %v1623_v12 = vpop.f32.mrb[97].mxu1 }
 0x1de   : > { %v1624_v18 = vadd.f32 %v1623_v12, %v7568_v7  ;;  %v1625_v27 = vpop.f32.mrb[98].mxu1  ;;  %2693 = vmatprep.mubr.bf16.mxu0 %v1889_v62 }
 0x1df   : > { %v1626_v29 = vadd.f32 %v1625_v27, %v7563_v55  ;;  %v1627_v31 = vpop.f32.mrb[99].mxu1  ;;  %2694 = vmatmul.mubr.bf16.gmra.mrb[60].mxu0 %v1888_v21  ;;  %v1706_v26 = vmax.f32 %v1622_v23, 0.0 }
 0x1e0   : > { %v1628_v32 = vadd.f32 %v1627_v31, %v7568_v7  ;;  %v1707_v25 = vmax.f32 %v1624_v18, 0.0 }
 0x1e1   : > { %v1714_v28 = vmax.f32 %v1626_v29, 0.0 }
 0x1e2   : > { %v1715_v33 = vmax.f32 %v1628_v32, 0.0 }
 0x1e3   : > { %v1834_v34 = vpack.c.bf16 %v1714_v28, %v1706_v26 }
 0x1e4   : > { %v1835_v35 = vpack.c.bf16 %v1715_v33, %v1707_v25  ;;  %v1631_v37 = vpop.f32.mrb[100].mxu1 }
 0x1e5   : > { %v1632_v39 = vadd.f32 %v1631_v37, %v7563_v55  ;;  %v1633_v40 = vpop.f32.mrb[101].mxu1 }
 0x1e6   : > { %v1634_v36 = vadd.f32 %v1633_v40, %v7568_v7  ;;  %v1635_v56 = vpop.f32.mrb[102].mxu1  ;;  %2734 = vmatprep.mubr.bf16.mxu1 %v1835_v35 }
 0x1e7   : > { %v1636_v38 = vadd.f32 %v1635_v56, %v7563_v55  ;;  %v1637_v41 = vpop.f32.mrb[103].mxu1  ;;  %2735 = vmatmul.mubr.bf16.vlgmr.msra.gmra.mrb[160].mxu1 %v1834_v34  ;;  %v1722_v58 = vmax.f32 %v1632_v39, 0.0 }
 0x1e8   : > { %v1638_v42 = vadd.f32 %v1637_v41, %v7568_v7  ;;  %v1723_v45 = vmax.f32 %v1634_v36, 0.0 }
 0x1e9   : > { %v1730_v44 = vmax.f32 %v1636_v38, 0.0 }
 0x1ea   : > { %v1731_v46 = vmax.f32 %v1638_v42, 0.0 }
 0x1eb   : > { %v1842_v48 = vpack.c.bf16 %v1730_v44, %v1722_v58 }
 0x1ec   : > { %v1843_v49 = vpack.c.bf16 %v1731_v46, %v1723_v45  ;;  %v1641_v50 = vpop.f32.mrb[104].mxu1 }
 0x1ed   : > { %v1642_v51 = vadd.f32 %v1641_v50, %v7563_v55  ;;  %v1643_v53 = vpop.f32.mrb[105].mxu1 }
 0x1ee   : > { %v1644_v54 = vadd.f32 %v1643_v53, %v7568_v7  ;;  %v1645_v2 = vpop.f32.mrb[106].mxu1  ;;  %2742 = vmatprep.mubr.bf16.mxu1 %v1843_v49 }
 0x1ef   : > { %v1646_v30 = vadd.f32 %v1645_v2, %v7563_v55  ;;  %v1647_v57 = vpop.f32.mrb[107].mxu1  ;;  %2743 = vmatmul.mubr.bf16.gmra.mrb[164].mxu1 %v1842_v48  ;;  %v1738_v17 = vmax.f32 %v1642_v51, 0.0 }
 0x1f0   : > { %v1648_v59 = vadd.f32 %v1647_v57, %v7568_v7  ;;  %v1739_v61 = vmax.f32 %v1644_v54, 0.0  ;;  %v2807_v57 = vld [vmem:[%s8847_s5] sm:$0xff] }
 0x1f1   : > { %v1746_v60 = vmax.f32 %v1646_v30, 0.0 }
 0x1f2   : > { %v1747_v63 = vmax.f32 %v1648_v59, 0.0  ;;  %v2811_v59 = vld [vmem:[%s8847_s5 + $0x20] sm:$0xff] }
 0x1f3   : > { %v1850_v1 = vpack.c.bf16 %v1746_v60, %v1738_v17 }
 0x1f4   : > { %v1851_v3 = vpack.c.bf16 %v1747_v63, %v1739_v61  ;;  %v1651_v8 = vpop.f32.mrb[108].mxu1  ;;  %v5611_v61 = vcombine.low %v2807_v57, %v2811_v59  ;;  %v5612_v63 = vcombine.high %v2807_v57, %v2811_v59  ;;  %v2827_v57 = vld [vmem:[%s8847_s5 + $0xa0] sm:$0xff] }
 0x1f5   : > { %v1652_v9 = vadd.f32 %v1651_v8, %v7563_v55  ;;  %v1653_v11 = vpop.f32.mrb[109].mxu1 }
 0x1f6   : > { %v1654_v13 = vadd.f32 %v1653_v11, %v7568_v7  ;;  %v1655_v52 = vpop.f32.mrb[110].mxu1  ;;  %2750 = vmatprep.mubr.bf16.mxu1 %v1851_v3  ;;  %3233 = vmatprep.subr.bf16.mxu0 %v5612_v63 }
 0x1f7   : > { %v1656_v16 = vadd.f32 %v1655_v52, %v7563_v55  ;;  %v1657_v19 = vpop.f32.mrb[111].mxu1  ;;  %2751 = vmatmul.mubr.bf16.gmra.mrb[168].mxu1 %v1850_v1  ;;  %v1754_v14 = vmax.f32 %v1652_v9, 0.0  ;;  %3234 = vmatpush1.bf16.msra.mxu0 %v5611_v61 }
 0x1f8   : > { %v1658_v5 = vadd.f32 %v1657_v19, %v7568_v7  ;;  %v1755_v62 = vmax.f32 %v1654_v13, 0.0 }
 0x1f9   : > { %v1762_v21 = vmax.f32 %v1656_v16, 0.0 }
 0x1fa   : > { %v1763_v22 = vmax.f32 %v1658_v5, 0.0  ;;  %v5855_v23 = vpop.f32.mrb[0].mxu0 }
 0x1fb   : > { %v1858_v12 = vpack.c.bf16 %v1762_v21, %v1754_v14  ;;  %v5856_v18 = vpop.f32.mrb[1].mxu0 }
 0x1fc   : > { %v1859_v27 = vpack.c.bf16 %v1763_v22, %v1755_v62  ;;  %v7586_v29 = vadd.f32 %v5856_v18, %v5855_v23  ;;  %v1661_v31 = vpop.f32.mrb[112].mxu1  ;;  %v5858_v32 = vpop.f32.mrb[2].mxu0 }
 0x1fd   : > { %v1662_v26 = vadd.f32 %v1661_v31, %v7563_v55  ;;  %v1663_v28 = vpop.f32.mrb[113].mxu1  ;;  %v5859_v25 = vpop.f32.mrb[3].mxu0  ;;  %v2815_v31 = vld [vmem:[%s8847_s5 + $0x40] sm:$0xff] }
 0x1fe   : > { %v1664_v33 = vadd.f32 %v1663_v28, %v7568_v7  ;;  %v7590_v34 = vadd.f32 %v5859_v25, %v5858_v32  ;;  %v1665_v35 = vpop.f32.mrb[114].mxu1  ;;  %2758 = vmatprep.mubr.bf16.mxu1 %v1859_v27  ;;  %v2819_v32 = vld [vmem:[%s8847_s5 + $0x60] sm:$0xff] }
 0x1ff   : > { %v1666_v37 = vadd.f32 %v1665_v35, %v7563_v55  ;;  %v1667_v39 = vpop.f32.mrb[115].mxu1  ;;  %2759 = vmatmul.mubr.bf16.gmra.mrb[172].mxu1 %v1858_v12  ;;  %v1770_v36 = vmax.f32 %v1662_v26, 0.0  ;;  %v5619_v25 = vcombine.low %v2815_v31, %v2819_v32 }
 0x200   : > { %v1668_v40 = vadd.f32 %v1667_v39, %v7568_v7  ;;  %v1771_v38 = vmax.f32 %v1664_v33, 0.0  ;;  %v5620_v33 = vcombine.high %v2815_v31, %v2819_v32 }
 0x201   : > { %v1778_v56 = vmax.f32 %v1666_v37, 0.0 }
 0x202   : > { %v1779_v41 = vmax.f32 %v1668_v40, 0.0  ;;  %v5861_v42 = vpop.f32.mrb[4].mxu0  ;;  %3235 = vmatprep.subr.bf16.mxu0 %v5620_v33 }
 0x203   : > { %v1866_v58 = vpack.c.bf16 %v1778_v56, %v1770_v36  ;;  %v5862_v44 = vpop.f32.mrb[5].mxu0  ;;  %3236 = vmatpush1.bf16.msra.mxu0 %v5619_v25 }
 0x204   : > { %v1867_v45 = vpack.c.bf16 %v1779_v41, %v1771_v38  ;;  %v7594_v46 = vadd.f32 %v5862_v44, %v5861_v42  ;;  %v1671_v48 = vpop.f32.mrb[116].mxu1  ;;  %v5864_v49 = vpop.f32.mrb[6].mxu0 }
 0x205   : > { %v1672_v50 = vadd.f32 %v1671_v48, %v7563_v55  ;;  %v1673_v51 = vpop.f32.mrb[117].mxu1  ;;  %v5865_v53 = vpop.f32.mrb[7].mxu0 }
 0x206   : > { %v1674_v54 = vadd.f32 %v1673_v51, %v7568_v7  ;;  %v7598_v2 = vadd.f32 %v5865_v53, %v5864_v49  ;;  %v1675_v30 = vpop.f32.mrb[118].mxu1  ;;  %2766 = vmatprep.mubr.bf16.mxu1 %v1867_v45 }
 0x207   : > { %v1676_v17 = vadd.f32 %v1675_v30, %v7563_v55  ;;  %v1677_v60 = vpop.f32.mrb[119].mxu1  ;;  %2767 = vmatmul.mubr.bf16.gmra.mrb[176].mxu1 %v1866_v58  ;;  %v1786_v3 = vmax.f32 %v1672_v50, 0.0  ;;  %v2823_v30 = vld [vmem:[%s8847_s5 + $0x80] sm:$0xff] }
 0x208   : > { %v1678_v1 = vadd.f32 %v1677_v60, %v7568_v7  ;;  %v1787_v9 = vmax.f32 %v1674_v54, 0.0  ;;  %v5627_v60 = vcombine.low %v2823_v30, %v2827_v57  ;;  %v5628_v61 = vcombine.high %v2823_v30, %v2827_v57 }
 0x209   : > { %v1794_v8 = vmax.f32 %v1676_v17, 0.0 }
 0x20a   : > { %v1795_v11 = vmax.f32 %v1678_v1, 0.0  ;;  %v5867_v13 = vpop.f32.mrb[8].mxu0  ;;  %3237 = vmatprep.subr.bf16.mxu0 %v5628_v61 }
 0x20b   : > { %v1874_v52 = vpack.c.bf16 %v1794_v8, %v1786_v3  ;;  %v5868_v16 = vpop.f32.mrb[9].mxu0  ;;  %3238 = vmatpush1.bf16.msra.mxu0 %v5627_v60  ;;  %v2836_v60 = vld [vmem:[%s8847_s5 + $0xe8] sm:$0xff] }
 0x20c   : > { %v1875_v19 = vpack.c.bf16 %v1795_v11, %v1787_v9  ;;  %v7608_v5 = vadd.f32 %v5868_v16, %v5867_v13  ;;  %v1681_v14 = vpop.f32.mrb[120].mxu1  ;;  %v5870_v21 = vpop.f32.mrb[10].mxu0 }
 0x20d   : > { %v1682_v62 = vadd.f32 %v1681_v14, %v7563_v55  ;;  %v1683_v22 = vpop.f32.mrb[121].mxu1  ;;  %v5871_v23 = vpop.f32.mrb[11].mxu0 }
 0x20e   : > { %v1684_v12 = vadd.f32 %v1683_v22, %v7568_v7  ;;  %v7612_v18 = vadd.f32 %v5871_v23, %v5870_v21  ;;  %v1685_v27 = vpop.f32.mrb[122].mxu1  ;;  %2774 = vmatprep.mubr.bf16.mxu1 %v1875_v19 }
 0x20f   : > { %v1686_v26 = vadd.f32 %v1685_v27, %v7563_v55  ;;  %v1687_v28 = vpop.f32.mrb[123].mxu1  ;;  %2775 = vmatmul.mubr.bf16.gmra.mrb[180].mxu1 %v1874_v52  ;;  %v1802_v37 = vmax.f32 %v1682_v62, 0.0  ;;  %v2835_v62 = vld [vmem:[%s8847_s5 + $0xe0] sm:$0xff]  ;;  %v2812_v27 = vld [vmem:[%s8847_s5 + $0x28] sm:$0xff] }
 0x210   : > { %v1688_v35 = vadd.f32 %v1687_v28, %v7568_v7  ;;  %v1803_v40 = vmax.f32 %v1684_v12, 0.0  ;;  %v2808_v12 = vld [vmem:[%s8847_s5 + $0x8] sm:$0xff] }
 0x211   : > { %v1810_v39 = vmax.f32 %v1686_v26, 0.0  ;;  %v5614_v32 = vcombine.high %v2808_v12, %v2812_v27  ;;  %v5613_v28 = vcombine.low %v2808_v12, %v2812_v27  ;;  %v2848_v12 = vld [vmem:[%s8847_s5 + $0x148] sm:$0xff] }
 0x212   : > { %v1811_v36 = vmax.f32 %v1688_v35, 0.0  ;;  %v5873_v56 = vpop.f32.mrb[12].mxu0  ;;  %v2852_v27 = vld [vmem:[%s8847_s5 + $0x168] sm:$0xff] }
 0x213   : > { %v1882_v38 = vpack.c.bf16 %v1810_v39, %v1802_v37  ;;  %v5874_v41 = vpop.f32.mrb[13].mxu0  ;;  %3346 = vmatprep.subr.bf16.mxu1 %v5614_v32  ;;  %v2816_v37 = vld [vmem:[%s8847_s5 + $0x48] sm:$0xff]  ;;  %v2855_v32 = vld [vmem:[%s8847_s5 + $0x180] sm:$0xff] }
 0x214   : > { %v1883_v42 = vpack.c.bf16 %v1811_v36, %v1803_v40  ;;  %v7622_v58 = vadd.f32 %v5874_v41, %v5873_v56  ;;  %v1691_v44 = vpop.f32.mrb[124].mxu1  ;;  %v5876_v45 = vpop.f32.mrb[14].mxu0  ;;  %3347 = vmatpush1.bf16.msra.mxu1 %v5613_v28  ;;  %v2820_v39 = vld [vmem:[%s8847_s5 + $0x68] sm:$0xff]  ;;  %v2839_v36 = vld [vmem:[%s8847_s5 + $0x100] sm:$0xff]  ;;  %v5654_v28 = vcombine.high %v2848_v12, %v2852_v27 }
 0x215   : > { %v1692_v48 = vadd.f32 %v1691_v44, %v7563_v55  ;;  %v1693_v49 = vpop.f32.mrb[125].mxu1  ;;  %v5877_v50 = vpop.f32.mrb[15].mxu0  ;;  %v2843_v56 = vld [vmem:[%s8847_s5 + $0x120] sm:$0xff]  ;;  %v5621_v44 = vcombine.low %v2816_v37, %v2820_v39 }
 0x216   : > { %v1694_v51 = vadd.f32 %v1693_v49, %v7568_v7  ;;  %v7626_v53 = vadd.f32 %v5877_v50, %v5876_v45  ;;  %v1695_v54 = vpop.f32.mrb[126].mxu1  ;;  %2782 = vmatprep.mubr.bf16.mxu1 %v1883_v42  ;;  %v5643_v41 = vcombine.low %v2839_v36, %v2843_v56  ;;  %v5644_v42 = vcombine.high %v2839_v36, %v2843_v56  ;;  %v2824_v45 = vld [vmem:[%s8847_s5 + $0x88] sm:$0xff] }
 0x217   : > { %v1696_v59 = vadd.f32 %v1695_v54, %v7563_v55  ;;  %v1697_v17 = vpop.f32.mrb[127].mxu1  ;;  %2783 = vmatmul.mubr.bf16.gmra.mrb[184].mxu1 %v1882_v38  ;;  %v1818_v1 = vmax.f32 %v1692_v48, 0.0  ;;  %v5622_v38 = vcombine.high %v2816_v37, %v2820_v39  ;;  %v2828_v48 = vld [vmem:[%s8847_s5 + $0xa8] sm:$0xff]  ;;  %v5653_v37 = vcombine.low %v2848_v12, %v2852_v27  ;;  %v7715_v39 = vld [vmem:[%s8846_s4] ss:$0 sm:$0xff] }
 0x218   : > { %v1698_v63 = vadd.f32 %v1697_v17, %v7568_v7  ;;  %v1819_v8 = vmax.f32 %v1694_v51, 0.0  ;;  %v2831_v7 = vld [vmem:[%s8847_s5 + $0xc0] sm:$0xff]  ;;  %v5630_v50 = vcombine.high %v2824_v45, %v2828_v48  ;;  %v5629_v54 = vcombine.low %v2824_v45, %v2828_v48  ;;  %v2832_v17 = vld [vmem:[%s8847_s5 + $0xc8] sm:$0xff] }
 0x219   : > { %v1826_v3 = vmax.f32 %v1696_v59, 0.0  ;;  %v5635_v22 = vcombine.low %v2831_v7, %v2835_v62  ;;  %v5636_v23 = vcombine.high %v2831_v7, %v2835_v62  ;;  %3348 = vmatprep.subr.bf16.mxu1 %v5622_v38  ;;  %v2856_v36 = vld [vmem:[%s8847_s5 + $0x188] sm:$0xff]  ;;  %v2446_v45 = vadd.f32 %v7586_v29, %v7715_v39 }
 0x21a   : > { %v1827_v9 = vmax.f32 %v1698_v63, 0.0  ;;  %v5879_v11 = vpop.f32.mrb[16].mxu0  ;;  %3349 = vmatpush1.bf16.msra.mxu1 %v5621_v44  ;;  %v2847_v63 = vld [vmem:[%s8847_s5 + $0x140] sm:$0xff]  ;;  %v2860_v56 = vld [vmem:[%s8847_s5 + $0x1a8] sm:$0xff] }
 0x21b   : > { %v1890_v13 = vpack.c.bf16 %v1826_v3, %v1818_v1  ;;  %v5880_v52 = vpop.f32.mrb[17].mxu0  ;;  %3239 = vmatprep.subr.bf16.mxu0 %v5636_v23  ;;  %3350 = vmatprep.subr.bf16.mxu1 %v5630_v50  ;;  %v2851_v1 = vld [vmem:[%s8847_s5 + $0x160] sm:$0xff]  ;;  %v5638_v3 = vcombine.high %v2832_v17, %v2836_v60  ;;  %v5661_v44 = vcombine.low %v2856_v36, %v2860_v56  ;;  %v2864_v29 = vld [vmem:[%s8847_s5 + $0x1c8] sm:$0xff] }
 0x21c   : > { %v1891_v16 = vpack.c.bf16 %v1827_v9, %v1819_v8  ;;  %v7636_v19 = vadd.f32 %v5880_v52, %v5879_v11  ;;  %v5882_v14 = vpop.f32.mrb[18].mxu0  ;;  %3240 = vmatpush1.bf16.msra.mxu0 %v5635_v22  ;;  %v5651_v8 = vcombine.low %v2847_v63, %v2851_v1  ;;  %v5652_v9 = vcombine.high %v2847_v63, %v2851_v1  ;;  %v2844_v52 = vld [vmem:[%s8847_s5 + $0x128] sm:$0xff] }
 0x21d   : > { %v5883_v55 = vpop.f32.mrb[19].mxu0  ;;  %3241 = vmatprep.subr.bf16.mxu0 %v5644_v42  ;;  %v5637_v11 = vcombine.low %v2832_v17, %v2836_v60  ;;  %v2449_v50 = vadd.f32 %v7590_v34, %v7715_v39  ;;  %v2868_v34 = vld [vmem:[%s8847_s5 + $0x1e8] sm:$0xff] }
 0x21e   : > { %v7638_v21 = vadd.f32 %v5883_v55, %v5882_v14  ;;  %2790 = vmatprep.mubr.bf16.mxu1 %v1891_v16  ;;  %3351 = vmatpush1.bf16.msra.mxu1 %v5629_v54  ;;  %v2863_v54 = vld [vmem:[%s8847_s5 + $0x1c0] sm:$0xff]  ;;  %v5669_v1 = vcombine.low %v2864_v29, %v2868_v34 }
 0x21f   : > { %2791 = vmatmul.mubr.bf16.gmra.mrb[188].mxu1 %v1890_v13  ;;  %3352 = vmatprep.subr.bf16.mxu1 %v5638_v3  ;;  %v2840_v13 = vld [vmem:[%s8847_s5 + $0x108] sm:$0xff]  ;;  %v5670_v3 = vcombine.high %v2864_v29, %v2868_v34  ;;  %v7780_v34 = vld [vmem:[%s8847_s5 + $0x10] sm:$0xff] }
 0x220   : > { %3242 = vmatpush1.bf16.msra.mxu0 %v5643_v41  ;;  %v5646_v14 = vcombine.high %v2840_v13, %v2844_v52  ;;  %v5645_v7 = vcombine.low %v2840_v13, %v2844_v52  ;;  %v5662_v41 = vcombine.high %v2856_v36, %v2860_v56  ;;  %v6659_v13 = vmov 0  }
 0x221   : > { %3243 = vmatprep.subr.bf16.mxu0 %v5652_v9  ;;  %3265 = vmatprep.mubr.bf16.mxu0 %v6659_v13  ;;  %v2454_v52 = vadd.f32 %v7594_v46, %v7715_v39  ;;  %v2465_v46 = vadd.f32 %v7612_v18, %v7715_v39 }
 0x222   : > { %v5885_v31 = vpop.f32.mrb[20].mxu0  ;;  %3353 = vmatpush1.bf16.msra.mxu1 %v5637_v11  ;;  %3378 = vmatprep.mubr.bf16.mxu1 %v6659_v13 }
 0x223   : > { %v5886_v26 = vpop.f32.mrb[21].mxu0  ;;  %3354 = vmatprep.subr.bf16.mxu1 %v5646_v14 }
 0x224   : > { %v7652_v25 = vadd.f32 %v5886_v26, %v5885_v31  ;;  %v5888_v33 = vpop.f32.mrb[22].mxu0  ;;  %3244 = vmatpush1.bf16.msra.mxu0 %v5651_v8  ;;  %v2859_v26 = vld [vmem:[%s8847_s5 + $0x1a0] sm:$0xff] }
 0x225   : > { %v5889_v35 = vpop.f32.mrb[23].mxu0 }
 0x226   : > { %v7660_v40 = vadd.f32 %v5889_v35, %v5888_v33  ;;  %3355 = vmatpush1.bf16.msra.mxu1 %v5645_v7  ;;  %v5659_v33 = vcombine.low %v2855_v32, %v2859_v26  ;;  %v5660_v35 = vcombine.high %v2855_v32, %v2859_v26  ;;  %v2457_v7 = vadd.f32 %v7598_v2, %v7715_v39 }
 0x227   : > { %3356 = vmatprep.subr.bf16.mxu1 %v5654_v28  ;;  %v2462_v26 = vadd.f32 %v7608_v5, %v7715_v39  ;;  %v2473_v5 = vadd.f32 %v7626_v53, %v7715_v39 }
 0x228   : > { %3245 = vmatprep.subr.bf16.mxu0 %v5660_v35 }
 0x229   : > { %3246 = vmatpush1.bf16.msra.mxu0 %v5659_v33 }
 0x22a   : > { %v5891_v49 = vpop.f32.mrb[24].mxu0  ;;  %3357 = vmatpush1.bf16.msra.mxu1 %v5653_v37 }
 0x22b   : > { %v5892_v51 = vpop.f32.mrb[25].mxu0  ;;  %3358 = vmatprep.subr.bf16.mxu1 %v5662_v41  ;;  %v2470_v41 = vadd.f32 %v7622_v58, %v7715_v39  ;;  %v2481_v58 = vadd.f32 %v7638_v21, %v7715_v39 }
 0x22c   : > { %v7674_v30 = vadd.f32 %v5892_v51, %v5891_v49  ;;  %v5894_v57 = vpop.f32.mrb[26].mxu0 }
 0x22d   : > { %v5895_v59 = vpop.f32.mrb[27].mxu0 }
 0x22e   : > { %v7682_v61 = vadd.f32 %v5895_v59, %v5894_v57  ;;  %v2867_v57 = vld [vmem:[%s8847_s5 + $0x1e0] sm:$0xff]  ;;  %3359 = vmatpush1.bf16.msra.mxu1 %v5661_v44 }
 0x22f   : > { %v5667_v60 = vcombine.low %v2863_v54, %v2867_v57  ;;  %v5668_v63 = vcombine.high %v2863_v54, %v2867_v57  ;;  %3360 = vmatprep.subr.bf16.mxu1 %v5670_v3  ;;  %v2478_v54 = vadd.f32 %v7636_v19, %v7715_v39  ;;  %v7785_v19 = vld [vmem:[%s8847_s5 + $0x30] sm:$0xff] }
 0x230   : > { %v5616_v3 = vcombine.high %v7780_v34, %v7785_v19 }
 0x231   : > { %3247 = vmatprep.subr.bf16.mxu0 %v5668_v63 }
 0x232   : > { %v5897_v16 = vpop.f32.mrb[28].mxu0  ;;  %3248 = vmatpush1.bf16.msra.mxu0 %v5667_v60  ;;  %3361 = vmatpush1.bf16.msra.mxu1 %v5669_v1  ;;  %v7790_v1 = vld [vmem:[%s8847_s5 + $0x18] sm:$0xff] }
 0x233   : > { %v5898_v55 = vpop.f32.mrb[29].mxu0  ;;  %3459 = vmatprep.subr.bf16.mxu0 %v5616_v3 }
 0x234   : > { %v7696_v62 = vadd.f32 %v5898_v55, %v5897_v16  ;;  %v5900_v22 = vpop.f32.mrb[30].mxu0 }
 0x235   : > { %v5901_v23 = vpop.f32.mrb[31].mxu0 }
 0x236   : > { %v7704_v31 = vadd.f32 %v5901_v23, %v5900_v22 }
 0x23a   : > { %v5919_v38 = vpop.f32.mrb[128].mxu1 }
 0x23b   : > { %v5920_v42 = vpop.f32.mrb[129].mxu1 }
 0x23c   : > { %v5921_v48 = vadd.f32 %v5920_v42, %v5919_v38  ;;  %v5922_v49 = vpop.f32.mrb[130].mxu1 }
 0x23d   : > { %v5923_v51 = vpop.f32.mrb[131].mxu1 }
 0x23e   : > { %v7736_v59 = vadd.f32 %v5921_v48, %v2446_v45  ;;  %v5924_v17 = vadd.f32 %v5923_v51, %v5922_v49 }
 0x240   : > { %v7741_v8 = vadd.f32 %v5924_v17, %v2449_v50 }
 0x242   : > { %v5925_v9 = vpop.f32.mrb[132].mxu1 }
 0x243   : > { %v5926_v11 = vpop.f32.mrb[133].mxu1 }
 0x244   : > { %v5927_v16 = vadd.f32 %v5926_v11, %v5925_v9  ;;  %v5928_v14 = vpop.f32.mrb[134].mxu1  ;;  %v7797_v9 = vld [vmem:[%s8847_s5 + $0x38] sm:$0xff] }
 0x245   : > { %v5929_v55 = vpop.f32.mrb[135].mxu1 }
 0x246   : > { %v7749_v22 = vadd.f32 %v5927_v16, %v2454_v52  ;;  %v5930_v23 = vadd.f32 %v5929_v55, %v5928_v14  ;;  %v5615_v52 = vcombine.low %v7780_v34, %v7785_v19  ;;  %v5617_v16 = vcombine.low %v7790_v1, %v7797_v9  ;;  %v2837_v34 = vld [vmem:[%s8847_s5 + $0xf0] sm:$0xff]  ;;  %v2834_v19 = vld [vmem:[%s8847_s5 + $0xd8] sm:$0xff] }
 0x247   : > { %v5618_v14 = vcombine.high %v7790_v1, %v7797_v9  ;;  %v2486_v55 = vadd.f32 %v7652_v25, %v7715_v39  ;;  %v2838_v1 = vld [vmem:[%s8847_s5 + $0xf8] sm:$0xff] }
 0x248   : > { %v7751_v12 = vadd.f32 %v5930_v23, %v2457_v7 }
 0x249   : > { %3572 = vmatprep.subr.bf16.mxu1 %v5618_v14 }
 0x24a   : > { %v5931_v27 = vpop.f32.mrb[136].mxu1 }
 0x24b   : > { %v5932_v32 = vpop.f32.mrb[137].mxu1 }
 0x24c   : > { %v5933_v28 = vadd.f32 %v5932_v32, %v5931_v27  ;;  %v5934_v33 = vpop.f32.mrb[138].mxu1  ;;  %v2489_v32 = vadd.f32 %v7660_v40, %v7715_v39 }
 0x24d   : > { %v5935_v35 = vpop.f32.mrb[139].mxu1 }
 0x24e   : > { %v7757_v37 = vadd.f32 %v5933_v28, %v2462_v26  ;;  %v5936_v36 = vadd.f32 %v5935_v35, %v5934_v33 }
 0x250   : > { %v7759_v2 = vadd.f32 %v5936_v36, %v2465_v46  ;;  %v2494_v36 = vadd.f32 %v7674_v30, %v7715_v39  ;;  %v2505_v30 = vadd.f32 %v7704_v31, %v7715_v39 }
 0x252   : > { %v5937_v56 = vpop.f32.mrb[140].mxu1 }
 0x253   : > { %v5938_v38 = vpop.f32.mrb[141].mxu1 }
 0x254   : > { %v5939_v42 = vadd.f32 %v5938_v38, %v5937_v56  ;;  %v5940_v44 = vpop.f32.mrb[142].mxu1 }
 0x255   : > { %v5941_v45 = vpop.f32.mrb[143].mxu1 }
 0x256   : > { %v7765_v48 = vadd.f32 %v5939_v42, %v2470_v41  ;;  %v5942_v49 = vadd.f32 %v5941_v45, %v5940_v44  ;;  %v2497_v41 = vadd.f32 %v7682_v61, %v7715_v39 }
 0x258   : > { %v7767_v18 = vadd.f32 %v5942_v49, %v2473_v5  ;;  %v2502_v49 = vadd.f32 %v7696_v62, %v7715_v39 }
 0x25a   : > { %v5943_v50 = vpop.f32.mrb[144].mxu1 }
 0x25b   : > { %v5944_v51 = vpop.f32.mrb[145].mxu1 }
 0x25c   : > { %v5945_v57 = vadd.f32 %v5944_v51, %v5943_v50  ;;  %v5946_v29 = vpop.f32.mrb[146].mxu1 }
 0x25d   : > { %v5947_v17 = vpop.f32.mrb[147].mxu1 }
 0x25e   : > { %v7773_v60 = vadd.f32 %v5945_v57, %v2478_v54  ;;  %v5948_v63 = vadd.f32 %v5947_v17, %v5946_v29 }
 0x260   : > { %v7775_v53 = vadd.f32 %v5948_v63, %v2481_v58 }
 0x262   : > { %v5949_v21 = vpop.f32.mrb[148].mxu1 }
 0x263   : > { %v5950_v11 = vpop.f32.mrb[149].mxu1 }
 0x264   : > { %v5951_v7 = vadd.f32 %v5950_v11, %v5949_v21  ;;  %v5952_v23 = vpop.f32.mrb[150].mxu1 }
 0x265   : > { %v5953_v27 = vpop.f32.mrb[151].mxu1 }
 0x266   : > { %v7809_v26 = vadd.f32 %v5951_v7, %v2486_v55  ;;  %v5954_v28 = vadd.f32 %v5953_v27, %v5952_v23 }
 0x268   : > { %v7811_v33 = vadd.f32 %v5954_v28, %v2489_v32 }
 0x26a   : > { %v5955_v35 = vpop.f32.mrb[152].mxu1 }
 0x26b   : > { %v5956_v46 = vpop.f32.mrb[153].mxu1 }
 0x26c   : > { %v5957_v56 = vadd.f32 %v5956_v46, %v5955_v35  ;;  %v5958_v25 = vpop.f32.mrb[154].mxu1 }
 0x26d   : > { %v5959_v38 = vpop.f32.mrb[155].mxu1 }
 0x26e   : > { %v7817_v42 = vadd.f32 %v5957_v56, %v2494_v36  ;;  %v5960_v44 = vadd.f32 %v5959_v38, %v5958_v25 }
 0x270   : > { %v7819_v40 = vadd.f32 %v5960_v44, %v2497_v41 }
 0x272   : > { %v5961_v45 = vpop.f32.mrb[156].mxu1 }
 0x273   : > { %v5962_v5 = vpop.f32.mrb[157].mxu1 }
 0x274   : > { %v5963_v50 = vadd.f32 %v5962_v5, %v5961_v45  ;;  %v5964_v51 = vpop.f32.mrb[158].mxu1 }
 0x275   : > { %v5965_v54 = vpop.f32.mrb[159].mxu1 }
 0x276   : > { %v7825_v57 = vadd.f32 %v5963_v50, %v2502_v49  ;;  %v5966_v29 = vadd.f32 %v5965_v54, %v5964_v51 }
 0x278   : > { %v7827_v61 = vadd.f32 %v5966_v29, %v2505_v30 }
 0x27a   : > { %v5983_v17 = vpop.f32.mrb[32].mxu0 }
 0x27b   : > { %v5984_v58 = vpop.f32.mrb[33].mxu0 }
 0x27c   : > { %v5985_v63 = vadd.f32 %v5984_v58, %v5983_v17  ;;  %v5986_v21 = vpop.f32.mrb[34].mxu0 }
 0x27d   : > { %v5987_v3 = vpop.f32.mrb[35].mxu0 }
 0x27e   : > { %v7830_v11 = vadd.f32 %v5985_v63, %v7736_v59  ;;  %v5988_v62 = vadd.f32 %v5987_v3, %v5986_v21 }
 0x280   : > { %v7833_v14 = vadd.f32 %v5988_v62, %v7741_v8 }
 0x282   : > { %v5989_v55 = vpop.f32.mrb[36].mxu0 }
 0x283   : > { %v5990_v7 = vpop.f32.mrb[37].mxu0 }
 0x284   : > { %v5991_v31 = vadd.f32 %v5990_v7, %v5989_v55  ;;  %v5992_v39 = vpop.f32.mrb[38].mxu0 }
 0x285   : > { %v5993_v23 = vpop.f32.mrb[39].mxu0 }
 0x286   : > { %v7836_v27 = vadd.f32 %v5991_v31, %v7749_v22  ;;  %v5994_v32 = vadd.f32 %v5993_v23, %v5992_v39 }
 0x288   : > { %v7839_v28 = vadd.f32 %v5994_v32, %v7751_v12 }
 0x28a   : > { %v5995_v35 = vpop.f32.mrb[40].mxu0 }
 0x28b   : > { %v5996_v46 = vpop.f32.mrb[41].mxu0 }
 0x28c   : > { %v5997_v59 = vadd.f32 %v5996_v46, %v5995_v35  ;;  %v5998_v36 = vpop.f32.mrb[42].mxu0 }
 0x28d   : > { %v5999_v56 = vpop.f32.mrb[43].mxu0 }
 0x28e   : > { %v7842_v8 = vadd.f32 %v5997_v59, %v7757_v37  ;;  %v6000_v25 = vadd.f32 %v5999_v56, %v5998_v36 }
 0x290   : > { %v7845_v38 = vadd.f32 %v6000_v25, %v7759_v2 }
 0x292   : > { %v6001_v41 = vpop.f32.mrb[44].mxu0 }
 0x293   : > { %v6002_v44 = vpop.f32.mrb[45].mxu0 }
 0x294   : > { %v6003_v22 = vadd.f32 %v6002_v44, %v6001_v41  ;;  %v6004_v45 = vpop.f32.mrb[46].mxu0 }
 0x295   : > { %v6005_v5 = vpop.f32.mrb[47].mxu0 }
 0x296   : > { %v7848_v12 = vadd.f32 %v6003_v22, %v7765_v48  ;;  %v6006_v49 = vadd.f32 %v6005_v5, %v6004_v45 }
 0x298   : > { %v7851_v50 = vadd.f32 %v6006_v49, %v7767_v18 }
 0x29a   : > { %v6007_v51 = vpop.f32.mrb[48].mxu0 }
 0x29b   : > { %v6008_v54 = vpop.f32.mrb[49].mxu0 }
 0x29c   : > { %v6009_v37 = vadd.f32 %v6008_v54, %v6007_v51  ;;  %v6010_v30 = vpop.f32.mrb[50].mxu0  ;;  %v2817_v54 = vld [vmem:[%s8847_s5 + $0x50] sm:$0xff] }
 0x29d   : > { %v6011_v29 = vpop.f32.mrb[51].mxu0 }
 0x29e   : > { %v7854_v2 = vadd.f32 %v6009_v37, %v7773_v60  ;;  %v6012_v17 = vadd.f32 %v6011_v29, %v6010_v30  ;;  %v2822_v30 = vld [vmem:[%s8847_s5 + $0x78] sm:$0xff] }
 0x2a0   : > { %v7857_v58 = vadd.f32 %v6012_v17, %v7775_v53 }
 0x2a2   : > { %v6013_v63 = vpop.f32.mrb[52].mxu0 }
 0x2a3   : > { %v6014_v21 = vpop.f32.mrb[53].mxu0 }
 0x2a4   : > { %v6015_v48 = vadd.f32 %v6014_v21, %v6013_v63  ;;  %v6016_v3 = vpop.f32.mrb[54].mxu0 }
 0x2a5   : > { %v6017_v62 = vpop.f32.mrb[55].mxu0 }
 0x2a6   : > { %v7860_v18 = vadd.f32 %v6015_v48, %v7809_v26  ;;  %v6018_v55 = vadd.f32 %v6017_v62, %v6016_v3  ;;  %v2829_v62 = vld [vmem:[%s8847_s5 + $0xb0] sm:$0xff] }
 0x2a8   : > { %v7863_v7 = vadd.f32 %v6018_v55, %v7811_v33  ;;  %v2826_v55 = vld [vmem:[%s8847_s5 + $0x98] sm:$0xff] }
 0x2aa   : > { %v6019_v31 = vpop.f32.mrb[56].mxu0 }
 0x2ab   : > { %v6020_v39 = vpop.f32.mrb[57].mxu0 }
 0x2ac   : > { %v6021_v60 = vadd.f32 %v6020_v39, %v6019_v31  ;;  %v6022_v23 = vpop.f32.mrb[58].mxu0  ;;  %v2830_v31 = vld [vmem:[%s8847_s5 + $0xb8] sm:$0xff] }
 0x2ad   : > { %v6023_v32 = vpop.f32.mrb[59].mxu0 }
 0x2ae   : > { %v7866_v53 = vadd.f32 %v6021_v60, %v7817_v42  ;;  %v6024_v35 = vadd.f32 %v6023_v32, %v6022_v23 }
 0x2b0   : > { %v7869_v46 = vadd.f32 %v6024_v35, %v7819_v40 }
 0x2b2   : > { %v6025_v59 = vpop.f32.mrb[60].mxu0 }
 0x2b3   : > { %v6026_v36 = vpop.f32.mrb[61].mxu0 }
 0x2b4   : > { %v6027_v26 = vadd.f32 %v6026_v36, %v6025_v59  ;;  %v6028_v56 = vpop.f32.mrb[62].mxu0  ;;  %v5634_v36 = vcombine.high %v2826_v55, %v2830_v31 }
 0x2b5   : > { %v6029_v25 = vpop.f32.mrb[63].mxu0 }
 0x2b6   : > { %v7872_v33 = vadd.f32 %v6027_v26, %v7825_v57  ;;  %v6030_v41 = vadd.f32 %v6029_v25, %v6028_v56  ;;  %v2821_v57 = vld [vmem:[%s8847_s5 + $0x70] sm:$0xff]  ;;  %v5633_v56 = vcombine.low %v2826_v55, %v2830_v31 }
 0x2b7   : > { %v5624_v63 = vcombine.high %v2817_v54, %v2821_v57  ;;  %v5623_v60 = vcombine.low %v2817_v54, %v2821_v57  ;;  %v2833_v26 = vld [vmem:[%s8847_s5 + $0xd0] sm:$0xff] }
 0x2b8   : > { %v7875_v44 = vadd.f32 %v6030_v41, %v7827_v61  ;;  %v2818_v61 = vld [vmem:[%s8847_s5 + $0x58] sm:$0xff]  ;;  %v5640_v25 = vcombine.high %v2833_v26, %v2837_v34  ;;  %v5642_v41 = vcombine.high %v2834_v19, %v2838_v1  ;;  %v5639_v54 = vcombine.low %v2833_v26, %v2837_v34 }
 0x2b9   : > { %v5626_v21 = vcombine.high %v2818_v61, %v2822_v30  ;;  %v5625_v35 = vcombine.low %v2818_v61, %v2822_v30  ;;  %v5641_v61 = vcombine.low %v2834_v19, %v2838_v1 }
 0x2ba   : > { %v6047_v22 = vpop.f32.mrb[160].mxu1 }
 0x2bb   : > { %v6048_v45 = vpop.f32.mrb[161].mxu1 }
 0x2bc   : > { %v6049_v42 = vadd.f32 %v6048_v45, %v6047_v22  ;;  %v6050_v5 = vpop.f32.mrb[162].mxu1  ;;  %v2841_v22 = vld [vmem:[%s8847_s5 + $0x110] sm:$0xff] }
 0x2bd   : > { %v6051_v49 = vpop.f32.mrb[163].mxu1 }
 0x2be   : > { %v2737_v40 = vadd.f32 %v6049_v42, %v7830_v11  ;;  %v6052_v51 = vadd.f32 %v6051_v49, %v6050_v5  ;;  %v2845_v5 = vld [vmem:[%s8847_s5 + $0x130] sm:$0xff]  ;;  %v2842_v49 = vld [vmem:[%s8847_s5 + $0x118] sm:$0xff] }
 0x2bf   : > { %v5648_v30 = vcombine.high %v2841_v22, %v2845_v5 }
 0x2c0   : > { %v2740_v37 = vadd.f32 %v6052_v51, %v7833_v14  ;;  %v2825_v14 = vld [vmem:[%s8847_s5 + $0x90] sm:$0xff] }
 0x2c1   : > { %v5632_v59 = vcombine.high %v2825_v14, %v2829_v62 }
 0x2c2   : > { %v7891_v11 = vpack.c.bf16 %v2740_v37, %v2737_v40  ;;  %v6053_v29 = vpop.f32.mrb[164].mxu1  ;;  %v2846_v40 = vld [vmem:[%s8847_s5 + $0x138] sm:$0xff] }
 0x2c3   : > { %v6054_v17 = vpop.f32.mrb[165].mxu1  ;;  %v5649_v55 = vcombine.low %v2842_v49, %v2846_v40 }
 0x2c4   : > { %v6055_v48 = vadd.f32 %v6054_v17, %v6053_v29  ;;  %v6056_v3 = vpop.f32.mrb[166].mxu1  ;;  %3266 = vmatmul.mubr.bf16.vlgmr.msra.gmra.mrb[64].mxu0 %v7891_v11  ;;  %3379 = vmatmul.mubr.bf16.vlgmr.msra.gmra.mrb[192].mxu1 %v7891_v11  ;;  %v5650_v29 = vcombine.high %v2842_v49, %v2846_v40  ;;  %v2849_v17 = vld [vmem:[%s8847_s5 + $0x150] sm:$0xff] }
 0x2c5   : > { %v6057_v39 = vpop.f32.mrb[167].mxu1  ;;  %3275 = vmatprep.mubr.bf16.mxu0 %v6659_v13  ;;  %3388 = vmatprep.mubr.bf16.mxu1 %v6659_v13 }
 0x2c6   : > { %v2745_v23 = vadd.f32 %v6055_v48, %v7836_v27  ;;  %v6058_v32 = vadd.f32 %v6057_v39, %v6056_v3  ;;  %3460 = vmatpush1.bf16.msra.mxu0 %v5615_v52  ;;  %3573 = vmatpush1.bf16.msra.mxu1 %v5617_v16  ;;  %v5631_v16 = vcombine.low %v2825_v14, %v2829_v62  ;;  %v2854_v14 = vld [vmem:[%s8847_s5 + $0x178] sm:$0xff] }
 0x2c7   : > { %3461 = vmatprep.subr.bf16.mxu0 %v5624_v63  ;;  %3574 = vmatprep.subr.bf16.mxu1 %v5626_v21  ;;  %v2853_v21 = vld [vmem:[%s8847_s5 + $0x170] sm:$0xff]  ;;  %v5647_v62 = vcombine.low %v2841_v22, %v2845_v5 }
 0x2c8   : > { %v2748_v27 = vadd.f32 %v6058_v32, %v7839_v28  ;;  %v5656_v31 = vcombine.high %v2849_v17, %v2853_v21 }
 0x2ca   : > { %v7929_v9 = vpack.c.bf16 %v2748_v27, %v2745_v23  ;;  %v6059_v52 = vpop.f32.mrb[168].mxu1  ;;  %3462 = vmatpush1.bf16.msra.mxu0 %v5623_v60  ;;  %3575 = vmatpush1.bf16.msra.mxu1 %v5625_v35  ;;  %v2857_v60 = vld [vmem:[%s8847_s5 + $0x190] sm:$0xff]  ;;  %v5655_v27 = vcombine.low %v2849_v17, %v2853_v21  ;;  %v6322_v17 = vld [vmem:[%s8849_s7 + $0x4] ss:$8 sps:$4 sm:$0xff]  }
 0x2cb   : > { %v6060_v28 = vpop.f32.mrb[169].mxu1  ;;  %3463 = vmatprep.subr.bf16.mxu0 %v5632_v59  ;;  %3576 = vmatprep.subr.bf16.mxu1 %v5634_v36  ;;  %v2861_v35 = vld [vmem:[%s8847_s5 + $0x1b0] sm:$0xff]  ;;  %v2858_v59 = vld [vmem:[%s8847_s5 + $0x198] sm:$0xff] }
 0x2cc   : > { %v6061_v45 = vadd.f32 %v6060_v28, %v6059_v52  ;;  %v6062_v42 = vpop.f32.mrb[170].mxu1  ;;  %3276 = vmatmul.mubr.bf16.gmra.mrb[68].mxu0 %v7929_v9  ;;  %3389 = vmatmul.mubr.bf16.gmra.mrb[196].mxu1 %v7929_v9  ;;  %v2862_v36 = vld [vmem:[%s8847_s5 + $0x1b8] sm:$0xff]  ;;  %v5664_v52 = vcombine.high %v2857_v60, %v2861_v35 }
 0x2cd   : > { %v6063_v51 = vpop.f32.mrb[171].mxu1  ;;  %3285 = vmatprep.mubr.bf16.mxu0 %v6659_v13  ;;  %3398 = vmatprep.mubr.bf16.mxu1 %v6659_v13  ;;  %v5665_v5 = vcombine.low %v2858_v59, %v2862_v36 }
 0x2ce   : > { %v2753_v37 = vadd.f32 %v6061_v45, %v7842_v8  ;;  %v6064_v57 = vadd.f32 %v6063_v51, %v6062_v42  ;;  %3464 = vmatpush1.bf16.msra.mxu0 %v5631_v16  ;;  %3577 = vmatpush1.bf16.msra.mxu1 %v5633_v56  ;;  %v2850_v8 = vld [vmem:[%s8847_s5 + $0x158] sm:$0xff]  ;;  %v5666_v16 = vcombine.high %v2858_v59, %v2862_v36  ;;  %v2865_v56 = vld [vmem:[%s8847_s5 + $0x1d0] sm:$0xff] }
 0x2cf   : > { %3465 = vmatprep.subr.bf16.mxu0 %v5640_v25  ;;  %3578 = vmatprep.subr.bf16.mxu1 %v5642_v41  ;;  %v5658_v39 = vcombine.high %v2850_v8, %v2854_v14  ;;  %v5657_v1 = vcombine.low %v2850_v8, %v2854_v14  ;;  %v2869_v25 = vld [vmem:[%s8847_s5 + $0x1f0] sm:$0xff]  ;;  %v2870_v41 = vld [vmem:[%s8847_s5 + $0x1f8] sm:$0xff]  ;;  %v5663_v42 = vcombine.low %v2857_v60, %v2861_v35 }
 0x2d0   : > { %v2756_v63 = vadd.f32 %v6064_v57, %v7845_v38  ;;  %v5672_v49 = vcombine.high %v2865_v56, %v2869_v25  ;;  %v5671_v57 = vcombine.low %v2865_v56, %v2869_v25  ;;  %v6320_v56 = vld [vmem:[%s8849_s7] ss:$8 sps:$4 sm:$0xff]  }
 0x2d1   : > { %v6326_v25 = vld [vmem:[%s8849_s7 + $0x20] ss:$8 sps:$4 sm:$0xff]  }
 0x2d2   : > { %v7961_v48 = vpack.c.bf16 %v2756_v63, %v2753_v37  ;;  %v6065_v3 = vpop.f32.mrb[172].mxu1  ;;  %3466 = vmatpush1.bf16.msra.mxu0 %v5639_v54  ;;  %3579 = vmatpush1.bf16.msra.mxu1 %v5641_v61 }
 0x2d3   : > { %v6066_v38 = vpop.f32.mrb[173].mxu1  ;;  %3467 = vmatprep.subr.bf16.mxu0 %v5648_v30  ;;  %3580 = vmatprep.subr.bf16.mxu1 %v5650_v29 }
 0x2d4   : > { %v6067_v23 = vadd.f32 %v6066_v38, %v6065_v3  ;;  %v6068_v32 = vpop.f32.mrb[174].mxu1  ;;  %3286 = vmatmul.mubr.bf16.gmra.mrb[72].mxu0 %v7961_v48  ;;  %3399 = vmatmul.mubr.bf16.gmra.mrb[200].mxu1 %v7961_v48 }
 0x2d5   : > { %v6069_v26 = vpop.f32.mrb[175].mxu1  ;;  %3295 = vmatprep.mubr.bf16.mxu0 %v6659_v13  ;;  %3408 = vmatprep.mubr.bf16.mxu1 %v6659_v13 }
 0x2d6   : > { %v2761_v34 = vadd.f32 %v6067_v23, %v7848_v12  ;;  %v6070_v19 = vadd.f32 %v6069_v26, %v6068_v32  ;;  %3468 = vmatpush1.bf16.msra.mxu0 %v5647_v62  ;;  %3581 = vmatpush1.bf16.msra.mxu1 %v5649_v55  ;;  %v2866_v12 = vld [vmem:[%s8847_s5 + $0x1d8] sm:$0xff] }
 0x2d7   : > { %3469 = vmatprep.subr.bf16.mxu0 %v5656_v31  ;;  %3582 = vmatprep.subr.bf16.mxu1 %v5658_v39  ;;  %v5674_v40 = vcombine.high %v2866_v12, %v2870_v41  ;;  %v5673_v29 = vcombine.low %v2866_v12, %v2870_v41  ;;  %v6329_v12 = vld [vmem:[%s8849_s7 + $0x30] ss:$8 sps:$4 sm:$0xff]   ;;  %v6334_v41 = vld [vmem:[%s8849_s7 + $0x44] ss:$8 sps:$4 sm:$0xff]  }
 0x2d8   : > { %v2764_v28 = vadd.f32 %v6070_v19, %v7851_v50 }
 0x2da   : > { %v7993_v22 = vpack.c.bf16 %v2764_v28, %v2761_v34  ;;  %v6071_v45 = vpop.f32.mrb[176].mxu1  ;;  %3470 = vmatpush1.bf16.msra.mxu0 %v5655_v27  ;;  %3583 = vmatpush1.bf16.msra.mxu1 %v5657_v1  ;;  %v6328_v28 = vld [vmem:[%s8849_s7 + $0x24] ss:$8 sps:$4 sm:$0xff]  }
 0x2db   : > { %v6072_v50 = vpop.f32.mrb[177].mxu1  ;;  %3471 = vmatprep.subr.bf16.mxu0 %v5664_v52  ;;  %3584 = vmatprep.subr.bf16.mxu1 %v5666_v16 }
 0x2dc   : > { %v6073_v51 = vadd.f32 %v6072_v50, %v6071_v45  ;;  %v6074_v54 = vpop.f32.mrb[178].mxu1  ;;  %3296 = vmatmul.mubr.bf16.gmra.mrb[76].mxu0 %v7993_v22  ;;  %3409 = vmatmul.mubr.bf16.gmra.mrb[204].mxu1 %v7993_v22  ;;  %v6332_v45 = vld [vmem:[%s8849_s7 + $0x40] ss:$8 sps:$4 sm:$0xff]  }
 0x2dd   : > { %v6075_v37 = vpop.f32.mrb[179].mxu1  ;;  %3305 = vmatprep.mubr.bf16.mxu0 %v6659_v13  ;;  %3418 = vmatprep.mubr.bf16.mxu1 %v6659_v13  ;;  %v6338_v50 = vld [vmem:[%s8849_s7 + $0x60] ss:$8 sps:$4 sm:$0xff]  }
 0x2de   : > { %v2769_v61 = vadd.f32 %v6073_v51, %v7854_v2  ;;  %v6076_v30 = vadd.f32 %v6075_v37, %v6074_v54  ;;  %3472 = vmatpush1.bf16.msra.mxu0 %v5663_v42  ;;  %3585 = vmatpush1.bf16.msra.mxu1 %v5665_v5  ;;  %v6335_v42 = vld [vmem:[%s8849_s7 + $0x50] ss:$8 sps:$4 sm:$0xff]   ;;  %v6340_v5 = vld [vmem:[%s8849_s7 + $0x64] ss:$8 sps:$4 sm:$0xff]   ;;  %v6344_v51 = vld [vmem:[%s8849_s7 + $0x80] ss:$8 sps:$4 sm:$0xff]  }
 0x2df   : > { %3473 = vmatprep.subr.bf16.mxu0 %v5672_v49  ;;  %3586 = vmatprep.subr.bf16.mxu1 %v5674_v40  ;;  %v6341_v49 = vld [vmem:[%s8849_s7 + $0x70] ss:$8 sps:$4 sm:$0xff]   ;;  %v6346_v40 = vld [vmem:[%s8849_s7 + $0x84] ss:$8 sps:$4 sm:$0xff]  }
 0x2e0   : > { %v2772_v63 = vadd.f32 %v6076_v30, %v7857_v58  ;;  %v6347_v54 = vld [vmem:[%s8849_s7 + $0x90] ss:$8 sps:$4 sm:$0xff]   ;;  %v6352_v37 = vld [vmem:[%s8849_s7 + $0xa4] ss:$8 sps:$4 sm:$0xff]  }
 0x2e1   : > { %v6353_v30 = vld [vmem:[%s8849_s7 + $0xb0] ss:$8 sps:$4 sm:$0xff]  }
 0x2e2   : > { %v8004_v21 = vpack.c.bf16 %v2772_v63, %v2769_v61  ;;  %v6077_v8 = vpop.f32.mrb[180].mxu1  ;;  %3474 = vmatpush1.bf16.msra.mxu0 %v5671_v57  ;;  %3587 = vmatpush1.bf16.msra.mxu1 %v5673_v29  ;;  %v6350_v57 = vld [vmem:[%s8849_s7 + $0xa0] ss:$8 sps:$4 sm:$0xff]   ;;  %v6355_v61 = vld [vmem:[%s8849_s7 + $0xb4] ss:$8 sps:$4 sm:$0xff]  }
 0x2e3   : > { %v6078_v14 = vpop.f32.mrb[181].mxu1  ;;  %4657 = vmatprep.subr.bf16.mxu0 %v6322_v17  ;;  %v6358_v29 = vld [vmem:[%s8849_s7 + $0xc4] ss:$8 sps:$4 sm:$0xff]   ;;  %v6356_v17 = vld [vmem:[%s8849_s7 + $0xc0] ss:$8 sps:$4 sm:$0xff]  }
 0x2e4   : > { %v6079_v2 = vadd.f32 %v6078_v14, %v6077_v8  ;;  %v6080_v3 = vpop.f32.mrb[182].mxu1  ;;  %3306 = vmatmul.mubr.bf16.gmra.mrb[80].mxu0 %v8004_v21  ;;  %3419 = vmatmul.mubr.bf16.gmra.mrb[208].mxu1 %v8004_v21  ;;  %v6361_v63 = vld [vmem:[%s8849_s7 + $0xd4] ss:$8 sps:$4 sm:$0xff]   ;;  %v6364_v8 = vld [vmem:[%s8849_s7 + $0xe4] ss:$8 sps:$4 sm:$0xff]  }
 0x2e5   : > { %v6081_v62 = vpop.f32.mrb[183].mxu1  ;;  %3315 = vmatprep.mubr.bf16.mxu0 %v6659_v13  ;;  %3428 = vmatprep.mubr.bf16.mxu1 %v6659_v13  ;;  %v6362_v14 = vld [vmem:[%s8849_s7 + $0xe0] ss:$8 sps:$4 sm:$0xff]  }
 0x2e6   : > { %v2777_v58 = vadd.f32 %v6079_v2, %v7860_v18  ;;  %v6082_v55 = vadd.f32 %v6081_v62, %v6080_v3  ;;  %v6365_v2 = vld [vmem:[%s8849_s7 + $0xf0] ss:$8 sps:$4 sm:$0xff]   ;;  %v6370_v3 = vld [vmem:[%s8849_s7 + $0x104] ss:$8 sps:$4 sm:$0xff]  }
 0x2e7   : > { %v8163_v62 = vld [vmem:[%s8848_s6] sm:$0xff] }
 0x2e8   : > { %v2780_v38 = vadd.f32 %v6082_v55, %v7863_v7  ;;  %v8172_v55 = vrot.slane %v8163_v62, %v498_v43 }
 0x2ea   : > { %v8012_v31 = vpack.c.bf16 %v2780_v38, %v2777_v58  ;;  %v6083_v39 = vpop.f32.mrb[184].mxu1  ;;  %v8167_v58 = vrot.slane %v8163_v62, %v7295_v24  ;;  %v8176_v38 = vrot.slane %v8163_v62, %v7303_v15 }
 0x2eb   : > { %v6084_v60 = vpop.f32.mrb[185].mxu1 }
 0x2ec   : > { %v6085_v23 = vadd.f32 %v6084_v60, %v6083_v39  ;;  %v6086_v32 = vpop.f32.mrb[186].mxu1  ;;  %3316 = vmatmul.mubr.bf16.gmra.mrb[84].mxu0 %v8012_v31  ;;  %3429 = vmatmul.mubr.bf16.gmra.mrb[212].mxu1 %v8012_v31 }
 0x2ed   : > { %v6087_v35 = vpop.f32.mrb[187].mxu1  ;;  %3325 = vmatprep.mubr.bf16.mxu0 %v6659_v13  ;;  %3438 = vmatprep.mubr.bf16.mxu1 %v6659_v13 }
 0x2ee   : > { %v2785_v18 = vadd.f32 %v6085_v23, %v7866_v53  ;;  %v6088_v59 = vadd.f32 %v6087_v35, %v6086_v32 }
 0x2f0   : > { %v2788_v7 = vadd.f32 %v6088_v59, %v7869_v46 }
 0x2f2   : > { %v8020_v36 = vpack.c.bf16 %v2788_v7, %v2785_v18  ;;  %v6089_v26 = vpop.f32.mrb[188].mxu1 }
 0x2f3   : > { %v6090_v27 = vpop.f32.mrb[189].mxu1 }
 0x2f4   : > { %v6091_v34 = vadd.f32 %v6090_v27, %v6089_v26  ;;  %v6092_v19 = vpop.f32.mrb[190].mxu1  ;;  %3326 = vmatmul.mubr.bf16.gmra.mrb[88].mxu0 %v8020_v36  ;;  %3439 = vmatmul.mubr.bf16.gmra.mrb[216].mxu1 %v8020_v36 }
 0x2f5   : > { %v6093_v1 = vpop.f32.mrb[191].mxu1  ;;  %3335 = vmatprep.mubr.bf16.mxu0 %v6659_v13  ;;  %3448 = vmatprep.mubr.bf16.mxu1 %v6659_v13 }
 0x2f6   : > { %v2793_v53 = vadd.f32 %v6091_v34, %v7872_v33  ;;  %v6094_v52 = vadd.f32 %v6093_v1, %v6092_v19  ;;  %v6325_v33 = vld [vmem:[%s8849_s7 + $0x14] ss:$8 sps:$4 sm:$0xff]  }
 0x2f8   : > { %v2796_v46 = vadd.f32 %v6094_v52, %v7875_v44  ;;  %v6323_v44 = vld [vmem:[%s8849_s7 + $0x10] ss:$8 sps:$4 sm:$0xff]  }
 0x2fa   : > { %v8028_v16 = vpack.c.bf16 %v2796_v46, %v2793_v53 }
 0x2fc   : > { %3336 = vmatmul.mubr.bf16.gmra.mrb[92].mxu0 %v8028_v16  ;;  %3449 = vmatmul.mubr.bf16.gmra.mrb[220].mxu1 %v8028_v16 }
 0x2fd   : > { %3491 = vmatprep.mubr.bf16.mxu0 %v6659_v13  ;;  %3604 = vmatprep.mubr.bf16.mxu1 %v6659_v13 }
 0x304   : > { %3492 = vmatmul.mubr.bf16.vlgmr.msra.gmra.mrb[96].mxu0 %v7891_v11  ;;  %3605 = vmatmul.mubr.bf16.vlgmr.msra.gmra.mrb[224].mxu1 %v7891_v11  ;;  %v6331_v11 = vld [vmem:[%s8849_s7 + $0x34] ss:$8 sps:$4 sm:$0xff]  }
 0x305   : > { %3501 = vmatprep.mubr.bf16.mxu0 %v6659_v13  ;;  %3614 = vmatprep.mubr.bf16.mxu1 %v6659_v13 }
 0x306   : > { %4658 = vmatpush1.bf16.msra.mxu0 %v6320_v56 }
 0x307   : > { %4659 = vmatprep.subr.bf16.mxu0 %v6325_v33 }
 0x30a   : > { %4660 = vmatpush1.bf16.msra.mxu0 %v6323_v44 }
 0x30b   : > { %4661 = vmatprep.subr.bf16.mxu0 %v6328_v28 }
 0x30c   : > { %3502 = vmatmul.mubr.bf16.gmra.mrb[100].mxu0 %v7929_v9  ;;  %3615 = vmatmul.mubr.bf16.gmra.mrb[228].mxu1 %v7929_v9  ;;  %v6337_v9 = vld [vmem:[%s8849_s7 + $0x54] ss:$8 sps:$4 sm:$0xff]  }
 0x30d   : > { %3511 = vmatprep.mubr.bf16.mxu0 %v6659_v13  ;;  %3624 = vmatprep.mubr.bf16.mxu1 %v6659_v13 }
 0x30e   : > { %4662 = vmatpush1.bf16.msra.mxu0 %v6326_v25 }
 0x30f   : > { %4663 = vmatprep.subr.bf16.mxu0 %v6331_v11 }
 0x312   : > { %4664 = vmatpush1.bf16.msra.mxu0 %v6329_v12 }
 0x313   : > { %4665 = vmatprep.subr.bf16.mxu0 %v6334_v41 }
 0x314   : > { %3512 = vmatmul.mubr.bf16.gmra.mrb[104].mxu0 %v7961_v48  ;;  %3625 = vmatmul.mubr.bf16.gmra.mrb[232].mxu1 %v7961_v48  ;;  %v6343_v48 = vld [vmem:[%s8849_s7 + $0x74] ss:$8 sps:$4 sm:$0xff]  }
 0x315   : > { %3521 = vmatprep.mubr.bf16.mxu0 %v6659_v13  ;;  %3634 = vmatprep.mubr.bf16.mxu1 %v6659_v13 }
 0x316   : > { %4666 = vmatpush1.bf16.msra.mxu0 %v6332_v45 }
 0x317   : > { %4667 = vmatprep.subr.bf16.mxu0 %v6337_v9 }
 0x31a   : > { %4668 = vmatpush1.bf16.msra.mxu0 %v6335_v42  ;;  %v6368_v42 = vld [vmem:[%s8849_s7 + $0x100] ss:$8 sps:$4 sm:$0xff]  }
 0x31b   : > { %4669 = vmatprep.subr.bf16.mxu0 %v6340_v5 }
 0x31c   : > { %3522 = vmatmul.mubr.bf16.gmra.mrb[108].mxu0 %v7993_v22  ;;  %3635 = vmatmul.mubr.bf16.gmra.mrb[236].mxu1 %v7993_v22  ;;  %v6349_v22 = vld [vmem:[%s8849_s7 + $0x94] ss:$8 sps:$4 sm:$0xff]  }
 0x31d   : > { %3531 = vmatprep.mubr.bf16.mxu0 %v6659_v13  ;;  %3644 = vmatprep.mubr.bf16.mxu1 %v6659_v13 }
 0x31e   : > { %4670 = vmatpush1.bf16.msra.mxu0 %v6338_v50 }
 0x31f   : > { %4671 = vmatprep.subr.bf16.mxu0 %v6343_v48 }
 0x322   : > { %4672 = vmatpush1.bf16.msra.mxu0 %v6341_v49 }
 0x323   : > { %4673 = vmatprep.subr.bf16.mxu0 %v6346_v40  ;;  %v6373_v40 = vld [vmem:[%s8849_s7 + $0x114] ss:$8 sps:$4 sm:$0xff]  }
 0x324   : > { %3532 = vmatmul.mubr.bf16.gmra.mrb[112].mxu0 %v8004_v21  ;;  %3645 = vmatmul.mubr.bf16.gmra.mrb[240].mxu1 %v8004_v21  ;;  %v6359_v21 = vld [vmem:[%s8849_s7 + $0xd0] ss:$8 sps:$4 sm:$0xff]  }
 0x325   : > { %3541 = vmatprep.mubr.bf16.mxu0 %v6659_v13  ;;  %3654 = vmatprep.mubr.bf16.mxu1 %v6659_v13 }
 0x326   : > { %4674 = vmatpush1.bf16.msra.mxu0 %v6344_v51 }
 0x327   : > { %4675 = vmatprep.subr.bf16.mxu0 %v6349_v22 }
 0x32a   : > { %4676 = vmatpush1.bf16.msra.mxu0 %v6347_v54 }
 0x32b   : > { %4677 = vmatprep.subr.bf16.mxu0 %v6352_v37 }
 0x32c   : > { %3542 = vmatmul.mubr.bf16.gmra.mrb[116].mxu0 %v8012_v31  ;;  %3655 = vmatmul.mubr.bf16.gmra.mrb[244].mxu1 %v8012_v31  ;;  %v8181_v31 = vrot.slane %v8163_v62, %v502_v47 }
 0x32d   : > { %3551 = vmatprep.mubr.bf16.mxu0 %v6659_v13  ;;  %3664 = vmatprep.mubr.bf16.mxu1 %v6659_v13 }
 0x32e   : > { %4678 = vmatpush1.bf16.msra.mxu0 %v6350_v57 }
 0x32f   : > { %4679 = vmatprep.subr.bf16.mxu0 %v6355_v61 }
 0x332   : > { %4680 = vmatpush1.bf16.msra.mxu0 %v6353_v30 }
 0x333   : > { %4681 = vmatprep.subr.bf16.mxu0 %v6358_v29 }
 0x334   : > { %3552 = vmatmul.mubr.bf16.gmra.mrb[120].mxu0 %v8020_v36  ;;  %3665 = vmatmul.mubr.bf16.gmra.mrb[248].mxu1 %v8020_v36 }
 0x335   : > { %3561 = vmatprep.mubr.bf16.mxu0 %v6659_v13  ;;  %3674 = vmatprep.mubr.bf16.mxu1 %v6659_v13  ;;  %v6367_v13 = vld [vmem:[%s8849_s7 + $0xf4] ss:$8 sps:$4 sm:$0xff]  }
 0x336   : > { %4682 = vmatpush1.bf16.msra.mxu0 %v6356_v17 }
 0x337   : > { %4683 = vmatprep.subr.bf16.mxu0 %v6361_v63 }
 0x33a   : > { %4684 = vmatpush1.bf16.msra.mxu0 %v6359_v21  ;;  %v6371_v21 = vld [vmem:[%s8849_s7 + $0x110] ss:$8 sps:$4 sm:$0xff]  }
 0x33b   : > { %4685 = vmatprep.subr.bf16.mxu0 %v6364_v8 }
 0x33c   : > { %3562 = vmatmul.mubr.bf16.gmra.mrb[124].mxu0 %v8028_v16  ;;  %3675 = vmatmul.mubr.bf16.gmra.mrb[252].mxu1 %v8028_v16 }
 0x33e   : > { %4686 = vmatpush1.bf16.msra.mxu0 %v6362_v14 }
 0x33f   : > { %4687 = vmatprep.subr.bf16.mxu0 %v6367_v13 }
 0x342   : > { %4688 = vmatpush1.bf16.msra.mxu0 %v6365_v2 }
 0x343   : > { %4770 = vmatprep.subr.bf16.mxu0 %v6370_v3  ;;  %v6376_v3 = vld [vmem:[%s8849_s7 + $0x124] ss:$8 sps:$4 sm:$0xff]  }
 0x397   : > { %v3267_v39 = vpop.f32.mrb[64].mxu0  ;;  %v3380_v60 = vpop.f32.mrb[192].mxu1 }
 0x398   : > { %v3268_v23 = vadd.f32 %v3267_v39, %v8167_v58  ;;  %v3381_v32 = vadd.f32 %v3380_v60, %v8172_v55  ;;  %v3269_v35 = vpop.f32.mrb[65].mxu0  ;;  %v3382_v18 = vpop.f32.mrb[193].mxu1 }
 0x399   : > { %v3270_v43 = vadd.f32 %v3269_v35, %v8176_v38  ;;  %v3383_v59 = vadd.f32 %v3382_v18, %v8181_v31  ;;  %v3271_v7 = vpop.f32.mrb[66].mxu0  ;;  %v3384_v36 = vpop.f32.mrb[194].mxu1 }
 0x39a   : > { %v3272_v26 = vadd.f32 %v3271_v7, %v8167_v58  ;;  %v3385_v27 = vadd.f32 %v3384_v36, %v8172_v55  ;;  %v3273_v47 = vpop.f32.mrb[67].mxu0  ;;  %v3386_v34 = vpop.f32.mrb[195].mxu1  ;;  %v3685_v53 = vmax.f32 %v3268_v23, 0.0  ;;  %v3687_v52 = vmax.f32 %v3381_v32, 0.0 }
 0x39b   : > { %v3274_v19 = vadd.f32 %v3273_v47, %v8176_v38  ;;  %v3387_v1 = vadd.f32 %v3386_v34, %v8181_v31  ;;  %v3686_v56 = vmax.f32 %v3270_v43, 0.0  ;;  %v3688_v33 = vmax.f32 %v3383_v59, 0.0 }
 0x39c   : > { %v3693_v46 = vmax.f32 %v3272_v26, 0.0  ;;  %v3695_v16 = vmax.f32 %v3385_v27, 0.0  ;;  %v6374_v26 = vld [vmem:[%s8849_s7 + $0x120] ss:$8 sps:$4 sm:$0xff]  }
 0x39d   : > { %v3694_v44 = vmax.f32 %v3274_v19, 0.0  ;;  %v3696_v28 = vmax.f32 %v3387_v1, 0.0  ;;  %v6379_v1 = vld [vmem:[%s8849_s7 + $0x134] ss:$8 sps:$4 sm:$0xff]  }
 0x39e   : > { %v3813_v25 = vpack.c.bf16 %v3693_v46, %v3685_v53  ;;  %v8191_v11 = vpack.c.bf16 %v3695_v16, %v3687_v52 }
 0x39f   : > { %v3814_v12 = vpack.c.bf16 %v3694_v44, %v3686_v56  ;;  %v8193_v41 = vpack.c.bf16 %v3696_v28, %v3688_v33  ;;  %v3277_v45 = vpop.f32.mrb[68].mxu0  ;;  %v3390_v9 = vpop.f32.mrb[196].mxu1 }
 0x3a0   : > { %v3278_v5 = vadd.f32 %v3277_v45, %v8167_v58  ;;  %v3391_v50 = vadd.f32 %v3390_v9, %v8172_v55  ;;  %v3279_v48 = vpop.f32.mrb[69].mxu0  ;;  %v3392_v49 = vpop.f32.mrb[197].mxu1  ;;  %v6377_v45 = vld [vmem:[%s8849_s7 + $0x130] ss:$8 sps:$4 sm:$0xff]  }
 0x3a1   : > { %v3280_v51 = vadd.f32 %v3279_v48, %v8176_v38  ;;  %v3393_v22 = vadd.f32 %v3392_v49, %v8181_v31  ;;  %v3281_v54 = vpop.f32.mrb[70].mxu0  ;;  %v3394_v37 = vpop.f32.mrb[198].mxu1  ;;  %4689 = vmatprep.mubr.bf16.mxu0 %v3814_v12  ;;  %v6382_v48 = vld [vmem:[%s8849_s7 + $0x144] ss:$8 sps:$4 sm:$0xff]  }
 0x3a2   : > { %v3282_v57 = vadd.f32 %v3281_v54, %v8167_v58  ;;  %v3395_v61 = vadd.f32 %v3394_v37, %v8172_v55  ;;  %v3283_v30 = vpop.f32.mrb[71].mxu0  ;;  %v3396_v29 = vpop.f32.mrb[199].mxu1  ;;  %4690 = vmatmul.mubr.bf16.vlgmr.msra.gmra.mrb[128].mxu0 %v3813_v25  ;;  %v3701_v8 = vmax.f32 %v3278_v5, 0.0  ;;  %v3703_v14 = vmax.f32 %v3391_v50, 0.0 }
 0x3a3   : > { %v3284_v17 = vadd.f32 %v3283_v30, %v8176_v38  ;;  %v3397_v63 = vadd.f32 %v3396_v29, %v8181_v31  ;;  %4771 = vmatpush1.bf16.msra.mxu0 %v6368_v42  ;;  %v3702_v39 = vmax.f32 %v3280_v51, 0.0  ;;  %v3704_v60 = vmax.f32 %v3393_v22, 0.0 }
 0x3a4   : > { %v3709_v13 = vmax.f32 %v3282_v57, 0.0  ;;  %v3711_v2 = vmax.f32 %v3395_v61, 0.0  ;;  %4772 = vmatprep.subr.bf16.mxu0 %v6373_v40 }
 0x3a5   : > { %v3710_v23 = vmax.f32 %v3284_v17, 0.0  ;;  %v3712_v32 = vmax.f32 %v3397_v63, 0.0  ;;  %v6380_v17 = vld [vmem:[%s8849_s7 + $0x140] ss:$8 sps:$4 sm:$0xff]  }
 0x3a6   : > { %v3821_v35 = vpack.c.bf16 %v3709_v13, %v3701_v8  ;;  %v8215_v18 = vpack.c.bf16 %v3711_v2, %v3703_v14  ;;  %v6385_v13 = vld [vmem:[%s8849_s7 + $0x154] ss:$8 sps:$4 sm:$0xff]  }
 0x3a7   : > { %v3822_v43 = vpack.c.bf16 %v3710_v23, %v3702_v39  ;;  %v8217_v59 = vpack.c.bf16 %v3712_v32, %v3704_v60  ;;  %v3287_v7 = vpop.f32.mrb[72].mxu0  ;;  %v3400_v36 = vpop.f32.mrb[200].mxu1  ;;  %4773 = vmatpush1.bf16.msra.mxu0 %v6371_v21 }
 0x3a8   : > { %v3288_v27 = vadd.f32 %v3287_v7, %v8167_v58  ;;  %v3401_v47 = vadd.f32 %v3400_v36, %v8172_v55  ;;  %v3289_v34 = vpop.f32.mrb[73].mxu0  ;;  %v3402_v19 = vpop.f32.mrb[201].mxu1  ;;  %4774 = vmatprep.subr.bf16.mxu0 %v6376_v3 }
 0x3a9   : > { %v3290_v53 = vadd.f32 %v3289_v34, %v8176_v38  ;;  %v3403_v52 = vadd.f32 %v3402_v19, %v8181_v31  ;;  %v3291_v46 = vpop.f32.mrb[74].mxu0  ;;  %v3404_v16 = vpop.f32.mrb[202].mxu1  ;;  %4699 = vmatprep.mubr.bf16.mxu0 %v3822_v43 }
 0x3aa   : > { %v3292_v56 = vadd.f32 %v3291_v46, %v8167_v58  ;;  %v3405_v33 = vadd.f32 %v3404_v16, %v8172_v55  ;;  %v3293_v44 = vpop.f32.mrb[75].mxu0  ;;  %v3406_v28 = vpop.f32.mrb[203].mxu1  ;;  %4700 = vmatmul.mubr.bf16.gmra.mrb[132].mxu0 %v3821_v35  ;;  %v3717_v9 = vmax.f32 %v3288_v27, 0.0  ;;  %v3719_v42 = vmax.f32 %v3401_v47, 0.0 }
 0x3ab   : > { %v3294_v25 = vadd.f32 %v3293_v44, %v8176_v38  ;;  %v3407_v12 = vadd.f32 %v3406_v28, %v8181_v31  ;;  %4775 = vmatpush1.bf16.msra.mxu0 %v6374_v26  ;;  %v3718_v49 = vmax.f32 %v3290_v53, 0.0  ;;  %v3720_v40 = vmax.f32 %v3403_v52, 0.0  ;;  %v6383_v26 = vld [vmem:[%s8849_s7 + $0x150] ss:$8 sps:$4 sm:$0xff]  }
 0x3ac   : > { %v3725_v5 = vmax.f32 %v3292_v56, 0.0  ;;  %v3727_v50 = vmax.f32 %v3405_v33, 0.0  ;;  %4776 = vmatprep.subr.bf16.mxu0 %v6379_v1  ;;  %v6388_v1 = vld [vmem:[%s8849_s7 + $0x164] ss:$8 sps:$4 sm:$0xff]  }
 0x3ad   : > { %v3726_v51 = vmax.f32 %v3294_v25, 0.0  ;;  %v3728_v22 = vmax.f32 %v3407_v12, 0.0 }
 0x3ae   : > { %v3829_v54 = vpack.c.bf16 %v3725_v5, %v3717_v9  ;;  %v8239_v37 = vpack.c.bf16 %v3727_v50, %v3719_v42 }
 0x3af   : > { %v3830_v57 = vpack.c.bf16 %v3726_v51, %v3718_v49  ;;  %v8241_v61 = vpack.c.bf16 %v3728_v22, %v3720_v40  ;;  %v3297_v30 = vpop.f32.mrb[76].mxu0  ;;  %v3410_v29 = vpop.f32.mrb[204].mxu1  ;;  %4777 = vmatpush1.bf16.msra.mxu0 %v6377_v45  ;;  %v6386_v45 = vld [vmem:[%s8849_s7 + $0x160] ss:$8 sps:$4 sm:$0xff]  }
 0x3b0   : > { %v3298_v63 = vadd.f32 %v3297_v30, %v8167_v58  ;;  %v3411_v21 = vadd.f32 %v3410_v29, %v8172_v55  ;;  %v3299_v8 = vpop.f32.mrb[77].mxu0  ;;  %v3412_v14 = vpop.f32.mrb[205].mxu1  ;;  %4778 = vmatprep.subr.bf16.mxu0 %v6382_v48  ;;  %v6391_v48 = vld [vmem:[%s8849_s7 + $0x174] ss:$8 sps:$4 sm:$0xff]  }
 0x3b1   : > { %v3300_v2 = vadd.f32 %v3299_v8, %v8176_v38  ;;  %v3413_v3 = vadd.f32 %v3412_v14, %v8181_v31  ;;  %v3301_v39 = vpop.f32.mrb[78].mxu0  ;;  %v3414_v60 = vpop.f32.mrb[206].mxu1  ;;  %4709 = vmatprep.mubr.bf16.mxu0 %v3830_v57 }
 0x3b2   : > { %v3302_v23 = vadd.f32 %v3301_v39, %v8167_v58  ;;  %v3415_v32 = vadd.f32 %v3414_v60, %v8172_v55  ;;  %v3303_v35 = vpop.f32.mrb[79].mxu0  ;;  %v3416_v43 = vpop.f32.mrb[207].mxu1  ;;  %4710 = vmatmul.mubr.bf16.gmra.mrb[136].mxu0 %v3829_v54  ;;  %v3733_v27 = vmax.f32 %v3298_v63, 0.0  ;;  %v3735_v47 = vmax.f32 %v3411_v21, 0.0  ;;  %v6389_v21 = vld [vmem:[%s8849_s7 + $0x170] ss:$8 sps:$4 sm:$0xff]  }
 0x3b3   : > { %v3304_v7 = vadd.f32 %v3303_v35, %v8176_v38  ;;  %v3417_v36 = vadd.f32 %v3416_v43, %v8181_v31  ;;  %4779 = vmatpush1.bf16.msra.mxu0 %v6380_v17  ;;  %v3734_v53 = vmax.f32 %v3300_v2, 0.0  ;;  %v3736_v52 = vmax.f32 %v3413_v3, 0.0  ;;  %v6394_v3 = vld [vmem:[%s8849_s7 + $0x184] ss:$8 sps:$4 sm:$0xff]  }
 0x3b4   : > { %v3741_v34 = vmax.f32 %v3302_v23, 0.0  ;;  %v3743_v19 = vmax.f32 %v3415_v32, 0.0  ;;  %4780 = vmatprep.subr.bf16.mxu0 %v6385_v13 }
 0x3b5   : > { %v3742_v46 = vmax.f32 %v3304_v7, 0.0  ;;  %v3744_v16 = vmax.f32 %v3417_v36, 0.0 }
 0x3b6   : > { %v3837_v56 = vpack.c.bf16 %v3741_v34, %v3733_v27  ;;  %v8263_v33 = vpack.c.bf16 %v3743_v19, %v3735_v47  ;;  %v6392_v47 = vld [vmem:[%s8849_s7 + $0x180] ss:$8 sps:$4 sm:$0xff]  }
 0x3b7   : > { %v3838_v44 = vpack.c.bf16 %v3742_v46, %v3734_v53  ;;  %v8265_v28 = vpack.c.bf16 %v3744_v16, %v3736_v52  ;;  %v3307_v25 = vpop.f32.mrb[80].mxu0  ;;  %v3420_v12 = vpop.f32.mrb[208].mxu1  ;;  %4781 = vmatpush1.bf16.msra.mxu0 %v6383_v26  ;;  %v6397_v52 = vld [vmem:[%s8849_s7 + $0x194] ss:$8 sps:$4 sm:$0xff]  }
 0x3b8   : > { %v3308_v9 = vadd.f32 %v3307_v25, %v8167_v58  ;;  %v3421_v42 = vadd.f32 %v3420_v12, %v8172_v55  ;;  %v3309_v5 = vpop.f32.mrb[81].mxu0  ;;  %v3422_v50 = vpop.f32.mrb[209].mxu1  ;;  %4782 = vmatprep.subr.bf16.mxu0 %v6388_v1 }
 0x3b9   : > { %v3310_v49 = vadd.f32 %v3309_v5, %v8176_v38  ;;  %v3423_v40 = vadd.f32 %v3422_v50, %v8181_v31  ;;  %v3311_v51 = vpop.f32.mrb[82].mxu0  ;;  %v3424_v22 = vpop.f32.mrb[210].mxu1  ;;  %4719 = vmatprep.mubr.bf16.mxu0 %v3838_v44  ;;  %v6395_v50 = vld [vmem:[%s8849_s7 + $0x190] ss:$8 sps:$4 sm:$0xff]  }
 0x3ba   : > { %v3312_v54 = vadd.f32 %v3311_v51, %v8167_v58  ;;  %v3425_v57 = vadd.f32 %v3424_v22, %v8172_v55  ;;  %v3313_v30 = vpop.f32.mrb[83].mxu0  ;;  %v3426_v29 = vpop.f32.mrb[211].mxu1  ;;  %4720 = vmatmul.mubr.bf16.gmra.mrb[140].mxu0 %v3837_v56  ;;  %v3749_v8 = vmax.f32 %v3308_v9, 0.0  ;;  %v3751_v14 = vmax.f32 %v3421_v42, 0.0  ;;  %v6400_v22 = vld [vmem:[%s8849_s7 + $0x1a4] ss:$8 sps:$4 sm:$0xff]  }
 0x3bb   : > { %v3314_v17 = vadd.f32 %v3313_v30, %v8176_v38  ;;  %v3427_v63 = vadd.f32 %v3426_v29, %v8181_v31  ;;  %4783 = vmatpush1.bf16.msra.mxu0 %v6386_v45  ;;  %v3750_v39 = vmax.f32 %v3310_v49, 0.0  ;;  %v3752_v60 = vmax.f32 %v3423_v40, 0.0 }
 0x3bc   : > { %v3757_v13 = vmax.f32 %v3312_v54, 0.0  ;;  %v3759_v2 = vmax.f32 %v3425_v57, 0.0  ;;  %4784 = vmatprep.subr.bf16.mxu0 %v6391_v48 }
 0x3bd   : > { %v3758_v23 = vmax.f32 %v3314_v17, 0.0  ;;  %v3760_v32 = vmax.f32 %v3427_v63, 0.0 }
 0x3be   : > { %v3845_v35 = vpack.c.bf16 %v3757_v13, %v3749_v8  ;;  %v8287_v43 = vpack.c.bf16 %v3759_v2, %v3751_v14  ;;  %v6398_v2 = vld [vmem:[%s8849_s7 + $0x1a0] ss:$8 sps:$4 sm:$0xff]  }
 0x3bf   : > { %v3846_v7 = vpack.c.bf16 %v3758_v23, %v3750_v39  ;;  %v8289_v36 = vpack.c.bf16 %v3760_v32, %v3752_v60  ;;  %v3317_v26 = vpop.f32.mrb[84].mxu0  ;;  %v3430_v27 = vpop.f32.mrb[212].mxu1  ;;  %4785 = vmatpush1.bf16.msra.mxu0 %v6389_v21  ;;  %v6403_v32 = vld [vmem:[%s8849_s7 + $0x1b4] ss:$8 sps:$4 sm:$0xff]  }
 0x3c0   : > { %v3318_v34 = vadd.f32 %v3317_v26, %v8167_v58  ;;  %v3431_v19 = vadd.f32 %v3430_v27, %v8172_v55  ;;  %v3319_v1 = vpop.f32.mrb[85].mxu0  ;;  %v3432_v53 = vpop.f32.mrb[213].mxu1  ;;  %4786 = vmatprep.subr.bf16.mxu0 %v6394_v3 }
 0x3c1   : > { %v3320_v46 = vadd.f32 %v3319_v1, %v8176_v38  ;;  %v3433_v16 = vadd.f32 %v3432_v53, %v8181_v31  ;;  %v3321_v56 = vpop.f32.mrb[86].mxu0  ;;  %v3434_v44 = vpop.f32.mrb[214].mxu1  ;;  %4729 = vmatprep.mubr.bf16.mxu0 %v3846_v7 }
 0x3c2   : > { %v3322_v25 = vadd.f32 %v3321_v56, %v8167_v58  ;;  %v3435_v12 = vadd.f32 %v3434_v44, %v8172_v55  ;;  %v3323_v45 = vpop.f32.mrb[87].mxu0  ;;  %v3436_v9 = vpop.f32.mrb[215].mxu1  ;;  %4730 = vmatmul.mubr.bf16.gmra.mrb[144].mxu0 %v3845_v35  ;;  %v3765_v48 = vmax.f32 %v3318_v34, 0.0  ;;  %v3767_v49 = vmax.f32 %v3431_v19, 0.0 }
 0x3c3   : > { %v3324_v42 = vadd.f32 %v3323_v45, %v8176_v38  ;;  %v3437_v5 = vadd.f32 %v3436_v9, %v8181_v31  ;;  %4787 = vmatpush1.bf16.msra.mxu0 %v6392_v47  ;;  %v3766_v54 = vmax.f32 %v3320_v46, 0.0  ;;  %v3768_v57 = vmax.f32 %v3433_v16, 0.0  ;;  %v6401_v46 = vld [vmem:[%s8849_s7 + $0x1b0] ss:$8 sps:$4 sm:$0xff]  }
 0x3c4   : > { %v3773_v40 = vmax.f32 %v3322_v25, 0.0  ;;  %v3775_v51 = vmax.f32 %v3435_v12, 0.0  ;;  %4788 = vmatprep.subr.bf16.mxu0 %v6397_v52  ;;  %v6406_v12 = vld [vmem:[%s8849_s7 + $0x1c4] ss:$8 sps:$4 sm:$0xff]  }
 0x3c5   : > { %v3774_v30 = vmax.f32 %v3324_v42, 0.0  ;;  %v3776_v29 = vmax.f32 %v3437_v5, 0.0 }
 0x3c6   : > { %v3853_v17 = vpack.c.bf16 %v3773_v40, %v3765_v48  ;;  %v8311_v63 = vpack.c.bf16 %v3775_v51, %v3767_v49 }
 0x3c7   : > { %v3854_v21 = vpack.c.bf16 %v3774_v30, %v3766_v54  ;;  %v8313_v8 = vpack.c.bf16 %v3776_v29, %v3768_v57  ;;  %v3327_v14 = vpop.f32.mrb[88].mxu0  ;;  %v3440_v13 = vpop.f32.mrb[216].mxu1  ;;  %4789 = vmatpush1.bf16.msra.mxu0 %v6395_v50  ;;  %v6404_v54 = vld [vmem:[%s8849_s7 + $0x1c0] ss:$8 sps:$4 sm:$0xff]  }
 0x3c8   : > { %v3328_v3 = vadd.f32 %v3327_v14, %v8167_v58  ;;  %v3441_v39 = vadd.f32 %v3440_v13, %v8172_v55  ;;  %v3329_v60 = vpop.f32.mrb[89].mxu0  ;;  %v3442_v23 = vpop.f32.mrb[217].mxu1  ;;  %4790 = vmatprep.subr.bf16.mxu0 %v6400_v22 }
 0x3c9   : > { %v3330_v35 = vadd.f32 %v3329_v60, %v8176_v38  ;;  %v3443_v7 = vadd.f32 %v3442_v23, %v8181_v31  ;;  %v3331_v26 = vpop.f32.mrb[90].mxu0  ;;  %v3444_v27 = vpop.f32.mrb[218].mxu1  ;;  %4739 = vmatprep.mubr.bf16.mxu0 %v3854_v21  ;;  %v6409_v21 = vld [vmem:[%s8849_s7 + $0x1d4] ss:$8 sps:$4 sm:$0xff]  }
 0x3ca   : > { %v3332_v47 = vadd.f32 %v3331_v26, %v8167_v58  ;;  %v3445_v34 = vadd.f32 %v3444_v27, %v8172_v55  ;;  %v3333_v19 = vpop.f32.mrb[91].mxu0  ;;  %v3446_v1 = vpop.f32.mrb[219].mxu1  ;;  %4740 = vmatmul.mubr.bf16.gmra.mrb[148].mxu0 %v3853_v17  ;;  %v3781_v16 = vmax.f32 %v3328_v3, 0.0  ;;  %v3783_v56 = vmax.f32 %v3441_v39, 0.0 }
 0x3cb   : > { %v3334_v53 = vadd.f32 %v3333_v19, %v8176_v38  ;;  %v3447_v52 = vadd.f32 %v3446_v1, %v8181_v31  ;;  %4791 = vmatpush1.bf16.msra.mxu0 %v6398_v2  ;;  %v3782_v45 = vmax.f32 %v3330_v35, 0.0  ;;  %v3784_v9 = vmax.f32 %v3443_v7, 0.0 }
 0x3cc   : > { %v3789_v44 = vmax.f32 %v3332_v47, 0.0  ;;  %v3791_v25 = vmax.f32 %v3445_v34, 0.0  ;;  %4792 = vmatprep.subr.bf16.mxu0 %v6403_v32  ;;  %v8354_v35 = vrot.slane %v8163_v62, %v506_v4  ;;  %v8359_v7 = vrot.slane %v8163_v62, %v514_v6 }
 0x3cd   : > { %v3790_v42 = vmax.f32 %v3334_v53, 0.0  ;;  %v3792_v5 = vmax.f32 %v3447_v52, 0.0  ;;  %v8374_v4 = vrot.slane %v8163_v62, %v518_v10 }
 0x3ce   : > { %v3861_v50 = vpack.c.bf16 %v3789_v44, %v3781_v16  ;;  %v8335_v48 = vpack.c.bf16 %v3791_v25, %v3783_v56  ;;  %v6410_v56 = vld [vmem:[%s8849_s7 + $0x1e0] ss:$8 sps:$4 sm:$0xff]  }
 0x3cf   : > { %v3862_v49 = vpack.c.bf16 %v3790_v42, %v3782_v45  ;;  %v8337_v40 = vpack.c.bf16 %v3792_v5, %v3784_v9  ;;  %v3337_v51 = vpop.f32.mrb[92].mxu0  ;;  %v3450_v22 = vpop.f32.mrb[220].mxu1  ;;  %4793 = vmatpush1.bf16.msra.mxu0 %v6401_v46  ;;  %v6415_v9 = vld [vmem:[%s8849_s7 + $0x1f4] ss:$8 sps:$4 sm:$0xff]  }
 0x3d0   : > { %v3338_v57 = vadd.f32 %v3337_v51, %v8167_v58  ;;  %v3451_v30 = vadd.f32 %v3450_v22, %v8172_v55  ;;  %v3339_v29 = vpop.f32.mrb[93].mxu0  ;;  %v3452_v17 = vpop.f32.mrb[221].mxu1  ;;  %4794 = vmatprep.subr.bf16.mxu0 %v6406_v12 }
 0x3d1   : > { %v3340_v14 = vadd.f32 %v3339_v29, %v8176_v38  ;;  %v3453_v13 = vadd.f32 %v3452_v17, %v8181_v31  ;;  %v3341_v2 = vpop.f32.mrb[94].mxu0  ;;  %v3454_v3 = vpop.f32.mrb[222].mxu1  ;;  %4749 = vmatprep.mubr.bf16.mxu0 %v3862_v49  ;;  %v6413_v17 = vld [vmem:[%s8849_s7 + $0x1f0] ss:$8 sps:$4 sm:$0xff]  }
 0x3d2   : > { %v3342_v39 = vadd.f32 %v3341_v2, %v8167_v58  ;;  %v3455_v60 = vadd.f32 %v3454_v3, %v8172_v55  ;;  %v3343_v23 = vpop.f32.mrb[95].mxu0  ;;  %v3456_v32 = vpop.f32.mrb[223].mxu1  ;;  %4750 = vmatmul.mubr.bf16.gmra.mrb[152].mxu0 %v3861_v50  ;;  %v6407_v58 = vld [vmem:[%s8849_s7 + $0x1d0] ss:$8 sps:$4 sm:$0xff]   ;;  %v8369_v55 = vrot.slane %v8163_v62, %v510_v0  ;;  %v3797_v6 = vmax.f32 %v3338_v57, 0.0 }
 0x3d3   : > { %v3344_v26 = vadd.f32 %v3343_v23, %v8176_v38  ;;  %v3457_v27 = vadd.f32 %v3456_v32, %v8181_v31  ;;  %4795 = vmatpush1.bf16.msra.mxu0 %v6404_v54  ;;  %v3799_v47 = vmax.f32 %v3451_v30, 0.0  ;;  %v6412_v31 = vld [vmem:[%s8849_s7 + $0x1e4] ss:$8 sps:$4 sm:$0xff]   ;;  %v3798_v19 = vmax.f32 %v3340_v14, 0.0 }
 0x3d4   : > { %v3805_v38 = vmax.f32 %v3342_v39, 0.0  ;;  %v3807_v34 = vmax.f32 %v3455_v60, 0.0  ;;  %4796 = vmatprep.subr.bf16.mxu0 %v6409_v21  ;;  %v3800_v1 = vmax.f32 %v3453_v13, 0.0  ;;  %v6418_v3 = vld [vmem:[%s8849_s7 + $0x204] ss:$8 sps:$4 sm:$0xff]  }
 0x3d5   : > { %v3806_v53 = vmax.f32 %v3344_v26, 0.0  ;;  %v3808_v52 = vmax.f32 %v3457_v27, 0.0 }
 0x3d6   : > { %v3869_v0 = vpack.c.bf16 %v3805_v38, %v3797_v6  ;;  %v8379_v46 = vpack.c.bf16 %v3807_v34, %v3799_v47  ;;  %v6416_v38 = vld [vmem:[%s8849_s7 + $0x200] ss:$8 sps:$4 sm:$0xff]  }
 0x3d7   : > { %v3870_v20 = vpack.c.bf16 %v3806_v53, %v3798_v19  ;;  %v8381_v16 = vpack.c.bf16 %v3808_v52, %v3800_v1  ;;  %v3493_v10 = vpop.f32.mrb[96].mxu0  ;;  %v3606_v62 = vpop.f32.mrb[224].mxu1  ;;  %4797 = vmatpush1.bf16.msra.mxu0 %v6407_v58  ;;  %v6421_v53 = vld [vmem:[%s8849_s7 + $0x214] ss:$8 sps:$4 sm:$0xff]  }
 0x3d8   : > { %v3494_v44 = vadd.f32 %v3493_v10, %v8354_v35  ;;  %v3607_v25 = vadd.f32 %v3606_v62, %v8359_v7  ;;  %v3495_v12 = vpop.f32.mrb[97].mxu0  ;;  %v3608_v45 = vpop.f32.mrb[225].mxu1  ;;  %4798 = vmatprep.subr.bf16.mxu0 %v6412_v31 }
 0x3d9   : > { %v3496_v42 = vadd.f32 %v3495_v12, %v8369_v55  ;;  %v3609_v5 = vadd.f32 %v3608_v45, %v8374_v4  ;;  %v3497_v50 = vpop.f32.mrb[98].mxu0  ;;  %v3610_v49 = vpop.f32.mrb[226].mxu1  ;;  %4759 = vmatprep.mubr.bf16.mxu0 %v3870_v20 }
 0x3da   : > { %v3498_v51 = vadd.f32 %v3497_v50, %v8354_v35  ;;  %v3611_v22 = vadd.f32 %v3610_v49, %v8359_v7  ;;  %v3499_v54 = vpop.f32.mrb[99].mxu0  ;;  %v3612_v57 = vpop.f32.mrb[227].mxu1  ;;  %4760 = vmatmul.mubr.bf16.gmra.mrb[156].mxu0 %v3869_v0  ;;  %v3689_v21 = vmax.f32 %v3494_v44, 0.0  ;;  %v3691_v14 = vmax.f32 %v3607_v25, 0.0 }
 0x3db   : > { %v3500_v30 = vadd.f32 %v3499_v54, %v8369_v55  ;;  %v3613_v29 = vadd.f32 %v3612_v57, %v8374_v4  ;;  %4799 = vmatpush1.bf16.msra.mxu0 %v6410_v56  ;;  %4802 = vmatprep.mubr.bf16.mxu0 %v8193_v41  ;;  %v3690_v39 = vmax.f32 %v3496_v42, 0.0  ;;  %v3692_v60 = vmax.f32 %v3609_v5, 0.0 }
 0x3dc   : > { %v3697_v13 = vmax.f32 %v3498_v51, 0.0  ;;  %v3699_v2 = vmax.f32 %v3611_v22, 0.0  ;;  %4800 = vmatprep.subr.bf16.mxu0 %v6415_v9  ;;  %v6419_v9 = vld [vmem:[%s8849_s7 + $0x210] ss:$8 sps:$4 sm:$0xff]  }
 0x3dd   : > { %v3698_v23 = vmax.f32 %v3500_v30, 0.0  ;;  %v3700_v32 = vmax.f32 %v3613_v29, 0.0 }
 0x3de   : > { %v8404_v26 = vpack.c.bf16 %v3697_v13, %v3689_v21  ;;  %v8406_v41 = vpack.c.bf16 %v3699_v2, %v3691_v14  ;;  %v6422_v13 = vld [vmem:[%s8849_s7 + $0x220] ss:$8 sps:$4 sm:$0xff]  }
 0x3df   : > { %v8408_v27 = vpack.c.bf16 %v3698_v23, %v3690_v39  ;;  %v8410_v58 = vpack.c.bf16 %v3700_v32, %v3692_v60  ;;  %v3503_v6 = vpop.f32.mrb[100].mxu0  ;;  %v3616_v47 = vpop.f32.mrb[228].mxu1  ;;  %4801 = vmatpush1.bf16.msra.mxu0 %v6413_v17  ;;  %v6427_v23 = vld [vmem:[%s8849_s7 + $0x234] ss:$8 sps:$4 sm:$0xff]  }
 0x3e0   : > { %v3504_v34 = vadd.f32 %v3503_v6, %v8354_v35  ;;  %v3617_v31 = vadd.f32 %v3616_v47, %v8359_v7  ;;  %v3505_v19 = vpop.f32.mrb[101].mxu0  ;;  %v3618_v1 = vpop.f32.mrb[229].mxu1  ;;  %4883 = vmatprep.subr.bf16.mxu0 %v6418_v3 }
 0x3e1   : > { %v3506_v52 = vadd.f32 %v3505_v19, %v8369_v55  ;;  %v3619_v0 = vadd.f32 %v3618_v1, %v8374_v4  ;;  %v3507_v20 = vpop.f32.mrb[102].mxu0  ;;  %v3620_v10 = vpop.f32.mrb[230].mxu1 }
 0x3e2   : > { %v3508_v62 = vadd.f32 %v3507_v20, %v8354_v35  ;;  %v3621_v56 = vadd.f32 %v3620_v10, %v8359_v7  ;;  %v3509_v44 = vpop.f32.mrb[103].mxu0  ;;  %v3622_v25 = vpop.f32.mrb[231].mxu1  ;;  %4803 = vmatmul.mubr.bf16.vlgmr.msra.gmra.mrb[128].mxu0 %v8191_v11  ;;  %v3705_v42 = vmax.f32 %v3504_v34, 0.0  ;;  %v3707_v5 = vmax.f32 %v3617_v31, 0.0  ;;  %v6424_v11 = vld [vmem:[%s8849_s7 + $0x224] ss:$8 sps:$4 sm:$0xff]  }
 0x3e3   : > { %v3510_v12 = vadd.f32 %v3509_v44, %v8369_v55  ;;  %v3623_v45 = vadd.f32 %v3622_v25, %v8374_v4  ;;  %4812 = vmatprep.mubr.bf16.mxu0 %v8217_v59  ;;  %4884 = vmatpush1.bf16.msra.mxu0 %v6416_v38  ;;  %v3706_v51 = vmax.f32 %v3506_v52, 0.0  ;;  %v3708_v22 = vmax.f32 %v3619_v0, 0.0  ;;  %v6425_v0 = vld [vmem:[%s8849_s7 + $0x230] ss:$8 sps:$4 sm:$0xff]  }
 0x3e4   : > { %v3713_v50 = vmax.f32 %v3508_v62, 0.0  ;;  %v3715_v49 = vmax.f32 %v3621_v56, 0.0  ;;  %4885 = vmatprep.subr.bf16.mxu0 %v6421_v53 }
 0x3e5   : > { %v3714_v54 = vmax.f32 %v3510_v12, 0.0  ;;  %v3716_v57 = vmax.f32 %v3623_v45, 0.0 }
 0x3e6   : > { %v8434_v30 = vpack.c.bf16 %v3713_v50, %v3705_v42  ;;  %v8436_v59 = vpack.c.bf16 %v3715_v49, %v3707_v5 }
 0x3e7   : > { %v8438_v29 = vpack.c.bf16 %v3714_v54, %v3706_v51  ;;  %v8440_v17 = vpack.c.bf16 %v3716_v57, %v3708_v22  ;;  %v3513_v21 = vpop.f32.mrb[104].mxu0  ;;  %v3626_v14 = vpop.f32.mrb[232].mxu1  ;;  %4886 = vmatpush1.bf16.msra.mxu0 %v6419_v9 }
 0x3e8   : > { %v3514_v2 = vadd.f32 %v3513_v21, %v8354_v35  ;;  %v3627_v3 = vadd.f32 %v3626_v14, %v8359_v7  ;;  %v3515_v39 = vpop.f32.mrb[105].mxu0  ;;  %v3628_v60 = vpop.f32.mrb[233].mxu1  ;;  %4887 = vmatprep.subr.bf16.mxu0 %v6424_v11  ;;  %v6428_v11 = vld [vmem:[%s8849_s7 + $0x240] ss:$8 sps:$4 sm:$0xff]   ;;  %v6433_v21 = vld [vmem:[%s8849_s7 + $0x254] ss:$8 sps:$4 sm:$0xff]  }
 0x3e9   : > { %v3516_v32 = vadd.f32 %v3515_v39, %v8369_v55  ;;  %v3629_v6 = vadd.f32 %v3628_v60, %v8374_v4  ;;  %v3517_v47 = vpop.f32.mrb[106].mxu0  ;;  %v3630_v38 = vpop.f32.mrb[234].mxu1 }
 0x3ea   : > { %v3518_v34 = vadd.f32 %v3517_v47, %v8354_v35  ;;  %v3631_v31 = vadd.f32 %v3630_v38, %v8359_v7  ;;  %v3519_v19 = vpop.f32.mrb[107].mxu0  ;;  %v3632_v1 = vpop.f32.mrb[235].mxu1  ;;  %4813 = vmatmul.mubr.bf16.gmra.mrb[132].mxu0 %v8215_v18  ;;  %v3721_v20 = vmax.f32 %v3514_v2, 0.0  ;;  %v3723_v10 = vmax.f32 %v3627_v3, 0.0  ;;  %v6430_v18 = vld [vmem:[%s8849_s7 + $0x244] ss:$8 sps:$4 sm:$0xff]  }
 0x3eb   : > { %v3520_v53 = vadd.f32 %v3519_v19, %v8369_v55  ;;  %v3633_v52 = vadd.f32 %v3632_v1, %v8374_v4  ;;  %4822 = vmatprep.mubr.bf16.mxu0 %v8241_v61  ;;  %4888 = vmatpush1.bf16.msra.mxu0 %v6422_v13  ;;  %v3722_v44 = vmax.f32 %v3516_v32, 0.0  ;;  %v3724_v25 = vmax.f32 %v3629_v6, 0.0  ;;  %v6431_v38 = vld [vmem:[%s8849_s7 + $0x250] ss:$8 sps:$4 sm:$0xff]  }
 0x3ec   : > { %v3729_v62 = vmax.f32 %v3518_v34, 0.0  ;;  %v3731_v56 = vmax.f32 %v3631_v31, 0.0  ;;  %4889 = vmatprep.subr.bf16.mxu0 %v6427_v23 }
 0x3ed   : > { %v3730_v12 = vmax.f32 %v3520_v53, 0.0  ;;  %v3732_v45 = vmax.f32 %v3633_v52, 0.0 }
 0x3ee   : > { %v8464_v9 = vpack.c.bf16 %v3729_v62, %v3721_v20  ;;  %v8466_v61 = vpack.c.bf16 %v3731_v56, %v3723_v10 }
 0x3ef   : > { %v8468_v42 = vpack.c.bf16 %v3730_v12, %v3722_v44  ;;  %v8470_v5 = vpack.c.bf16 %v3732_v45, %v3724_v25  ;;  %v3523_v50 = vpop.f32.mrb[108].mxu0  ;;  %v3636_v49 = vpop.f32.mrb[236].mxu1  ;;  %4890 = vmatpush1.bf16.msra.mxu0 %v6425_v0  ;;  %v6434_v25 = vld [vmem:[%s8849_s7 + $0x260] ss:$8 sps:$4 sm:$0xff]  }
 0x3f0   : > { %v3524_v51 = vadd.f32 %v3523_v50, %v8354_v35  ;;  %v3637_v22 = vadd.f32 %v3636_v49, %v8359_v7  ;;  %v3525_v54 = vpop.f32.mrb[109].mxu0  ;;  %v3638_v57 = vpop.f32.mrb[237].mxu1  ;;  %4891 = vmatprep.subr.bf16.mxu0 %v6430_v18 }
 0x3f1   : > { %v3526_v14 = vadd.f32 %v3525_v54, %v8369_v55  ;;  %v3639_v13 = vadd.f32 %v3638_v57, %v8374_v4  ;;  %v3527_v2 = vpop.f32.mrb[110].mxu0  ;;  %v3640_v3 = vpop.f32.mrb[238].mxu1 }
 0x3f2   : > { %v3528_v39 = vadd.f32 %v3527_v2, %v8354_v35  ;;  %v3641_v60 = vadd.f32 %v3640_v3, %v8359_v7  ;;  %v3529_v23 = vpop.f32.mrb[111].mxu0  ;;  %v3642_v32 = vpop.f32.mrb[239].mxu1  ;;  %4823 = vmatmul.mubr.bf16.gmra.mrb[136].mxu0 %v8239_v37  ;;  %v3737_v34 = vmax.f32 %v3524_v51, 0.0  ;;  %v3739_v31 = vmax.f32 %v3637_v22, 0.0  ;;  %v6436_v37 = vld [vmem:[%s8849_s7 + $0x264] ss:$8 sps:$4 sm:$0xff]  }
 0x3f3   : > { %v3530_v6 = vadd.f32 %v3529_v23, %v8369_v55  ;;  %v3643_v47 = vadd.f32 %v3642_v32, %v8374_v4  ;;  %4832 = vmatprep.mubr.bf16.mxu0 %v8265_v28  ;;  %4892 = vmatpush1.bf16.msra.mxu0 %v6428_v11  ;;  %v3738_v53 = vmax.f32 %v3526_v14, 0.0  ;;  %v3740_v52 = vmax.f32 %v3639_v13, 0.0  ;;  %v6439_v11 = vld [vmem:[%s8849_s7 + $0x274] ss:$8 sps:$4 sm:$0xff]  }
 0x3f4   : > { %v3745_v19 = vmax.f32 %v3528_v39, 0.0  ;;  %v3747_v1 = vmax.f32 %v3641_v60, 0.0  ;;  %4893 = vmatprep.subr.bf16.mxu0 %v6433_v21  ;;  %v6437_v60 = vld [vmem:[%s8849_s7 + $0x270] ss:$8 sps:$4 sm:$0xff]  }
 0x3f5   : > { %v3746_v0 = vmax.f32 %v3530_v6, 0.0  ;;  %v3748_v20 = vmax.f32 %v3643_v47, 0.0 }
 0x3f6   : > { %v8494_v10 = vpack.c.bf16 %v3745_v19, %v3737_v34  ;;  %v8496_v28 = vpack.c.bf16 %v3747_v1, %v3739_v31 }
 0x3f7   : > { %v8498_v62 = vpack.c.bf16 %v3746_v0, %v3738_v53  ;;  %v8500_v56 = vpack.c.bf16 %v3748_v20, %v3740_v52  ;;  %v3533_v18 = vpop.f32.mrb[112].mxu0  ;;  %v3646_v44 = vpop.f32.mrb[240].mxu1  ;;  %4894 = vmatpush1.bf16.msra.mxu0 %v6431_v38  ;;  %v6440_v20 = vld [vmem:[%s8849_s7 + $0x280] ss:$8 sps:$4 sm:$0xff]  }
 0x3f8   : > { %v3534_v12 = vadd.f32 %v3533_v18, %v8354_v35  ;;  %v3647_v45 = vadd.f32 %v3646_v44, %v8359_v7  ;;  %v3535_v50 = vpop.f32.mrb[113].mxu0  ;;  %v3648_v49 = vpop.f32.mrb[241].mxu1  ;;  %4895 = vmatprep.subr.bf16.mxu0 %v6436_v37 }
 0x3f9   : > { %v3536_v51 = vadd.f32 %v3535_v50, %v8369_v55  ;;  %v3649_v22 = vadd.f32 %v3648_v49, %v8374_v4  ;;  %v3537_v54 = vpop.f32.mrb[114].mxu0  ;;  %v3650_v57 = vpop.f32.mrb[242].mxu1 }
 0x3fa   : > { %v3538_v21 = vadd.f32 %v3537_v54, %v8354_v35  ;;  %v3651_v14 = vadd.f32 %v3650_v57, %v8359_v7  ;;  %v3539_v13 = vpop.f32.mrb[115].mxu0  ;;  %v3652_v2 = vpop.f32.mrb[243].mxu1  ;;  %4833 = vmatmul.mubr.bf16.gmra.mrb[140].mxu0 %v8263_v33  ;;  %v3753_v23 = vmax.f32 %v3534_v12, 0.0  ;;  %v3755_v32 = vmax.f32 %v3647_v45, 0.0  ;;  %v6442_v33 = vld [vmem:[%s8849_s7 + $0x284] ss:$8 sps:$4 sm:$0xff]  }
 0x3fb   : > { %v3540_v3 = vadd.f32 %v3539_v13, %v8369_v55  ;;  %v3653_v39 = vadd.f32 %v3652_v2, %v8374_v4  ;;  %4842 = vmatprep.mubr.bf16.mxu0 %v8289_v36  ;;  %4896 = vmatpush1.bf16.msra.mxu0 %v6434_v25  ;;  %v3754_v38 = vmax.f32 %v3536_v51, 0.0  ;;  %v3756_v34 = vmax.f32 %v3649_v22, 0.0  ;;  %v6445_v45 = vld [vmem:[%s8849_s7 + $0x294] ss:$8 sps:$4 sm:$0xff]   ;;  %v6443_v2 = vld [vmem:[%s8849_s7 + $0x290] ss:$8 sps:$4 sm:$0xff]  }
 0x3fc   : > { %v3761_v6 = vmax.f32 %v3538_v21, 0.0  ;;  %v3763_v47 = vmax.f32 %v3651_v14, 0.0  ;;  %4897 = vmatprep.subr.bf16.mxu0 %v6439_v11 }
 0x3fd   : > { %v3762_v31 = vmax.f32 %v3540_v3, 0.0  ;;  %v3764_v19 = vmax.f32 %v3653_v39, 0.0 }
 0x3fe   : > { %v8524_v1 = vpack.c.bf16 %v3761_v6, %v3753_v23  ;;  %v8526_v36 = vpack.c.bf16 %v3763_v47, %v3755_v32 }
 0x3ff   : > { %v8528_v37 = vpack.c.bf16 %v3762_v31, %v3754_v38  ;;  %v8530_v53 = vpack.c.bf16 %v3764_v19, %v3756_v34  ;;  %v3543_v52 = vpop.f32.mrb[116].mxu0  ;;  %v3656_v0 = vpop.f32.mrb[244].mxu1  ;;  %4898 = vmatpush1.bf16.msra.mxu0 %v6437_v60 }
 0x400   : > { %v3544_v18 = vadd.f32 %v3543_v52, %v8354_v35  ;;  %v3657_v44 = vadd.f32 %v3656_v0, %v8359_v7  ;;  %v3545_v25 = vpop.f32.mrb[117].mxu0  ;;  %v3658_v12 = vpop.f32.mrb[245].mxu1  ;;  %4899 = vmatprep.subr.bf16.mxu0 %v6442_v33  ;;  %v6446_v0 = vld [vmem:[%s8849_s7 + $0x2a0] ss:$8 sps:$4 sm:$0xff]  }
 0x401   : > { %v3546_v50 = vadd.f32 %v3545_v25, %v8369_v55  ;;  %v3659_v49 = vadd.f32 %v3658_v12, %v8374_v4  ;;  %v3547_v11 = vpop.f32.mrb[118].mxu0  ;;  %v3660_v51 = vpop.f32.mrb[246].mxu1  ;;  %v6451_v12 = vld [vmem:[%s8849_s7 + $0x2b4] ss:$8 sps:$4 sm:$0xff]  }
 0x402   : > { %v3548_v22 = vadd.f32 %v3547_v11, %v8354_v35  ;;  %v3661_v54 = vadd.f32 %v3660_v51, %v8359_v7  ;;  %v3549_v57 = vpop.f32.mrb[119].mxu0  ;;  %v3662_v21 = vpop.f32.mrb[247].mxu1  ;;  %4843 = vmatmul.mubr.bf16.gmra.mrb[144].mxu0 %v8287_v43  ;;  %v3769_v3 = vmax.f32 %v3544_v18, 0.0  ;;  %v3771_v39 = vmax.f32 %v3657_v44, 0.0  ;;  %v6448_v43 = vld [vmem:[%s8849_s7 + $0x2a4] ss:$8 sps:$4 sm:$0xff]  }
 0x403   : > { %v3550_v14 = vadd.f32 %v3549_v57, %v8369_v55  ;;  %v3663_v13 = vadd.f32 %v3662_v21, %v8374_v4  ;;  %4852 = vmatprep.mubr.bf16.mxu0 %v8313_v8  ;;  %4900 = vmatpush1.bf16.msra.mxu0 %v6440_v20  ;;  %v3770_v32 = vmax.f32 %v3546_v50, 0.0  ;;  %v3772_v6 = vmax.f32 %v3659_v49, 0.0 }
 0x404   : > { %v3777_v60 = vmax.f32 %v3548_v22, 0.0  ;;  %v3779_v23 = vmax.f32 %v3661_v54, 0.0  ;;  %4901 = vmatprep.subr.bf16.mxu0 %v6445_v45 }
 0x405   : > { %v3778_v47 = vmax.f32 %v3550_v14, 0.0  ;;  %v3780_v33 = vmax.f32 %v3663_v13, 0.0  ;;  %v6449_v13 = vld [vmem:[%s8849_s7 + $0x2b0] ss:$8 sps:$4 sm:$0xff]  }
 0x406   : > { %v8554_v38 = vpack.c.bf16 %v3777_v60, %v3769_v3  ;;  %v8556_v8 = vpack.c.bf16 %v3779_v23, %v3771_v39 }
 0x407   : > { %v8558_v34 = vpack.c.bf16 %v3778_v47, %v3770_v32  ;;  %v8560_v31 = vpack.c.bf16 %v3780_v33, %v3772_v6  ;;  %v3553_v19 = vpop.f32.mrb[120].mxu0  ;;  %v3666_v52 = vpop.f32.mrb[248].mxu1  ;;  %4902 = vmatpush1.bf16.msra.mxu0 %v6443_v2 }
 0x408   : > { %v3554_v20 = vadd.f32 %v3553_v19, %v8354_v35  ;;  %v3667_v18 = vadd.f32 %v3666_v52, %v8359_v7  ;;  %v3555_v44 = vpop.f32.mrb[121].mxu0  ;;  %v3668_v25 = vpop.f32.mrb[249].mxu1  ;;  %4903 = vmatprep.subr.bf16.mxu0 %v6448_v43 }
 0x409   : > { %v3556_v45 = vadd.f32 %v3555_v44, %v8369_v55  ;;  %v3669_v50 = vadd.f32 %v3668_v25, %v8374_v4  ;;  %v3557_v49 = vpop.f32.mrb[122].mxu0  ;;  %v3670_v11 = vpop.f32.mrb[250].mxu1 }
 0x40a   : > { %v3558_v51 = vadd.f32 %v3557_v49, %v8354_v35  ;;  %v3671_v22 = vadd.f32 %v3670_v11, %v8359_v7  ;;  %v3559_v54 = vpop.f32.mrb[123].mxu0  ;;  %v3672_v57 = vpop.f32.mrb[251].mxu1  ;;  %4853 = vmatmul.mubr.bf16.gmra.mrb[148].mxu0 %v8311_v63  ;;  %v3785_v2 = vmax.f32 %v3554_v20, 0.0  ;;  %v3787_v3 = vmax.f32 %v3667_v18, 0.0  ;;  %v6454_v63 = vld [vmem:[%s8849_s7 + $0x2c4] ss:$8 sps:$4 sm:$0xff]  }
 0x40b   : > { %v3560_v21 = vadd.f32 %v3559_v54, %v8369_v55  ;;  %v3673_v14 = vadd.f32 %v3672_v57, %v8374_v4  ;;  %4862 = vmatprep.mubr.bf16.mxu0 %v8337_v40  ;;  %4904 = vmatpush1.bf16.msra.mxu0 %v6446_v0  ;;  %v3786_v23 = vmax.f32 %v3556_v45, 0.0  ;;  %v3788_v43 = vmax.f32 %v3669_v50, 0.0  ;;  %v6452_v20 = vld [vmem:[%s8849_s7 + $0x2c0] ss:$8 sps:$4 sm:$0xff]   ;;  %v6457_v45 = vld [vmem:[%s8849_s7 + $0x2d4] ss:$8 sps:$4 sm:$0xff]  }
 0x40c   : > { %v3793_v39 = vmax.f32 %v3558_v51, 0.0  ;;  %v3795_v60 = vmax.f32 %v3671_v22, 0.0  ;;  %4905 = vmatprep.subr.bf16.mxu0 %v6451_v12 }
 0x40d   : > { %v3794_v32 = vmax.f32 %v3560_v21, 0.0  ;;  %v3796_v6 = vmax.f32 %v3673_v14, 0.0 }
 0x40e   : > { %v8584_v47 = vpack.c.bf16 %v3793_v39, %v3785_v2  ;;  %v8586_v40 = vpack.c.bf16 %v3795_v60, %v3787_v3  ;;  %v6455_v2 = vld [vmem:[%s8849_s7 + $0x2d0] ss:$8 sps:$4 sm:$0xff]  }
 0x40f   : > { %v8588_v33 = vpack.c.bf16 %v3794_v32, %v3786_v23  ;;  %v8590_v19 = vpack.c.bf16 %v3796_v6, %v3788_v43  ;;  %v3563_v52 = vpop.f32.mrb[124].mxu0  ;;  %v3676_v0 = vpop.f32.mrb[252].mxu1  ;;  %4906 = vmatpush1.bf16.msra.mxu0 %v6449_v13  ;;  %v6458_v6 = vld [vmem:[%s8849_s7 + $0x2e0] ss:$8 sps:$4 sm:$0xff]  }
 0x410   : > { %v3564_v18 = vadd.f32 %v3563_v52, %v8354_v35  ;;  %v3677_v44 = vadd.f32 %v3676_v0, %v8359_v7  ;;  %v3565_v25 = vpop.f32.mrb[125].mxu0  ;;  %v3678_v12 = vpop.f32.mrb[253].mxu1  ;;  %4907 = vmatprep.subr.bf16.mxu0 %v6454_v63  ;;  %v6463_v52 = vld [vmem:[%s8849_s7 + $0x2f4] ss:$8 sps:$4 sm:$0xff]   ;;  %v6461_v0 = vld [vmem:[%s8849_s7 + $0x2f0] ss:$8 sps:$4 sm:$0xff]  }
 0x411   : > { %v3566_v50 = vadd.f32 %v3565_v25, %v8369_v55  ;;  %v3679_v49 = vadd.f32 %v3678_v12, %v8374_v4  ;;  %v3567_v11 = vpop.f32.mrb[126].mxu0  ;;  %v3680_v51 = vpop.f32.mrb[254].mxu1  ;;  %v6470_v25 = vld [vmem:[%s8849_s7 + $0x320] ss:$8 sps:$4 sm:$0xff]   ;;  %v6478_v12 = vld [vmem:[%s8849_s7 + $0x344] ss:$8 sps:$4 sm:$0xff]  }
 0x412   : > { %v3568_v22 = vadd.f32 %v3567_v11, %v8354_v35  ;;  %v3681_v54 = vadd.f32 %v3680_v51, %v8359_v7  ;;  %v3569_v57 = vpop.f32.mrb[127].mxu0  ;;  %v3682_v21 = vpop.f32.mrb[255].mxu1  ;;  %4863 = vmatmul.mubr.bf16.gmra.mrb[152].mxu0 %v8335_v48  ;;  %v3801_v3 = vmax.f32 %v3564_v18, 0.0  ;;  %v3803_v39 = vmax.f32 %v3677_v44, 0.0  ;;  %v6460_v48 = vld [vmem:[%s8849_s7 + $0x2e4] ss:$8 sps:$4 sm:$0xff]  }
 0x413   : > { %v3570_v14 = vadd.f32 %v3569_v57, %v8369_v55  ;;  %v3683_v13 = vadd.f32 %v3682_v21, %v8374_v4  ;;  %4872 = vmatprep.mubr.bf16.mxu0 %v8381_v16  ;;  %4908 = vmatpush1.bf16.msra.mxu0 %v6452_v20  ;;  %v3802_v7 = vmax.f32 %v3566_v50, 0.0  ;;  %v3804_v55 = vmax.f32 %v3679_v49, 0.0  ;;  %v6466_v20 = vld [vmem:[%s8849_s7 + $0x304] ss:$8 sps:$4 sm:$0xff]   ;;  %v6464_v18 = vld [vmem:[%s8849_s7 + $0x300] ss:$8 sps:$4 sm:$0xff]  }
 0x414   : > { %v3809_v35 = vmax.f32 %v3568_v22, 0.0  ;;  %v3811_v60 = vmax.f32 %v3681_v54, 0.0  ;;  %4909 = vmatprep.subr.bf16.mxu0 %v6457_v45  ;;  %v6472_v44 = vld [vmem:[%s8849_s7 + $0x324] ss:$8 sps:$4 sm:$0xff]   ;;  %v6476_v45 = vld [vmem:[%s8849_s7 + $0x340] ss:$8 sps:$4 sm:$0xff]  }
 0x415   : > { %v3810_v63 = vmax.f32 %v3570_v14, 0.0  ;;  %v3812_v4 = vmax.f32 %v3683_v13, 0.0  ;;  %v6484_v50 = vld [vmem:[%s8849_s7 + $0x364] ss:$8 sps:$4 sm:$0xff]   ;;  %v6482_v49 = vld [vmem:[%s8849_s7 + $0x360] ss:$8 sps:$4 sm:$0xff]  }
 0x416   : > { %v8614_v23 = vpack.c.bf16 %v3809_v35, %v3801_v3  ;;  %v8616_v16 = vpack.c.bf16 %v3811_v60, %v3803_v39  ;;  %v6490_v11 = vld [vmem:[%s8849_s7 + $0x384] ss:$8 sps:$4 sm:$0xff]   ;;  %v6488_v51 = vld [vmem:[%s8849_s7 + $0x380] ss:$8 sps:$4 sm:$0xff]  }
 0x417   : > { %v8618_v43 = vpack.c.bf16 %v3810_v63, %v3802_v7  ;;  %v8620_v32 = vpack.c.bf16 %v3812_v4, %v3804_v55  ;;  %4910 = vmatpush1.bf16.msra.mxu0 %v6455_v2  ;;  %v6496_v22 = vld [vmem:[%s8849_s7 + $0x3a4] ss:$8 sps:$4 sm:$0xff]   ;;  %v6494_v54 = vld [vmem:[%s8849_s7 + $0x3a0] ss:$8 sps:$4 sm:$0xff]   ;;  %v6509_v2 = vld [vmem:[%s8849_s7 + $0x3f0] ss:$8 sps:$4 sm:$0xff]  }
 0x418   : > { %4911 = vmatprep.subr.bf16.mxu0 %v6460_v48  ;;  %v6502_v57 = vld [vmem:[%s8849_s7 + $0x3c4] ss:$8 sps:$4 sm:$0xff]   ;;  %v6500_v21 = vld [vmem:[%s8849_s7 + $0x3c0] ss:$8 sps:$4 sm:$0xff]  }
 0x419   : > { %v6508_v14 = vld [vmem:[%s8849_s7 + $0x3e4] ss:$8 sps:$4 sm:$0xff]   ;;  %v6506_v13 = vld [vmem:[%s8849_s7 + $0x3e0] ss:$8 sps:$4 sm:$0xff]  }
 0x41a   : > { %4873 = vmatmul.mubr.bf16.gmra.mrb[156].mxu0 %v8379_v46  ;;  %v6469_v46 = vld [vmem:[%s8849_s7 + $0x314] ss:$8 sps:$4 sm:$0xff]  }
 0x41b   : > { %4912 = vmatpush1.bf16.msra.mxu0 %v6458_v6  ;;  %4915 = vmatprep.mubr.bf16.mxu0 %v8408_v27  ;;  %v6467_v27 = vld [vmem:[%s8849_s7 + $0x310] ss:$8 sps:$4 sm:$0xff]  }
 0x41c   : > { %4913 = vmatprep.subr.bf16.mxu0 %v6463_v52 }
 0x41f   : > { %4914 = vmatpush1.bf16.msra.mxu0 %v6461_v0 }
 0x420   : > { %4996 = vmatprep.subr.bf16.mxu0 %v6466_v20 }
 0x422   : > { %4916 = vmatmul.mubr.bf16.vlgmr.msra.gmra.mrb[128].mxu0 %v8404_v26  ;;  %v6475_v26 = vld [vmem:[%s8849_s7 + $0x334] ss:$8 sps:$4 sm:$0xff]  }
 0x423   : > { %4925 = vmatprep.mubr.bf16.mxu0 %v8438_v29  ;;  %4997 = vmatpush1.bf16.msra.mxu0 %v6464_v18  ;;  %v6473_v29 = vld [vmem:[%s8849_s7 + $0x330] ss:$8 sps:$4 sm:$0xff]  }
 0x424   : > { %4998 = vmatprep.subr.bf16.mxu0 %v6469_v46 }
 0x427   : > { %4999 = vmatpush1.bf16.msra.mxu0 %v6467_v27 }
 0x428   : > { %5000 = vmatprep.subr.bf16.mxu0 %v6472_v44 }
 0x42a   : > { %4926 = vmatmul.mubr.bf16.gmra.mrb[132].mxu0 %v8434_v30  ;;  %v6481_v30 = vld [vmem:[%s8849_s7 + $0x354] ss:$8 sps:$4 sm:$0xff]  }
 0x42b   : > { %4935 = vmatprep.mubr.bf16.mxu0 %v8468_v42  ;;  %5001 = vmatpush1.bf16.msra.mxu0 %v6470_v25  ;;  %v6479_v42 = vld [vmem:[%s8849_s7 + $0x350] ss:$8 sps:$4 sm:$0xff]  }
 0x42c   : > { %5002 = vmatprep.subr.bf16.mxu0 %v6475_v26 }
 0x42f   : > { %5003 = vmatpush1.bf16.msra.mxu0 %v6473_v29 }
 0x430   : > { %5004 = vmatprep.subr.bf16.mxu0 %v6478_v12 }
 0x432   : > { %4936 = vmatmul.mubr.bf16.gmra.mrb[136].mxu0 %v8464_v9  ;;  %v6487_v9 = vld [vmem:[%s8849_s7 + $0x374] ss:$8 sps:$4 sm:$0xff]  }
 0x433   : > { %4945 = vmatprep.mubr.bf16.mxu0 %v8498_v62  ;;  %5005 = vmatpush1.bf16.msra.mxu0 %v6476_v45  ;;  %v6485_v62 = vld [vmem:[%s8849_s7 + $0x370] ss:$8 sps:$4 sm:$0xff]  }
 0x434   : > { %5006 = vmatprep.subr.bf16.mxu0 %v6481_v30 }
 0x437   : > { %5007 = vmatpush1.bf16.msra.mxu0 %v6479_v42 }
 0x438   : > { %5008 = vmatprep.subr.bf16.mxu0 %v6484_v50 }
 0x43a   : > { %4946 = vmatmul.mubr.bf16.gmra.mrb[140].mxu0 %v8494_v10  ;;  %v6493_v10 = vld [vmem:[%s8849_s7 + $0x394] ss:$8 sps:$4 sm:$0xff]  }
 0x43b   : > { %4955 = vmatprep.mubr.bf16.mxu0 %v8528_v37  ;;  %5009 = vmatpush1.bf16.msra.mxu0 %v6482_v49  ;;  %v6491_v37 = vld [vmem:[%s8849_s7 + $0x390] ss:$8 sps:$4 sm:$0xff]  }
 0x43c   : > { %5010 = vmatprep.subr.bf16.mxu0 %v6487_v9 }
 0x43f   : > { %5011 = vmatpush1.bf16.msra.mxu0 %v6485_v62 }
 0x440   : > { %5012 = vmatprep.subr.bf16.mxu0 %v6490_v11 }
 0x442   : > { %4956 = vmatmul.mubr.bf16.gmra.mrb[144].mxu0 %v8524_v1  ;;  %v6499_v1 = vld [vmem:[%s8849_s7 + $0x3b4] ss:$8 sps:$4 sm:$0xff]  }
 0x443   : > { %4965 = vmatprep.mubr.bf16.mxu0 %v8558_v34  ;;  %5013 = vmatpush1.bf16.msra.mxu0 %v6488_v51  ;;  %v6497_v34 = vld [vmem:[%s8849_s7 + $0x3b0] ss:$8 sps:$4 sm:$0xff]  }
 0x444   : > { %5014 = vmatprep.subr.bf16.mxu0 %v6493_v10 }
 0x447   : > { %5015 = vmatpush1.bf16.msra.mxu0 %v6491_v37 }
 0x448   : > { %5016 = vmatprep.subr.bf16.mxu0 %v6496_v22 }
 0x44a   : > { %4966 = vmatmul.mubr.bf16.gmra.mrb[148].mxu0 %v8554_v38  ;;  %v6505_v38 = vld [vmem:[%s8849_s7 + $0x3d4] ss:$8 sps:$4 sm:$0xff]  }
 0x44b   : > { %4975 = vmatprep.mubr.bf16.mxu0 %v8588_v33  ;;  %5017 = vmatpush1.bf16.msra.mxu0 %v6494_v54  ;;  %v6503_v33 = vld [vmem:[%s8849_s7 + $0x3d0] ss:$8 sps:$4 sm:$0xff]  }
 0x44c   : > { %5018 = vmatprep.subr.bf16.mxu0 %v6499_v1 }
 0x44f   : > { %5019 = vmatpush1.bf16.msra.mxu0 %v6497_v34 }
 0x450   : > { %5020 = vmatprep.subr.bf16.mxu0 %v6502_v57 }
 0x452   : > { %4976 = vmatmul.mubr.bf16.gmra.mrb[152].mxu0 %v8584_v47  ;;  %v6511_v47 = vld [vmem:[%s8849_s7 + $0x3f4] ss:$8 sps:$4 sm:$0xff]  }
 0x453   : > { %4985 = vmatprep.mubr.bf16.mxu0 %v8618_v43  ;;  %5021 = vmatpush1.bf16.msra.mxu0 %v6500_v21 }
 0x454   : > { %5022 = vmatprep.subr.bf16.mxu0 %v6505_v38 }
 0x457   : > { %5023 = vmatpush1.bf16.msra.mxu0 %v6503_v33 }
 0x458   : > { %5024 = vmatprep.subr.bf16.mxu0 %v6508_v14 }
 0x45a   : > { %4986 = vmatmul.mubr.bf16.gmra.mrb[156].mxu0 %v8614_v23 }
 0x45b   : > { %5025 = vmatpush1.bf16.msra.mxu0 %v6506_v13  ;;  %5028 = vmatprep.mubr.bf16.mxu0 %v8410_v58 }
 0x45c   : > { %5026 = vmatprep.subr.bf16.mxu0 %v6511_v47 }
 0x45f   : > { %5027 = vmatpush1.bf16.msra.mxu0 %v6509_v2 }
 0x462   : > { %5029 = vmatmul.mubr.bf16.vlgmr.msra.gmra.mrb[128].mxu0 %v8406_v41  ;;  %v4005_v41 = vld [vmem:[%s8850_s8] sm:$0x3] }
 0x463   : > { %5038 = vmatprep.mubr.bf16.mxu0 %v8440_v17  ;;  %v8764_v58 = vrot.slane %v4005_v41, %v7295_v24 }
 0x46a   : > { %5039 = vmatmul.mubr.bf16.gmra.mrb[132].mxu0 %v8436_v59  ;;  %v8767_v59 = vrot.slane %v4005_v41, %v7303_v15 }
 0x46b   : > { %5048 = vmatprep.mubr.bf16.mxu0 %v8470_v5 }
 0x472   : > { %5049 = vmatmul.mubr.bf16.gmra.mrb[136].mxu0 %v8466_v61 }
 0x473   : > { %5058 = vmatprep.mubr.bf16.mxu0 %v8500_v56 }
 0x47a   : > { %5059 = vmatmul.mubr.bf16.gmra.mrb[140].mxu0 %v8496_v28 }
 0x47b   : > { %5068 = vmatprep.mubr.bf16.mxu0 %v8530_v53 }
 0x482   : > { %5069 = vmatmul.mubr.bf16.gmra.mrb[144].mxu0 %v8526_v36 }
 0x483   : > { %5078 = vmatprep.mubr.bf16.mxu0 %v8560_v31 }
 0x48a   : > { %5079 = vmatmul.mubr.bf16.gmra.mrb[148].mxu0 %v8556_v8 }
 0x48b   : > { %5088 = vmatprep.mubr.bf16.mxu0 %v8590_v19 }
 0x492   : > { %5089 = vmatmul.mubr.bf16.gmra.mrb[152].mxu0 %v8586_v40 }
 0x493   : > { %5098 = vmatprep.mubr.bf16.mxu0 %v8620_v32 }
 0x49a   : > { %5099 = vmatmul.mubr.bf16.gmra.mrb[156].mxu0 %v8616_v16 }
 0x535   : > { %v5030_v17 = vpop.f32.mrb[128].mxu0 }
 0x536   : > { %v6095_v61 = vadd.f32 %v5030_v17, %v8764_v58  ;;  %v5032_v5 = vpop.f32.mrb[129].mxu0 }
 0x537   : > { %v6096_v28 = vadd.f32 %v5032_v5, %v8767_v59  ;;  %v5034_v56 = vpop.f32.mrb[130].mxu0 }
 0x538   : > { %v5803_v36 = vmul.f32 -1.442695, %v6095_v61  ;;  %v6097_v53 = vadd.f32 %v5034_v56, %v8764_v58  ;;  %v5036_v8 = vpop.f32.mrb[131].mxu0 }
 0x539   : > { %v5804_v31 = vmul.f32 -1.442695, %v6096_v28  ;;  %v6098_v40 = vadd.f32 %v5036_v8, %v8767_v59 }
 0x53a   : > { %6512 = vpow2.f32 %v5803_v36  ;;  %v5805_v24 = vmul.f32 -1.442695, %v6097_v53 }
 0x53b   : > { %6514 = vpow2.f32 %v5804_v31  ;;  %v5806_v19 = vmul.f32 -1.442695, %v6098_v40 }
 0x53c   : > { %6516 = vpow2.f32 %v5805_v24 }
 0x53d   : > { %6518 = vpow2.f32 %v5806_v19  ;;  %v5040_v15 = vpop.f32.mrb[132].mxu0 }
 0x53e   : > { %v6099_v3 = vadd.f32 %v5040_v15, %v8764_v58  ;;  %v5042_v39 = vpop.f32.mrb[133].mxu0 }
 0x53f   : > { %v6100_v35 = vadd.f32 %v5042_v39, %v8767_v59  ;;  %v5044_v60 = vpop.f32.mrb[134].mxu0 }
 0x540   : > { %v5807_v48 = vmul.f32 -1.442695, %v6099_v3  ;;  %v6101_v7 = vadd.f32 %v5044_v60, %v8764_v58  ;;  %v5046_v55 = vpop.f32.mrb[135].mxu0 }
 0x541   : > { %v5808_v63 = vmul.f32 -1.442695, %v6100_v35  ;;  %v6102_v4 = vadd.f32 %v5046_v55, %v8767_v59 }
 0x542   : > { %6520 = vpow2.f32 %v5807_v48  ;;  %v5809_v23 = vmul.f32 -1.442695, %v6101_v7 }
 0x543   : > { %6522 = vpow2.f32 %v5808_v63  ;;  %v5810_v16 = vmul.f32 -1.442695, %v6102_v4 }
 0x544   : > { %v6513_v43 = vpop.eup %6512  ;;  %6524 = vpow2.f32 %v5809_v23 }
 0x545   : > { %v6515_v32 = vpop.eup %6514  ;;  %v5205_v6 = vadd.f32 1.0, %v6513_v43  ;;  %6526 = vpow2.f32 %v5810_v16  ;;  %v5050_v52 = vpop.f32.mrb[136].mxu0 }
 0x546   : > { %v6517_v0 = vpop.eup %6516  ;;  %v5206_v20 = vadd.f32 1.0, %v6515_v32  ;;  %v6103_v18 = vadd.f32 %v5050_v52, %v8764_v58  ;;  %v5052_v46 = vpop.f32.mrb[137].mxu0 }
 0x547   : > { %v6519_v27 = vpop.eup %6518  ;;  %6528 = vrcp.f32 %v5205_v6  ;;  %v5207_v44 = vadd.f32 1.0, %v6517_v0  ;;  %v6104_v25 = vadd.f32 %v5052_v46, %v8767_v59  ;;  %v5054_v26 = vpop.f32.mrb[138].mxu0 }
 0x548   : > { %6530 = vrcp.f32 %v5206_v20  ;;  %v5208_v29 = vadd.f32 1.0, %v6519_v27  ;;  %v5811_v12 = vmul.f32 -1.442695, %v6103_v18  ;;  %v6105_v45 = vadd.f32 %v5054_v26, %v8764_v58  ;;  %v5056_v30 = vpop.f32.mrb[139].mxu0 }
 0x549   : > { %6532 = vrcp.f32 %v5207_v44  ;;  %v5812_v42 = vmul.f32 -1.442695, %v6104_v25  ;;  %v6106_v50 = vadd.f32 %v5056_v30, %v8767_v59 }
 0x54a   : > { %6534 = vrcp.f32 %v5208_v29  ;;  %v5813_v49 = vmul.f32 -1.442695, %v6105_v45 }
 0x54b   : > { %6536 = vpow2.f32 %v5811_v12  ;;  %v5814_v9 = vmul.f32 -1.442695, %v6106_v50 }
 0x54c   : > { %v6521_v62 = vpop.eup %6520  ;;  %6538 = vpow2.f32 %v5812_v42 }
 0x54d   : > { %v6523_v11 = vpop.eup %6522  ;;  %v5209_v51 = vadd.f32 1.0, %v6521_v62  ;;  %6540 = vpow2.f32 %v5813_v49  ;;  %v5060_v10 = vpop.f32.mrb[140].mxu0 }
 0x54e   : > { %v6525_v37 = vpop.eup %6524  ;;  %v5210_v22 = vadd.f32 1.0, %v6523_v11  ;;  %6542 = vpow2.f32 %v5814_v9  ;;  %v6107_v54 = vadd.f32 %v5060_v10, %v8764_v58  ;;  %v5062_v1 = vpop.f32.mrb[141].mxu0 }
 0x54f   : > { %v6527_v34 = vpop.eup %6526  ;;  %6544 = vrcp.f32 %v5209_v51  ;;  %v5211_v57 = vadd.f32 1.0, %v6525_v37  ;;  %v6108_v21 = vadd.f32 %v5062_v1, %v8767_v59  ;;  %v5064_v38 = vpop.f32.mrb[142].mxu0 }
 0x550   : > { %6546 = vrcp.f32 %v5210_v22  ;;  %v5212_v33 = vadd.f32 1.0, %v6527_v34  ;;  %v5815_v14 = vmul.f32 -1.442695, %v6107_v54  ;;  %v6109_v13 = vadd.f32 %v5064_v38, %v8764_v58  ;;  %v5066_v47 = vpop.f32.mrb[143].mxu0 }
 0x551   : > { %v6529_v2 = vpop.eup %6528  ;;  %6548 = vrcp.f32 %v5211_v57  ;;  %v5816_v41 = vmul.f32 -1.442695, %v6108_v21  ;;  %v6110_v17 = vadd.f32 %v5066_v47, %v8767_v59 }
 0x552   : > { %v6531_v61 = vpop.eup %6530  ;;  %5301 = vst [vmem:[%s8786_s13] sm:$0xff] %v6529_v2  ;;  %6550 = vrcp.f32 %v5212_v33  ;;  %v5817_v5 = vmul.f32 -1.442695, %v6109_v13 }
 0x553   : > { %v6533_v28 = vpop.eup %6532  ;;  %5302 = vst [vmem:[%s8786_s13 + $0x8] sm:$0xff] %v6531_v61  ;;  %6552 = vpow2.f32 %v5815_v14  ;;  %v5818_v56 = vmul.f32 -1.442695, %v6110_v17 }
 0x554   : > { %v6535_v36 = vpop.eup %6534  ;;  %5303 = vst [vmem:[%s8786_s13 + $0x10] sm:$0xff] %v6533_v28  ;;  %6554 = vpow2.f32 %v5816_v41 }
 0x555   : > { %v6537_v53 = vpop.eup %6536  ;;  %5304 = vst [vmem:[%s8786_s13 + $0x18] sm:$0xff] %v6535_v36  ;;  %6556 = vpow2.f32 %v5817_v5  ;;  %v5070_v8 = vpop.f32.mrb[144].mxu0 }
 0x556   : > { %v6539_v31 = vpop.eup %6538  ;;  %v5213_v40 = vadd.f32 1.0, %v6537_v53  ;;  %6558 = vpow2.f32 %v5818_v56  ;;  %v6111_v24 = vadd.f32 %v5070_v8, %v8764_v58  ;;  %v5072_v19 = vpop.f32.mrb[145].mxu0 }
 0x557   : > { %v6541_v15 = vpop.eup %6540  ;;  %v5214_v3 = vadd.f32 1.0, %v6539_v31  ;;  %v6112_v39 = vadd.f32 %v5072_v19, %v8767_v59  ;;  %v5074_v35 = vpop.f32.mrb[146].mxu0 }
 0x558   : > { %v6543_v60 = vpop.eup %6542  ;;  %6560 = vrcp.f32 %v5213_v40  ;;  %v5215_v48 = vadd.f32 1.0, %v6541_v15  ;;  %v5819_v7 = vmul.f32 -1.442695, %v6111_v24  ;;  %v6113_v55 = vadd.f32 %v5074_v35, %v8764_v58  ;;  %v5076_v63 = vpop.f32.mrb[147].mxu0 }
 0x559   : > { %v6545_v4 = vpop.eup %6544  ;;  %6562 = vrcp.f32 %v5214_v3  ;;  %v5216_v23 = vadd.f32 1.0, %v6543_v60  ;;  %v5820_v16 = vmul.f32 -1.442695, %v6112_v39  ;;  %v6114_v43 = vadd.f32 %v5076_v63, %v8767_v59 }
 0x55a   : > { %v6547_v32 = vpop.eup %6546  ;;  %5305 = vst [vmem:[%s8786_s13 + $0x20] sm:$0xff] %v6545_v4  ;;  %6564 = vrcp.f32 %v5215_v48  ;;  %v5821_v6 = vmul.f32 -1.442695, %v6113_v55 }
 0x55b   : > { %v6549_v52 = vpop.eup %6548  ;;  %5306 = vst [vmem:[%s8786_s13 + $0x28] sm:$0xff] %v6547_v32  ;;  %6566 = vrcp.f32 %v5216_v23  ;;  %v5822_v0 = vmul.f32 -1.442695, %v6114_v43 }
 0x55c   : > { %v6551_v20 = vpop.eup %6550  ;;  %5307 = vst [vmem:[%s8786_s13 + $0x30] sm:$0xff] %v6549_v52  ;;  %6568 = vpow2.f32 %v5819_v7 }
 0x55d   : > { %v6553_v18 = vpop.eup %6552  ;;  %5308 = vst [vmem:[%s8786_s13 + $0x38] sm:$0xff] %v6551_v20  ;;  %6570 = vpow2.f32 %v5820_v16  ;;  %v5080_v46 = vpop.f32.mrb[148].mxu0 }
 0x55e   : > { %v6555_v27 = vpop.eup %6554  ;;  %v5217_v44 = vadd.f32 1.0, %v6553_v18  ;;  %6572 = vpow2.f32 %v5821_v6  ;;  %v6115_v25 = vadd.f32 %v5080_v46, %v8764_v58  ;;  %v5082_v26 = vpop.f32.mrb[149].mxu0 }
 0x55f   : > { %v6557_v29 = vpop.eup %6556  ;;  %v5218_v12 = vadd.f32 1.0, %v6555_v27  ;;  %6574 = vpow2.f32 %v5822_v0  ;;  %v6116_v45 = vadd.f32 %v5082_v26, %v8767_v59  ;;  %v5084_v30 = vpop.f32.mrb[150].mxu0 }
 0x560   : > { %v6559_v42 = vpop.eup %6558  ;;  %6576 = vrcp.f32 %v5217_v44  ;;  %v5219_v50 = vadd.f32 1.0, %v6557_v29  ;;  %v5823_v49 = vmul.f32 -1.442695, %v6115_v25  ;;  %v6117_v9 = vadd.f32 %v5084_v30, %v8764_v58  ;;  %v5086_v62 = vpop.f32.mrb[151].mxu0 }
 0x561   : > { %6578 = vrcp.f32 %v5218_v12  ;;  %v5220_v11 = vadd.f32 1.0, %v6559_v42  ;;  %v5824_v51 = vmul.f32 -1.442695, %v6116_v45  ;;  %v6118_v10 = vadd.f32 %v5086_v62, %v8767_v59 }
 0x562   : > { %v6561_v37 = vpop.eup %6560  ;;  %6580 = vrcp.f32 %v5219_v50  ;;  %v5825_v22 = vmul.f32 -1.442695, %v6117_v9 }
 0x563   : > { %v6563_v54 = vpop.eup %6562  ;;  %5309 = vst [vmem:[%s8786_s13 + $0x40] sm:$0xff] %v6561_v37  ;;  %6582 = vrcp.f32 %v5220_v11  ;;  %v5826_v1 = vmul.f32 -1.442695, %v6118_v10 }
 0x564   : > { %v6565_v34 = vpop.eup %6564  ;;  %5310 = vst [vmem:[%s8786_s13 + $0x48] sm:$0xff] %v6563_v54  ;;  %6584 = vpow2.f32 %v5823_v49 }
 0x565   : > { %v6567_v57 = vpop.eup %6566  ;;  %5311 = vst [vmem:[%s8786_s13 + $0x50] sm:$0xff] %v6565_v34  ;;  %6586 = vpow2.f32 %v5824_v51  ;;  %v5090_v21 = vpop.f32.mrb[152].mxu0 }
 0x566   : > { %v6569_v38 = vpop.eup %6568  ;;  %5312 = vst [vmem:[%s8786_s13 + $0x58] sm:$0xff] %v6567_v57  ;;  %6588 = vpow2.f32 %v5825_v22  ;;  %v6119_v33 = vadd.f32 %v5090_v21, %v8764_v58  ;;  %v5092_v14 = vpop.f32.mrb[153].mxu0 }
 0x567   : > { %v6571_v13 = vpop.eup %6570  ;;  %v5221_v47 = vadd.f32 1.0, %v6569_v38  ;;  %6590 = vpow2.f32 %v5826_v1  ;;  %v6120_v2 = vadd.f32 %v5092_v14, %v8767_v59  ;;  %v5094_v41 = vpop.f32.mrb[154].mxu0 }
 0x568   : > { %v6573_v17 = vpop.eup %6572  ;;  %v5222_v61 = vadd.f32 1.0, %v6571_v13  ;;  %v6121_v5 = vadd.f32 %v5094_v41, %v8764_v58  ;;  %v5096_v28 = vpop.f32.mrb[155].mxu0  ;;  %v5827_v53 = vmul.f32 -1.442695, %v6119_v33 }
 0x569   : > { %v6575_v56 = vpop.eup %6574  ;;  %6592 = vrcp.f32 %v5221_v47  ;;  %v5223_v36 = vadd.f32 1.0, %v6573_v17  ;;  %v6122_v8 = vadd.f32 %v5096_v28, %v8767_v59  ;;  %v5828_v24 = vmul.f32 -1.442695, %v6120_v2 }
 0x56a   : > { %v6577_v31 = vpop.eup %6576  ;;  %6594 = vrcp.f32 %v5222_v61  ;;  %v5224_v40 = vadd.f32 1.0, %v6575_v56  ;;  %v5829_v15 = vmul.f32 -1.442695, %v6121_v5 }
 0x56b   : > { %v6579_v19 = vpop.eup %6578  ;;  %5313 = vst [vmem:[%s8786_s13 + $0x60] sm:$0xff] %v6577_v31  ;;  %6596 = vrcp.f32 %v5223_v36  ;;  %v5830_v39 = vmul.f32 -1.442695, %v6122_v8 }
 0x56c   : > { %v6581_v3 = vpop.eup %6580  ;;  %5314 = vst [vmem:[%s8786_s13 + $0x68] sm:$0xff] %v6579_v19  ;;  %6598 = vrcp.f32 %v5224_v40 }
 0x56d   : > { %v6583_v35 = vpop.eup %6582  ;;  %5315 = vst [vmem:[%s8786_s13 + $0x70] sm:$0xff] %v6581_v3  ;;  %6600 = vpow2.f32 %v5827_v53  ;;  %v5100_v60 = vpop.f32.mrb[156].mxu0 }
 0x56e   : > { %v6585_v48 = vpop.eup %6584  ;;  %5316 = vst [vmem:[%s8786_s13 + $0x78] sm:$0xff] %v6583_v35  ;;  %6602 = vpow2.f32 %v5828_v24  ;;  %v6123_v7 = vadd.f32 %v5100_v60, %v8764_v58  ;;  %v5102_v55 = vpop.f32.mrb[157].mxu0 }
 0x56f   : > { %v6587_v63 = vpop.eup %6586  ;;  %v5225_v4 = vadd.f32 1.0, %v6585_v48  ;;  %6604 = vpow2.f32 %v5829_v15  ;;  %v6124_v23 = vadd.f32 %v5102_v55, %v8767_v59  ;;  %v5104_v16 = vpop.f32.mrb[158].mxu0 }
 0x570   : > { %v6589_v43 = vpop.eup %6588  ;;  %v5226_v32 = vadd.f32 1.0, %v6587_v63  ;;  %6606 = vpow2.f32 %v5830_v39  ;;  %v6125_v6 = vadd.f32 %v5104_v16, %v8764_v58  ;;  %v5106_v52 = vpop.f32.mrb[159].mxu0  ;;  %v5831_v18 = vmul.f32 -1.442695, %v6123_v7 }
 0x571   : > { %v6591_v0 = vpop.eup %6590  ;;  %6608 = vrcp.f32 %v5225_v4  ;;  %v5227_v20 = vadd.f32 1.0, %v6589_v43  ;;  %v6126_v46 = vadd.f32 %v5106_v52, %v8767_v59  ;;  %v5832_v44 = vmul.f32 -1.442695, %v6124_v23 }
 0x572   : > { %6610 = vrcp.f32 %v5226_v32  ;;  %v5228_v27 = vadd.f32 1.0, %v6591_v0  ;;  %v5833_v26 = vmul.f32 -1.442695, %v6125_v6 }
 0x573   : > { %v6593_v25 = vpop.eup %6592  ;;  %6612 = vrcp.f32 %v5227_v20  ;;  %v5834_v58 = vmul.f32 -1.442695, %v6126_v46 }
 0x574   : > { %v6595_v29 = vpop.eup %6594  ;;  %5317 = vst [vmem:[%s8786_s13 + $0x80] sm:$0xff] %v6593_v25  ;;  %6614 = vrcp.f32 %v5228_v27 }
 0x575   : > { %v6597_v12 = vpop.eup %6596  ;;  %5318 = vst [vmem:[%s8786_s13 + $0x88] sm:$0xff] %v6595_v29  ;;  %6616 = vpow2.f32 %v5831_v18 }
 0x576   : > { %v6599_v45 = vpop.eup %6598  ;;  %5319 = vst [vmem:[%s8786_s13 + $0x90] sm:$0xff] %v6597_v12  ;;  %6618 = vpow2.f32 %v5832_v44 }
 0x577   : > { %v6601_v30 = vpop.eup %6600  ;;  %5320 = vst [vmem:[%s8786_s13 + $0x98] sm:$0xff] %v6599_v45  ;;  %6620 = vpow2.f32 %v5833_v26 }
 0x578   : > { %v6603_v59 = vpop.eup %6602  ;;  %v5229_v42 = vadd.f32 1.0, %v6601_v30  ;;  %6622 = vpow2.f32 %v5834_v58 }
 0x579   : > { %v6605_v50 = vpop.eup %6604  ;;  %v5230_v49 = vadd.f32 1.0, %v6603_v59 }
 0x57a   : > { %v6607_v9 = vpop.eup %6606  ;;  %6624 = vrcp.f32 %v5229_v42  ;;  %v5231_v62 = vadd.f32 1.0, %v6605_v50 }
 0x57b   : > { %v6609_v11 = vpop.eup %6608  ;;  %6626 = vrcp.f32 %v5230_v49  ;;  %v5232_v51 = vadd.f32 1.0, %v6607_v9 }
 0x57c   : > { %v6611_v10 = vpop.eup %6610  ;;  %5321 = vst [vmem:[%s8786_s13 + $0xa0] sm:$0xff] %v6609_v11  ;;  %6628 = vrcp.f32 %v5231_v62 }
 0x57d   : > { %v6613_v37 = vpop.eup %6612  ;;  %5322 = vst [vmem:[%s8786_s13 + $0xa8] sm:$0xff] %v6611_v10  ;;  %6630 = vrcp.f32 %v5232_v51 }
 0x57e   : > { %v6615_v22 = vpop.eup %6614  ;;  %5323 = vst [vmem:[%s8786_s13 + $0xb0] sm:$0xff] %v6613_v37 }
 0x57f   : > { %v6617_v54 = vpop.eup %6616  ;;  %5324 = vst [vmem:[%s8786_s13 + $0xb8] sm:$0xff] %v6615_v22 }
 0x580   : > { %v6619_v1 = vpop.eup %6618  ;;  %v5233_v34 = vadd.f32 1.0, %v6617_v54 }
 0x581   : > { %v6621_v57 = vpop.eup %6620  ;;  %v5234_v21 = vadd.f32 1.0, %v6619_v1 }
 0x582   : > { %v6623_v38 = vpop.eup %6622  ;;  %6632 = vrcp.f32 %v5233_v34  ;;  %v5235_v33 = vadd.f32 1.0, %v6621_v57 }
 0x583   : > { %6634 = vrcp.f32 %v5234_v21  ;;  %v5236_v14 = vadd.f32 1.0, %v6623_v38 }
 0x584   : > { %v6625_v13 = vpop.eup %6624  ;;  %6636 = vrcp.f32 %v5235_v33 }
 0x585   : > { %v6627_v47 = vpop.eup %6626  ;;  %5325 = vst [vmem:[%s8786_s13 + $0xc0] sm:$0xff] %v6625_v13  ;;  %6638 = vrcp.f32 %v5236_v14 }
 0x586   : > { %v6629_v2 = vpop.eup %6628  ;;  %5326 = vst [vmem:[%s8786_s13 + $0xc8] sm:$0xff] %v6627_v47 }
 0x587   : > { %v6631_v41 = vpop.eup %6630  ;;  %5327 = vst [vmem:[%s8786_s13 + $0xd0] sm:$0xff] %v6629_v2 }
 0x588   : > { %5328 = vst [vmem:[%s8786_s13 + $0xd8] sm:$0xff] %v6631_v41 }
 0x58c   : > { %v6633_v17 = vpop.eup %6632 }
 0x58d   : > { %v6635_v61 = vpop.eup %6634  ;;  %5329 = vst [vmem:[%s8786_s13 + $0xe0] sm:$0xff] %v6633_v17 }
 0x58e   : > { %v6637_v5 = vpop.eup %6636  ;;  %5330 = vst [vmem:[%s8786_s13 + $0xe8] sm:$0xff] %v6635_v61 }
 0x58f   : > { %v6639_v28 = vpop.eup %6638  ;;  %5331 = vst [vmem:[%s8786_s13 + $0xf0] sm:$0xff] %v6637_v5 }
 0x590   : > { %5332 = vst [vmem:[%s8786_s13 + $0xf8] sm:$0xff] %v6639_v28 }
 0x591 PF: > { %s19_s30 = sadd.s32 1, %s6657_s30  }
 0x592   : > { %p16_p4 = scmp.ge.s32.totalorder %s19_s30, 4  }
 0x594   :  { %18 = sbr.rel (!%p16_p4) target bundleno = 1 (0x1), region = 86 }

</bundles_post_ra>
